<compile_context>
chip_gen: v6e
topology: v6e:2x2x1
jax: 0.10.0
libtpu: 0.0.40
codegen_flags: <defaults>
</compile_context>

<pallas_src>
import jax
import jax.numpy as jnp
from jax.experimental import pallas as pl
from jax.experimental.pallas import tpu as pltpu


# ---------------------------------------------------------------------------
# Kernel
# ---------------------------------------------------------------------------
def gru_kernel(x_ref, wih_ref, whh_ref, bih_ref, bhh_ref, wfc_ref, bfc_ref,
               out_ref, h_ref):
    """One grid step = one (batch tile, time chunk).

    Grid = (batch_tiles, time_chunks); the time axis (axis 1, innermost) is the
    sequential recurrence.  The hidden state lives in VMEM scratch `h_ref` and is
    carried across time chunks of the same batch tile.  The output block has a
    constant index along the time axis, so it stays resident in VMEM and is
    written exactly once on the final chunk (standard Pallas accumulator pattern).
    """
    c = pl.program_id(1)                      # time-chunk index (innermost)

    tb, tc, dp = x_ref.shape
    hdim = h_ref.shape[-1]

    # h_0 = 0 at the start of every sequence (c resets to 0 for each batch tile).
    @pl.when(c == 0)
    def _():
        h_ref[...] = jnp.zeros_like(h_ref)

    # ---- chunk-level input projection: ONE MXU matmul for all tc steps ----
    # (tb*tc, dp) x (dp, 3H) -> (tb*tc, 3H); bf16 operands, f32 accumulate.
    # The reshape merges the sublane-aligned (tb, tc) dims -> layout no-op.
    xb = x_ref[...].reshape(tb * tc, dp).astype(jnp.bfloat16)
    gi = jnp.dot(xb, wih_ref[...], preferred_element_type=jnp.float32)
    gi = (gi + bih_ref[...]).reshape(tb, tc, 3 * hdim)   # fold b_ih once per chunk

    # Hoisted broadcast of the recurrent bias (not re-materialized every step).
    bhh = jnp.broadcast_to(bhh_ref[...], (tb, 3 * hdim))

    w_hh = whh_ref[...]                        # (H, 3H) bf16
    h = h_ref[...]                             # (tb, H) f32

    # Serial recurrence over the chunk.  tc is small and static -> unrolled
    # Python loop with static, lane-aligned slices (H is a multiple of 128).
    # For very long chunks, switch this to lax.fori_loop.
    for t in range(tc):
        gi_t = gi[:, t, :]                     # (tb, 3H)
        gh = jnp.dot(h.astype(jnp.bfloat16), w_hh,
                     preferred_element_type=jnp.float32) + bhh
        r = jax.nn.sigmoid(gi_t[:, :hdim] + gh[:, :hdim])
        z = jax.nn.sigmoid(gi_t[:, hdim:2 * hdim] + gh[:, hdim:2 * hdim])
        n = jnp.tanh(gi_t[:, 2 * hdim:] + r * gh[:, 2 * hdim:])
        h = n + z * (h - n)                    # == (1 - z)*n + z*h  (torch form)

    h_ref[...] = h                             # carry to the next time chunk

    # Final chunk: ReLU -> Dropout (eval mode == identity) -> Linear, lane-dense write.
    @pl.when(c == pl.num_programs(1) - 1)
    def _():
        act = jnp.maximum(h, 0.0).astype(jnp.bfloat16)
        out_ref[...] = (jnp.dot(act, wfc_ref[...],
                                preferred_element_type=jnp.float32)
                        + bfc_ref[...]).astype(out_ref.dtype)


# ---------------------------------------------------------------------------
# Parameter handling
# ---------------------------------------------------------------------------
def _pad_axis(a, axis, multiple):
    pad = (-a.shape[axis]) % multiple
    if pad == 0:
        return a
    widths = [(0, 0)] * a.ndim
    widths[axis] = (0, pad)
    return jnp.pad(a, widths)


def init_params(key, input_dim, hidden_size, out_size):
    """Deterministic synthetic params with torch.nn.GRU / Linear shapes + init."""
    ks = jax.random.split(key, 6)
    s = 1.0 / jnp.sqrt(hidden_size)
    return {
        "w_ih": jax.random.uniform(ks[0], (3 * hidden_size, input_dim), jnp.float32, -s, s),
        "w_hh": jax.random.uniform(ks[1], (3 * hidden_size, hidden_size), jnp.float32, -s, s),
        "b_ih": jax.random.uniform(ks[2], (3 * hidden_size,), jnp.float32, -s, s),
        "b_hh": jax.random.uniform(ks[3], (3 * hidden_size,), jnp.float32, -s, s),
        "w_fc": jax.random.uniform(ks[4], (out_size, hidden_size), jnp.float32, -s, s),
        "b_fc": jax.random.uniform(ks[5], (out_size,), jnp.float32, -s, s),
    }


def pack_params(raw):
    """Torch-layout f32 params -> kernel-ready padded / transposed / bf16 params.

    One-time prep (outside the hot path): transpose to [in, out], pad D and the FC
    output dim to 128 lanes, cast weights to bf16 (native MXU dtype), keep biases f32.
    """
    h = raw["w_hh"].shape[1]
    assert h % 128 == 0, "hidden_size must be a multiple of 128 for lane-aligned gates"
    # TODO(synk): support arbitrary hidden_size by zero-padding H (correct, not needed here).
    return {
        "w_ih_t": _pad_axis(raw["w_ih"].T, 0, 128).astype(jnp.bfloat16),        # (Dp, 3H)
        "w_hh_t": raw["w_hh"].T.astype(jnp.bfloat16),                           # (H, 3H)
        "b_ih": raw["b_ih"].reshape(1, -1).astype(jnp.float32),                 # (1, 3H)
        "b_hh": raw["b_hh"].reshape(1, -1).astype(jnp.float32),                 # (1, 3H)
        "w_fc_t": _pad_axis(raw["w_fc"].T, 1, 128).astype(jnp.bfloat16),        # (H, OUTp)
        "b_fc": _pad_axis(raw["b_fc"].reshape(1, -1), 1, 128).astype(jnp.float32),
        "in_dim": int(raw["w_ih"].shape[1]),
        "out_size": int(raw["w_fc"].shape[0]),
    }


# ---------------------------------------------------------------------------
# Forward wrapper
# ---------------------------------------------------------------------------
def gru_net_forward(x, kp, *, tc=None, tb=None):
    """x: [B, T, D] f32 (batch_first, like PyTorch).  Returns [B, out_size] f32."""
    B, T, D = x.shape
    assert T >= 1, "empty sequence would leave the output uninitialized"
    assert D == kp["in_dim"]
    H = kp["w_hh_t"].shape[0]
    Dp = kp["w_ih_t"].shape[0]
    OUTp = kp["w_fc_t"].shape[1]

    Bp = ((B + 7) // 8) * 8                    # pad batch to f32 sublane multiple
    x_p = jnp.pad(x, ((0, Bp - B), (0, 0), (0, Dp - D)))   # lane-dense, aligned K

    tc = T if tc is None else tc               # timesteps per grid iteration
    tb = Bp if tb is None else tb              # batch rows per grid iteration
    assert T % tc == 0 and (tc % 8 == 0 or tc == T)
    assert Bp % tb == 0 and tb % 8 == 0

    grid = (Bp // tb, T // tc)                 # (parallel batch tiles, sequential time)

    grid_spec = pltpu.PrefetchScalarGridSpec(
        num_scalar_prefetch=0,
        grid=grid,
        in_specs=[
            pl.BlockSpec((tb, tc, Dp), lambda b, c: (b, c, 0)),   # x chunk (no transpose)
            pl.BlockSpec((Dp, 3 * H), lambda b, c: (0, 0)),       # W_ih^T  (bf16)
            pl.BlockSpec((H, 3 * H), lambda b, c: (0, 0)),        # W_hh^T  (bf16)
            pl.BlockSpec((1, 3 * H), lambda b, c: (0, 0)),        # b_ih    (f32)
            pl.BlockSpec((1, 3 * H), lambda b, c: (0, 0)),        # b_hh    (f32)
            pl.BlockSpec((H, OUTp), lambda b, c: (0, 0)),         # W_fc^T  (bf16)
            pl.BlockSpec((1, OUTp), lambda b, c: (0, 0)),         # b_fc    (f32)
        ],
        # Constant block index along the time axis -> output stays VMEM-resident
        # and is written once on the last chunk.
        out_specs=pl.BlockSpec((tb, OUTp), lambda b, c: (b, 0)),
        scratch_shapes=[pltpu.VMEM((tb, H), jnp.float32)],        # hidden state
    )

    out_p = pl.pallas_call(
        gru_kernel,
        out_shape=jax.ShapeDtypeStruct((Bp, OUTp), jnp.float32),
        grid_spec=grid_spec,
        compiler_params=pltpu.CompilerParams(
            # Batch tiles are independent (shard across v7x's 2 TCs); time is a
            # sequential recurrence.
            dimension_semantics=("parallel", "arbitrary"),
            # Explicit VMEM budget (v7x has 64 MiB/TC); actual use here is ~2 MiB.
            vmem_limit_bytes=64 * 1024 * 1024,
        ),
    )(x_p, kp["w_ih_t"], kp["w_hh_t"], kp["b_ih"], kp["b_hh"],
      kp["w_fc_t"], kp["b_fc"])

    return out_p[:B, :kp["out_size"]]


# ---------------------------------------------------------------------------
# Pure-JAX reference (mirrors the kernel's bf16-operand / f32-accumulate numerics)
# ---------------------------------------------------------------------------
def reference_forward(x, raw):
    B, T, _ = x.shape
    H = raw["w_hh"].shape[1]
    w_ih = raw["w_ih"].T.astype(jnp.bfloat16)
    w_hh = raw["w_hh"].T.astype(jnp.bfloat16)
    w_fc = raw["w_fc"].T.astype(jnp.bfloat16)
    b_ih = raw["b_ih"][None, :]
    b_hh = raw["b_hh"][None, :]
    b_fc = raw["b_fc"][None, :]
    h = jnp.zeros((B, H), jnp.float32)
    for t in range(T):
        gi = jnp.dot(x[:, t, :].astype(jnp.bfloat16), w_ih,
                     preferred_element_type=jnp.float32) + b_ih
        gh = jnp.dot(h.astype(jnp.bfloat16), w_hh,
                     preferred_element_type=jnp.float32) + b_hh
        r = jax.nn.sigmoid(gi[:, :H] + gh[:, :H])
        z = jax.nn.sigmoid(gi[:, H:2 * H] + gh[:, H:2 * H])
        n = jnp.tanh(gi[:, 2 * H:] + r * gh[:, 2 * H:])
        h = n + z * (h - n)
    act = jnp.maximum(h, 0.0)   # ReLU; Dropout(eval) = identity
    return jnp.dot(act.astype(jnp.bfloat16), w_fc,
                   preferred_element_type=jnp.float32) + b_fc


if __name__ == "__main__":
    # Shapes consistent with the module's forward: [batch, seq, input_dim];
    # hidden_size = 256 as in the spec (keeps gate slices 128-lane aligned).
    B, T, D = 2, 8, 16
    hidden_size = 256
    out_size = 8

    key = jax.random.PRNGKey(0)
    k_x, k_p = jax.random.split(key)
    x = jax.random.normal(k_x, (B, T, D), jnp.float32)
    raw = init_params(k_p, D, hidden_size, out_size)
    packed = pack_params(raw)

    out = gru_net_forward(x, packed)
    out = jax.block_until_ready(out)

    ref = reference_forward(x, raw)
    assert out.shape == (B, out_size)
    max_err = jnp.max(jnp.abs(out - ref))
    assert jnp.allclose(out, ref, atol=1e-2, rtol=1e-2), \
        f"mismatch vs JAX reference (max abs err {max_err})"
    print("KERNEL_OK")
</pallas_src>

<mosaic_0001>
module attributes {stable_mosaic.version = 11 : i64} {
  func.func @gru_kernel(%arg0: i32, %arg1: i32, %arg2: memref<8x8x128xf32, #tpu.memory_space<vmem>>, %arg3: memref<128x768xbf16, #tpu.memory_space<vmem>>, %arg4: memref<256x768xbf16, #tpu.memory_space<vmem>>, %arg5: memref<1x768xf32, #tpu.memory_space<vmem>>, %arg6: memref<1x768xf32, #tpu.memory_space<vmem>>, %arg7: memref<256x128xbf16, #tpu.memory_space<vmem>>, %arg8: memref<1x128xf32, #tpu.memory_space<vmem>>, %arg9: memref<8x128xf32, #tpu.memory_space<vmem>>, %arg10: memref<8x256xf32, #tpu.memory_space<vmem>>) attributes {dimension_semantics = [#tpu.dimension_semantics<parallel>, #tpu.dimension_semantics<arbitrary>], iteration_bounds = array<i64: 1, 1>, scalar_prefetch = 0 : i64, scratch_operands = 1 : i64, tpu.core_type = #tpu.core_type<tc>, window_params = [{transform_indices = @transform_0, window_bounds = array<i64: 8, 8, 128>}, {pipeline_mode = #tpu.pipeline_mode<synchronous>, transform_indices = @transform_1, window_bounds = array<i64: 128, 768>}, {pipeline_mode = #tpu.pipeline_mode<synchronous>, transform_indices = @transform_2, window_bounds = array<i64: 256, 768>}, {pipeline_mode = #tpu.pipeline_mode<synchronous>, transform_indices = @transform_3, window_bounds = array<i64: 1, 768>}, {pipeline_mode = #tpu.pipeline_mode<synchronous>, transform_indices = @transform_4, window_bounds = array<i64: 1, 768>}, {pipeline_mode = #tpu.pipeline_mode<synchronous>, transform_indices = @transform_5, window_bounds = array<i64: 256, 128>}, {pipeline_mode = #tpu.pipeline_mode<synchronous>, transform_indices = @transform_6, window_bounds = array<i64: 1, 128>}, {transform_indices = @transform_7, window_bounds = array<i64: 8, 128>}]} {
    %c0_i32 = arith.constant 0 : i32
    %0 = arith.cmpi eq, %arg1, %c0_i32 : i32
    %1 = arith.extui %0 : i1 to i32
    %c0_i32_0 = arith.constant 0 : i32
    %2 = arith.cmpi ne, %1, %c0_i32_0 : i32
    scf.if %2 {
      %cst_41 = arith.constant 0.000000e+00 : f32
      %253 = vector.broadcast %cst_41 : f32 to vector<8x256xf32>
      %c0_42 = arith.constant 0 : index
      %c0_43 = arith.constant 0 : index
      %254 = vector.load %arg10[%c0_42, %c0_43] : memref<8x256xf32, #tpu.memory_space<vmem>>, vector<8x256xf32>
      tpu.vector_store %arg10[%c0_42, %c0_43], %253 {strides = array<i32>} : memref<8x256xf32, #tpu.memory_space<vmem>>, vector<8x256xf32>,
    } else {
    }
    %c0 = arith.constant 0 : index
    %c0_1 = arith.constant 0 : index
    %c0_2 = arith.constant 0 : index
    %3 = vector.load %arg2[%c0, %c0_1, %c0_2] : memref<8x8x128xf32, #tpu.memory_space<vmem>>, vector<8x8x128xf32>
    %4 = vector.shape_cast %3 : vector<8x8x128xf32> to vector<64x128xf32>
    %5 = arith.truncf %4 : vector<64x128xf32> to vector<64x128xbf16>
    %c0_3 = arith.constant 0 : index
    %c0_4 = arith.constant 0 : index
    %6 = vector.load %arg3[%c0_3, %c0_4] : memref<128x768xbf16, #tpu.memory_space<vmem>>, vector<128x768xbf16>
    %cst = arith.constant dense<0.000000e+00> : vector<64x768xf32>
    %7 = tpu.matmul %5, %6, %cst {dimension_numbers = #tpu.dot_dimension_numbers<[1], [0], [0], [1], [0, 0, 1, 1], [], []>} : vector<64x128xbf16>, vector<128x768xbf16>, vector<64x768xf32> -> vector<64x768xf32>
    %c0_5 = arith.constant 0 : index
    %c0_6 = arith.constant 0 : index
    %8 = vector.load %arg5[%c0_5, %c0_6] : memref<1x768xf32, #tpu.memory_space<vmem>>, vector<1x768xf32>
    %9 = vector.broadcast %8 : vector<1x768xf32> to vector<64x768xf32>
    %10 = arith.addf %7, %9 : vector<64x768xf32>
    %11 = vector.shape_cast %10 : vector<64x768xf32> to vector<8x8x768xf32>
    %c0_7 = arith.constant 0 : index
    %c0_8 = arith.constant 0 : index
    %12 = vector.load %arg6[%c0_7, %c0_8] : memref<1x768xf32, #tpu.memory_space<vmem>>, vector<1x768xf32>
    %13 = vector.shape_cast %12 : vector<1x768xf32> to vector<1x768xf32>
    %14 = vector.broadcast %13 : vector<1x768xf32> to vector<8x768xf32>
    %c0_9 = arith.constant 0 : index
    %c0_10 = arith.constant 0 : index
    %15 = vector.load %arg4[%c0_9, %c0_10] : memref<256x768xbf16, #tpu.memory_space<vmem>>, vector<256x768xbf16>
    %c0_11 = arith.constant 0 : index
    %c0_12 = arith.constant 0 : index
    %16 = vector.load %arg10[%c0_11, %c0_12] : memref<8x256xf32, #tpu.memory_space<vmem>>, vector<8x256xf32>
    %17 = vector.extract_strided_slice %11 {offsets = [0, 0, 0], sizes = [8, 1, 768], strides = [1, 1, 1]} : vector<8x8x768xf32> to vector<8x1x768xf32>
    %18 = vector.shape_cast %17 : vector<8x1x768xf32> to vector<8x768xf32>
    %19 = arith.truncf %16 : vector<8x256xf32> to vector<8x256xbf16>
    %cst_13 = arith.constant dense<0.000000e+00> : vector<8x768xf32>
    %20 = tpu.matmul %19, %15, %cst_13 {dimension_numbers = #tpu.dot_dimension_numbers<[1], [0], [0], [1], [0, 0, 1, 1], [], []>} : vector<8x256xbf16>, vector<256x768xbf16>, vector<8x768xf32> -> vector<8x768xf32>
    %21 = arith.addf %20, %14 : vector<8x768xf32>
    %22 = vector.extract_strided_slice %18 {offsets = [0, 0], sizes = [8, 256], strides = [1, 1]} : vector<8x768xf32> to vector<8x256xf32>
    %23 = vector.extract_strided_slice %21 {offsets = [0, 0], sizes = [8, 256], strides = [1, 1]} : vector<8x768xf32> to vector<8x256xf32>
    %24 = arith.addf %22, %23 : vector<8x256xf32>
    %25 = arith.negf %24 : vector<8x256xf32>
    %26 = math.exp %25 : vector<8x256xf32>
    %cst_14 = arith.constant 1.000000e+00 : f32
    %27 = vector.broadcast %cst_14 : f32 to vector<8x256xf32>
    %28 = arith.addf %27, %26 : vector<8x256xf32>
    %29 = arith.divf %27, %28 : vector<8x256xf32>
    %30 = vector.extract_strided_slice %18 {offsets = [0, 256], sizes = [8, 256], strides = [1, 1]} : vector<8x768xf32> to vector<8x256xf32>
    %31 = vector.extract_strided_slice %21 {offsets = [0, 256], sizes = [8, 256], strides = [1, 1]} : vector<8x768xf32> to vector<8x256xf32>
    %32 = arith.addf %30, %31 : vector<8x256xf32>
    %33 = arith.negf %32 : vector<8x256xf32>
    %34 = math.exp %33 : vector<8x256xf32>
    %cst_15 = arith.constant 1.000000e+00 : f32
    %35 = vector.broadcast %cst_15 : f32 to vector<8x256xf32>
    %36 = arith.addf %35, %34 : vector<8x256xf32>
    %37 = arith.divf %35, %36 : vector<8x256xf32>
    %38 = vector.extract_strided_slice %18 {offsets = [0, 512], sizes = [8, 256], strides = [1, 1]} : vector<8x768xf32> to vector<8x256xf32>
    %39 = vector.extract_strided_slice %21 {offsets = [0, 512], sizes = [8, 256], strides = [1, 1]} : vector<8x768xf32> to vector<8x256xf32>
    %40 = arith.mulf %29, %39 : vector<8x256xf32>
    %41 = arith.addf %38, %40 : vector<8x256xf32>
    %42 = math.tanh %41 : vector<8x256xf32>
    %43 = arith.subf %16, %42 : vector<8x256xf32>
    %44 = arith.mulf %37, %43 : vector<8x256xf32>
    %45 = arith.addf %42, %44 : vector<8x256xf32>
    %46 = vector.extract_strided_slice %11 {offsets = [0, 1, 0], sizes = [8, 1, 768], strides = [1, 1, 1]} : vector<8x8x768xf32> to vector<8x1x768xf32>
    %47 = vector.shape_cast %46 : vector<8x1x768xf32> to vector<8x768xf32>
    %48 = arith.truncf %45 : vector<8x256xf32> to vector<8x256xbf16>
    %cst_16 = arith.constant dense<0.000000e+00> : vector<8x768xf32>
    %49 = tpu.matmul %48, %15, %cst_16 {dimension_numbers = #tpu.dot_dimension_numbers<[1], [0], [0], [1], [0, 0, 1, 1], [], []>} : vector<8x256xbf16>, vector<256x768xbf16>, vector<8x768xf32> -> vector<8x768xf32>
    %50 = arith.addf %49, %14 : vector<8x768xf32>
    %51 = vector.extract_strided_slice %47 {offsets = [0, 0], sizes = [8, 256], strides = [1, 1]} : vector<8x768xf32> to vector<8x256xf32>
    %52 = vector.extract_strided_slice %50 {offsets = [0, 0], sizes = [8, 256], strides = [1, 1]} : vector<8x768xf32> to vector<8x256xf32>
    %53 = arith.addf %51, %52 : vector<8x256xf32>
    %54 = arith.negf %53 : vector<8x256xf32>
    %55 = math.exp %54 : vector<8x256xf32>
    %cst_17 = arith.constant 1.000000e+00 : f32
    %56 = vector.broadcast %cst_17 : f32 to vector<8x256xf32>
    %57 = arith.addf %56, %55 : vector<8x256xf32>
    %58 = arith.divf %56, %57 : vector<8x256xf32>
    %59 = vector.extract_strided_slice %47 {offsets = [0, 256], sizes = [8, 256], strides = [1, 1]} : vector<8x768xf32> to vector<8x256xf32>
    %60 = vector.extract_strided_slice %50 {offsets = [0, 256], sizes = [8, 256], strides = [1, 1]} : vector<8x768xf32> to vector<8x256xf32>
    %61 = arith.addf %59, %60 : vector<8x256xf32>
    %62 = arith.negf %61 : vector<8x256xf32>
    %63 = math.exp %62 : vector<8x256xf32>
    %cst_18 = arith.constant 1.000000e+00 : f32
    %64 = vector.broadcast %cst_18 : f32 to vector<8x256xf32>
    %65 = arith.addf %64, %63 : vector<8x256xf32>
    %66 = arith.divf %64, %65 : vector<8x256xf32>
    %67 = vector.extract_strided_slice %47 {offsets = [0, 512], sizes = [8, 256], strides = [1, 1]} : vector<8x768xf32> to vector<8x256xf32>
    %68 = vector.extract_strided_slice %50 {offsets = [0, 512], sizes = [8, 256], strides = [1, 1]} : vector<8x768xf32> to vector<8x256xf32>
    %69 = arith.mulf %58, %68 : vector<8x256xf32>
    %70 = arith.addf %67, %69 : vector<8x256xf32>
    %71 = math.tanh %70 : vector<8x256xf32>
    %72 = arith.subf %45, %71 : vector<8x256xf32>
    %73 = arith.mulf %66, %72 : vector<8x256xf32>
    %74 = arith.addf %71, %73 : vector<8x256xf32>
    %75 = vector.extract_strided_slice %11 {offsets = [0, 2, 0], sizes = [8, 1, 768], strides = [1, 1, 1]} : vector<8x8x768xf32> to vector<8x1x768xf32>
    %76 = vector.shape_cast %75 : vector<8x1x768xf32> to vector<8x768xf32>
    %77 = arith.truncf %74 : vector<8x256xf32> to vector<8x256xbf16>
    %cst_19 = arith.constant dense<0.000000e+00> : vector<8x768xf32>
    %78 = tpu.matmul %77, %15, %cst_19 {dimension_numbers = #tpu.dot_dimension_numbers<[1], [0], [0], [1], [0, 0, 1, 1], [], []>} : vector<8x256xbf16>, vector<256x768xbf16>, vector<8x768xf32> -> vector<8x768xf32>
    %79 = arith.addf %78, %14 : vector<8x768xf32>
    %80 = vector.extract_strided_slice %76 {offsets = [0, 0], sizes = [8, 256], strides = [1, 1]} : vector<8x768xf32> to vector<8x256xf32>
    %81 = vector.extract_strided_slice %79 {offsets = [0, 0], sizes = [8, 256], strides = [1, 1]} : vector<8x768xf32> to vector<8x256xf32>
    %82 = arith.addf %80, %81 : vector<8x256xf32>
    %83 = arith.negf %82 : vector<8x256xf32>
    %84 = math.exp %83 : vector<8x256xf32>
    %cst_20 = arith.constant 1.000000e+00 : f32
    %85 = vector.broadcast %cst_20 : f32 to vector<8x256xf32>
    %86 = arith.addf %85, %84 : vector<8x256xf32>
    %87 = arith.divf %85, %86 : vector<8x256xf32>
    %88 = vector.extract_strided_slice %76 {offsets = [0, 256], sizes = [8, 256], strides = [1, 1]} : vector<8x768xf32> to vector<8x256xf32>
    %89 = vector.extract_strided_slice %79 {offsets = [0, 256], sizes = [8, 256], strides = [1, 1]} : vector<8x768xf32> to vector<8x256xf32>
    %90 = arith.addf %88, %89 : vector<8x256xf32>
    %91 = arith.negf %90 : vector<8x256xf32>
    %92 = math.exp %91 : vector<8x256xf32>
    %cst_21 = arith.constant 1.000000e+00 : f32
    %93 = vector.broadcast %cst_21 : f32 to vector<8x256xf32>
    %94 = arith.addf %93, %92 : vector<8x256xf32>
    %95 = arith.divf %93, %94 : vector<8x256xf32>
    %96 = vector.extract_strided_slice %76 {offsets = [0, 512], sizes = [8, 256], strides = [1, 1]} : vector<8x768xf32> to vector<8x256xf32>
    %97 = vector.extract_strided_slice %79 {offsets = [0, 512], sizes = [8, 256], strides = [1, 1]} : vector<8x768xf32> to vector<8x256xf32>
    %98 = arith.mulf %87, %97 : vector<8x256xf32>
    %99 = arith.addf %96, %98 : vector<8x256xf32>
    %100 = math.tanh %99 : vector<8x256xf32>
    %101 = arith.subf %74, %100 : vector<8x256xf32>
    %102 = arith.mulf %95, %101 : vector<8x256xf32>
    %103 = arith.addf %100, %102 : vector<8x256xf32>
    %104 = vector.extract_strided_slice %11 {offsets = [0, 3, 0], sizes = [8, 1, 768], strides = [1, 1, 1]} : vector<8x8x768xf32> to vector<8x1x768xf32>
    %105 = vector.shape_cast %104 : vector<8x1x768xf32> to vector<8x768xf32>
    %106 = arith.truncf %103 : vector<8x256xf32> to vector<8x256xbf16>
    %cst_22 = arith.constant dense<0.000000e+00> : vector<8x768xf32>
    %107 = tpu.matmul %106, %15, %cst_22 {dimension_numbers = #tpu.dot_dimension_numbers<[1], [0], [0], [1], [0, 0, 1, 1], [], []>} : vector<8x256xbf16>, vector<256x768xbf16>, vector<8x768xf32> -> vector<8x768xf32>
    %108 = arith.addf %107, %14 : vector<8x768xf32>
    %109 = vector.extract_strided_slice %105 {offsets = [0, 0], sizes = [8, 256], strides = [1, 1]} : vector<8x768xf32> to vector<8x256xf32>
    %110 = vector.extract_strided_slice %108 {offsets = [0, 0], sizes = [8, 256], strides = [1, 1]} : vector<8x768xf32> to vector<8x256xf32>
    %111 = arith.addf %109, %110 : vector<8x256xf32>
    %112 = arith.negf %111 : vector<8x256xf32>
    %113 = math.exp %112 : vector<8x256xf32>
    %cst_23 = arith.constant 1.000000e+00 : f32
    %114 = vector.broadcast %cst_23 : f32 to vector<8x256xf32>
    %115 = arith.addf %114, %113 : vector<8x256xf32>
    %116 = arith.divf %114, %115 : vector<8x256xf32>
    %117 = vector.extract_strided_slice %105 {offsets = [0, 256], sizes = [8, 256], strides = [1, 1]} : vector<8x768xf32> to vector<8x256xf32>
    %118 = vector.extract_strided_slice %108 {offsets = [0, 256], sizes = [8, 256], strides = [1, 1]} : vector<8x768xf32> to vector<8x256xf32>
    %119 = arith.addf %117, %118 : vector<8x256xf32>
    %120 = arith.negf %119 : vector<8x256xf32>
    %121 = math.exp %120 : vector<8x256xf32>
    %cst_24 = arith.constant 1.000000e+00 : f32
    %122 = vector.broadcast %cst_24 : f32 to vector<8x256xf32>
    %123 = arith.addf %122, %121 : vector<8x256xf32>
    %124 = arith.divf %122, %123 : vector<8x256xf32>
    %125 = vector.extract_strided_slice %105 {offsets = [0, 512], sizes = [8, 256], strides = [1, 1]} : vector<8x768xf32> to vector<8x256xf32>
    %126 = vector.extract_strided_slice %108 {offsets = [0, 512], sizes = [8, 256], strides = [1, 1]} : vector<8x768xf32> to vector<8x256xf32>
    %127 = arith.mulf %116, %126 : vector<8x256xf32>
    %128 = arith.addf %125, %127 : vector<8x256xf32>
    %129 = math.tanh %128 : vector<8x256xf32>
    %130 = arith.subf %103, %129 : vector<8x256xf32>
    %131 = arith.mulf %124, %130 : vector<8x256xf32>
    %132 = arith.addf %129, %131 : vector<8x256xf32>
    %133 = vector.extract_strided_slice %11 {offsets = [0, 4, 0], sizes = [8, 1, 768], strides = [1, 1, 1]} : vector<8x8x768xf32> to vector<8x1x768xf32>
    %134 = vector.shape_cast %133 : vector<8x1x768xf32> to vector<8x768xf32>
    %135 = arith.truncf %132 : vector<8x256xf32> to vector<8x256xbf16>
    %cst_25 = arith.constant dense<0.000000e+00> : vector<8x768xf32>
    %136 = tpu.matmul %135, %15, %cst_25 {dimension_numbers = #tpu.dot_dimension_numbers<[1], [0], [0], [1], [0, 0, 1, 1], [], []>} : vector<8x256xbf16>, vector<256x768xbf16>, vector<8x768xf32> -> vector<8x768xf32>
    %137 = arith.addf %136, %14 : vector<8x768xf32>
    %138 = vector.extract_strided_slice %134 {offsets = [0, 0], sizes = [8, 256], strides = [1, 1]} : vector<8x768xf32> to vector<8x256xf32>
    %139 = vector.extract_strided_slice %137 {offsets = [0, 0], sizes = [8, 256], strides = [1, 1]} : vector<8x768xf32> to vector<8x256xf32>
    %140 = arith.addf %138, %139 : vector<8x256xf32>
    %141 = arith.negf %140 : vector<8x256xf32>
    %142 = math.exp %141 : vector<8x256xf32>
    %cst_26 = arith.constant 1.000000e+00 : f32
    %143 = vector.broadcast %cst_26 : f32 to vector<8x256xf32>
    %144 = arith.addf %143, %142 : vector<8x256xf32>
    %145 = arith.divf %143, %144 : vector<8x256xf32>
    %146 = vector.extract_strided_slice %134 {offsets = [0, 256], sizes = [8, 256], strides = [1, 1]} : vector<8x768xf32> to vector<8x256xf32>
    %147 = vector.extract_strided_slice %137 {offsets = [0, 256], sizes = [8, 256], strides = [1, 1]} : vector<8x768xf32> to vector<8x256xf32>
    %148 = arith.addf %146, %147 : vector<8x256xf32>
    %149 = arith.negf %148 : vector<8x256xf32>
    %150 = math.exp %149 : vector<8x256xf32>
    %cst_27 = arith.constant 1.000000e+00 : f32
    %151 = vector.broadcast %cst_27 : f32 to vector<8x256xf32>
    %152 = arith.addf %151, %150 : vector<8x256xf32>
    %153 = arith.divf %151, %152 : vector<8x256xf32>
    %154 = vector.extract_strided_slice %134 {offsets = [0, 512], sizes = [8, 256], strides = [1, 1]} : vector<8x768xf32> to vector<8x256xf32>
    %155 = vector.extract_strided_slice %137 {offsets = [0, 512], sizes = [8, 256], strides = [1, 1]} : vector<8x768xf32> to vector<8x256xf32>
    %156 = arith.mulf %145, %155 : vector<8x256xf32>
    %157 = arith.addf %154, %156 : vector<8x256xf32>
    %158 = math.tanh %157 : vector<8x256xf32>
    %159 = arith.subf %132, %158 : vector<8x256xf32>
    %160 = arith.mulf %153, %159 : vector<8x256xf32>
    %161 = arith.addf %158, %160 : vector<8x256xf32>
    %162 = vector.extract_strided_slice %11 {offsets = [0, 5, 0], sizes = [8, 1, 768], strides = [1, 1, 1]} : vector<8x8x768xf32> to vector<8x1x768xf32>
    %163 = vector.shape_cast %162 : vector<8x1x768xf32> to vector<8x768xf32>
    %164 = arith.truncf %161 : vector<8x256xf32> to vector<8x256xbf16>
    %cst_28 = arith.constant dense<0.000000e+00> : vector<8x768xf32>
    %165 = tpu.matmul %164, %15, %cst_28 {dimension_numbers = #tpu.dot_dimension_numbers<[1], [0], [0], [1], [0, 0, 1, 1], [], []>} : vector<8x256xbf16>, vector<256x768xbf16>, vector<8x768xf32> -> vector<8x768xf32>
    %166 = arith.addf %165, %14 : vector<8x768xf32>
    %167 = vector.extract_strided_slice %163 {offsets = [0, 0], sizes = [8, 256], strides = [1, 1]} : vector<8x768xf32> to vector<8x256xf32>
    %168 = vector.extract_strided_slice %166 {offsets = [0, 0], sizes = [8, 256], strides = [1, 1]} : vector<8x768xf32> to vector<8x256xf32>
    %169 = arith.addf %167, %168 : vector<8x256xf32>
    %170 = arith.negf %169 : vector<8x256xf32>
    %171 = math.exp %170 : vector<8x256xf32>
    %cst_29 = arith.constant 1.000000e+00 : f32
    %172 = vector.broadcast %cst_29 : f32 to vector<8x256xf32>
    %173 = arith.addf %172, %171 : vector<8x256xf32>
    %174 = arith.divf %172, %173 : vector<8x256xf32>
    %175 = vector.extract_strided_slice %163 {offsets = [0, 256], sizes = [8, 256], strides = [1, 1]} : vector<8x768xf32> to vector<8x256xf32>
    %176 = vector.extract_strided_slice %166 {offsets = [0, 256], sizes = [8, 256], strides = [1, 1]} : vector<8x768xf32> to vector<8x256xf32>
    %177 = arith.addf %175, %176 : vector<8x256xf32>
    %178 = arith.negf %177 : vector<8x256xf32>
    %179 = math.exp %178 : vector<8x256xf32>
    %cst_30 = arith.constant 1.000000e+00 : f32
    %180 = vector.broadcast %cst_30 : f32 to vector<8x256xf32>
    %181 = arith.addf %180, %179 : vector<8x256xf32>
    %182 = arith.divf %180, %181 : vector<8x256xf32>
    %183 = vector.extract_strided_slice %163 {offsets = [0, 512], sizes = [8, 256], strides = [1, 1]} : vector<8x768xf32> to vector<8x256xf32>
    %184 = vector.extract_strided_slice %166 {offsets = [0, 512], sizes = [8, 256], strides = [1, 1]} : vector<8x768xf32> to vector<8x256xf32>
    %185 = arith.mulf %174, %184 : vector<8x256xf32>
    %186 = arith.addf %183, %185 : vector<8x256xf32>
    %187 = math.tanh %186 : vector<8x256xf32>
    %188 = arith.subf %161, %187 : vector<8x256xf32>
    %189 = arith.mulf %182, %188 : vector<8x256xf32>
    %190 = arith.addf %187, %189 : vector<8x256xf32>
    %191 = vector.extract_strided_slice %11 {offsets = [0, 6, 0], sizes = [8, 1, 768], strides = [1, 1, 1]} : vector<8x8x768xf32> to vector<8x1x768xf32>
    %192 = vector.shape_cast %191 : vector<8x1x768xf32> to vector<8x768xf32>
    %193 = arith.truncf %190 : vector<8x256xf32> to vector<8x256xbf16>
    %cst_31 = arith.constant dense<0.000000e+00> : vector<8x768xf32>
    %194 = tpu.matmul %193, %15, %cst_31 {dimension_numbers = #tpu.dot_dimension_numbers<[1], [0], [0], [1], [0, 0, 1, 1], [], []>} : vector<8x256xbf16>, vector<256x768xbf16>, vector<8x768xf32> -> vector<8x768xf32>
    %195 = arith.addf %194, %14 : vector<8x768xf32>
    %196 = vector.extract_strided_slice %192 {offsets = [0, 0], sizes = [8, 256], strides = [1, 1]} : vector<8x768xf32> to vector<8x256xf32>
    %197 = vector.extract_strided_slice %195 {offsets = [0, 0], sizes = [8, 256], strides = [1, 1]} : vector<8x768xf32> to vector<8x256xf32>
    %198 = arith.addf %196, %197 : vector<8x256xf32>
    %199 = arith.negf %198 : vector<8x256xf32>
    %200 = math.exp %199 : vector<8x256xf32>
    %cst_32 = arith.constant 1.000000e+00 : f32
    %201 = vector.broadcast %cst_32 : f32 to vector<8x256xf32>
    %202 = arith.addf %201, %200 : vector<8x256xf32>
    %203 = arith.divf %201, %202 : vector<8x256xf32>
    %204 = vector.extract_strided_slice %192 {offsets = [0, 256], sizes = [8, 256], strides = [1, 1]} : vector<8x768xf32> to vector<8x256xf32>
    %205 = vector.extract_strided_slice %195 {offsets = [0, 256], sizes = [8, 256], strides = [1, 1]} : vector<8x768xf32> to vector<8x256xf32>
    %206 = arith.addf %204, %205 : vector<8x256xf32>
    %207 = arith.negf %206 : vector<8x256xf32>
    %208 = math.exp %207 : vector<8x256xf32>
    %cst_33 = arith.constant 1.000000e+00 : f32
    %209 = vector.broadcast %cst_33 : f32 to vector<8x256xf32>
    %210 = arith.addf %209, %208 : vector<8x256xf32>
    %211 = arith.divf %209, %210 : vector<8x256xf32>
    %212 = vector.extract_strided_slice %192 {offsets = [0, 512], sizes = [8, 256], strides = [1, 1]} : vector<8x768xf32> to vector<8x256xf32>
    %213 = vector.extract_strided_slice %195 {offsets = [0, 512], sizes = [8, 256], strides = [1, 1]} : vector<8x768xf32> to vector<8x256xf32>
    %214 = arith.mulf %203, %213 : vector<8x256xf32>
    %215 = arith.addf %212, %214 : vector<8x256xf32>
    %216 = math.tanh %215 : vector<8x256xf32>
    %217 = arith.subf %190, %216 : vector<8x256xf32>
    %218 = arith.mulf %211, %217 : vector<8x256xf32>
    %219 = arith.addf %216, %218 : vector<8x256xf32>
    %220 = vector.extract_strided_slice %11 {offsets = [0, 7, 0], sizes = [8, 1, 768], strides = [1, 1, 1]} : vector<8x8x768xf32> to vector<8x1x768xf32>
    %221 = vector.shape_cast %220 : vector<8x1x768xf32> to vector<8x768xf32>
    %222 = arith.truncf %219 : vector<8x256xf32> to vector<8x256xbf16>
    %cst_34 = arith.constant dense<0.000000e+00> : vector<8x768xf32>
    %223 = tpu.matmul %222, %15, %cst_34 {dimension_numbers = #tpu.dot_dimension_numbers<[1], [0], [0], [1], [0, 0, 1, 1], [], []>} : vector<8x256xbf16>, vector<256x768xbf16>, vector<8x768xf32> -> vector<8x768xf32>
    %224 = arith.addf %223, %14 : vector<8x768xf32>
    %225 = vector.extract_strided_slice %221 {offsets = [0, 0], sizes = [8, 256], strides = [1, 1]} : vector<8x768xf32> to vector<8x256xf32>
    %226 = vector.extract_strided_slice %224 {offsets = [0, 0], sizes = [8, 256], strides = [1, 1]} : vector<8x768xf32> to vector<8x256xf32>
    %227 = arith.addf %225, %226 : vector<8x256xf32>
    %228 = arith.negf %227 : vector<8x256xf32>
    %229 = math.exp %228 : vector<8x256xf32>
    %cst_35 = arith.constant 1.000000e+00 : f32
    %230 = vector.broadcast %cst_35 : f32 to vector<8x256xf32>
    %231 = arith.addf %230, %229 : vector<8x256xf32>
    %232 = arith.divf %230, %231 : vector<8x256xf32>
    %233 = vector.extract_strided_slice %221 {offsets = [0, 256], sizes = [8, 256], strides = [1, 1]} : vector<8x768xf32> to vector<8x256xf32>
    %234 = vector.extract_strided_slice %224 {offsets = [0, 256], sizes = [8, 256], strides = [1, 1]} : vector<8x768xf32> to vector<8x256xf32>
    %235 = arith.addf %233, %234 : vector<8x256xf32>
    %236 = arith.negf %235 : vector<8x256xf32>
    %237 = math.exp %236 : vector<8x256xf32>
    %cst_36 = arith.constant 1.000000e+00 : f32
    %238 = vector.broadcast %cst_36 : f32 to vector<8x256xf32>
    %239 = arith.addf %238, %237 : vector<8x256xf32>
    %240 = arith.divf %238, %239 : vector<8x256xf32>
    %241 = vector.extract_strided_slice %221 {offsets = [0, 512], sizes = [8, 256], strides = [1, 1]} : vector<8x768xf32> to vector<8x256xf32>
    %242 = vector.extract_strided_slice %224 {offsets = [0, 512], sizes = [8, 256], strides = [1, 1]} : vector<8x768xf32> to vector<8x256xf32>
    %243 = arith.mulf %232, %242 : vector<8x256xf32>
    %244 = arith.addf %241, %243 : vector<8x256xf32>
    %245 = math.tanh %244 : vector<8x256xf32>
    %246 = arith.subf %219, %245 : vector<8x256xf32>
    %247 = arith.mulf %240, %246 : vector<8x256xf32>
    %248 = arith.addf %245, %247 : vector<8x256xf32>
    %c0_37 = arith.constant 0 : index
    %c0_38 = arith.constant 0 : index
    %249 = vector.load %arg10[%c0_37, %c0_38] : memref<8x256xf32, #tpu.memory_space<vmem>>, vector<8x256xf32>
    tpu.vector_store %arg10[%c0_37, %c0_38], %248 {strides = array<i32>} : memref<8x256xf32, #tpu.memory_space<vmem>>, vector<8x256xf32>,
    %c0_i32_39 = arith.constant 0 : i32
    %250 = arith.cmpi eq, %arg1, %c0_i32_39 : i32
    %251 = arith.extui %250 : i1 to i32
    %c0_i32_40 = arith.constant 0 : i32
    %252 = arith.cmpi ne, %251, %c0_i32_40 : i32
    scf.if %252 {
      %cst_41 = arith.constant 0.000000e+00 : f32
      %253 = vector.broadcast %cst_41 : f32 to vector<8x256xf32>
      %254 = arith.maximumf %248, %253 : vector<8x256xf32>
      %255 = arith.truncf %254 : vector<8x256xf32> to vector<8x256xbf16>
      %c0_42 = arith.constant 0 : index
      %c0_43 = arith.constant 0 : index
      %256 = vector.load %arg7[%c0_42, %c0_43] : memref<256x128xbf16, #tpu.memory_space<vmem>>, vector<256x128xbf16>
      %cst_44 = arith.constant dense<0.000000e+00> : vector<8x128xf32>
      %257 = tpu.matmul %255, %256, %cst_44 {dimension_numbers = #tpu.dot_dimension_numbers<[1], [0], [0], [1], [0, 0, 1, 1], [], []>} : vector<8x256xbf16>, vector<256x128xbf16>, vector<8x128xf32> -> vector<8x128xf32>
      %c0_45 = arith.constant 0 : index
      %c0_46 = arith.constant 0 : index
      %258 = vector.load %arg8[%c0_45, %c0_46] : memref<1x128xf32, #tpu.memory_space<vmem>>, vector<1x128xf32>
      %259 = vector.broadcast %258 : vector<1x128xf32> to vector<8x128xf32>
      %260 = arith.addf %257, %259 : vector<8x128xf32>
      %c0_47 = arith.constant 0 : index
      %c0_48 = arith.constant 0 : index
      %261 = vector.load %arg9[%c0_47, %c0_48] : memref<8x128xf32, #tpu.memory_space<vmem>>, vector<8x128xf32>
      tpu.vector_store %arg9[%c0_47, %c0_48], %260 {strides = array<i32>} : memref<8x128xf32, #tpu.memory_space<vmem>>, vector<8x128xf32>,
    } else {
    }
    return
  }
  func.func @transform_0(%arg0: i32, %arg1: i32) -> (i32, i32, i32) {
    %c0_i32 = arith.constant 0 : i32
    %c0_i32_0 = arith.constant 0 : i32
    return %arg0, %arg1, %c0_i32 : i32, i32, i32
  }
  func.func @transform_1(%arg0: i32, %arg1: i32) -> (i32, i32) {
    %c0_i32 = arith.constant 0 : i32
    %c0_i32_0 = arith.constant 0 : i32
    %c0_i32_1 = arith.constant 0 : i32
    return %c0_i32, %c0_i32_0 : i32, i32
  }
  func.func @transform_2(%arg0: i32, %arg1: i32) -> (i32, i32) {
    %c0_i32 = arith.constant 0 : i32
    %c0_i32_0 = arith.constant 0 : i32
    %c0_i32_1 = arith.constant 0 : i32
    return %c0_i32, %c0_i32_0 : i32, i32
  }
  func.func @transform_3(%arg0: i32, %arg1: i32) -> (i32, i32) {
    %c0_i32 = arith.constant 0 : i32
    %c0_i32_0 = arith.constant 0 : i32
    %c0_i32_1 = arith.constant 0 : i32
    return %c0_i32, %c0_i32_0 : i32, i32
  }
  func.func @transform_4(%arg0: i32, %arg1: i32) -> (i32, i32) {
    %c0_i32 = arith.constant 0 : i32
    %c0_i32_0 = arith.constant 0 : i32
    %c0_i32_1 = arith.constant 0 : i32
    return %c0_i32, %c0_i32_0 : i32, i32
  }
  func.func @transform_5(%arg0: i32, %arg1: i32) -> (i32, i32) {
    %c0_i32 = arith.constant 0 : i32
    %c0_i32_0 = arith.constant 0 : i32
    %c0_i32_1 = arith.constant 0 : i32
    return %c0_i32, %c0_i32_0 : i32, i32
  }
  func.func @transform_6(%arg0: i32, %arg1: i32) -> (i32, i32) {
    %c0_i32 = arith.constant 0 : i32
    %c0_i32_0 = arith.constant 0 : i32
    %c0_i32_1 = arith.constant 0 : i32
    return %c0_i32, %c0_i32_0 : i32, i32
  }
  func.func @transform_7(%arg0: i32, %arg1: i32) -> (i32, i32) {
    %c0_i32 = arith.constant 0 : i32
    %c0_i32_0 = arith.constant 0 : i32
    return %arg0, %c0_i32 : i32, i32
  }
}

</mosaic_0001>

<bundles_post_ra>
// kernel: tpu_custom_call.1
= control target key start
LH: loop header
LB: loop body
LE: loop exit
PB: predicated region body
PF: predicated region fallthrough
CT: control target
= control target key end

     0   :  { %12 = vsyncpa [#allocation4], 0  ;;  %s12841_s0 = inlined_call_operand.hbm [shape: f32[8,8,128], index: 0, kind: input, shape index: {}]   ;;  %s12842_s1 = inlined_call_operand.hbm [shape: bf16[128,768], index: 1, kind: input, shape index: {}]   ;;  %s12843_s2 = inlined_call_operand.hbm [shape: bf16[256,768], index: 2, kind: input, shape index: {}]   ;;  %s12844_s3 = inlined_call_operand.hbm [shape: f32[1,768], index: 3, kind: input, shape index: {}]   ;;  %s12845_s4 = inlined_call_operand.vmem [shape: f32[1,768], index: 4, kind: input, shape index: {}]   ;;  %s12846_s5 = inlined_call_operand.hbm [shape: bf16[256,128], index: 5, kind: input, shape index: {}]   ;;  %s12847_s6 = inlined_call_operand.vmem [shape: f32[1,128], index: 6, kind: input, shape index: {}]   ;;  %s12848_s7 = inlined_call_operand.hbm [shape: f32[8,128], index: 7, kind: output, shape index: {}]  }
   0x1   :  { %13 = vsyncpa [#allocation7], 0 }
   0x2   :  { %14 = vsyncpa [#allocation10], 0 }
   0x3   :  { %15 = vsyncpa [#allocation5], 0  ;;  %s9917_s24 = smov [#allocation6]  }
   0x4   :  { %s33_s25 = sshll.u32 %s9917_s24, 4  ;;  %s34_s25 = int_to_ptr.vmem [resolvable:$true] %s33_s25 }
   0x5   :  { %s9797_s26 = scalar_lea.vmem %s34_s25, 6144  ;;  %p9802_p1 = scmp.lt.s32.totalorder %s34_s25, %s34_s25 }
   0x6   :  { %p9798_p0 = scmp.ne.s32.totalorder %s34_s25, %s9797_s26  ;;  %p9803_p2 = scmp.lt.s32.totalorder %s9797_s26, %s9797_s26 }
   0x8   :  { %p9804_p3 = por %p9803_p2, %p9802_p1 }
   0xa   :  { %p9805_p4 = pnand %p9804_p3, %p9798_p0 }
   0xc   :  { %9808 = shalt.err (!%p9805_p4)
}
   0xd   :  { %s9918_s27 = smov 384   ;;  %s9919_s28 = smov 24  }
   0xe   :  { %39 = dma.hbm_to_vmem [thread:$0]  %s12842_s1, 6144, %s34_s25, [#allocation7], %s9918_s27, %s9918_s27, %s9919_s28  }
   0xf   :  { %s9920_s8 = smov [#allocation9]   ;;  %s9921_s10 = smov [#allocation3]  }
  0x10   :  { %s58_s9 = sshll.u32 %s9920_s8, 4  ;;  %s21_s11 = sshll.u32 %s9921_s10, 4  ;;  %s59_s9 = int_to_ptr.vmem [resolvable:$true] %s58_s9  ;;  %s22_s11 = int_to_ptr.vmem [resolvable:$true] %s21_s11 }
  0x11   :  { %s9817_s12 = scalar_lea.vmem %s59_s9, 96  ;;  %p9822_p6 = scmp.lt.s32.totalorder %s59_s9, %s59_s9 }
  0x12   :  { %p9818_p5 = scmp.ne.s32.totalorder %s59_s9, %s9817_s12  ;;  %p9823_p7 = scmp.lt.s32.totalorder %s9817_s12, %s9817_s12 }
  0x14   :  { %p9824_p8 = por %p9823_p7, %p9822_p6 }
  0x16   :  { %p9825_p9 = pnand %p9824_p8, %p9818_p5 }
  0x18   :  { %9828 = shalt.err (!%p9825_p9)
}
  0x19   :  { %61 = dma.hbm_to_vmem [thread:$0]  %s12844_s3, 96, %s59_s9, [#allocation10]  }
  0x1a   :  { %s9837_s15 = scalar_lea.vmem %s22_s11, 1024  ;;  %p9842_p11 = scmp.lt.s32.totalorder %s22_s11, %s22_s11 }
  0x1b   :  { %p9838_p10 = scmp.ne.s32.totalorder %s22_s11, %s9837_s15  ;;  %p9843_p12 = scmp.lt.s32.totalorder %s9837_s15, %s9837_s15 }
  0x1d   :  { %p9844_p13 = por %p9843_p12, %p9842_p11 }
  0x1f   :  { %p9845_p0 = pnand %p9844_p13, %p9838_p10 }
  0x21   :  { %9848 = shalt.err (!%p9845_p0)
}
  0x22   :  { %s9922_s1 = smov 128   ;;  %s9923_s16 = smov 8  }
  0x23   :  { %27 = dma.hbm_to_vmem [thread:$0]  %s12841_s0, 1024, %s22_s11, [#allocation4], %s9922_s1, %s9922_s1, %s9923_s16  }
  0x24   :  { %s9924_s19 = smov [#allocation8]   ;;  %s9925_s21 = smov [#allocation11]  }
  0x25   :  { %s45_s20 = sshll.u32 %s9924_s19, 4  ;;  %s69_s22 = sshll.u32 %s9925_s21, 4  ;;  %s46_s20 = int_to_ptr.vmem [resolvable:$true] %s45_s20  ;;  %s70_s22 = int_to_ptr.vmem [resolvable:$true] %s69_s22 }
  0x26   :  { %s9857_s3 = scalar_lea.vmem %s46_s20, 12288  ;;  %p9862_p2 = scmp.lt.s32.totalorder %s46_s20, %s46_s20 }
  0x27   :  { %p9858_p1 = scmp.ne.s32.totalorder %s46_s20, %s9857_s3  ;;  %p9863_p3 = scmp.lt.s32.totalorder %s9857_s3, %s9857_s3 }
  0x29   :  { %p9864_p4 = por %p9863_p3, %p9862_p2 }
  0x2b   :  { %p9865_p5 = pnand %p9864_p4, %p9858_p1 }
  0x2d   :  { %9868 = shalt.err (!%p9865_p5)
}
  0x2e   :  { %51 = dma.hbm_to_vmem [thread:$0]  %s12843_s2, 12288, %s46_s20, [#allocation7], %s9918_s27, %s9918_s27, %s9919_s28  }
  0x2f   :  { %s9877_s0 = scalar_lea.vmem %s70_s22, 2048  ;;  %p9882_p7 = scmp.lt.s32.totalorder %s70_s22, %s70_s22 }
  0x30   :  { %p9878_p6 = scmp.ne.s32.totalorder %s70_s22, %s9877_s0  ;;  %p9883_p8 = scmp.lt.s32.totalorder %s9877_s0, %s9877_s0 }
  0x32   :  { %p9884_p9 = por %p9883_p8, %p9882_p7 }
  0x34   :  { %p9885_p10 = pnand %p9884_p9, %p9878_p6 }
  0x36   :  { %9888 = shalt.err (!%p9885_p10)
}
  0x37   :  { %s9926_s25 = smov 64   ;;  %s9927_s26 = smov 4  }
  0x38   :  { %75 = dma.hbm_to_vmem [thread:$0]  %s12846_s5, 2048, %s70_s22, [#allocation10], %s9926_s25, %s9926_s25, %s9927_s26  }
  0x39   :  { %9909 = dma.done.wait [#allocation4], 1024  }
  0x3a   :  { %9910 = vsyncadd [#allocation4], 4294966272 }
  0x3b   :  { %9911 = dma.done.wait [#allocation7], 18432  }
  0x3c   :  { %9912 = vsyncadd [#allocation7], 4294948864 }
  0x3d   :  { %9913 = dma.done.wait [#allocation10], 2144  }
  0x3e   :  { %9914 = vsyncadd [#allocation10], 4294965152  ;;  %v9928_v0 = vmov 0   ;;  %v7671_v1 = vld [vmem:[#allocation6 + $0x154] ss:$24 sps:$4 sm:$0xff]   ;;  %v100_v33 = vld [vmem:[#allocation3] sm:$0xff] }
  0x3f   :  { %537 = vmatprep.mubr.bf16.mxu1 %v9928_v0  ;;  %464 = vmatprep.mubr.bf16.mxu0 %v9928_v0  ;;  %v7673_v2 = vld [vmem:[#allocation6 + $0x15c] ss:$24 sps:$4 sm:$0xff]   ;;  %v7675_v3 = vld [vmem:[#allocation6 + $0x150] ss:$24 sps:$4 sm:$0xff]   ;;  %v7679_v6 = vld [vmem:[#allocation6 + $0x12c] ss:$24 sps:$4 sm:$0xff]  }
  0x40   :  { %432 = vmatprep.subr.bf16.mxu0 %v7671_v1  ;;  %v7676_v4 = vld [vmem:[#allocation6 + $0x158] ss:$24 sps:$4 sm:$0xff]   ;;  %505 = vmatprep.subr.bf16.mxu1 %v7673_v2  ;;  %v7677_v5 = vld [vmem:[#allocation6 + $0x124] ss:$24 sps:$4 sm:$0xff]   ;;  %v7682_v8 = vld [vmem:[#allocation6 + $0x128] ss:$24 sps:$4 sm:$0xff]  }
  0x41   :  { %433 = vmatpush1.bf16.msra.mxu0 %v7675_v3  ;;  %506 = vmatpush1.bf16.msra.mxu1 %v7676_v4  ;;  %v7681_v7 = vld [vmem:[#allocation6 + $0x120] ss:$24 sps:$4 sm:$0xff]   ;;  %v7683_v9 = vld [vmem:[#allocation6 + $0xf4] ss:$24 sps:$4 sm:$0xff]   ;;  %v7687_v11 = vld [vmem:[#allocation6 + $0xf0] ss:$24 sps:$4 sm:$0xff]  }
  0x42   :  { %434 = vmatprep.subr.bf16.mxu0 %v7677_v5  ;;  %507 = vmatprep.subr.bf16.mxu1 %v7679_v6  ;;  %v7685_v10 = vld [vmem:[#allocation6 + $0xfc] ss:$24 sps:$4 sm:$0xff]   ;;  %v7688_v12 = vld [vmem:[#allocation6 + $0xf8] ss:$24 sps:$4 sm:$0xff]   ;;  %v7691_v14 = vld [vmem:[#allocation6 + $0xcc] ss:$24 sps:$4 sm:$0xff]  }
  0x43   :  { %v7689_v13 = vld [vmem:[#allocation6 + $0xc4] ss:$24 sps:$4 sm:$0xff]   ;;  %v7693_v15 = vld [vmem:[#allocation6 + $0xc0] ss:$24 sps:$4 sm:$0xff]   ;;  %v7695_v17 = vld [vmem:[#allocation6 + $0x94] ss:$24 sps:$4 sm:$0xff]  }
  0x44   :  { %v7694_v16 = vld [vmem:[#allocation6 + $0xc8] ss:$24 sps:$4 sm:$0xff]   ;;  %v7697_v18 = vld [vmem:[#allocation6 + $0x9c] ss:$24 sps:$4 sm:$0xff]   ;;  %v7700_v20 = vld [vmem:[#allocation6 + $0x98] ss:$24 sps:$4 sm:$0xff]  }
  0x45   :  { %435 = vmatpush1.bf16.msra.mxu0 %v7681_v7  ;;  %508 = vmatpush1.bf16.msra.mxu1 %v7682_v8  ;;  %v7699_v19 = vld [vmem:[#allocation6 + $0x90] ss:$24 sps:$4 sm:$0xff]   ;;  %v7701_v21 = vld [vmem:[#allocation6 + $0x64] ss:$24 sps:$4 sm:$0xff]   ;;  %v7705_v23 = vld [vmem:[#allocation6 + $0x60] ss:$24 sps:$4 sm:$0xff]  }
  0x46   :  { %436 = vmatprep.subr.bf16.mxu0 %v7683_v9  ;;  %509 = vmatprep.subr.bf16.mxu1 %v7685_v10  ;;  %v7703_v22 = vld [vmem:[#allocation6 + $0x6c] ss:$24 sps:$4 sm:$0xff]   ;;  %v7706_v24 = vld [vmem:[#allocation6 + $0x68] ss:$24 sps:$4 sm:$0xff]   ;;  %v7709_v26 = vld [vmem:[#allocation6 + $0x3c] ss:$24 sps:$4 sm:$0xff]  }
  0x47   :  { %v7707_v25 = vld [vmem:[#allocation6 + $0x34] ss:$24 sps:$4 sm:$0xff]   ;;  %v7711_v27 = vld [vmem:[#allocation6 + $0x30] ss:$24 sps:$4 sm:$0xff]   ;;  %v7713_v29 = vld [vmem:[#allocation6 + $0x4] ss:$24 sps:$4 sm:$0xff]  }
  0x48   :  { %v7712_v28 = vld [vmem:[#allocation6 + $0x38] ss:$24 sps:$4 sm:$0xff]   ;;  %v7715_v30 = vld [vmem:[#allocation6 + $0xc] ss:$24 sps:$4 sm:$0xff]   ;;  %v7718_v32 = vld [vmem:[#allocation6 + $0x8] ss:$24 sps:$4 sm:$0xff]  }
  0x49   :  { %437 = vmatpush1.bf16.msra.mxu0 %v7687_v11  ;;  %510 = vmatpush1.bf16.msra.mxu1 %v7688_v12  ;;  %v7717_v31 = vld [vmem:[#allocation6] ss:$24 sps:$4 sm:$0xff]   ;;  %v101_v34 = vld [vmem:[#allocation3 + $0x8] sm:$0xff]  ;;  %v7721_v35 = vld [vmem:[#allocation6 + $0x164] ss:$24 sps:$4 sm:$0xff]   ;;  %vm1771_vm0 = vcmask 1041409  }
  0x4a   :  { %438 = vmatprep.subr.bf16.mxu0 %v7689_v13  ;;  %511 = vmatprep.subr.bf16.mxu1 %v7691_v14  ;;  %v9994_v36 = vld [vmem:[#allocation8 + $0x154] ss:$24 sps:$4 sm:$0xff]   ;;  %v9996_v37 = vpack.c.bf16 %v101_v34, %v100_v33  ;;  %v7719_v38 = vld [vmem:[#allocation6 + $0x160] ss:$24 sps:$4 sm:$0xff]   ;;  %v9998_v39 = vld [vmem:[#allocation8 + $0x150] ss:$24 sps:$4 sm:$0xff]  }
  0x4b   :  { %v7727_v40 = vld [vmem:[#allocation6 + $0x134] ss:$24 sps:$4 sm:$0xff]   ;;  %v10001_v41 = vld [vmem:[#allocation8 + $0x124] ss:$24 sps:$4 sm:$0xff]   ;;  %v7725_v42 = vld [vmem:[#allocation6 + $0x130] ss:$24 sps:$4 sm:$0xff]  }
  0x4c   :  { %v10005_v43 = vld [vmem:[#allocation8 + $0x120] ss:$24 sps:$4 sm:$0xff]   ;;  %v102_v44 = vld [vmem:[#allocation3 + $0x10] sm:$0xff]  ;;  %v7733_v46 = vld [vmem:[#allocation6 + $0x104] ss:$24 sps:$4 sm:$0xff]   ;;  %vm1774_vm1 = vcmask 1042434  }
  0x4d   :  { %439 = vmatpush1.bf16.msra.mxu0 %v7693_v15  ;;  %512 = vmatpush1.bf16.msra.mxu1 %v7694_v16  ;;  %v103_v45 = vld [vmem:[#allocation3 + $0x18] sm:$0xff]  ;;  %v10009_v47 = vld [vmem:[#allocation8 + $0xf4] ss:$24 sps:$4 sm:$0xff]   ;;  %v10016_v50 = vld [vmem:[#allocation8 + $0xf0] ss:$24 sps:$4 sm:$0xff]   ;;  %v12850_v16 = vmov 0.0|0.0  }
  0x4e   :  { %440 = vmatprep.subr.bf16.mxu0 %v7695_v17  ;;  %513 = vmatprep.subr.bf16.mxu1 %v7697_v18  ;;  %v10013_v48 = vpack.c.bf16 %v103_v45, %v102_v44  ;;  %v7731_v49 = vld [vmem:[#allocation6 + $0x100] ss:$24 sps:$4 sm:$0xff]   ;;  %v7739_v51 = vld [vmem:[#allocation6 + $0xd4] ss:$24 sps:$4 sm:$0xff]   ;;  %v10019_v52 = vld [vmem:[#allocation8 + $0xc4] ss:$24 sps:$4 sm:$0xff]  }
  0x4f   :  { %v7737_v53 = vld [vmem:[#allocation6 + $0xd0] ss:$24 sps:$4 sm:$0xff]   ;;  %v10021_v54 = vld [vmem:[#allocation8 + $0xc0] ss:$24 sps:$4 sm:$0xff]   ;;  %v7745_v55 = vld [vmem:[#allocation6 + $0xa4] ss:$24 sps:$4 sm:$0xff]  }
  0x50   :  { %v104_v56 = vld [vmem:[#allocation3 + $0x20] sm:$0xff]  ;;  %v105_v57 = vld [vmem:[#allocation3 + $0x28] sm:$0xff]  ;;  %v106_v4 = vld [vmem:[#allocation3 + $0x30] sm:$0xff]  ;;  %vm1777_vm2 = vcmask 1043459   ;;  %vm1780_vm3 = vcmask 1044484   ;;  %vm1783_vm4 = vcmask 1045509  }
  0x51   :  { %441 = vmatpush1.bf16.msra.mxu0 %v7699_v19  ;;  %514 = vmatpush1.bf16.msra.mxu1 %v7700_v20  ;;  %v10027_v58 = vld [vmem:[#allocation8 + $0x94] ss:$24 sps:$4 sm:$0xff]   ;;  %v7743_v59 = vld [vmem:[#allocation6 + $0xa0] ss:$24 sps:$4 sm:$0xff]   ;;  %v10031_v60 = vpack.c.bf16 %v105_v57, %v104_v56  ;;  %v10033_v61 = vld [vmem:[#allocation8 + $0x90] ss:$24 sps:$4 sm:$0xff]  }
  0x52   :  { %442 = vmatprep.subr.bf16.mxu0 %v7701_v21  ;;  %515 = vmatprep.subr.bf16.mxu1 %v7703_v22  ;;  %v7751_v62 = vld [vmem:[#allocation6 + $0x74] ss:$24 sps:$4 sm:$0xff]   ;;  %v10037_v63 = vld [vmem:[#allocation8 + $0x64] ss:$24 sps:$4 sm:$0xff]   ;;  %v7749_v1 = vld [vmem:[#allocation6 + $0x70] ss:$24 sps:$4 sm:$0xff]  }
  0x53   :  { %v10039_v2 = vld [vmem:[#allocation8 + $0x60] ss:$24 sps:$4 sm:$0xff]   ;;  %v7757_v3 = vld [vmem:[#allocation6 + $0x44] ss:$24 sps:$4 sm:$0xff]   ;;  %v10045_v6 = vld [vmem:[#allocation8 + $0x34] ss:$24 sps:$4 sm:$0xff]  }
  0x54   :  { %v107_v5 = vld [vmem:[#allocation3 + $0x38] sm:$0xff]  ;;  %v10051_v9 = vld [vmem:[#allocation8 + $0x30] ss:$24 sps:$4 sm:$0xff]   ;;  %v7763_v10 = vld [vmem:[#allocation6 + $0x14] ss:$24 sps:$4 sm:$0xff]   ;;  %vm1786_vm5 = vcmask 1046534  }
  0x55   :  { %443 = vmatpush1.bf16.msra.mxu0 %v7705_v23  ;;  %516 = vmatpush1.bf16.msra.mxu1 %v7706_v24  ;;  %v7755_v7 = vld [vmem:[#allocation6 + $0x40] ss:$24 sps:$4 sm:$0xff]   ;;  %v10049_v8 = vpack.c.bf16 %v107_v5, %v106_v4  ;;  %v10055_v11 = vld [vmem:[#allocation8 + $0x4] ss:$24 sps:$4 sm:$0xff]   ;;  %v7761_v12 = vld [vmem:[#allocation6 + $0x10] ss:$24 sps:$4 sm:$0xff]  }
  0x56   :  { %444 = vmatprep.subr.bf16.mxu0 %v7707_v25  ;;  %517 = vmatprep.subr.bf16.mxu1 %v7709_v26  ;;  %v10060_v13 = vld [vmem:[#allocation8] ss:$24 sps:$4 sm:$0xff]   ;;  %v10062_v14 = vld [vmem:[#allocation8 + $0x2d4] ss:$24 sps:$4 sm:$0xff]   ;;  %v10069_v17 = vld [vmem:[#allocation8 + $0x2d0] ss:$24 sps:$4 sm:$0xff]  }
  0x57   :  { %v10065_v15 = vld [vmem:[#allocation8 + $0x15c] ss:$24 sps:$4 sm:$0xff]   ;;  %v10071_v18 = vld [vmem:[#allocation8 + $0x158] ss:$24 sps:$4 sm:$0xff]   ;;  %v10078_v20 = vld [vmem:[#allocation8 + $0x12c] ss:$24 sps:$4 sm:$0xff]  }
  0x58   :  { %v10074_v19 = vld [vmem:[#allocation8 + $0x2a4] ss:$24 sps:$4 sm:$0xff]   ;;  %v10081_v21 = vld [vmem:[#allocation8 + $0x2a0] ss:$24 sps:$4 sm:$0xff]   ;;  %v10087_v23 = vld [vmem:[#allocation8 + $0x274] ss:$24 sps:$4 sm:$0xff]  }
  0x59   :  { %445 = vmatpush1.bf16.msra.mxu0 %v7711_v27  ;;  %518 = vmatpush1.bf16.msra.mxu1 %v7712_v28  ;;  %v10085_v22 = vld [vmem:[#allocation8 + $0x128] ss:$24 sps:$4 sm:$0xff]   ;;  %v10091_v24 = vld [vmem:[#allocation8 + $0xfc] ss:$24 sps:$4 sm:$0xff]   ;;  %v10096_v26 = vld [vmem:[#allocation8 + $0xf8] ss:$24 sps:$4 sm:$0xff]  }
  0x5a   :  { %446 = vmatprep.subr.bf16.mxu0 %v7713_v29  ;;  %519 = vmatprep.subr.bf16.mxu1 %v7715_v30  ;;  %v10094_v25 = vld [vmem:[#allocation8 + $0x270] ss:$24 sps:$4 sm:$0xff]   ;;  %v10100_v27 = vld [vmem:[#allocation8 + $0x244] ss:$24 sps:$4 sm:$0xff]   ;;  %v10106_v29 = vld [vmem:[#allocation8 + $0x240] ss:$24 sps:$4 sm:$0xff]  }
  0x5b   :  { %v10104_v28 = vld [vmem:[#allocation8 + $0xcc] ss:$24 sps:$4 sm:$0xff]   ;;  %v10111_v30 = vld [vmem:[#allocation8 + $0xc8] ss:$24 sps:$4 sm:$0xff]   ;;  %v10122_v34 = vld [vmem:[#allocation8 + $0x98] ss:$24 sps:$4 sm:$0xff]  }
  0x5c   :  { %v10120_v33 = vld [vmem:[#allocation8 + $0x210] ss:$24 sps:$4 sm:$0xff]   ;;  %v10143_v44 = vld [vmem:[#allocation8 + $0x3c] ss:$24 sps:$4 sm:$0xff]   ;;  %v7820_v57 = vld [vmem:[#allocation8 + $0x160] ss:$24 sps:$4 sm:$0xff]  }
  0x5d   :  { %447 = vmatpush1.bf16.msra.mxu0 %v7717_v31  ;;  %520 = vmatpush1.bf16.msra.mxu1 %v7718_v32  ;;  %v10113_v31 = vld [vmem:[#allocation8 + $0x214] ss:$24 sps:$4 sm:$0xff]   ;;  %v10146_v45 = vld [vmem:[#allocation8 + $0x1b0] ss:$24 sps:$4 sm:$0xff]   ;;  %v7829_v4 = vld [vmem:[#allocation8 + $0x104] ss:$24 sps:$4 sm:$0xff]  }
  0x5e   :  { %578 = vmatprep.subr.bf16.mxu0 %v7721_v35  ;;  %1263 = vmatprep.subr.bf16.mxu1 %v9994_v36  ;;  %v10117_v32 = vld [vmem:[#allocation8 + $0x9c] ss:$24 sps:$4 sm:$0xff]   ;;  %v10172_v56 = vld [vmem:[#allocation8 + $0x2d8] ss:$24 sps:$4 sm:$0xff]   ;;  %vm1789_vm6 = vcmask 1047559   ;;  %s9930_s28 = smov [#allocation12]  }
  0x5f   :  { %v10126_v35 = vld [vmem:[#allocation8 + $0x1e4] ss:$24 sps:$4 sm:$0xff]   ;;  %13009 = vst [vmem:[#allocation17_spill] sm:$0xff] %v10172_v56  ;;  %v10187_v5 = vld [vmem:[#allocation8 + $0x278] ss:$24 sps:$4 sm:$0xff]   ;;  %s7207_s8 = sshll.u32 %s9930_s28, 4  ;;  %s7208_s8 = int_to_ptr.vmem [resolvable:$true] %s7207_s8 }
  0x60   :  { %538 = vmatmul.mubr.bf16.vlgmr.msra.gmra.mxu1 %v9996_v37  ;;  %465 = vmatmul.mubr.bf16.vlgmr.msra.gmra.mxu0 %v9996_v37  ;;  %13011 = vst [vmem:[#allocation19_spill] sm:$0xff] %v10187_v5  ;;  %s9889_s9 = scalar_lea.vmem %s7208_s8, 128  ;;  %p9894_p12 = scmp.lt.s32.totalorder %s7208_s8, %s7208_s8 }
  0x61   :  { %579 = vmatpush1.bf16.msra.mxu0 %v7719_v38  ;;  %1264 = vmatpush1.bf16.msra.mxu1 %v9998_v39  ;;  %v10132_v38 = vld [vmem:[#allocation8 + $0x1e0] ss:$24 sps:$4 sm:$0xff]   ;;  %p9890_p11 = scmp.ne.s32.totalorder %s7208_s8, %s9889_s9  ;;  %p9895_p13 = scmp.lt.s32.totalorder %s9889_s9, %s9889_s9 }
  0x62   :  { %580 = vmatprep.subr.bf16.mxu0 %v7727_v40  ;;  %1265 = vmatprep.subr.bf16.mxu1 %v10001_v41  ;;  %v10137_v40 = vld [vmem:[#allocation8 + $0x68] ss:$24 sps:$4 sm:$0xff]  }
  0x63   :  { %474 = vmatprep.mubr.bf16.mxu0 %v9928_v0  ;;  %547 = vmatprep.mubr.bf16.mxu1 %v9928_v0  ;;  %p9896_p0 = por %p9895_p13, %p9894_p12 }
  0x65   :  { %581 = vmatpush1.bf16.msra.mxu0 %v7725_v42  ;;  %1266 = vmatpush1.bf16.msra.mxu1 %v10005_v43  ;;  %v10139_v42 = vld [vmem:[#allocation8 + $0x1b4] ss:$24 sps:$4 sm:$0xff]   ;;  %p9897_p1 = pnand %p9896_p0, %p9890_p11 }
  0x66   :  { %582 = vmatprep.subr.bf16.mxu0 %v7733_v46  ;;  %1267 = vmatprep.subr.bf16.mxu1 %v10009_v47  ;;  %v10148_v46 = vld [vmem:[#allocation8 + $0x38] ss:$24 sps:$4 sm:$0xff]  }
  0x68   :  { %475 = vmatmul.mubr.bf16.gmra.mxu0 %v10013_v48  ;;  %548 = vmatmul.mubr.bf16.gmra.mxu1 %v10013_v48 }
  0x69   :  { %583 = vmatpush1.bf16.msra.mxu0 %v7731_v49  ;;  %1268 = vmatpush1.bf16.msra.mxu1 %v10016_v50  ;;  %v10156_v49 = vld [vmem:[#allocation8 + $0xc] ss:$24 sps:$4 sm:$0xff]  }
  0x6a   :  { %584 = vmatprep.subr.bf16.mxu0 %v7739_v51  ;;  %1269 = vmatprep.subr.bf16.mxu1 %v10019_v52  ;;  %v10158_v51 = vld [vmem:[#allocation8 + $0x180] ss:$24 sps:$4 sm:$0xff]  }
  0x6b   :  { %484 = vmatprep.mubr.bf16.mxu0 %v9928_v0  ;;  %557 = vmatprep.mubr.bf16.mxu1 %v9928_v0 }
  0x6d   :  { %585 = vmatpush1.bf16.msra.mxu0 %v7737_v53  ;;  %1270 = vmatpush1.bf16.msra.mxu1 %v10021_v54  ;;  %v10160_v53 = vld [vmem:[#allocation8 + $0x8] ss:$24 sps:$4 sm:$0xff]  }
  0x6e   :  { %586 = vmatprep.subr.bf16.mxu0 %v7745_v55  ;;  %1271 = vmatprep.subr.bf16.mxu1 %v10027_v58  ;;  %v10169_v55 = vld [vmem:[#allocation8 + $0x164] ss:$24 sps:$4 sm:$0xff]  }
  0x70   :  { %485 = vmatmul.mubr.bf16.gmra.mxu0 %v10031_v60  ;;  %558 = vmatmul.mubr.bf16.gmra.mxu1 %v10031_v60 }
  0x71   :  { %587 = vmatpush1.bf16.msra.mxu0 %v7743_v59  ;;  %1272 = vmatpush1.bf16.msra.mxu1 %v10033_v61  ;;  %v10176_v59 = vld [vmem:[#allocation8 + $0x2ac] ss:$24 sps:$4 sm:$0xff]  }
  0x72   :  { %588 = vmatprep.subr.bf16.mxu0 %v7751_v62  ;;  %1273 = vmatprep.subr.bf16.mxu1 %v10037_v63  ;;  %v10180_v62 = vld [vmem:[#allocation8 + $0x2a8] ss:$24 sps:$4 sm:$0xff]  }
  0x73   :  { %494 = vmatprep.mubr.bf16.mxu0 %v9928_v0  ;;  %567 = vmatprep.mubr.bf16.mxu1 %v9928_v0 }
  0x75   :  { %589 = vmatpush1.bf16.msra.mxu0 %v7749_v1  ;;  %1274 = vmatpush1.bf16.msra.mxu1 %v10039_v2  ;;  %v7826_v1 = vld [vmem:[#allocation8 + $0x130] ss:$24 sps:$4 sm:$0xff]  }
  0x76   :  { %590 = vmatprep.subr.bf16.mxu0 %v7757_v3  ;;  %1275 = vmatprep.subr.bf16.mxu1 %v10045_v6  ;;  %v10183_v3 = vld [vmem:[#allocation8 + $0x27c] ss:$24 sps:$4 sm:$0xff]  }
  0x77   :  { %13010 = vst [vmem:[#allocation18_spill] sm:$0xff] %v10183_v3 }
  0x78   :  { %495 = vmatmul.mubr.bf16.gmra.mxu0 %v10049_v8  ;;  %568 = vmatmul.mubr.bf16.gmra.mxu1 %v10049_v8 }
  0x79   :  { %591 = vmatpush1.bf16.msra.mxu0 %v7755_v7  ;;  %1276 = vmatpush1.bf16.msra.mxu1 %v10051_v9  ;;  %v7832_v7 = vld [vmem:[#allocation8 + $0x100] ss:$24 sps:$4 sm:$0xff]  }
  0x7a   :  { %592 = vmatprep.subr.bf16.mxu0 %v7763_v10  ;;  %1277 = vmatprep.subr.bf16.mxu1 %v10055_v11  ;;  %v7835_v10 = vld [vmem:[#allocation8 + $0xd4] ss:$24 sps:$4 sm:$0xff]  }
  0x7b   :  { %610 = vmatprep.mubr.bf16.mxu0 %v9928_v0  ;;  %1295 = vmatprep.mubr.bf16.mxu1 %v12850_v16 }
  0x7d   :  { %593 = vmatpush1.bf16.msra.mxu0 %v7761_v12  ;;  %1278 = vmatpush1.bf16.msra.mxu1 %v10060_v13  ;;  %v10194_v12 = vld [vmem:[#allocation8 + $0x248] ss:$24 sps:$4 sm:$0xff]  }
  0x7e   :  { %1279 = vmatprep.subr.bf16.mxu1 %v10062_v14  ;;  %1304 = vmatprep.subr.bf16.mxu0 %v10065_v15 }
  0x80   :  { %611 = vmatmul.mubr.bf16.vlgmr.msra.gmra.mxu0 %v9996_v37  ;;  %v10130_v37 = vld [vmem:[#allocation8 + $0x6c] ss:$24 sps:$4 sm:$0xff]  }
  0x81   :  { %1280 = vmatpush2.bf16.msra.mxu1 %v10069_v17  ;;  %1305 = vmatpush1.bf16.msra.mxu0 %v10071_v18 }
  0x82   :  { %1281 = vmatprep.subr.bf16.mxu1 %v10074_v19  ;;  %1306 = vmatprep.subr.bf16.mxu0 %v10078_v20 }
  0x83   :  { %620 = vmatprep.mubr.bf16.mxu0 %v9928_v0 }
  0x85   :  { %1282 = vmatpush2.bf16.msra.mxu1 %v10081_v21  ;;  %1307 = vmatpush1.bf16.msra.mxu0 %v10085_v22 }
  0x86   :  { %1283 = vmatprep.subr.bf16.mxu1 %v10087_v23  ;;  %1308 = vmatprep.subr.bf16.mxu0 %v10091_v24 }
  0x88   :  { %621 = vmatmul.mubr.bf16.gmra.mxu0 %v10013_v48  ;;  %v10152_v48 = vld [vmem:[#allocation8 + $0x184] ss:$24 sps:$4 sm:$0xff]  }
  0x89   :  { %1284 = vmatpush2.bf16.msra.mxu1 %v10094_v25  ;;  %1309 = vmatpush1.bf16.msra.mxu0 %v10096_v26 }
  0x8a   :  { %1285 = vmatprep.subr.bf16.mxu1 %v10100_v27  ;;  %1310 = vmatprep.subr.bf16.mxu0 %v10104_v28 }
  0x8b   :  { %630 = vmatprep.mubr.bf16.mxu0 %v9928_v0 }
  0x8d   :  { %1286 = vmatpush2.bf16.msra.mxu1 %v10106_v29  ;;  %1311 = vmatpush1.bf16.msra.mxu0 %v10111_v30 }
  0x8e   :  { %1287 = vmatprep.subr.bf16.mxu1 %v10113_v31  ;;  %1312 = vmatprep.subr.bf16.mxu0 %v10117_v32 }
  0x90   :  { %631 = vmatmul.mubr.bf16.gmra.mxu0 %v10031_v60  ;;  %v7823_v60 = vld [vmem:[#allocation8 + $0x134] ss:$24 sps:$4 sm:$0xff]  }
  0x91   :  { %1288 = vmatpush2.bf16.msra.mxu1 %v10120_v33  ;;  %1313 = vmatpush1.bf16.msra.mxu0 %v10122_v34 }
  0x92   :  { %1289 = vmatprep.subr.bf16.mxu1 %v10126_v35  ;;  %1314 = vmatprep.subr.bf16.mxu0 %v10130_v37 }
  0x93   :  { %640 = vmatprep.mubr.bf16.mxu0 %v9928_v0  ;;  %v10165_v0 = vld [vmem:[#allocation8 + $0x2dc] ss:$24 sps:$4 sm:$0xff]  }
  0x95   :  { %1290 = vmatpush2.bf16.msra.mxu1 %v10132_v38  ;;  %1315 = vmatpush1.bf16.msra.mxu0 %v10137_v40 }
  0x96   :  { %1291 = vmatprep.subr.bf16.mxu1 %v10139_v42  ;;  %1316 = vmatprep.subr.bf16.mxu0 %v10143_v44 }
  0x98   :  { %641 = vmatmul.mubr.bf16.gmra.mxu0 %v10049_v8  ;;  %v10190_v8 = vld [vmem:[#allocation8 + $0x24c] ss:$24 sps:$4 sm:$0xff]  }
  0x99   :  { %1292 = vmatpush2.bf16.msra.mxu1 %v10146_v45  ;;  %1317 = vmatpush1.bf16.msra.mxu0 %v10148_v46 }
  0x9a   :  { %1293 = vmatprep.subr.bf16.mxu1 %v10152_v48  ;;  %1318 = vmatprep.subr.bf16.mxu0 %v10156_v49 }
  0x9b   :  { %1336 = vmatprep.mubr.bf16.mxu0 %v12850_v16 }
  0x9d   :  { %1294 = vmatpush2.bf16.msra.mxu1 %v10158_v51  ;;  %1319 = vmatpush1.bf16.msra.mxu0 %v10160_v53 }
  0x9e   :  { %1320 = vmatprep.subr.bf16.mxu0 %v10165_v0  ;;  %1345 = vmatprep.subr.bf16.mxu1 %v10169_v55 }
  0xa0   :  { %1296 = vmatmul.mubr.bf16.vlgmr.msra.gmra.mxu1 %v12850_v16 }
  0xa1   :  { %1321 = vmatpush2.bf16.msra.mxu0 %v10172_v56  ;;  %1346 = vmatpush1.bf16.msra.mxu1 %v7820_v57  ;;  %v7838_v57 = vld [vmem:[#allocation8 + $0xd0] ss:$24 sps:$4 sm:$0xff]   ;;  %v10196_v56 = vld [vmem:[#allocation8 + $0x21c] ss:$24 sps:$4 sm:$0xff]  }
  0xa2   :  { %1322 = vmatprep.subr.bf16.mxu0 %v10176_v59  ;;  %1347 = vmatprep.subr.bf16.mxu1 %v7823_v60  ;;  %13012 = vst [vmem:[#allocation20_spill] sm:$0xff] %v10196_v56  ;;  %v7841_v60 = vld [vmem:[#allocation8 + $0xa4] ss:$24 sps:$4 sm:$0xff]  }
  0xa3   :  { %1377 = vmatprep.mubr.bf16.mxu1 %v12850_v16  ;;  %v10201_v16 = vld [vmem:[#allocation8 + $0x218] ss:$24 sps:$4 sm:$0xff]  }
  0xa4   :  { %13013 = vst [vmem:[#allocation21_spill] sm:$0xff] %v10201_v16 }
  0xa5   :  { %1323 = vmatpush2.bf16.msra.mxu0 %v10180_v62  ;;  %1348 = vmatpush1.bf16.msra.mxu1 %v7826_v1  ;;  %v7844_v1 = vld [vmem:[#allocation8 + $0xa0] ss:$24 sps:$4 sm:$0xff]  }
  0xa6   :  { %1324 = vmatprep.subr.bf16.mxu0 %v10183_v3  ;;  %1349 = vmatprep.subr.bf16.mxu1 %v7829_v4  ;;  %v10204_v4 = vld [vmem:[#allocation8 + $0x1ec] ss:$24 sps:$4 sm:$0xff]  }
  0xa7   :  { %13014 = vst [vmem:[#allocation22_spill] sm:$0xff] %v10204_v4  ;;  %v7847_v3 = vld [vmem:[#allocation8 + $0x74] ss:$24 sps:$4 sm:$0xff]  }
  0xa9   :  { %1325 = vmatpush2.bf16.msra.mxu0 %v10187_v5  ;;  %1350 = vmatpush1.bf16.msra.mxu1 %v7832_v7  ;;  %v10207_v5 = vld [vmem:[#allocation8 + $0x1e8] ss:$24 sps:$4 sm:$0xff]  }
  0xaa   :  { %1326 = vmatprep.subr.bf16.mxu0 %v10190_v8  ;;  %1351 = vmatprep.subr.bf16.mxu1 %v7835_v10  ;;  %13015 = vst [vmem:[#allocation23_spill] sm:$0xff] %v10207_v5  ;;  %v7850_v7 = vld [vmem:[#allocation8 + $0x70] ss:$24 sps:$4 sm:$0xff]   ;;  %v10210_v10 = vld [vmem:[#allocation8 + $0x1bc] ss:$24 sps:$4 sm:$0xff]  }
  0xab   :  { %13016 = vst [vmem:[#allocation24_spill] sm:$0xff] %v10210_v10 }
  0xad   :  { %1327 = vmatpush2.bf16.msra.mxu0 %v10194_v12  ;;  %1352 = vmatpush1.bf16.msra.mxu1 %v7838_v57  ;;  %v7853_v57 = vld [vmem:[#allocation8 + $0x44] ss:$24 sps:$4 sm:$0xff]  }
  0xae   :  { %1328 = vmatprep.subr.bf16.mxu0 %v10196_v56  ;;  %1353 = vmatprep.subr.bf16.mxu1 %v7841_v60  ;;  %v10213_v56 = vld [vmem:[#allocation8 + $0x1b8] ss:$24 sps:$4 sm:$0xff]  }
  0xaf   :  { %13017 = vst [vmem:[#allocation25_spill] sm:$0xff] %v10213_v56  ;;  %v7856_v60 = vld [vmem:[#allocation8 + $0x40] ss:$24 sps:$4 sm:$0xff]  }
  0xb1   :  { %1329 = vmatpush2.bf16.msra.mxu0 %v10201_v16  ;;  %1354 = vmatpush1.bf16.msra.mxu1 %v7844_v1  ;;  %v10216_v16 = vld [vmem:[#allocation8 + $0x18c] ss:$24 sps:$4 sm:$0xff]  }
  0xb2   :  { %1330 = vmatprep.subr.bf16.mxu0 %v10204_v4  ;;  %1355 = vmatprep.subr.bf16.mxu1 %v7847_v3  ;;  %v7859_v1 = vld [vmem:[#allocation8 + $0x14] ss:$24 sps:$4 sm:$0xff]   ;;  %v10219_v4 = vld [vmem:[#allocation8 + $0x188] ss:$24 sps:$4 sm:$0xff]  }
  0xb3   :  { %v7862_v3 = vld [vmem:[#allocation8 + $0x10] ss:$24 sps:$4 sm:$0xff]  }
  0xb5   :  { %1331 = vmatpush2.bf16.msra.mxu0 %v10207_v5  ;;  %1356 = vmatpush1.bf16.msra.mxu1 %v7850_v7  ;;  %v7863_v5 = vld [vmem:[#allocation8 + $0x2e4] ss:$24 sps:$4 sm:$0xff]   ;;  %v7865_v7 = vld [vmem:[#allocation8 + $0x2e0] ss:$24 sps:$4 sm:$0xff]  }
  0xb6   :  { %1332 = vmatprep.subr.bf16.mxu0 %v10210_v10  ;;  %1357 = vmatprep.subr.bf16.mxu1 %v7853_v57  ;;  %v7866_v10 = vld [vmem:[#allocation8 + $0x2b4] ss:$24 sps:$4 sm:$0xff]   ;;  %v13018_v57 = vmov 0.0|0.0  }
  0xb9   :  { %1333 = vmatpush2.bf16.msra.mxu0 %v10213_v56  ;;  %1358 = vmatpush1.bf16.msra.mxu1 %v7856_v60  ;;  %v7868_v56 = vld [vmem:[#allocation8 + $0x2b0] ss:$24 sps:$4 sm:$0xff]   ;;  %v7869_v60 = vld [vmem:[#allocation8 + $0x284] ss:$24 sps:$4 sm:$0xff]  }
  0xba   :  { %1334 = vmatprep.subr.bf16.mxu0 %v10216_v16  ;;  %1359 = vmatprep.subr.bf16.mxu1 %v7859_v1  ;;  %v7871_v1 = vld [vmem:[#allocation8 + $0x280] ss:$24 sps:$4 sm:$0xff]  }
  0xbd   :  { %1335 = vmatpush2.bf16.msra.mxu0 %v10219_v4  ;;  %1360 = vmatpush1.bf16.msra.mxu1 %v7862_v3  ;;  %v7872_v3 = vld [vmem:[#allocation8 + $0x254] ss:$24 sps:$4 sm:$0xff]  }
  0xbe   :  { %1361 = vmatprep.subr.bf16.mxu1 %v7863_v5  ;;  %1953 = vmatprep.subr.bf16.mxu0 %v9994_v36  ;;  %v7874_v5 = vld [vmem:[#allocation8 + $0x250] ss:$24 sps:$4 sm:$0xff]  }
  0xc0   :  { %1337 = vmatmul.mubr.bf16.vlgmr.msra.gmra.mxu0 %v13018_v57 }
  0xc1   :  { %1362 = vmatpush2.bf16.msra.mxu1 %v7865_v7  ;;  %1954 = vmatpush1.bf16.msra.mxu0 %v9998_v39  ;;  %v7875_v7 = vld [vmem:[#allocation8 + $0x224] ss:$24 sps:$4 sm:$0xff]   ;;  %v7877_v39 = vld [vmem:[#allocation8 + $0x220] ss:$24 sps:$4 sm:$0xff]  }
  0xc2   :  { %1363 = vmatprep.subr.bf16.mxu1 %v7866_v10  ;;  %1955 = vmatprep.subr.bf16.mxu0 %v10001_v41  ;;  %v7878_v41 = vld [vmem:[#allocation8 + $0x1f4] ss:$24 sps:$4 sm:$0xff]  }
  0xc5   :  { %1364 = vmatpush2.bf16.msra.mxu1 %v7868_v56  ;;  %1956 = vmatpush1.bf16.msra.mxu0 %v10005_v43  ;;  %v7880_v43 = vld [vmem:[#allocation8 + $0x1f0] ss:$24 sps:$4 sm:$0xff]  }
  0xc6   :  { %1365 = vmatprep.subr.bf16.mxu1 %v7869_v60  ;;  %1957 = vmatprep.subr.bf16.mxu0 %v10009_v47  ;;  %v7881_v47 = vld [vmem:[#allocation8 + $0x1c4] ss:$24 sps:$4 sm:$0xff]  }
  0xc9   :  { %1366 = vmatpush2.bf16.msra.mxu1 %v7871_v1  ;;  %1958 = vmatpush1.bf16.msra.mxu0 %v10016_v50  ;;  %v7883_v50 = vld [vmem:[#allocation8 + $0x1c0] ss:$24 sps:$4 sm:$0xff]  }
  0xca   :  { %1367 = vmatprep.subr.bf16.mxu1 %v7872_v3  ;;  %1959 = vmatprep.subr.bf16.mxu0 %v10019_v52  ;;  %v7884_v52 = vld [vmem:[#allocation8 + $0x194] ss:$24 sps:$4 sm:$0xff]   ;;  %v10362_v1 = vld [vmem:[%s12845_s4] sm:$0x3f] }
  0xcd   :  { %1368 = vmatpush2.bf16.msra.mxu1 %v7874_v5  ;;  %1960 = vmatpush1.bf16.msra.mxu0 %v10021_v54  ;;  %v7886_v54 = vld [vmem:[#allocation8 + $0x190] ss:$24 sps:$4 sm:$0xff]  }
  0xce   :  { %1369 = vmatprep.subr.bf16.mxu1 %v7875_v7  ;;  %1961 = vmatprep.subr.bf16.mxu0 %v10027_v58  ;;  %v13019_v58 = vld [vmem:[#allocation17_spill] sm:$0xff] }
  0xd1   :  { %1370 = vmatpush2.bf16.msra.mxu1 %v7877_v39  ;;  %1962 = vmatpush1.bf16.msra.mxu0 %v10033_v61  ;;  %v13020_v61 = vld [vmem:[#allocation18_spill] sm:$0xff] }
  0xd2   :  { %1371 = vmatprep.subr.bf16.mxu1 %v7878_v41  ;;  %1963 = vmatprep.subr.bf16.mxu0 %v10037_v63  ;;  %v13021_v63 = vld [vmem:[#allocation19_spill] sm:$0xff] }
  0xd5   :  { %1372 = vmatpush2.bf16.msra.mxu1 %v7880_v43  ;;  %1964 = vmatpush1.bf16.msra.mxu0 %v10039_v2  ;;  %v13022_v2 = vld [vmem:[#allocation20_spill] sm:$0xff] }
  0xd6   :  { %1373 = vmatprep.subr.bf16.mxu1 %v7881_v47  ;;  %1965 = vmatprep.subr.bf16.mxu0 %v10045_v6  ;;  %v13023_v6 = vld [vmem:[#allocation21_spill] sm:$0xff]  ;;  %v10370_v47 = vld [vmem:[#allocation9] sm:$0x3f] }
  0xd9   :  { %1374 = vmatpush2.bf16.msra.mxu1 %v7883_v50  ;;  %1966 = vmatpush1.bf16.msra.mxu0 %v10051_v9  ;;  %v13024_v9 = vld [vmem:[#allocation22_spill] sm:$0xff] }
  0xda   :  { %1375 = vmatprep.subr.bf16.mxu1 %v7884_v52  ;;  %1967 = vmatprep.subr.bf16.mxu0 %v10055_v11  ;;  %v13025_v11 = vld [vmem:[#allocation23_spill] sm:$0xff] }
  0xdd   :  { %1376 = vmatpush2.bf16.msra.mxu1 %v7886_v54  ;;  %1968 = vmatpush1.bf16.msra.mxu0 %v10060_v13  ;;  %v13026_v13 = vld [vmem:[#allocation24_spill] sm:$0xff] }
  0xde   :  { %1994 = vmatprep.subr.bf16.mxu1 %v10065_v15  ;;  %1969 = vmatprep.subr.bf16.mxu0 %v10062_v14  ;;  %v13027_v14 = vld [vmem:[#allocation25_spill] sm:$0xff] }
  0xe0   :  { %1378 = vmatmul.mubr.bf16.vlgmr.msra.gmra.mxu1 %v13018_v57 }
  0xe1   :  { %1995 = vmatpush1.bf16.msra.mxu1 %v10071_v18  ;;  %1970 = vmatpush2.bf16.msra.mxu0 %v10069_v17 }
  0xe2   :  { %1996 = vmatprep.subr.bf16.mxu1 %v10078_v20  ;;  %1971 = vmatprep.subr.bf16.mxu0 %v10074_v19 }
  0xe5   :  { %1997 = vmatpush1.bf16.msra.mxu1 %v10085_v22  ;;  %1972 = vmatpush2.bf16.msra.mxu0 %v10081_v21 }
  0xe6   :  { %1998 = vmatprep.subr.bf16.mxu1 %v10091_v24  ;;  %1973 = vmatprep.subr.bf16.mxu0 %v10087_v23 }
  0xe9   :  { %1999 = vmatpush1.bf16.msra.mxu1 %v10096_v26  ;;  %1974 = vmatpush2.bf16.msra.mxu0 %v10094_v25 }
  0xea   :  { %2000 = vmatprep.subr.bf16.mxu1 %v10104_v28  ;;  %1975 = vmatprep.subr.bf16.mxu0 %v10100_v27 }
  0xed   :  { %2001 = vmatpush1.bf16.msra.mxu1 %v10111_v30  ;;  %1976 = vmatpush2.bf16.msra.mxu0 %v10106_v29 }
  0xee   :  { %2002 = vmatprep.subr.bf16.mxu1 %v10117_v32  ;;  %1977 = vmatprep.subr.bf16.mxu0 %v10113_v31 }
  0xf1   :  { %2003 = vmatpush1.bf16.msra.mxu1 %v10122_v34  ;;  %1978 = vmatpush2.bf16.msra.mxu0 %v10120_v33 }
  0xf2   :  { %2004 = vmatprep.subr.bf16.mxu1 %v10130_v37  ;;  %1979 = vmatprep.subr.bf16.mxu0 %v10126_v35 }
  0xf5   :  { %2005 = vmatpush1.bf16.msra.mxu1 %v10137_v40  ;;  %1980 = vmatpush2.bf16.msra.mxu0 %v10132_v38 }
  0xf6   :  { %2006 = vmatprep.subr.bf16.mxu1 %v10143_v44  ;;  %1981 = vmatprep.subr.bf16.mxu0 %v10139_v42 }
  0xf9   :  { %2007 = vmatpush1.bf16.msra.mxu1 %v10148_v46  ;;  %1982 = vmatpush2.bf16.msra.mxu0 %v10146_v45 }
  0xfa   :  { %2008 = vmatprep.subr.bf16.mxu1 %v10156_v49  ;;  %1983 = vmatprep.subr.bf16.mxu0 %v10152_v48 }
  0xfd   :  { %2009 = vmatpush1.bf16.msra.mxu1 %v10160_v53  ;;  %1984 = vmatpush2.bf16.msra.mxu0 %v10158_v51 }
  0xfe   :  { %2010 = vmatprep.subr.bf16.mxu1 %v10165_v0  ;;  %2035 = vmatprep.subr.bf16.mxu0 %v10169_v55 }
 0x101   :  { %2011 = vmatpush2.bf16.msra.mxu1 %v13019_v58 }
 0x102   :  { %2012 = vmatprep.subr.bf16.mxu1 %v10176_v59 }
 0x105   :  { %2013 = vmatpush2.bf16.msra.mxu1 %v10180_v62 }
 0x106   :  { %2014 = vmatprep.subr.bf16.mxu1 %v13020_v61 }
 0x109   :  { %2015 = vmatpush2.bf16.msra.mxu1 %v13021_v63 }
 0x10a   :  { %2016 = vmatprep.subr.bf16.mxu1 %v10190_v8  ;;  %v162_v8 = vlaneseq }
 0x10c   :  { %v10355_v10 = vshrl.u32 %v162_v8, 7 }
 0x10d   :  { %2017 = vmatpush2.bf16.msra.mxu1 %v10194_v12 }
 0x10e   :  { %2018 = vmatprep.subr.bf16.mxu1 %v13022_v2  ;;  %v164_v3 = vsub.s32 0, %v10355_v10  ;;  %v168_v58 = vsub.s32 1, %v10355_v10 }
 0x110   :  { %v10366_v7 = vrot.slane %v10362_v1, %v164_v3  ;;  %v165_v54 = vrot.slane %v10370_v47, %v164_v3  ;;  %v10378_v63 = vrot.slane %v10362_v1, %v168_v58 }
 0x111   :  { %2019 = vmatpush2.bf16.msra.mxu1 %v13023_v6 }
 0x112   :  { %2020 = vmatprep.subr.bf16.mxu1 %v13024_v9  ;;  %13029 = vst [vmem:[#allocation18_spill] sm:$0xff] %v10366_v7  ;;  %13032 = vst [vmem:[#allocation21_spill] sm:$0xff] %v10378_v63 }
 0x115   :  { %2021 = vmatpush2.bf16.msra.mxu1 %v13025_v11 }
 0x116   :  { %2022 = vmatprep.subr.bf16.mxu1 %v13026_v13 }
 0x119   :  { %2023 = vmatpush2.bf16.msra.mxu1 %v13027_v14 }
 0x11a   :  { %2024 = vmatprep.subr.bf16.mxu1 %v10216_v16 }
 0x11d   :  { %2025 = vmatpush2.bf16.msra.mxu1 %v10219_v4 }
 0x11e   :  { %2668 = vmatprep.subr.bf16.mxu1 %v9994_v36 }
 0x120   :  { %v466_v15 = vpop.f32.mrf.mxu0  ;;  %v10293_v18 = vpop.f32.mrf.mxu1 }
 0x121   :  { %v10382_v6 = vadd.f32 %v466_v15, %v165_v54  ;;  %v169_v15 = vrot.slane %v10370_v47, %v168_v58 }
 0x122   :  { %v10291_v17 = vpop.f32.mrf.mxu0  ;;  %v10297_v21 = vpop.f32.mrf.mxu1 }
 0x123   :  { %13034 = vst [vmem:[#allocation23_spill] sm:$0xff] %v10382_v6 }
 0x124   :  { %v470_v19 = vpop.f32.mrf.mxu0  ;;  %v10301_v24 = vpop.f32.mrf.mxu1 }
 0x125   :  { %v10384_v11 = vadd.f32 %v470_v19, %v165_v54 }
 0x126   :  { %v10295_v20 = vpop.f32.mrf.mxu0  ;;  %v10305_v26 = vpop.f32.mrf.mxu1 }
 0x127   :  { %13035 = vst [vmem:[#allocation24_spill] sm:$0xff] %v10384_v11 }
 0x128   :  { %v476_v22 = vpop.f32.mrf.mxu0  ;;  %v10307_v27 = vpop.f32.mrf.mxu1 }
 0x129   :  { %v10386_v14 = vadd.f32 %v476_v22, %v165_v54 }
 0x12a   :  { %v10299_v23 = vpop.f32.mrf.mxu0  ;;  %v10311_v30 = vpop.f32.mrf.mxu1 }
 0x12b   :  { %13036 = vst [vmem:[#allocation25_spill] sm:$0xff] %v10386_v14 }
 0x12c   :  { %v480_v16 = vpop.f32.mrf.mxu0  ;;  %v10315_v33 = vpop.f32.mrf.mxu1 }
 0x12d   :  { %v10389_v3 = vadd.f32 %v480_v16, %v165_v54 }
 0x12e   :  { %v10303_v25 = vpop.f32.mrf.mxu0  ;;  %v10319_v37 = vpop.f32.mrf.mxu1 }
 0x12f   :  { %13037 = vst [vmem:[#allocation26_spill] sm:$0xff] %v10389_v3 }
 0x130   :  { %v486_v36 = vpop.f32.mrf.mxu0  ;;  %v10323_v40 = vpop.f32.mrf.mxu1 }
 0x131   :  { %v10398_v19 = vadd.f32 %v486_v36, %v165_v54 }
 0x132   :  { %v10309_v28 = vpop.f32.mrf.mxu0  ;;  %v10327_v44 = vpop.f32.mrf.mxu1 }
 0x133   :  { %13039 = vst [vmem:[#allocation28_spill] sm:$0xff] %v10398_v19 }
 0x134   :  { %v490_v29 = vpop.f32.mrf.mxu0  ;;  %v10331_v46 = vpop.f32.mrf.mxu1 }
 0x136   :  { %v10313_v31 = vpop.f32.mrf.mxu0  ;;  %v10335_v49 = vpop.f32.mrf.mxu1 }
 0x138   :  { %v496_v32 = vpop.f32.mrf.mxu0  ;;  %v10341_v0 = vpop.f32.mrf.mxu1 }
 0x13a   :  { %v10317_v34 = vpop.f32.mrf.mxu0  ;;  %v10345_v56 = vpop.f32.mrf.mxu1 }
 0x13c   :  { %v500_v35 = vpop.f32.mrf.mxu0  ;;  %v10349_v62 = vpop.f32.mrf.mxu1 }
 0x13e   :  { %v10321_v38 = vpop.f32.mrf.mxu0  ;;  %v10353_v4 = vpop.f32.mrf.mxu1 }
 0x140   :  { %v10325_v42 = vpop.f32.mrf.mxu0 }
 0x142   :  { %v10329_v45 = vpop.f32.mrf.mxu0 }
 0x144   :  { %v10333_v48 = vpop.f32.mrf.mxu0 }
 0x146   :  { %v10337_v51 = vpop.f32.mrf.mxu0 }
 0x148   :  { %v10339_v53 = vpop.f32.mrf.mxu0 }
 0x14a   :  { %v10343_v55 = vpop.f32.mrf.mxu0 }
 0x14c   :  { %v10347_v59 = vpop.f32.mrf.mxu0 }
 0x14e   :  { %v10351_v12 = vpop.f32.mrf.mxu0 }
 0x150   :  { %v10357_v60 = vpop.f32.mrf.mxu0 }
 0x151   :  { %13028 = vst [vmem:[#allocation17_spill] sm:$0xff] %v10357_v60 }
 0x152   :  { %v10368_v41 = vpop.f32.mrf.mxu0 }
 0x153   :  { %13030 = vst [vmem:[#allocation19_spill] sm:$0xff] %v10368_v41  ;;  %v10404_v41 = vadd.f32 %v496_v32, %v165_v54 }
 0x154   :  { %v10373_v52 = vpop.f32.mrf.mxu0 }
 0x155   :  { %13031 = vst [vmem:[#allocation20_spill] sm:$0xff] %v10373_v52  ;;  %13041 = vst [vmem:[#allocation30_spill] sm:$0xff] %v10404_v41 }
 0x156   :  { %v10380_v2 = vpop.f32.mrf.mxu0 }
 0x157   :  { %13033 = vst [vmem:[#allocation22_spill] sm:$0xff] %v10380_v2  ;;  %v10401_v2 = vadd.f32 %v490_v29, %v165_v54  ;;  %v10414_v29 = vadd.f32 %v10291_v17, %v169_v15 }
 0x158   :  { %v10395_v52 = vpop.f32.mrf.mxu0 }
 0x159   :  { %13038 = vst [vmem:[#allocation27_spill] sm:$0xff] %v10395_v52  ;;  %13040 = vst [vmem:[#allocation29_spill] sm:$0xff] %v10401_v2 }
 0x15a   :  { %v10411_v52 = vpop.f32.mrf.mxu0  ;;  %13043 = vst [vmem:[#allocation32_spill] sm:$0xff] %v10414_v29 }
 0x160   :  { %v1297_v57 = vpop.f32.mrf.mxu1 }
 0x161   :  { %v1298_v50 = vadd.f32 %v1297_v57, %v10366_v7 }
 0x162   :  { %v1299_v5 = vpop.f32.mrf.mxu1 }
 0x163   :  { %v1388_v61 = vrot.slane %v1298_v50, 1  ;;  %v1390_v9 = vrot.slane %v1298_v50, 2  ;;  %v1392_v13 = vrot.slane %v1298_v50, 3  ;;  %v1394_v8 = vrot.slane %v1298_v50, 4 }
 0x164   :  { %v1301_v39 = vpop.f32.mrf.mxu1  ;;  %v1418_v57 = vadd.f32 %v1298_v50, %v10382_v6  ;;  %v10393_v7 = vadd.f32 %v1299_v5, %v10378_v63  ;;  %v1398_v60 = vrot.slane %v1298_v50, 6  ;;  %v1400_v6 = vrot.slane %v1298_v50, 7 }
 0x165   :  { %v1396_v39 = vrot.slane %v1298_v50, 5  ;;  %v1422_v22 = vadd.f32 %v1390_v9, %v10386_v14  ;;  %v1424_v16 = vadd.f32 %v1392_v13, %v10389_v3  ;;  %v10407_v63 = vadd.f32 %v500_v35, %v165_v54 }
 0x166   :  { %v1302_v43 = vpop.f32.mrf.mxu1  ;;  %v7362_v5 = vmul.f32 -1.442695, %v1418_v57  ;;  %v1389_v36 = vrot.slane %v10393_v7, 1  ;;  %v1430_v50 = vadd.f32 %v1398_v60, %v10404_v41  ;;  %v1391_v32 = vrot.slane %v10393_v7, 2 }
 0x167   :  { %v1420_v43 = vadd.f32 %v1388_v61, %v10384_v11  ;;  %v1426_v61 = vadd.f32 %v1394_v8, %v10398_v19  ;;  %13042 = vst [vmem:[#allocation31_spill] sm:$0xff] %v10407_v63  ;;  %v1428_v11 = vadd.f32 %v1396_v39, %v10401_v2  ;;  %v7366_v9 = vmul.f32 -1.442695, %v1422_v22  ;;  %v10432_v22 = vpop.f32.mrf.mxu0 }
 0x168   :  { %v10419_v13 = vadd.f32 %v10295_v20, %v169_v15  ;;  %v10422_v35 = vadd.f32 %v10299_v23, %v169_v15  ;;  %v1432_v54 = vadd.f32 %v1400_v6, %v10407_v63  ;;  %v7368_v8 = vmul.f32 -1.442695, %v1424_v16 }
 0x169   :  { %v7364_v58 = vmul.f32 -1.442695, %v1420_v43  ;;  %v10426_v57 = vadd.f32 %v10303_v25, %v169_v15  ;;  %7903 = vpow2.f32 %v7362_v5  ;;  %v7370_v17 = vmul.f32 -1.442695, %v1426_v61 }
 0x16a   :  { %13044 = vst [vmem:[#allocation33_spill] sm:$0xff] %v10419_v13  ;;  %13045 = vst [vmem:[#allocation34_spill] sm:$0xff] %v10422_v35  ;;  %v1419_v60 = vadd.f32 %v10393_v7, %v10414_v29  ;;  %v7372_v39 = vmul.f32 -1.442695, %v1428_v11  ;;  %v1393_v43 = vrot.slane %v10393_v7, 3  ;;  %v1421_v20 = vadd.f32 %v1389_v36, %v10419_v13 }
 0x16b   :  { %13046 = vst [vmem:[#allocation35_spill] sm:$0xff] %v10426_v57  ;;  %7905 = vpow2.f32 %v7364_v58  ;;  %v7374_v23 = vmul.f32 -1.442695, %v1430_v50  ;;  %v1395_v6 = vrot.slane %v10393_v7, 4  ;;  %v1423_v25 = vadd.f32 %v1391_v32, %v10422_v35 }
 0x16c   :  { %7907 = vpow2.f32 %v7366_v9  ;;  %v10437_v16 = vadd.f32 %v10309_v28, %v169_v15  ;;  %v7376_v61 = vmul.f32 -1.442695, %v1432_v54  ;;  %v1397_v5 = vrot.slane %v10393_v7, 5  ;;  %v10448_v28 = vpop.f32.mrf.mxu0 }
 0x16d   :  { %7909 = vpow2.f32 %v7368_v8  ;;  %v10441_v11 = vadd.f32 %v10313_v31, %v169_v15  ;;  %v1399_v58 = vrot.slane %v10393_v7, 6  ;;  %v7363_v36 = vmul.f32 -1.442695, %v1419_v60 }
 0x16e   :  { %13047 = vst [vmem:[#allocation36_spill] sm:$0xff] %v10437_v16  ;;  %7911 = vpow2.f32 %v7370_v17  ;;  %v10445_v50 = vadd.f32 %v10317_v34, %v169_v15  ;;  %v1425_v9 = vadd.f32 %v1393_v43, %v10426_v57  ;;  %v7365_v32 = vmul.f32 -1.442695, %v1421_v20 }
 0x16f   :  { %13048 = vst [vmem:[#allocation37_spill] sm:$0xff] %v10441_v11  ;;  %7913 = vpow2.f32 %v7372_v39  ;;  %v1401_v54 = vrot.slane %v10393_v7, 7  ;;  %v1427_v8 = vadd.f32 %v1395_v6, %v10437_v16  ;;  %v7367_v31 = vmul.f32 -1.442695, %v1423_v25 }
 0x170   :  { %13049 = vst [vmem:[#allocation38_spill] sm:$0xff] %v10445_v50  ;;  %7915 = vpow2.f32 %v7374_v23  ;;  %v1429_v17 = vadd.f32 %v1397_v5, %v10441_v11  ;;  %v10454_v60 = vadd.f32 %v10321_v38, %v169_v15  ;;  %v1431_v34 = vadd.f32 %v1399_v58, %v10445_v50 }
 0x171   :  { %7917 = vpow2.f32 %v7376_v61  ;;  %v7369_v39 = vmul.f32 -1.442695, %v1425_v9  ;;  %v172_v20 = vsub.s32 2, %v10355_v10  ;;  %v7371_v7 = vmul.f32 -1.442695, %v1427_v8 }
 0x172   :  { %13050 = vst [vmem:[#allocation39_spill] sm:$0xff] %v10454_v60  ;;  %7919 = vpow2.f32 %v7363_v36  ;;  %v1433_v23 = vadd.f32 %v1401_v54, %v10454_v60  ;;  %v176_v6 = vsub.s32 3, %v10355_v10  ;;  %v7373_v25 = vmul.f32 -1.442695, %v1429_v17 }
 0x173   :  { %7921 = vpow2.f32 %v7365_v32  ;;  %v7375_v5 = vmul.f32 -1.442695, %v1431_v34  ;;  %v10461_v38 = vrot.slane %v10362_v1, %v172_v20  ;;  %v180_v9 = vsub.s32 4, %v10355_v10 }
 0x174   :  { %7923 = vpow2.f32 %v7367_v31  ;;  %v184_v32 = vsub.s32 5, %v10355_v10  ;;  %v7377_v54 = vmul.f32 -1.442695, %v1433_v23  ;;  %v10466_v8 = vrot.slane %v10370_v47, %v172_v20 }
 0x175   :  { %13051 = vst [vmem:[#allocation40_spill] sm:$0xff] %v10461_v38  ;;  %7925 = vpow2.f32 %v7369_v39  ;;  %v10469_v17 = vrot.slane %v10370_v47, %v176_v6  ;;  %v10475_v23 = vrot.slane %v10370_v47, %v180_v9 }
 0x176   :  { %v7904_v15 = vpop.eup %7903  ;;  %7927 = vpow2.f32 %v7371_v7  ;;  %v10478_v20 = vrot.slane %v10370_v47, %v184_v32  ;;  %v10519_v35 = vrot.slane %v10362_v1, %v184_v32 }
 0x177   :  { %7929 = vpow2.f32 %v7373_v25  ;;  %v1482_v50 = vadd.f32 1.0, %v7904_v15  ;;  %v10482_v25 = vadd.f32 %v10293_v18, %v10466_v8  ;;  %v10489_v15 = vrot.slane %v10362_v1, %v176_v6 }
 0x178   :  { %v7906_v36 = vpop.eup %7905  ;;  %7931 = vpow2.f32 %v7375_v5  ;;  %v10497_v18 = vadd.f32 %v10301_v24, %v10466_v8  ;;  %v10513_v24 = vadd.f32 %v10315_v33, %v10466_v8  ;;  %13061 = vst [vmem:[#allocation50_spill] sm:$0xff] %v10519_v35 }
 0x179   :  { %v7908_v31 = vpop.eup %7907  ;;  %v1484_v11 = vadd.f32 1.0, %v7906_v36  ;;  %7933 = vpow2.f32 %v7377_v54  ;;  %13052 = vst [vmem:[#allocation41_spill] sm:$0xff] %v10482_v25  ;;  %13054 = vst [vmem:[#allocation43_spill] sm:$0xff] %v10489_v15  ;;  %v10493_v54 = vrot.slane %v10362_v1, %v180_v9  ;;  %v10509_v9 = vadd.f32 %v10311_v30, %v10469_v17 }
 0x17a   :  { %v7910_v60 = vpop.eup %7909  ;;  %v1486_v7 = vadd.f32 1.0, %v7908_v31  ;;  %7935 = vrcp.f32 %v1482_v50  ;;  %13056 = vst [vmem:[#allocation45_spill] sm:$0xff] %v10497_v18  ;;  %v10505_v50 = vadd.f32 %v10307_v27, %v10466_v8  ;;  %13060 = vst [vmem:[#allocation49_spill] sm:$0xff] %v10513_v24  ;;  %v10523_v30 = vadd.f32 %v10319_v37, %v10469_v17 }
 0x17b   :  { %v1488_v5 = vadd.f32 1.0, %v7910_v60  ;;  %13055 = vst [vmem:[#allocation44_spill] sm:$0xff] %v10493_v54  ;;  %7937 = vrcp.f32 %v1484_v11  ;;  %13059 = vst [vmem:[#allocation48_spill] sm:$0xff] %v10509_v9  ;;  %v10538_v37 = vadd.f32 %v10331_v46, %v10466_v8 }
 0x17c   :  { %13058 = vst [vmem:[#allocation47_spill] sm:$0xff] %v10505_v50  ;;  %7939 = vrcp.f32 %v1486_v7  ;;  %13062 = vst [vmem:[#allocation51_spill] sm:$0xff] %v10523_v30 }
 0x17d   :  { %7941 = vrcp.f32 %v1488_v5  ;;  %v10530_v5 = vadd.f32 %v10323_v40, %v10466_v8  ;;  %13065 = vst [vmem:[#allocation54_spill] sm:$0xff] %v10538_v37  ;;  %v10543_v40 = vadd.f32 %v10335_v49, %v10469_v17 }
 0x17f   :  { %13063 = vst [vmem:[#allocation52_spill] sm:$0xff] %v10530_v5  ;;  %13066 = vst [vmem:[#allocation55_spill] sm:$0xff] %v10543_v40 }
 0x180   :  { %v1338_v43 = vpop.f32.mrf.mxu0 }
 0x181   :  { %v10472_v39 = vadd.f32 %v1338_v43, %v10461_v38  ;;  %v10486_v43 = vadd.f32 %v10297_v21, %v10469_v17  ;;  %v10501_v21 = vadd.f32 %v10305_v26, %v10469_v17 }
 0x182   :  { %v1340_v61 = vpop.f32.mrf.mxu0 }
 0x183   :  { %13053 = vst [vmem:[#allocation42_spill] sm:$0xff] %v10486_v43  ;;  %v1532_v47 = vrot.slane %v10472_v39, 1  ;;  %13057 = vst [vmem:[#allocation46_spill] sm:$0xff] %v10501_v21  ;;  %v1562_v11 = vadd.f32 %v10472_v39, %v10482_v25  ;;  %v10526_v33 = vadd.f32 %v1340_v61, %v10489_v15  ;;  %v1534_v61 = vrot.slane %v10472_v39, 2 }
 0x184   :  { %v1342_v58 = vpop.f32.mrf.mxu0  ;;  %v1540_v49 = vrot.slane %v10472_v39, 5 }
 0x185   :  { %v7912_v58 = vpop.eup %7911  ;;  %v1564_v27 = vadd.f32 %v1532_v47, %v10497_v18  ;;  %v1563_v46 = vadd.f32 %v10526_v33, %v10486_v43  ;;  %v1533_v43 = vrot.slane %v10526_v33, 1 }
 0x186   :  { %v1343_v34 = vpop.f32.mrf.mxu0  ;;  %v7914_v10 = vpop.eup %7913 }
 0x187   :  { %v7916_v16 = vpop.eup %7915  ;;  %v1490_v34 = vadd.f32 1.0, %v7912_v58  ;;  %v1492_v60 = vadd.f32 1.0, %v7914_v10 }
 0x188   :  { %v7918_v36 = vpop.eup %7917  ;;  %v1494_v58 = vadd.f32 1.0, %v7916_v16 }
 0x189   :  { %v7920_v31 = vpop.eup %7919  ;;  %v1496_v26 = vadd.f32 1.0, %v7918_v36  ;;  %7943 = vrcp.f32 %v1490_v34  ;;  %v10534_v36 = vadd.f32 %v10327_v44, %v10469_v17  ;;  %v7378_v34 = vmul.f32 -1.442695, %v1562_v11 }
 0x18a   :  { %v7922_v6 = vpop.eup %7921  ;;  %v1483_v10 = vadd.f32 1.0, %v7920_v31  ;;  %7945 = vrcp.f32 %v1492_v60  ;;  %v1536_v44 = vrot.slane %v10472_v39, 3  ;;  %v7380_v31 = vmul.f32 -1.442695, %v1564_v27 }
 0x18b   :  { %v7924_v57 = vpop.eup %7923  ;;  %v1485_v16 = vadd.f32 1.0, %v7922_v6  ;;  %13064 = vst [vmem:[#allocation53_spill] sm:$0xff] %v10534_v36  ;;  %7947 = vrcp.f32 %v1494_v58  ;;  %v1538_v6 = vrot.slane %v10472_v39, 4  ;;  %v10551_v58 = vadd.f32 %v10341_v0, %v10466_v8 }
 0x18c   :  { %v7926_v7 = vpop.eup %7925  ;;  %v1487_v1 = vadd.f32 1.0, %v7924_v57  ;;  %7949 = vrcp.f32 %v1496_v26  ;;  %v1542_v27 = vrot.slane %v10472_v39, 6  ;;  %v1568_v13 = vadd.f32 %v1536_v44, %v10513_v24 }
 0x18d   :  { %v7928_v32 = vpop.eup %7927  ;;  %7951 = vrcp.f32 %v1483_v10  ;;  %v1489_v57 = vadd.f32 1.0, %v7926_v7  ;;  %13067 = vst [vmem:[#allocation56_spill] sm:$0xff] %v10551_v58  ;;  %v1566_v7 = vadd.f32 %v1534_v61, %v10505_v50  ;;  %v1570_v0 = vadd.f32 %v1538_v6, %v10530_v5 }
 0x18e   :  { %v7930_v47 = vpop.eup %7929  ;;  %7953 = vrcp.f32 %v1485_v16  ;;  %v1491_v26 = vadd.f32 1.0, %v7928_v32  ;;  %v7379_v32 = vmul.f32 -1.442695, %v1563_v46  ;;  %v1572_v61 = vadd.f32 %v1540_v49, %v10538_v37 }
 0x18f   :  { %v7932_v60 = vpop.eup %7931  ;;  %7955 = vrcp.f32 %v1487_v1  ;;  %v1493_v10 = vadd.f32 1.0, %v7930_v47  ;;  %v1535_v1 = vrot.slane %v10526_v33, 2  ;;  %v7384_v46 = vmul.f32 -1.442695, %v1568_v13 }
 0x190   :  { %v7934_v11 = vpop.eup %7933  ;;  %7957 = vpow2.f32 %v7378_v34  ;;  %v1495_v16 = vadd.f32 1.0, %v7932_v60  ;;  %v1537_v34 = vrot.slane %v10526_v33, 3  ;;  %v7382_v60 = vmul.f32 -1.442695, %v1566_v7 }
 0x191   :  { %7959 = vpow2.f32 %v7380_v31  ;;  %v10558_v29 = vpop.eup %7935  ;;  %v1497_v15 = vadd.f32 1.0, %v7934_v11  ;;  %v1574_v31 = vadd.f32 %v1542_v27, %v10551_v58  ;;  %v1541_v5 = vrot.slane %v10526_v33, 5 }
 0x192   :  { %7961 = vrcp.f32 %v1489_v57  ;;  %v10562_v47 = vpop.eup %7937  ;;  %v1539_v57 = vrot.slane %v10526_v33, 4  ;;  %v7386_v49 = vmul.f32 -1.442695, %v1570_v0  ;;  %v1543_v37 = vrot.slane %v10526_v33, 6 }
 0x193   :  { %7963 = vrcp.f32 %v1491_v26  ;;  %v10566_v44 = vpop.eup %7939  ;;  %v1565_v26 = vadd.f32 %v1533_v43, %v10501_v21  ;;  %v7388_v7 = vmul.f32 -1.442695, %v1572_v61  ;;  %v1545_v58 = vrot.slane %v10526_v33, 7 }
 0x194   :  { %7965 = vrcp.f32 %v1493_v10  ;;  %v10570_v6 = vpop.eup %7941  ;;  %v1567_v10 = vadd.f32 %v1535_v1, %v10509_v9  ;;  %v1569_v13 = vadd.f32 %v1537_v34, %v10523_v30  ;;  %v10586_v43 = vadd.f32 %v10345_v56, %v10469_v17 }
 0x195   :  { %7967 = vrcp.f32 %v1495_v16  ;;  %v7390_v0 = vmul.f32 -1.442695, %v1574_v31  ;;  %v1571_v21 = vadd.f32 %v1539_v57, %v10534_v36  ;;  %v1573_v33 = vadd.f32 %v1541_v5, %v10543_v40 }
 0x196   :  { %v10574_v11 = vpop.eup %7943  ;;  %7969 = vpow2.f32 %v7379_v32  ;;  %13068 = vst [vmem:[#allocation57_spill] sm:$0xff] %v10586_v43  ;;  %v7381_v32 = vmul.f32 -1.442695, %v1565_v26  ;;  %v1544_v34 = vrot.slane %v10472_v39, 7  ;;  %v1575_v56 = vadd.f32 %v1543_v37, %v10586_v43 }
 0x197   :  { %v10578_v27 = vpop.eup %7945  ;;  %7971 = vrcp.f32 %v1497_v15  ;;  %v10593_v15 = vadd.f32 %v10353_v4, %v10469_v17  ;;  %v7383_v31 = vmul.f32 -1.442695, %v1567_v10  ;;  %v7385_v36 = vmul.f32 -1.442695, %v1569_v13 }
 0x198   :  { %v10582_v16 = vpop.eup %7947  ;;  %7973 = vpow2.f32 %v7382_v60  ;;  %v10606_v5 = vadd.f32 %v10349_v62, %v10466_v8  ;;  %v10610_v39 = vadd.f32 %v10325_v42, %v10475_v23  ;;  %v7387_v37 = vmul.f32 -1.442695, %v1571_v21 }
 0x199   :  { %v10589_v1 = vpop.eup %7949  ;;  %13069 = vst [vmem:[#allocation58_spill] sm:$0xff] %v10593_v15  ;;  %7975 = vpow2.f32 %v7384_v46  ;;  %v1577_v4 = vadd.f32 %v1545_v58, %v10593_v15  ;;  %v7389_v10 = vmul.f32 -1.442695, %v1573_v33  ;;  %v10619_v62 = vadd.f32 %v10333_v48, %v10475_v23 }
 0x19a   :  { %v10596_v61 = vpop.eup %7951  ;;  %7977 = vpow2.f32 %v7386_v49  ;;  %13070 = vst [vmem:[#allocation59_spill] sm:$0xff] %v10606_v5  ;;  %13071 = vst [vmem:[#allocation60_spill] sm:$0xff] %v10610_v39  ;;  %v10614_v49 = vadd.f32 %v10329_v45, %v10478_v20  ;;  %v10623_v42 = vadd.f32 %v10337_v51, %v10478_v20  ;;  %v7391_v21 = vmul.f32 -1.442695, %v1575_v56 }
 0x19b   :  { %v7954_v57 = vpop.eup %7953  ;;  %7979 = vpow2.f32 %v7388_v7  ;;  %13072 = vst [vmem:[#allocation61_spill] sm:$0xff] %v10619_v62  ;;  %v10627_v45 = vadd.f32 %v10339_v53, %v10475_v23  ;;  %v7393_v33 = vmul.f32 -1.442695, %v1577_v4 }
 0x19c   :  { %v7956_v17 = vpop.eup %7955  ;;  %7981 = vpow2.f32 %v7390_v0  ;;  %v1576_v0 = vadd.f32 %v1544_v34, %v10606_v5  ;;  %v10640_v34 = vadd.f32 %v10347_v59, %v10475_v23 }
 0x19d   :  { %v7958_v26 = vpop.eup %7957  ;;  %7983 = vpow2.f32 %v7381_v32  ;;  %13073 = vst [vmem:[#allocation62_spill] sm:$0xff] %v10627_v45 }
 0x19e   :  { %v7960_v7 = vpop.eup %7959  ;;  %7985 = vpow2.f32 %v7383_v31  ;;  %13075 = vst [vmem:[#allocation64_spill] sm:$0xff] %v10640_v34 }
 0x19f   :  { %v7962_v13 = vpop.eup %7961  ;;  %7987 = vpow2.f32 %v7385_v36  ;;  %v10636_v36 = vadd.f32 %v10343_v55, %v10478_v20 }
 0x1a0   :  { %v1379_v60 = vpop.f32.mrf.mxu1  ;;  %v7964_v32 = vpop.eup %7963  ;;  %7989 = vpow2.f32 %v7387_v37 }
 0x1a1   :  { %v10601_v30 = vadd.f32 %v1379_v60, %v10493_v54  ;;  %v1626_v60 = vadd.f32 1.0, %v7958_v26  ;;  %v7966_v31 = vpop.eup %7965  ;;  %7991 = vpow2.f32 %v7389_v10  ;;  %13074 = vst [vmem:[#allocation63_spill] sm:$0xff] %v10636_v36 }
 0x1a2   :  { %v1381_v46 = vpop.f32.mrf.mxu1  ;;  %v7968_v15 = vpop.eup %7967  ;;  %7993 = vpow2.f32 %v7391_v21 }
 0x1a3   :  { %v1676_v58 = vrot.slane %v10601_v30, 1  ;;  %v1678_v48 = vrot.slane %v10601_v30, 2  ;;  %v1382_v51 = vadd.f32 %v1381_v46, %v10519_v35  ;;  %v1680_v56 = vrot.slane %v10601_v30, 3  ;;  %v7970_v37 = vpop.eup %7969 }
 0x1a4   :  { %v1383_v8 = vpop.f32.mrf.mxu1  ;;  %v1706_v46 = vmul.f32 %v10558_v29, %v10601_v30  ;;  %7995 = vpow2.f32 %v7393_v33  ;;  %v7972_v10 = vpop.eup %7971  ;;  %v1627_v5 = vadd.f32 1.0, %v7970_v37 }
 0x1a5   :  { %v1628_v8 = vadd.f32 1.0, %v7960_v7  ;;  %v1708_v53 = vmul.f32 %v10562_v47, %v1676_v58  ;;  %v1677_v4 = vrot.slane %v1382_v51, 1  ;;  %v1679_v26 = vrot.slane %v1382_v51, 2  ;;  %v10645_v7 = vpop.eup %7973 }
 0x1a6   :  { %v1384_v54 = vpop.f32.mrf.mxu1  ;;  %7997 = vrcp.f32 %v1626_v60  ;;  %v1710_v47 = vmul.f32 %v10566_v44, %v1678_v48  ;;  %v1681_v58 = vrot.slane %v1382_v51, 3  ;;  %v1712_v59 = vmul.f32 %v10570_v6, %v1680_v56 }
 0x1a7   :  { %v7392_v54 = vmul.f32 -1.442695, %v1576_v0  ;;  %v1709_v55 = vmul.f32 %v7954_v57, %v1677_v4  ;;  %7999 = vrcp.f32 %v1628_v8  ;;  %v1724_v21 = vadd.f32 %v1708_v53, %v10619_v62  ;;  %v10649_v0 = vpop.eup %7975 }
 0x1a8   :  { %v1683_v35 = vrot.slane %v1382_v51, 4  ;;  %v1685_v29 = vrot.slane %v1382_v51, 5  ;;  %v1707_v33 = vmul.f32 %v10596_v61, %v1382_v51  ;;  %v10653_v43 = vpop.eup %7977  ;;  %v1722_v44 = vadd.f32 %v1706_v46, %v10610_v39 }
 0x1a9   :  { %v1725_v60 = vadd.f32 %v1709_v55, %v10623_v42  ;;  %v1711_v57 = vmul.f32 %v7956_v17, %v1679_v26  ;;  %v1687_v48 = vrot.slane %v1382_v51, 6  ;;  %8001 = vpow2.f32 %v7392_v54  ;;  %v10656_v8 = vpop.eup %7979 }
 0x1aa   :  { %v1726_v6 = vadd.f32 %v1710_v47, %v10627_v45  ;;  %v1713_v56 = vmul.f32 %v7962_v13, %v1681_v58  ;;  %v1689_v53 = vrot.slane %v1382_v51, 7  ;;  %v10659_v4 = vpop.eup %7981  ;;  %v10663_v61 = vadd.f32 %v10351_v12, %v10478_v20  ;;  %v13077_v51 = vld [vmem:[#allocation19_spill] sm:$0xff] }
 0x1ab   :  { %8003 = vtanh.f32 %v1725_v60  ;;  %v1728_v37 = vadd.f32 %v1712_v59, %v10640_v34  ;;  %v1715_v46 = vmul.f32 %v7964_v32, %v1683_v35  ;;  %v7984_v17 = vpop.eup %7983  ;;  %v1682_v54 = vrot.slane %v10601_v30, 4  ;;  %v13079_v59 = vld [vmem:[#allocation22_spill] sm:$0xff] }
 0x1ac   :  { %13076 = vst [vmem:[#allocation65_spill] sm:$0xff] %v10663_v61  ;;  %8005 = vtanh.f32 %v1724_v21  ;;  %v1723_v26 = vadd.f32 %v1707_v33, %v10614_v49  ;;  %v1717_v47 = vmul.f32 %v7966_v31, %v1685_v29  ;;  %v7986_v13 = vpop.eup %7985  ;;  %v10670_v58 = vadd.f32 %v13077_v51, %v10478_v20 }
 0x1ad   :  { %8007 = vrcp.f32 %v1627_v5  ;;  %v1727_v12 = vadd.f32 %v1711_v57, %v10636_v36  ;;  %v1719_v55 = vmul.f32 %v7968_v15, %v1687_v48  ;;  %v7988_v60 = vpop.eup %7987  ;;  %v10675_v35 = vadd.f32 %v13079_v59, %v10478_v20 }
 0x1ae   :  { %13078 = vst [vmem:[#allocation19_spill] sm:$0xff] %v10670_v58  ;;  %8009 = vtanh.f32 %v1722_v44  ;;  %v1721_v5 = vmul.f32 %v7972_v10, %v1689_v53  ;;  %v1729_v32 = vadd.f32 %v1713_v56, %v10663_v61  ;;  %v7990_v21 = vpop.eup %7989  ;;  %v10680_v31 = vadd.f32 %v10411_v52, %v10478_v20  ;;  %v13083_v52 = vld [vmem:[#allocation17_spill] sm:$0xff] }
 0x1af   :  { %13080 = vst [vmem:[#allocation22_spill] sm:$0xff] %v10675_v35  ;;  %8011 = vtanh.f32 %v1726_v6  ;;  %v1731_v29 = vadd.f32 %v1715_v46, %v10670_v58  ;;  %v7992_v33 = vpop.eup %7991  ;;  %v10685_v15 = vadd.f32 %v10448_v28, %v10478_v20  ;;  %v1714_v44 = vmul.f32 %v10574_v11, %v1682_v54 }
 0x1b0   :  { %13081 = vst [vmem:[#allocation66_spill] sm:$0xff] %v10680_v31  ;;  %8013 = vtanh.f32 %v1728_v37  ;;  %v1733_v10 = vadd.f32 %v1717_v47, %v10675_v35  ;;  %v7994_v57 = vpop.eup %7993  ;;  %v1735_v48 = vadd.f32 %v1719_v55, %v10680_v31  ;;  %v10692_v56 = vadd.f32 %v13083_v52, %v10475_v23 }
 0x1b1   :  { %13082 = vst [vmem:[#allocation67_spill] sm:$0xff] %v10685_v15  ;;  %8015 = vtanh.f32 %v1723_v26  ;;  %v7996_v6 = vpop.eup %7995  ;;  %v1737_v53 = vadd.f32 %v1721_v5, %v10685_v15  ;;  %v1629_v28 = vadd.f32 1.0, %v7984_v17  ;;  %v1684_v11 = vrot.slane %v10601_v30, 5 }
 0x1b2   :  { %8017 = vtanh.f32 %v1727_v12  ;;  %13084 = vst [vmem:[#allocation17_spill] sm:$0xff] %v10692_v56  ;;  %v1730_v46 = vadd.f32 %v1714_v44, %v10692_v56  ;;  %v1631_v54 = vadd.f32 1.0, %v7986_v13  ;;  %v1686_v47 = vrot.slane %v10601_v30, 6  ;;  %v13085_v13 = vld [vmem:[#allocation20_spill] sm:$0xff] }
 0x1b3   :  { %8019 = vtanh.f32 %v1729_v32  ;;  %v10695_v37 = vpop.eup %7997  ;;  %v1633_v51 = vadd.f32 1.0, %v7988_v60  ;;  %v1635_v17 = vadd.f32 1.0, %v7990_v21  ;;  %v1716_v59 = vmul.f32 %v10578_v27, %v1684_v11 }
 0x1b4   :  { %8021 = vtanh.f32 %v1731_v29  ;;  %v10697_v20 = vpop.eup %7999  ;;  %v1637_v5 = vadd.f32 1.0, %v7992_v33  ;;  %v10713_v29 = vadd.f32 %v13085_v13, %v10475_v23  ;;  %v1688_v60 = vrot.slane %v10601_v30, 7  ;;  %v13087_v30 = vld [vmem:[#allocation27_spill] sm:$0xff] }
 0x1b5   :  { %8023 = vtanh.f32 %v1733_v10  ;;  %v1639_v44 = vadd.f32 1.0, %v7994_v57  ;;  %v1718_v27 = vmul.f32 %v10582_v16, %v1686_v47  ;;  %v1630_v52 = vadd.f32 1.0, %v10645_v7 }
 0x1b6   :  { %8025 = vtanh.f32 %v1735_v48  ;;  %v10701_v26 = vpop.eup %8001  ;;  %13086 = vst [vmem:[#allocation20_spill] sm:$0xff] %v10713_v29  ;;  %v1641_v48 = vadd.f32 1.0, %v7996_v6  ;;  %v10728_v57 = vadd.f32 %v13087_v30, %v10475_v23  ;;  %v1732_v6 = vadd.f32 %v1716_v59, %v10713_v29 }
 0x1b7   :  { %8027 = vtanh.f32 %v1737_v53  ;;  %v1720_v16 = vmul.f32 %v10589_v1, %v1688_v60  ;;  %v1632_v13 = vadd.f32 1.0, %v10649_v0 }
 0x1b8   :  { %v10704_v12 = vpop.eup %8003  ;;  %8029 = vrcp.f32 %v1629_v28  ;;  %13088 = vst [vmem:[#allocation27_spill] sm:$0xff] %v10728_v57  ;;  %v1734_v47 = vadd.f32 %v1718_v27, %v10728_v57 }
 0x1b9   :  { %v10706_v55 = vpop.eup %8005  ;;  %8031 = vtanh.f32 %v1730_v46  ;;  %v1791_v21 = vrot.slane %v10704_v12, 7 }
 0x1ba   :  { %v10709_v32 = vpop.eup %8007  ;;  %8033 = vrcp.f32 %v1631_v54  ;;  %v1770_v53 = vrot.slane %v10706_v55, 7 }
 0x1bb   :  { %v10716_v10 = vpop.eup %8009  ;;  %8035 = vrcp.f32 %v1633_v51 }
 0x1bc   :  { %v10720_v33 = vpop.eup %8011  ;;  %8037 = vrcp.f32 %v1635_v17  ;;  %v10744_v17 = vadd.f32 %v10432_v22, %v10475_v23  ;;  %v1772_v1 = vsel %vm1771_vm0, %v1770_v53, %v10716_v10  ;;  %v1634_v23 = vadd.f32 1.0, %v10653_v43 }
 0x1bd   :  { %v10724_v28 = vpop.eup %8013  ;;  %8039 = vrcp.f32 %v1637_v5  ;;  %v1773_v46 = vrot.slane %v10720_v33, 6 }
 0x1be   :  { %v10731_v11 = vpop.eup %8015  ;;  %8041 = vrcp.f32 %v1639_v44  ;;  %13089 = vst [vmem:[#allocation68_spill] sm:$0xff] %v10744_v17  ;;  %v1776_v57 = vrot.slane %v10724_v28, 5 }
 0x1bf   :  { %v10734_v7 = vpop.eup %8017  ;;  %v1792_v54 = vsel %vm1771_vm0, %v1791_v21, %v10731_v11  ;;  %8043 = vrcp.f32 %v1641_v48  ;;  %v1736_v48 = vadd.f32 %v1720_v16, %v10744_v17  ;;  %v1638_v17 = vadd.f32 1.0, %v10659_v4 }
 0x1c0   :  { %v10740_v51 = vpop.eup %8019  ;;  %8045 = vrcp.f32 %v1630_v52  ;;  %v1793_v59 = vrot.slane %v10734_v7, 6  ;;  %v1775_v52 = vsel %vm1774_vm1, %v1773_v46, %v1772_v1  ;;  %v1640_v4 = vadd.f32 1.0, %v10701_v26 }
 0x1c1   :  { %v10749_v5 = vpop.eup %8021  ;;  %v1795_v60 = vrot.slane %v10740_v51, 5  ;;  %8047 = vtanh.f32 %v1732_v6  ;;  %v1778_v1 = vsel %vm1777_vm2, %v1776_v57, %v1775_v52 }
 0x1c2   :  { %v8024_v44 = vpop.eup %8023  ;;  %v1794_v21 = vsel %vm1774_vm1, %v1793_v59, %v1792_v54  ;;  %v1797_v22 = vrot.slane %v10749_v5, 4  ;;  %8049 = vtanh.f32 %v1734_v47  ;;  %v1636_v54 = vadd.f32 1.0, %v10656_v8 }
 0x1c3   :  { %v8026_v27 = vpop.eup %8025  ;;  %v1796_v53 = vsel %vm1777_vm2, %v1795_v60, %v1794_v21  ;;  %v1799_v30 = vrot.slane %v8024_v44, 3  ;;  %8051 = vrcp.f32 %v1632_v13 }
 0x1c4   :  { %v8028_v0 = vpop.eup %8027  ;;  %v1798_v6 = vsel %vm1780_vm3, %v1797_v22, %v1796_v53  ;;  %v1801_v29 = vrot.slane %v8026_v27, 2  ;;  %8053 = vtanh.f32 %v1736_v48 }
 0x1c5   :  { %v8030_v59 = vpop.eup %8029  ;;  %v1800_v43 = vsel %vm1783_vm4, %v1799_v30, %v1798_v6  ;;  %v1803_v16 = vrot.slane %v8028_v0, 1  ;;  %8055 = vrcp.f32 %v1634_v23 }
 0x1c6   :  { %v10764_v46 = vpop.eup %8031  ;;  %v1802_v47 = vsel %vm1786_vm5, %v1801_v29, %v1800_v43  ;;  %8057 = vrcp.f32 %v1636_v54 }
 0x1c7   :  { %v8034_v60 = vpop.eup %8033  ;;  %v1804_v21 = vsel %vm1789_vm6, %v1803_v16, %v1802_v47  ;;  %v1779_v8 = vrot.slane %v10764_v46, 4  ;;  %8059 = vrcp.f32 %v1638_v17 }
 0x1c8   :  { %v8036_v13 = vpop.eup %8035  ;;  %v1808_v22 = vsub.f32 0.0, %v1804_v21  ;;  %8061 = vrcp.f32 %v1640_v4 }
 0x1c9   :  { %v8038_v53 = vpop.eup %8037  ;;  %v1781_v30 = vsel %vm1780_vm3, %v1779_v8, %v1778_v1 }
 0x1ca   :  { %v8040_v57 = vpop.eup %8039  ;;  %v1812_v52 = vrot.slane %v1808_v22, 1  ;;  %v1814_v6 = vrot.slane %v1808_v22, 2  ;;  %v1816_v29 = vrot.slane %v1808_v22, 3  ;;  %v1818_v48 = vrot.slane %v1808_v22, 4 }
 0x1cb   :  { %v8042_v43 = vpop.eup %8041  ;;  %v1820_v56 = vrot.slane %v1808_v22, 5  ;;  %v1822_v16 = vrot.slane %v1808_v22, 6  ;;  %v1824_v23 = vrot.slane %v1808_v22, 7  ;;  %v1842_v47 = vmul.f32 %v10709_v32, %v1808_v22 }
 0x1cc   :  { %v8044_v15 = vpop.eup %8043  ;;  %v1844_v21 = vmul.f32 %v8030_v59, %v1812_v52  ;;  %v1846_v54 = vmul.f32 %v8034_v60, %v1814_v6  ;;  %v1848_v31 = vmul.f32 %v8036_v13, %v1816_v29  ;;  %v1850_v35 = vmul.f32 %v8038_v53, %v1818_v48 }
 0x1cd   :  { %v10773_v26 = vpop.eup %8045  ;;  %v1852_v17 = vmul.f32 %v8040_v57, %v1820_v56  ;;  %v1854_v1 = vmul.f32 %v8042_v43, %v1822_v16  ;;  %v1856_v8 = vmul.f32 %v8044_v15, %v1824_v23  ;;  %v10776_v58 = vadd.f32 %v10731_v11, %v1842_v47 }
 0x1ce   :  { %v10778_v61 = vpop.eup %8047  ;;  %v10781_v36 = vadd.f32 %v10704_v12, %v1844_v21  ;;  %v10784_v32 = vadd.f32 %v10734_v7, %v1846_v54  ;;  %v10787_v59 = vadd.f32 %v10740_v51, %v1848_v31  ;;  %v10790_v60 = vadd.f32 %v10749_v5, %v1850_v35 }
 0x1cf   :  { %v10792_v56 = vadd.f32 %v8024_v44, %v1852_v17  ;;  %v10794_v15 = vadd.f32 %v8026_v27, %v1854_v1  ;;  %v10796_v11 = vadd.f32 %v8028_v0, %v1856_v8  ;;  %v1874_v13 = vpack.c.bf16 %v10776_v58, %v10776_v58  ;;  %v10800_v12 = vpop.eup %8049 }
 0x1d0   :  { %v1876_v7 = vpack.c.bf16 %v10781_v36, %v10781_v36  ;;  %v1878_v31 = vpack.c.bf16 %v10784_v32, %v10784_v32  ;;  %v1880_v35 = vpack.c.bf16 %v10787_v59, %v10787_v59  ;;  %v1882_v51 = vpack.c.bf16 %v10790_v60, %v10790_v60  ;;  %v8052_v0 = vpop.eup %8051 }
 0x1d1   :  { %13090 = vst [vmem:[#allocation69_spill] sm:$0xff] %v10794_v15  ;;  %13091 = vst [vmem:[#allocation70_spill] sm:$0xff] %v10796_v11  ;;  %v1884_v5 = vpack.c.bf16 %v10792_v56, %v10792_v56  ;;  %v1886_v44 = vpack.c.bf16 %v10794_v15, %v10794_v15  ;;  %v1782_v27 = vrot.slane %v10778_v61, 3  ;;  %v1888_v22 = vpack.c.bf16 %v10796_v11, %v10796_v11  ;;  %v8054_v6 = vpop.eup %8053 }
 0x1d2   :  { %v1908_v53 = vunpack.c.l.b16 %v1876_v7  ;;  %v1910_v57 = vunpack.c.l.b16 %v1878_v31  ;;  %v1912_v52 = vunpack.c.l.b16 %v1880_v35  ;;  %v1914_v29 = vunpack.c.l.b16 %v1882_v51  ;;  %v8056_v16 = vpop.eup %8055 }
 0x1d3   :  { %v1784_v48 = vsel %vm1783_vm4, %v1782_v27, %v1781_v30  ;;  %v1785_v43 = vrot.slane %v10800_v12, 2  ;;  %v1906_v23 = vunpack.c.l.b16 %v1874_v13  ;;  %v1916_v47 = vunpack.c.l.b16 %v1884_v5  ;;  %v8058_v54 = vpop.eup %8057 }
 0x1d4   :  { %v1935_v21 = vrot.slane %v1908_v53, 7  ;;  %v1937_v4 = vrot.slane %v1910_v57, 6  ;;  %v1918_v17 = vunpack.c.l.b16 %v1886_v44  ;;  %v8060_v8 = vpop.eup %8059  ;;  %v1920_v11 = vunpack.c.l.b16 %v1888_v22 }
 0x1d5   :  { %v1787_v1 = vsel %vm1786_vm5, %v1785_v43, %v1784_v48  ;;  %v1939_v31 = vrot.slane %v1912_v52, 5  ;;  %v1788_v35 = vrot.slane %v8054_v6, 1  ;;  %v1941_v30 = vrot.slane %v1914_v29, 4 }
 0x1d6   :  { %v1936_v7 = vsel %vm1771_vm0, %v1935_v21, %v1906_v23  ;;  %v1943_v15 = vrot.slane %v1916_v47, 3  ;;  %v1945_v53 = vrot.slane %v1918_v17, 2  ;;  %v1947_v48 = vrot.slane %v1920_v11, 1 }
 0x1d7   :  { %v1938_v51 = vsel %vm1774_vm1, %v1937_v4, %v1936_v7  ;;  %v1790_v13 = vsel %vm1789_vm6, %v1788_v35, %v1787_v1  ;;  %v8062_v35 = vpop.eup %8061 }
 0x1d8   :  { %v1940_v27 = vsel %vm1777_vm2, %v1939_v31, %v1938_v51  ;;  %v1807_v44 = vsub.f32 0.0, %v1790_v13 }
 0x1d9   :  { %v1942_v5 = vsel %vm1780_vm3, %v1941_v30, %v1940_v27 }
 0x1da   :  { %v1944_v57 = vsel %vm1783_vm4, %v1943_v15, %v1942_v5  ;;  %v1811_v43 = vrot.slane %v1807_v44, 1  ;;  %v1813_v52 = vrot.slane %v1807_v44, 2  ;;  %v1815_v23 = vrot.slane %v1807_v44, 3 }
 0x1db   :  { %v1946_v22 = vsel %vm1786_vm5, %v1945_v53, %v1944_v57  ;;  %v1817_v29 = vrot.slane %v1807_v44, 4  ;;  %v1819_v4 = vrot.slane %v1807_v44, 5  ;;  %v1821_v7 = vrot.slane %v1807_v44, 6 }
 0x1dc   :  { %v1948_v21 = vsel %vm1789_vm6, %v1947_v48, %v1946_v22  ;;  %v1823_v31 = vrot.slane %v1807_v44, 7  ;;  %v1841_v1 = vmul.f32 %v10695_v37, %v1807_v44  ;;  %v1843_v17 = vmul.f32 %v10697_v20, %v1811_v43 }
 0x1dd   :  { %v1950_v47 = vpack.c.b16 %v1948_v21, %v1948_v21  ;;  %v1845_v15 = vmul.f32 %v10773_v26, %v1813_v52  ;;  %v1847_v11 = vmul.f32 %v8052_v0, %v1815_v23  ;;  %v1849_v51 = vmul.f32 %v8056_v16, %v1817_v29 }
 0x1de   :  { %v1851_v30 = vmul.f32 %v8058_v54, %v1819_v4  ;;  %v1853_v27 = vmul.f32 %v8060_v8, %v1821_v7  ;;  %v1855_v13 = vmul.f32 %v8062_v35, %v1823_v31  ;;  %v10832_v5 = vadd.f32 %v10716_v10, %v1841_v1 }
 0x1df   :  { %1985 = vmatprep.mubr.bf16.mxu0 %v1950_v47  ;;  %2026 = vmatprep.mubr.bf16.mxu1 %v1950_v47  ;;  %v10835_v53 = vadd.f32 %v10706_v55, %v1843_v17  ;;  %v10838_v37 = vadd.f32 %v10720_v33, %v1845_v15  ;;  %v10841_v20 = vadd.f32 %v10724_v28, %v1847_v11 }
 0x1e0   :  { %v10844_v26 = vadd.f32 %v10764_v46, %v1849_v51  ;;  %v10847_v0 = vadd.f32 %v10778_v61, %v1851_v30  ;;  %v10850_v16 = vadd.f32 %v10800_v12, %v1853_v27  ;;  %v10852_v10 = vadd.f32 %v8054_v6, %v1855_v13 }
 0x1e1   :  { %v1873_v55 = vpack.c.bf16 %v10832_v5, %v10832_v5  ;;  %v1875_v33 = vpack.c.bf16 %v10835_v53, %v10835_v53  ;;  %v1877_v28 = vpack.c.bf16 %v10838_v37, %v10838_v37  ;;  %v1879_v46 = vpack.c.bf16 %v10841_v20, %v10841_v20 }
 0x1e2   :  { %v1881_v61 = vpack.c.bf16 %v10844_v26, %v10844_v26  ;;  %v1883_v12 = vpack.c.bf16 %v10847_v0, %v10847_v0  ;;  %v1885_v6 = vpack.c.bf16 %v10850_v16, %v10850_v16  ;;  %v1887_v54 = vpack.c.bf16 %v10852_v10, %v10852_v10 }
 0x1e3   :  { %v1907_v8 = vunpack.c.l.b16 %v1875_v33  ;;  %v1909_v44 = vunpack.c.l.b16 %v1877_v28  ;;  %v1911_v57 = vunpack.c.l.b16 %v1879_v46  ;;  %v1905_v22 = vunpack.c.l.b16 %v1873_v55  ;;  %v9183_v33 = vld [vmem:[#allocation8 + $0x160] ss:$24 sps:$4 sm:$0xff]   ;;  %v9184_v28 = vld [vmem:[#allocation8 + $0x134] ss:$24 sps:$4 sm:$0xff]   ;;  %v9185_v46 = vld [vmem:[#allocation8 + $0x150] ss:$24 sps:$4 sm:$0xff]  }
 0x1e4   :  { %v1913_v48 = vunpack.c.l.b16 %v1881_v61  ;;  %v1915_v43 = vunpack.c.l.b16 %v1883_v12  ;;  %v1917_v21 = vunpack.c.l.b16 %v1885_v6  ;;  %v1919_v29 = vunpack.c.l.b16 %v1887_v54  ;;  %v9186_v61 = vld [vmem:[#allocation8 + $0x124] ss:$24 sps:$4 sm:$0xff]   ;;  %v9187_v12 = vld [vmem:[#allocation8 + $0x130] ss:$24 sps:$4 sm:$0xff]   ;;  %v9189_v54 = vld [vmem:[#allocation8 + $0x120] ss:$24 sps:$4 sm:$0xff]  }
 0x1e5   :  { %v1921_v52 = vrot.slane %v1907_v8, 7  ;;  %v1923_v23 = vrot.slane %v1909_v44, 6  ;;  %v1925_v7 = vrot.slane %v1911_v57, 5  ;;  %v9188_v6 = vld [vmem:[#allocation8 + $0x104] ss:$24 sps:$4 sm:$0xff]  }
 0x1e6   :  { %v1927_v1 = vrot.slane %v1913_v48, 4  ;;  %v1929_v35 = vrot.slane %v1915_v43, 3  ;;  %v1931_v11 = vrot.slane %v1917_v21, 2  ;;  %v1933_v30 = vrot.slane %v1919_v29, 1  ;;  %v9190_v8 = vld [vmem:[#allocation8 + $0xf4] ss:$24 sps:$4 sm:$0xff]  }
 0x1e7   :  { %v1922_v4 = vsel %vm1771_vm0, %v1921_v52, %v1905_v22  ;;  %v9191_v44 = vld [vmem:[#allocation8 + $0x100] ss:$24 sps:$4 sm:$0xff]   ;;  %v9192_v57 = vld [vmem:[#allocation8 + $0xd4] ss:$24 sps:$4 sm:$0xff]   ;;  %v9193_v48 = vld [vmem:[#allocation8 + $0xf0] ss:$24 sps:$4 sm:$0xff]  }
 0x1e8   :  { %v1924_v31 = vsel %vm1774_vm1, %v1923_v23, %v1922_v4  ;;  %v9195_v22 = vld [vmem:[#allocation8 + $0xd0] ss:$24 sps:$4 sm:$0xff]   ;;  %v9196_v43 = vld [vmem:[#allocation8 + $0xa4] ss:$24 sps:$4 sm:$0xff]   ;;  %v9197_v52 = vld [vmem:[#allocation8 + $0xc0] ss:$24 sps:$4 sm:$0xff]  }
 0x1e9   :  { %v1926_v17 = vsel %vm1777_vm2, %v1925_v7, %v1924_v31  ;;  %v9198_v23 = vld [vmem:[#allocation8 + $0x94] ss:$24 sps:$4 sm:$0xff]   ;;  %v9199_v21 = vld [vmem:[#allocation8 + $0xa0] ss:$24 sps:$4 sm:$0xff]   ;;  %v9201_v4 = vld [vmem:[#allocation8 + $0x90] ss:$24 sps:$4 sm:$0xff]  }
 0x1ea   :  { %v1928_v15 = vsel %vm1780_vm3, %v1927_v1, %v1926_v17  ;;  %v9200_v29 = vld [vmem:[#allocation8 + $0x74] ss:$24 sps:$4 sm:$0xff]   ;;  %v9202_v7 = vld [vmem:[#allocation8 + $0x64] ss:$24 sps:$4 sm:$0xff]   ;;  %v9203_v31 = vld [vmem:[#allocation8 + $0x70] ss:$24 sps:$4 sm:$0xff]  }
 0x1eb   :  { %v1930_v51 = vsel %vm1783_vm4, %v1929_v35, %v1928_v15  ;;  %v9204_v1 = vld [vmem:[#allocation8 + $0x44] ss:$24 sps:$4 sm:$0xff]   ;;  %v9205_v17 = vld [vmem:[#allocation8 + $0x60] ss:$24 sps:$4 sm:$0xff]   ;;  %v9206_v35 = vld [vmem:[#allocation8 + $0x34] ss:$24 sps:$4 sm:$0xff]  }
 0x1ec   :  { %v1932_v27 = vsel %vm1786_vm5, %v1931_v11, %v1930_v51  ;;  %v9207_v15 = vld [vmem:[#allocation8 + $0x40] ss:$24 sps:$4 sm:$0xff]   ;;  %v9208_v11 = vld [vmem:[#allocation8 + $0x14] ss:$24 sps:$4 sm:$0xff]   ;;  %v9209_v51 = vld [vmem:[#allocation8 + $0x30] ss:$24 sps:$4 sm:$0xff]  }
 0x1ed   :  { %v1934_v13 = vsel %vm1789_vm6, %v1933_v30, %v1932_v27  ;;  %v9210_v30 = vld [vmem:[#allocation8 + $0x4] ss:$24 sps:$4 sm:$0xff]   ;;  %v9211_v27 = vld [vmem:[#allocation8 + $0x10] ss:$24 sps:$4 sm:$0xff]  }
 0x1ee   :  { %v10877_v55 = vpack.c.b16 %v1934_v13, %v1934_v13  ;;  %v9212_v13 = vld [vmem:[#allocation8 + $0x2e4] ss:$24 sps:$4 sm:$0xff]  }
 0x1f0   :  { %1986 = vmatmul.mubr.bf16.vlgmr.msra.gmra.mxu0 %v10877_v55  ;;  %2027 = vmatmul.mubr.bf16.vlgmr.msra.gmra.mxu1 %v10877_v55 }
 0x1f1   :  { %2036 = vmatpush1.bf16.msra.mxu0 %v9183_v33  ;;  %2067 = vmatprep.mubr.bf16.mxu0 %v1950_v47  ;;  %v9194_v47 = vld [vmem:[#allocation8 + $0xc4] ss:$24 sps:$4 sm:$0xff]   ;;  %v9213_v33 = vld [vmem:[#allocation8] ss:$24 sps:$4 sm:$0xff]  }
 0x1f2   :  { %2037 = vmatprep.subr.bf16.mxu0 %v9184_v28  ;;  %2669 = vmatpush1.bf16.msra.mxu1 %v9185_v46  ;;  %v9214_v28 = vld [vmem:[#allocation8 + $0x2d4] ss:$24 sps:$4 sm:$0xff]   ;;  %v9215_v46 = vld [vmem:[#allocation8 + $0x2e0] ss:$24 sps:$4 sm:$0xff]  }
 0x1f3   :  { %2670 = vmatprep.subr.bf16.mxu1 %v9186_v61  ;;  %v9216_v61 = vld [vmem:[#allocation8 + $0x2b4] ss:$24 sps:$4 sm:$0xff]  }
 0x1f5   :  { %2038 = vmatpush1.bf16.msra.mxu0 %v9187_v12  ;;  %v9217_v12 = vld [vmem:[#allocation8 + $0x2d0] ss:$24 sps:$4 sm:$0xff]  }
 0x1f6   :  { %2039 = vmatprep.subr.bf16.mxu0 %v9188_v6  ;;  %2671 = vmatpush1.bf16.msra.mxu1 %v9189_v54  ;;  %v9218_v6 = vld [vmem:[#allocation8 + $0x2a4] ss:$24 sps:$4 sm:$0xff]   ;;  %v9219_v54 = vld [vmem:[#allocation8 + $0x2b0] ss:$24 sps:$4 sm:$0xff]  }
 0x1f7   :  { %2672 = vmatprep.subr.bf16.mxu1 %v9190_v8  ;;  %v9220_v8 = vld [vmem:[#allocation8 + $0x284] ss:$24 sps:$4 sm:$0xff]  }
 0x1f9   :  { %2040 = vmatpush1.bf16.msra.mxu0 %v9191_v44  ;;  %v9221_v44 = vld [vmem:[#allocation8 + $0x2a0] ss:$24 sps:$4 sm:$0xff]  }
 0x1fa   :  { %2041 = vmatprep.subr.bf16.mxu0 %v9192_v57  ;;  %2673 = vmatpush1.bf16.msra.mxu1 %v9193_v48  ;;  %v9222_v57 = vld [vmem:[#allocation8 + $0x274] ss:$24 sps:$4 sm:$0xff]   ;;  %v9223_v48 = vld [vmem:[#allocation8 + $0x280] ss:$24 sps:$4 sm:$0xff]  }
 0x1fb   :  { %2674 = vmatprep.subr.bf16.mxu1 %v9194_v47  ;;  %v9224_v47 = vld [vmem:[#allocation8 + $0x254] ss:$24 sps:$4 sm:$0xff]  }
 0x1fd   :  { %2042 = vmatpush1.bf16.msra.mxu0 %v9195_v22  ;;  %v9225_v22 = vld [vmem:[#allocation8 + $0x270] ss:$24 sps:$4 sm:$0xff]  }
 0x1fe   :  { %2043 = vmatprep.subr.bf16.mxu0 %v9196_v43  ;;  %2675 = vmatpush1.bf16.msra.mxu1 %v9197_v52  ;;  %v9226_v43 = vld [vmem:[#allocation8 + $0x244] ss:$24 sps:$4 sm:$0xff]   ;;  %v9227_v52 = vld [vmem:[#allocation8 + $0x250] ss:$24 sps:$4 sm:$0xff]  }
 0x1ff   :  { %2676 = vmatprep.subr.bf16.mxu1 %v9198_v23  ;;  %v9228_v23 = vld [vmem:[#allocation8 + $0x224] ss:$24 sps:$4 sm:$0xff]  }
 0x201   :  { %2044 = vmatpush1.bf16.msra.mxu0 %v9199_v21  ;;  %v9229_v21 = vld [vmem:[#allocation8 + $0x240] ss:$24 sps:$4 sm:$0xff]  }
 0x202   :  { %2045 = vmatprep.subr.bf16.mxu0 %v9200_v29  ;;  %2677 = vmatpush1.bf16.msra.mxu1 %v9201_v4  ;;  %v9230_v29 = vld [vmem:[#allocation8 + $0x214] ss:$24 sps:$4 sm:$0xff]   ;;  %v9231_v4 = vld [vmem:[#allocation8 + $0x220] ss:$24 sps:$4 sm:$0xff]  }
 0x203   :  { %2678 = vmatprep.subr.bf16.mxu1 %v9202_v7  ;;  %v9232_v7 = vld [vmem:[#allocation8 + $0x1f4] ss:$24 sps:$4 sm:$0xff]  }
 0x205   :  { %2046 = vmatpush1.bf16.msra.mxu0 %v9203_v31  ;;  %v9233_v31 = vld [vmem:[#allocation8 + $0x210] ss:$24 sps:$4 sm:$0xff]  }
 0x206   :  { %2047 = vmatprep.subr.bf16.mxu0 %v9204_v1  ;;  %2679 = vmatpush1.bf16.msra.mxu1 %v9205_v17  ;;  %v9234_v1 = vld [vmem:[#allocation8 + $0x1e4] ss:$24 sps:$4 sm:$0xff]   ;;  %v9235_v17 = vld [vmem:[#allocation8 + $0x1f0] ss:$24 sps:$4 sm:$0xff]  }
 0x207   :  { %2680 = vmatprep.subr.bf16.mxu1 %v9206_v35  ;;  %v9236_v35 = vld [vmem:[#allocation8 + $0x1c4] ss:$24 sps:$4 sm:$0xff]  }
 0x209   :  { %2048 = vmatpush1.bf16.msra.mxu0 %v9207_v15  ;;  %v9237_v15 = vld [vmem:[#allocation8 + $0x1e0] ss:$24 sps:$4 sm:$0xff]  }
 0x20a   :  { %2049 = vmatprep.subr.bf16.mxu0 %v9208_v11  ;;  %2681 = vmatpush1.bf16.msra.mxu1 %v9209_v51  ;;  %v9238_v11 = vld [vmem:[#allocation8 + $0x1b4] ss:$24 sps:$4 sm:$0xff]   ;;  %v9239_v51 = vld [vmem:[#allocation8 + $0x1c0] ss:$24 sps:$4 sm:$0xff]  }
 0x20b   :  { %2682 = vmatprep.subr.bf16.mxu1 %v9210_v30  ;;  %v9240_v30 = vld [vmem:[#allocation8 + $0x194] ss:$24 sps:$4 sm:$0xff]  }
 0x20d   :  { %2050 = vmatpush1.bf16.msra.mxu0 %v9211_v27  ;;  %v9241_v27 = vld [vmem:[#allocation8 + $0x1b0] ss:$24 sps:$4 sm:$0xff]  }
 0x20e   :  { %2051 = vmatprep.subr.bf16.mxu0 %v9212_v13  ;;  %2683 = vmatpush1.bf16.msra.mxu1 %v9213_v33  ;;  %v9242_v13 = vld [vmem:[#allocation8 + $0x184] ss:$24 sps:$4 sm:$0xff]   ;;  %v9243_v33 = vld [vmem:[#allocation8 + $0x190] ss:$24 sps:$4 sm:$0xff]  }
 0x20f   :  { %2684 = vmatprep.subr.bf16.mxu1 %v9214_v28  ;;  %v9244_v28 = vld [vmem:[#allocation8 + $0x15c] ss:$24 sps:$4 sm:$0xff]  }
 0x211   :  { %2052 = vmatpush2.bf16.msra.mxu0 %v9215_v46  ;;  %v9245_v46 = vld [vmem:[#allocation8 + $0x180] ss:$24 sps:$4 sm:$0xff]  }
 0x212   :  { %2053 = vmatprep.subr.bf16.mxu0 %v9216_v61  ;;  %2685 = vmatpush2.bf16.msra.mxu1 %v9217_v12  ;;  %v9246_v61 = vld [vmem:[#allocation8 + $0x164] ss:$24 sps:$4 sm:$0xff]   ;;  %v9247_v12 = vld [vmem:[#allocation8 + $0x158] ss:$24 sps:$4 sm:$0xff]  }
 0x213   :  { %2686 = vmatprep.subr.bf16.mxu1 %v9218_v6  ;;  %v9248_v6 = vld [vmem:[#allocation8 + $0x12c] ss:$24 sps:$4 sm:$0xff]  }
 0x215   :  { %2054 = vmatpush2.bf16.msra.mxu0 %v9219_v54  ;;  %v9249_v54 = vld [vmem:[#allocation8 + $0x128] ss:$24 sps:$4 sm:$0xff]  }
 0x216   :  { %2055 = vmatprep.subr.bf16.mxu0 %v9220_v8  ;;  %2687 = vmatpush2.bf16.msra.mxu1 %v9221_v44  ;;  %v9250_v8 = vld [vmem:[#allocation8 + $0xfc] ss:$24 sps:$4 sm:$0xff]   ;;  %v9251_v44 = vld [vmem:[#allocation8 + $0xf8] ss:$24 sps:$4 sm:$0xff]  }
 0x217   :  { %2688 = vmatprep.subr.bf16.mxu1 %v9222_v57  ;;  %v9252_v57 = vld [vmem:[#allocation8 + $0xcc] ss:$24 sps:$4 sm:$0xff]  }
 0x219   :  { %2056 = vmatpush2.bf16.msra.mxu0 %v9223_v48  ;;  %v9253_v48 = vld [vmem:[#allocation8 + $0xc8] ss:$24 sps:$4 sm:$0xff]  }
 0x21a   :  { %2057 = vmatprep.subr.bf16.mxu0 %v9224_v47  ;;  %2689 = vmatpush2.bf16.msra.mxu1 %v9225_v22  ;;  %v9254_v47 = vld [vmem:[#allocation8 + $0x9c] ss:$24 sps:$4 sm:$0xff]   ;;  %v9255_v22 = vld [vmem:[#allocation8 + $0x98] ss:$24 sps:$4 sm:$0xff]  }
 0x21b   :  { %2690 = vmatprep.subr.bf16.mxu1 %v9226_v43  ;;  %v9256_v43 = vld [vmem:[#allocation8 + $0x6c] ss:$24 sps:$4 sm:$0xff]  }
 0x21d   :  { %2058 = vmatpush2.bf16.msra.mxu0 %v9227_v52  ;;  %v9258_v52 = vld [vmem:[#allocation8 + $0x3c] ss:$24 sps:$4 sm:$0xff]  }
 0x21e   :  { %2059 = vmatprep.subr.bf16.mxu0 %v9228_v23  ;;  %2691 = vmatpush2.bf16.msra.mxu1 %v9229_v21  ;;  %v9259_v23 = vld [vmem:[#allocation8 + $0x38] ss:$24 sps:$4 sm:$0xff]   ;;  %v9260_v21 = vld [vmem:[#allocation8 + $0xc] ss:$24 sps:$4 sm:$0xff]  }
 0x21f   :  { %2692 = vmatprep.subr.bf16.mxu1 %v9230_v29  ;;  %v9261_v29 = vld [vmem:[#allocation8 + $0x8] ss:$24 sps:$4 sm:$0xff]  }
 0x221   :  { %2060 = vmatpush2.bf16.msra.mxu0 %v9231_v4  ;;  %v9262_v4 = vld [vmem:[#allocation8 + $0x2dc] ss:$24 sps:$4 sm:$0xff]  }
 0x222   :  { %2061 = vmatprep.subr.bf16.mxu0 %v9232_v7  ;;  %2693 = vmatpush2.bf16.msra.mxu1 %v9233_v31  ;;  %v9263_v7 = vld [vmem:[#allocation8 + $0x2d8] ss:$24 sps:$4 sm:$0xff]   ;;  %v9264_v31 = vld [vmem:[#allocation8 + $0x2ac] ss:$24 sps:$4 sm:$0xff]  }
 0x223   :  { %2694 = vmatprep.subr.bf16.mxu1 %v9234_v1  ;;  %v9265_v1 = vld [vmem:[#allocation8 + $0x2a8] ss:$24 sps:$4 sm:$0xff]  }
 0x225   :  { %2062 = vmatpush2.bf16.msra.mxu0 %v9235_v17  ;;  %v9266_v17 = vld [vmem:[#allocation8 + $0x27c] ss:$24 sps:$4 sm:$0xff]  }
 0x226   :  { %2063 = vmatprep.subr.bf16.mxu0 %v9236_v35  ;;  %2695 = vmatpush2.bf16.msra.mxu1 %v9237_v15  ;;  %v9267_v35 = vld [vmem:[#allocation8 + $0x278] ss:$24 sps:$4 sm:$0xff]   ;;  %v9268_v15 = vld [vmem:[#allocation8 + $0x24c] ss:$24 sps:$4 sm:$0xff]  }
 0x227   :  { %2696 = vmatprep.subr.bf16.mxu1 %v9238_v11  ;;  %v9269_v11 = vld [vmem:[#allocation8 + $0x248] ss:$24 sps:$4 sm:$0xff]  }
 0x229   :  { %2064 = vmatpush2.bf16.msra.mxu0 %v9239_v51  ;;  %v9270_v51 = vld [vmem:[#allocation8 + $0x21c] ss:$24 sps:$4 sm:$0xff]  }
 0x22a   :  { %2065 = vmatprep.subr.bf16.mxu0 %v9240_v30  ;;  %2697 = vmatpush2.bf16.msra.mxu1 %v9241_v27  ;;  %v9271_v30 = vld [vmem:[#allocation8 + $0x218] ss:$24 sps:$4 sm:$0xff]   ;;  %v9272_v27 = vld [vmem:[#allocation8 + $0x1ec] ss:$24 sps:$4 sm:$0xff]  }
 0x22b   :  { %2698 = vmatprep.subr.bf16.mxu1 %v9242_v13  ;;  %v9273_v13 = vld [vmem:[#allocation8 + $0x1e8] ss:$24 sps:$4 sm:$0xff]  }
 0x22d   :  { %2066 = vmatpush2.bf16.msra.mxu0 %v9243_v33  ;;  %v9274_v33 = vld [vmem:[#allocation8 + $0x1bc] ss:$24 sps:$4 sm:$0xff]  }
 0x22e   :  { %2709 = vmatprep.subr.bf16.mxu0 %v9244_v28  ;;  %2699 = vmatpush2.bf16.msra.mxu1 %v9245_v46  ;;  %v9275_v28 = vld [vmem:[#allocation8 + $0x1b8] ss:$24 sps:$4 sm:$0xff]   ;;  %v9276_v46 = vld [vmem:[#allocation8 + $0x18c] ss:$24 sps:$4 sm:$0xff]  }
 0x22f   :  { %2750 = vmatprep.subr.bf16.mxu1 %v9246_v61  ;;  %v9277_v61 = vld [vmem:[#allocation8 + $0x188] ss:$24 sps:$4 sm:$0xff]  }
 0x230   :  { %2068 = vmatmul.mubr.bf16.vlgmr.msra.gmra.mxu0 %v10877_v55  ;;  %v9257_v55 = vld [vmem:[#allocation8 + $0x68] ss:$24 sps:$4 sm:$0xff]  }
 0x231   :  { %2710 = vmatpush1.bf16.msra.mxu0 %v9247_v12  ;;  %v9278_v12 = vld [vmem:[#allocation8 + $0x154] ss:$24 sps:$4 sm:$0xff]  }
 0x232   :  { %2711 = vmatprep.subr.bf16.mxu0 %v9248_v6 }
 0x235   :  { %2712 = vmatpush1.bf16.msra.mxu0 %v9249_v54 }
 0x236   :  { %2713 = vmatprep.subr.bf16.mxu0 %v9250_v8  ;;  %v13092_v8 = vld [vmem:[#allocation18_spill] sm:$0xff] }
 0x239   :  { %2714 = vmatpush1.bf16.msra.mxu0 %v9251_v44 }
 0x23a   :  { %2715 = vmatprep.subr.bf16.mxu0 %v9252_v57 }
 0x23d   :  { %2716 = vmatpush1.bf16.msra.mxu0 %v9253_v48 }
 0x23e   :  { %2717 = vmatprep.subr.bf16.mxu0 %v9254_v47 }
 0x241   :  { %2718 = vmatpush1.bf16.msra.mxu0 %v9255_v22 }
 0x242   :  { %2719 = vmatprep.subr.bf16.mxu0 %v9256_v43 }
 0x245   :  { %2720 = vmatpush1.bf16.msra.mxu0 %v9257_v55 }
 0x246   :  { %2721 = vmatprep.subr.bf16.mxu0 %v9258_v52 }
 0x249   :  { %2722 = vmatpush1.bf16.msra.mxu0 %v9259_v23 }
 0x24a   :  { %2723 = vmatprep.subr.bf16.mxu0 %v9260_v21 }
 0x24d   :  { %2724 = vmatpush1.bf16.msra.mxu0 %v9261_v29 }
 0x24e   :  { %2725 = vmatprep.subr.bf16.mxu0 %v9262_v4  ;;  %v13093_v4 = vld [vmem:[#allocation24_spill] sm:$0xff] }
 0x251   :  { %2726 = vmatpush2.bf16.msra.mxu0 %v9263_v7 }
 0x252   :  { %2727 = vmatprep.subr.bf16.mxu0 %v9264_v31 }
 0x255   :  { %2728 = vmatpush2.bf16.msra.mxu0 %v9265_v1 }
 0x256   :  { %2729 = vmatprep.subr.bf16.mxu0 %v9266_v17  ;;  %v13094_v17 = vld [vmem:[#allocation23_spill] sm:$0xff] }
 0x259   :  { %2730 = vmatpush2.bf16.msra.mxu0 %v9267_v35 }
 0x25a   :  { %2731 = vmatprep.subr.bf16.mxu0 %v9268_v15 }
 0x25d   :  { %2732 = vmatpush2.bf16.msra.mxu0 %v9269_v11 }
 0x25e   :  { %2733 = vmatprep.subr.bf16.mxu0 %v9270_v51 }
 0x261   :  { %2734 = vmatpush2.bf16.msra.mxu0 %v9271_v30 }
 0x262   :  { %2735 = vmatprep.subr.bf16.mxu0 %v9272_v27 }
 0x265   :  { %2736 = vmatpush2.bf16.msra.mxu0 %v9273_v13 }
 0x266   :  { %2737 = vmatprep.subr.bf16.mxu0 %v9274_v33 }
 0x269   :  { %2738 = vmatpush2.bf16.msra.mxu0 %v9275_v28 }
 0x26a   :  { %2739 = vmatprep.subr.bf16.mxu0 %v9276_v46 }
 0x26d   :  { %2740 = vmatpush2.bf16.msra.mxu0 %v9277_v61 }
 0x26e   :  { %3383 = vmatprep.subr.bf16.mxu0 %v9278_v12 }
 0x2b0   :  { %v1987_v6 = vpop.f32.mrf.mxu0  ;;  %v2028_v54 = vpop.f32.mrf.mxu1 }
 0x2b1   :  { %v1988_v44 = vadd.f32 %v1987_v6, %v13092_v8  ;;  %v10884_v57 = vadd.f32 %v2028_v54, %v10461_v38 }
 0x2b2   :  { %v1989_v48 = vpop.f32.mrf.mxu0  ;;  %v10886_v47 = vpop.f32.mrf.mxu1 }
 0x2b3   :  { %v2078_v22 = vrot.slane %v1988_v44, 7  ;;  %v2080_v43 = vrot.slane %v1988_v44, 1  ;;  %v2082_v55 = vrot.slane %v1988_v44, 2  ;;  %v2084_v52 = vrot.slane %v1988_v44, 3 }
 0x2b4   :  { %v2086_v23 = vrot.slane %v1988_v44, 4  ;;  %v2088_v21 = vrot.slane %v1988_v44, 5  ;;  %v2090_v29 = vrot.slane %v1988_v44, 6  ;;  %v2110_v7 = vadd.f32 %v1988_v44, %v13093_v4  ;;  %v1991_v31 = vpop.f32.mrf.mxu0  ;;  %v2032_v1 = vpop.f32.mrf.mxu1 }
 0x2b5   :  { %v2108_v35 = vadd.f32 %v2078_v22, %v13094_v17  ;;  %v2112_v15 = vadd.f32 %v2080_v43, %v10386_v14  ;;  %v2114_v11 = vadd.f32 %v2082_v55, %v10389_v3  ;;  %v2116_v51 = vadd.f32 %v2084_v52, %v10398_v19 }
 0x2b6   :  { %v2118_v30 = vadd.f32 %v2086_v23, %v10401_v2  ;;  %v2120_v27 = vadd.f32 %v2088_v21, %v10404_v41  ;;  %v7396_v13 = vmul.f32 -1.442695, %v2110_v7  ;;  %v1992_v33 = vpop.f32.mrf.mxu0  ;;  %v2033_v28 = vpop.f32.mrf.mxu1  ;;  %v2122_v46 = vadd.f32 %v2090_v29, %v10407_v63 }
 0x2b7   :  { %v7394_v61 = vmul.f32 -1.442695, %v2108_v35  ;;  %v7398_v12 = vmul.f32 -1.442695, %v2112_v15  ;;  %v7400_v6 = vmul.f32 -1.442695, %v2114_v11  ;;  %v2254_v31 = vadd.f32 %v10884_v57, %v10497_v18 }
 0x2b8   :  { %8063 = vpow2.f32 %v7396_v13  ;;  %v7402_v54 = vmul.f32 -1.442695, %v2116_v51  ;;  %v7404_v44 = vmul.f32 -1.442695, %v2118_v30  ;;  %v2222_v22 = vrot.slane %v10884_v57, 7  ;;  %v13095_v51 = vld [vmem:[#allocation52_spill] sm:$0xff] }
 0x2b9   :  { %8065 = vpow2.f32 %v7394_v61  ;;  %v7406_v43 = vmul.f32 -1.442695, %v2120_v27  ;;  %v2224_v55 = vrot.slane %v10884_v57, 1  ;;  %v7408_v52 = vmul.f32 -1.442695, %v2122_v46  ;;  %v13096_v27 = vld [vmem:[#allocation54_spill] sm:$0xff] }
 0x2ba   :  { %8067 = vpow2.f32 %v7398_v12  ;;  %v2226_v23 = vrot.slane %v10884_v57, 2  ;;  %v2252_v21 = vadd.f32 %v2222_v22, %v10482_v25  ;;  %v2228_v29 = vrot.slane %v10884_v57, 3  ;;  %v13097_v28 = vld [vmem:[#allocation56_spill] sm:$0xff] }
 0x2bb   :  { %8069 = vpow2.f32 %v7400_v6  ;;  %v2230_v7 = vrot.slane %v10884_v57, 4  ;;  %v2232_v1 = vrot.slane %v10884_v57, 5  ;;  %v2256_v35 = vadd.f32 %v2224_v55, %v10505_v50 }
 0x2bc   :  { %8071 = vpow2.f32 %v7402_v54  ;;  %v7410_v15 = vmul.f32 -1.442695, %v2252_v21  ;;  %v2258_v11 = vadd.f32 %v2226_v23, %v10513_v24  ;;  %v2260_v30 = vadd.f32 %v2228_v29, %v13095_v51  ;;  %v13098_v54 = vld [vmem:[#allocation21_spill] sm:$0xff]  ;;  %v13103_v24 = vld [vmem:[#allocation35_spill] sm:$0xff] }
 0x2bd   :  { %8073 = vpow2.f32 %v7404_v44  ;;  %v2262_v13 = vadd.f32 %v2230_v7, %v13096_v27  ;;  %v7412_v33 = vmul.f32 -1.442695, %v2254_v31  ;;  %v2264_v46 = vadd.f32 %v2232_v1, %v13097_v28 }
 0x2be   :  { %8075 = vpow2.f32 %v7406_v43  ;;  %v7414_v61 = vmul.f32 -1.442695, %v2256_v35  ;;  %v7416_v12 = vmul.f32 -1.442695, %v2258_v11  ;;  %v7418_v6 = vmul.f32 -1.442695, %v2260_v30 }
 0x2bf   :  { %8077 = vpow2.f32 %v7408_v52  ;;  %v1990_v44 = vadd.f32 %v1989_v48, %v13098_v54  ;;  %v7420_v43 = vmul.f32 -1.442695, %v2262_v13  ;;  %v7422_v52 = vmul.f32 -1.442695, %v2264_v46 }
 0x2c0   :  { %8079 = vpow2.f32 %v7410_v15 }
 0x2c1   :  { %8081 = vpow2.f32 %v7412_v33  ;;  %v2079_v7 = vrot.slane %v1990_v44, 7  ;;  %v2081_v48 = vrot.slane %v1990_v44, 1  ;;  %v2083_v13 = vrot.slane %v1990_v44, 2 }
 0x2c2   :  { %8083 = vpow2.f32 %v7414_v61  ;;  %v13099_v61 = vld [vmem:[#allocation43_spill] sm:$0xff] }
 0x2c3   :  { %8085 = vpow2.f32 %v7416_v12  ;;  %v10913_v46 = vadd.f32 %v10886_v47, %v13099_v61  ;;  %v2091_v61 = vrot.slane %v1990_v44, 6 }
 0x2c4   :  { %8087 = vpow2.f32 %v7418_v6  ;;  %v2085_v6 = vrot.slane %v1990_v44, 3 }
 0x2c5   :  { %v8064_v22 = vpop.eup %8063  ;;  %8089 = vpow2.f32 %v7420_v43 }
 0x2c6   :  { %v8066_v55 = vpop.eup %8065  ;;  %v2174_v21 = vadd.f32 1.0, %v8064_v22  ;;  %8091 = vpow2.f32 %v7422_v52  ;;  %v13101_v52 = vld [vmem:[#allocation33_spill] sm:$0xff] }
 0x2c7   :  { %v8068_v23 = vpop.eup %8067  ;;  %v2172_v15 = vadd.f32 1.0, %v8066_v55  ;;  %v13100_v55 = vld [vmem:[#allocation32_spill] sm:$0xff]  ;;  %v2111_v28 = vadd.f32 %v1990_v44, %v13101_v52 }
 0x2c8   :  { %v8070_v29 = vpop.eup %8069  ;;  %v2176_v1 = vadd.f32 1.0, %v8068_v23  ;;  %8093 = vrcp.f32 %v2174_v21  ;;  %v2109_v54 = vadd.f32 %v2079_v7, %v13100_v55  ;;  %v2089_v21 = vrot.slane %v1990_v44, 5 }
 0x2c9   :  { %v8072_v31 = vpop.eup %8071  ;;  %v2178_v11 = vadd.f32 1.0, %v8070_v29  ;;  %8095 = vrcp.f32 %v2172_v15  ;;  %v2087_v29 = vrot.slane %v1990_v44, 4  ;;  %v13104_v15 = vld [vmem:[#allocation36_spill] sm:$0xff]  ;;  %v7397_v52 = vmul.f32 -1.442695, %v2111_v28  ;;  %v13108_v28 = vld [vmem:[#allocation42_spill] sm:$0xff] }
 0x2ca   :  { %v8074_v35 = vpop.eup %8073  ;;  %v2180_v33 = vadd.f32 1.0, %v8072_v31  ;;  %8097 = vrcp.f32 %v2176_v1  ;;  %v13102_v31 = vld [vmem:[#allocation34_spill] sm:$0xff]  ;;  %v2117_v50 = vadd.f32 %v2085_v6, %v13104_v15  ;;  %v7395_v7 = vmul.f32 -1.442695, %v2109_v54  ;;  %v13105_v1 = vld [vmem:[#allocation37_spill] sm:$0xff] }
 0x2cb   :  { %v8076_v30 = vpop.eup %8075  ;;  %v2182_v22 = vadd.f32 1.0, %v8074_v35  ;;  %8099 = vrcp.f32 %v2178_v11  ;;  %v2113_v51 = vadd.f32 %v2081_v48, %v13102_v31  ;;  %v2115_v35 = vadd.f32 %v2083_v13, %v13103_v24  ;;  %v13106_v11 = vld [vmem:[#allocation38_spill] sm:$0xff]  ;;  %v13107_v13 = vld [vmem:[#allocation39_spill] sm:$0xff] }
 0x2cc   :  { %v8078_v12 = vpop.eup %8077  ;;  %v2184_v43 = vadd.f32 1.0, %v8076_v30  ;;  %8101 = vrcp.f32 %v2180_v33  ;;  %v2223_v30 = vrot.slane %v10913_v46, 7  ;;  %v2119_v55 = vadd.f32 %v2087_v29, %v13105_v1 }
 0x2cd   :  { %v8080_v23 = vpop.eup %8079  ;;  %v2186_v27 = vadd.f32 1.0, %v8078_v12  ;;  %8103 = vrcp.f32 %v2182_v22  ;;  %v2121_v18 = vadd.f32 %v2089_v21, %v13106_v11  ;;  %v7399_v48 = vmul.f32 -1.442695, %v2113_v51  ;;  %v13109_v11 = vld [vmem:[#allocation46_spill] sm:$0xff] }
 0x2ce   :  { %v2316_v47 = vadd.f32 1.0, %v8080_v23  ;;  %8105 = vrcp.f32 %v2184_v43  ;;  %v8082_v12 = vpop.eup %8081  ;;  %v2225_v33 = vrot.slane %v10913_v46, 1  ;;  %v2123_v22 = vadd.f32 %v2091_v61, %v13107_v13 }
 0x2cf   :  { %8107 = vrcp.f32 %v2186_v27  ;;  %v8084_v44 = vpop.eup %8083  ;;  %v7401_v23 = vmul.f32 -1.442695, %v2115_v35  ;;  %v2227_v54 = vrot.slane %v10913_v46, 2  ;;  %v7403_v43 = vmul.f32 -1.442695, %v2117_v50 }
 0x2d0   :  { %8109 = vrcp.f32 %v2316_v47  ;;  %v8086_v6 = vpop.eup %8085  ;;  %v2229_v29 = vrot.slane %v10913_v46, 3  ;;  %v2253_v1 = vadd.f32 %v2223_v30, %v13108_v28  ;;  %v7405_v51 = vmul.f32 -1.442695, %v2119_v55  ;;  %v13110_v55 = vld [vmem:[#allocation51_spill] sm:$0xff] }
 0x2d1   :  { %8111 = vpow2.f32 %v7395_v7  ;;  %v10928_v27 = vpop.eup %8087  ;;  %v2231_v21 = vrot.slane %v10913_v46, 4  ;;  %v2255_v47 = vadd.f32 %v10913_v46, %v13109_v11  ;;  %v7407_v35 = vmul.f32 -1.442695, %v2121_v18  ;;  %v13111_v11 = vld [vmem:[#allocation53_spill] sm:$0xff] }
 0x2d2   :  { %8113 = vpow2.f32 %v7397_v52  ;;  %v10933_v61 = vpop.eup %8089  ;;  %v2233_v7 = vrot.slane %v10913_v46, 5  ;;  %v2257_v50 = vadd.f32 %v2225_v33, %v10509_v9  ;;  %v7409_v30 = vmul.f32 -1.442695, %v2123_v22  ;;  %v13112_v22 = vld [vmem:[#allocation57_spill] sm:$0xff] }
 0x2d3   :  { %8115 = vpow2.f32 %v7399_v48  ;;  %v10937_v13 = vpop.eup %8091  ;;  %v2235_v52 = vrot.slane %v10913_v46, 6  ;;  %v2259_v28 = vadd.f32 %v2227_v54, %v13110_v55  ;;  %v2261_v24 = vadd.f32 %v2229_v29, %v13111_v11 }
 0x2d4   :  { %8117 = vpow2.f32 %v7401_v23  ;;  %v7411_v31 = vmul.f32 -1.442695, %v2253_v1  ;;  %v2263_v18 = vadd.f32 %v2231_v21, %v10543_v40  ;;  %v7413_v33 = vmul.f32 -1.442695, %v2255_v47 }
 0x2d5   :  { %v10941_v15 = vpop.eup %8093  ;;  %8119 = vpow2.f32 %v7403_v43  ;;  %v2265_v23 = vadd.f32 %v2233_v7, %v13112_v22  ;;  %v7415_v46 = vmul.f32 -1.442695, %v2257_v50  ;;  %v7417_v54 = vmul.f32 -1.442695, %v2259_v28  ;;  %v13113_v43 = vld [vmem:[#allocation58_spill] sm:$0xff] }
 0x2d6   :  { %v10944_v48 = vpop.eup %8095  ;;  %8121 = vpow2.f32 %v7405_v51  ;;  %v2267_v55 = vadd.f32 %v2235_v52, %v13113_v43  ;;  %v7419_v1 = vmul.f32 -1.442695, %v2261_v24  ;;  %v7421_v21 = vmul.f32 -1.442695, %v2263_v18 }
 0x2d7   :  { %v10947_v9 = vpop.eup %8097  ;;  %8123 = vpow2.f32 %v7407_v35  ;;  %v7423_v35 = vmul.f32 -1.442695, %v2265_v23  ;;  %v2318_v28 = vadd.f32 1.0, %v8082_v12  ;;  %v2320_v43 = vadd.f32 1.0, %v8084_v44 }
 0x2d8   :  { %v10950_v25 = vpop.eup %8099  ;;  %8125 = vpow2.f32 %v7409_v30  ;;  %v7425_v50 = vmul.f32 -1.442695, %v2267_v55 }
 0x2d9   :  { %v10953_v29 = vpop.eup %8101  ;;  %8127 = vpow2.f32 %v7411_v31  ;;  %v2322_v31 = vadd.f32 1.0, %v8086_v6 }
 0x2da   :  { %v10955_v51 = vpop.eup %8103  ;;  %8129 = vpow2.f32 %v7413_v33 }
 0x2db   :  { %v10957_v47 = vpop.eup %8105  ;;  %8131 = vpow2.f32 %v7415_v46 }
 0x2dc   :  { %v10959_v7 = vpop.eup %8107  ;;  %8133 = vpow2.f32 %v7417_v54 }
 0x2dd   :  { %v10961_v30 = vpop.eup %8109  ;;  %8135 = vpow2.f32 %v7419_v1 }
 0x2de   :  { %v8112_v52 = vpop.eup %8111  ;;  %8137 = vpow2.f32 %v7421_v21 }
 0x2df   :  { %v8114_v24 = vpop.eup %8113  ;;  %8139 = vpow2.f32 %v7423_v35  ;;  %v2173_v18 = vadd.f32 1.0, %v8112_v52 }
 0x2e0   :  { %v8116_v33 = vpop.eup %8115  ;;  %8141 = vpow2.f32 %v7425_v50  ;;  %v2175_v23 = vadd.f32 1.0, %v8114_v24  ;;  %v2234_v50 = vrot.slane %v10884_v57, 6 }
 0x2e1   :  { %v8118_v22 = vpop.eup %8117  ;;  %8143 = vrcp.f32 %v2318_v28  ;;  %v2177_v54 = vadd.f32 1.0, %v8116_v33 }
 0x2e2   :  { %v8120_v46 = vpop.eup %8119  ;;  %8145 = vrcp.f32 %v2320_v43  ;;  %v2179_v40 = vadd.f32 1.0, %v8118_v22 }
 0x2e3   :  { %v8122_v55 = vpop.eup %8121  ;;  %8147 = vrcp.f32 %v2322_v31  ;;  %v2181_v1 = vadd.f32 1.0, %v8120_v46 }
 0x2e4   :  { %v8124_v12 = vpop.eup %8123  ;;  %8149 = vrcp.f32 %v2173_v18  ;;  %v2183_v21 = vadd.f32 1.0, %v8122_v55  ;;  %v13114_v55 = vld [vmem:[#allocation59_spill] sm:$0xff] }
 0x2e5   :  { %v8126_v44 = vpop.eup %8125  ;;  %8151 = vrcp.f32 %v2175_v23  ;;  %v2185_v35 = vadd.f32 1.0, %v8124_v12  ;;  %v2266_v23 = vadd.f32 %v2234_v50, %v13114_v55 }
 0x2e6   :  { %v8128_v6 = vpop.eup %8127  ;;  %8153 = vrcp.f32 %v2177_v54  ;;  %v2187_v28 = vadd.f32 1.0, %v8126_v44 }
 0x2e7   :  { %v8130_v52 = vpop.eup %8129  ;;  %8155 = vrcp.f32 %v2179_v40  ;;  %v2317_v43 = vadd.f32 1.0, %v8128_v6  ;;  %v13115_v6 = vld [vmem:[#allocation44_spill] sm:$0xff] }
 0x2e8   :  { %v8132_v24 = vpop.eup %8131  ;;  %8157 = vrcp.f32 %v2181_v1  ;;  %v2319_v22 = vadd.f32 1.0, %v8130_v52 }
 0x2e9   :  { %v8134_v33 = vpop.eup %8133  ;;  %8159 = vrcp.f32 %v2183_v21  ;;  %v2321_v18 = vadd.f32 1.0, %v8132_v24  ;;  %v7424_v24 = vmul.f32 -1.442695, %v2266_v23 }
 0x2ea   :  { %v8136_v31 = vpop.eup %8135  ;;  %8161 = vrcp.f32 %v2185_v35  ;;  %v2323_v12 = vadd.f32 1.0, %v8134_v33 }
 0x2eb   :  { %v8138_v46 = vpop.eup %8137  ;;  %8163 = vrcp.f32 %v2187_v28  ;;  %v2325_v11 = vadd.f32 1.0, %v8136_v31 }
 0x2ec   :  { %v8140_v54 = vpop.eup %8139  ;;  %8165 = vrcp.f32 %v2317_v43  ;;  %v2327_v44 = vadd.f32 1.0, %v8138_v46 }
 0x2ed   :  { %v8142_v57 = vpop.eup %8141  ;;  %8167 = vrcp.f32 %v2319_v22  ;;  %v2329_v52 = vadd.f32 1.0, %v8140_v54 }
 0x2ee   :  { %v10965_v1 = vpop.eup %8143  ;;  %8169 = vrcp.f32 %v2321_v18  ;;  %v2331_v28 = vadd.f32 1.0, %v8142_v57 }
 0x2ef   :  { %v10970_v35 = vpop.eup %8145  ;;  %8171 = vrcp.f32 %v2323_v12 }
 0x2f0   :  { %v2069_v40 = vpop.f32.mrf.mxu0  ;;  %v10972_v33 = vpop.eup %8147  ;;  %8173 = vrcp.f32 %v2325_v11  ;;  %v13116_v11 = vld [vmem:[#allocation50_spill] sm:$0xff] }
 0x2f1   :  { %v10968_v21 = vadd.f32 %v2069_v40, %v13115_v6  ;;  %v8150_v46 = vpop.eup %8149  ;;  %8175 = vrcp.f32 %v2327_v44 }
 0x2f2   :  { %v2071_v50 = vpop.f32.mrf.mxu0  ;;  %v8152_v40 = vpop.eup %8151  ;;  %8177 = vrcp.f32 %v2329_v52 }
 0x2f3   :  { %v2366_v43 = vrot.slane %v10968_v21, 7  ;;  %v2368_v22 = vrot.slane %v10968_v21, 1  ;;  %v2370_v31 = vrot.slane %v10968_v21, 2  ;;  %v2398_v54 = vmul.f32 %v10941_v15, %v10968_v21  ;;  %v8154_v6 = vpop.eup %8153 }
 0x2f4   :  { %v2073_v18 = vpop.f32.mrf.mxu0  ;;  %v2372_v55 = vrot.slane %v10968_v21, 3  ;;  %v2072_v41 = vadd.f32 %v2071_v50, %v13116_v11  ;;  %8179 = vrcp.f32 %v2331_v28  ;;  %v8156_v15 = vpop.eup %8155  ;;  %v13117_v11 = vld [vmem:[#allocation63_spill] sm:$0xff] }
 0x2f5   :  { %v2396_v23 = vmul.f32 %v10944_v48, %v2366_v43  ;;  %v2400_v12 = vmul.f32 %v10947_v9, %v2368_v22  ;;  %v2402_v57 = vmul.f32 %v10950_v25, %v2370_v31  ;;  %v2414_v63 = vadd.f32 %v2398_v54, %v10619_v62  ;;  %v8158_v9 = vpop.eup %8157 }
 0x2f6   :  { %v2074_v2 = vpop.f32.mrf.mxu0  ;;  %8181 = vpow2.f32 %v7424_v24  ;;  %v2367_v25 = vrot.slane %v2072_v41, 7  ;;  %v2369_v52 = vrot.slane %v2072_v41, 1  ;;  %v2371_v43 = vrot.slane %v2072_v41, 2  ;;  %v8160_v22 = vpop.eup %8159 }
 0x2f7   :  { %v2412_v44 = vadd.f32 %v2396_v23, %v10610_v39  ;;  %v2416_v18 = vadd.f32 %v2400_v12, %v10627_v45  ;;  %v2418_v48 = vadd.f32 %v2402_v57, %v10640_v34  ;;  %8183 = vtanh.f32 %v2414_v63  ;;  %v8162_v2 = vpop.eup %8161 }
 0x2f8   :  { %v2373_v31 = vrot.slane %v2072_v41, 3  ;;  %v2375_v54 = vrot.slane %v2072_v41, 4  ;;  %v2399_v50 = vmul.f32 %v8152_v40, %v2072_v41  ;;  %v2397_v28 = vmul.f32 %v8150_v46, %v2367_v25  ;;  %v8164_v39 = vpop.eup %8163 }
 0x2f9   :  { %8185 = vtanh.f32 %v2412_v44  ;;  %v2401_v62 = vmul.f32 %v8154_v6, %v2369_v52  ;;  %v2403_v23 = vmul.f32 %v8156_v15, %v2371_v43  ;;  %v2377_v57 = vrot.slane %v2072_v41, 5  ;;  %v10989_v63 = vpop.eup %8165  ;;  %v13118_v6 = vld [vmem:[#allocation65_spill] sm:$0xff]  ;;  %v13120_v43 = vld [vmem:[#allocation22_spill] sm:$0xff] }
 0x2fa   :  { %8187 = vtanh.f32 %v2416_v18  ;;  %v2405_v12 = vmul.f32 %v8158_v9, %v2373_v31  ;;  %v2415_v24 = vadd.f32 %v2399_v50, %v10623_v42  ;;  %v2413_v34 = vadd.f32 %v2397_v28, %v10614_v49  ;;  %v10993_v40 = vpop.eup %8167  ;;  %v13119_v18 = vld [vmem:[#allocation19_spill] sm:$0xff] }
 0x2fb   :  { %8189 = vtanh.f32 %v2418_v48  ;;  %v2417_v44 = vadd.f32 %v2401_v62, %v13117_v11  ;;  %v2379_v45 = vrot.slane %v2072_v41, 6  ;;  %v2407_v19 = vmul.f32 %v8160_v22, %v2375_v54  ;;  %v10997_v9 = vpop.eup %8169  ;;  %v13121_v62 = vld [vmem:[#allocation66_spill] sm:$0xff]  ;;  %v13122_v28 = vld [vmem:[#allocation67_spill] sm:$0xff] }
 0x2fc   :  { %8191 = vtanh.f32 %v2415_v24  ;;  %v2409_v46 = vmul.f32 %v8162_v2, %v2377_v57  ;;  %v2419_v15 = vadd.f32 %v2403_v23, %v13118_v6  ;;  %v2421_v48 = vadd.f32 %v2405_v12, %v13119_v18  ;;  %v11001_v50 = vpop.eup %8171 }
 0x2fd   :  { %v2374_v25 = vrot.slane %v10968_v21, 4  ;;  %8193 = vtanh.f32 %v2413_v34  ;;  %v2411_v52 = vmul.f32 %v8164_v39, %v2379_v45  ;;  %v2423_v31 = vadd.f32 %v2407_v19, %v13120_v43  ;;  %v11005_v54 = vpop.eup %8173 }
 0x2fe   :  { %v2376_v41 = vrot.slane %v10968_v21, 5  ;;  %v2425_v22 = vadd.f32 %v2409_v46, %v13121_v62  ;;  %8195 = vtanh.f32 %v2417_v44  ;;  %v2378_v2 = vrot.slane %v10968_v21, 6  ;;  %v11009_v12 = vpop.eup %8175 }
 0x2ff   :  { %v2427_v23 = vadd.f32 %v2411_v52, %v13122_v28  ;;  %8197 = vtanh.f32 %v2419_v15  ;;  %v2404_v39 = vmul.f32 %v10953_v29, %v2372_v55  ;;  %v2324_v19 = vadd.f32 1.0, %v10928_v27  ;;  %v11013_v45 = vpop.eup %8177  ;;  %v13123_v15 = vld [vmem:[#allocation17_spill] sm:$0xff] }
 0x300   :  { %8199 = vtanh.f32 %v2421_v48  ;;  %v2406_v34 = vmul.f32 %v10955_v51, %v2374_v25  ;;  %v2326_v24 = vadd.f32 1.0, %v10933_v61  ;;  %v2328_v21 = vadd.f32 1.0, %v10937_v13  ;;  %v13124_v25 = vld [vmem:[#allocation20_spill] sm:$0xff]  ;;  %v13125_v13 = vld [vmem:[#allocation27_spill] sm:$0xff] }
 0x301   :  { %8201 = vtanh.f32 %v2423_v31  ;;  %v11017_v57 = vpop.eup %8179  ;;  %v2408_v44 = vmul.f32 %v10957_v47, %v2376_v41  ;;  %v2410_v29 = vmul.f32 %v10959_v7, %v2378_v2  ;;  %v2420_v48 = vadd.f32 %v2404_v39, %v13123_v15  ;;  %v13126_v7 = vld [vmem:[#allocation68_spill] sm:$0xff] }
 0x302   :  { %8203 = vtanh.f32 %v2425_v22  ;;  %v2422_v61 = vadd.f32 %v2406_v34, %v13124_v25 }
 0x303   :  { %v8182_v46 = vpop.eup %8181  ;;  %8205 = vtanh.f32 %v2427_v23  ;;  %v2424_v22 = vadd.f32 %v2408_v44, %v13125_v13  ;;  %v2426_v2 = vadd.f32 %v2410_v29, %v13126_v7 }
 0x304   :  { %v8184_v55 = vpop.eup %8183  ;;  %v2330_v27 = vadd.f32 1.0, %v8182_v46  ;;  %8207 = vrcp.f32 %v2324_v19 }
 0x305   :  { %8209 = vrcp.f32 %v2326_v24  ;;  %v2462_v52 = vrot.slane %v8184_v55, 1 }
 0x306   :  { %v8186_v51 = vpop.eup %8185  ;;  %8211 = vrcp.f32 %v2328_v21 }
 0x307   :  { %v11024_v31 = vpop.eup %8187  ;;  %v2460_v47 = vrot.slane %v8186_v51, 1  ;;  %8213 = vrcp.f32 %v2330_v27  ;;  %v2494_v39 = vsub.f32 %v10835_v53, %v2462_v52 }
 0x308   :  { %v11027_v41 = vpop.eup %8189  ;;  %v2464_v23 = vrot.slane %v11024_v31, 1  ;;  %8215 = vtanh.f32 %v2420_v48 }
 0x309   :  { %v2466_v19 = vrot.slane %v11027_v41, 1  ;;  %v2492_v34 = vsub.f32 %v10832_v5, %v2460_v47  ;;  %v8192_v24 = vpop.eup %8191  ;;  %8217 = vtanh.f32 %v2422_v61  ;;  %v2526_v44 = vrot.slane %v2494_v39, 7 }
 0x30a   :  { %v2496_v21 = vsub.f32 %v10838_v37, %v2464_v23  ;;  %v8194_v46 = vpop.eup %8193  ;;  %v2463_v13 = vrot.slane %v8192_v24, 1  ;;  %8219 = vtanh.f32 %v2424_v22 }
 0x30b   :  { %v2498_v27 = vsub.f32 %v10841_v20, %v2466_v19  ;;  %v2524_v29 = vrot.slane %v2492_v34, 7  ;;  %v8196_v7 = vpop.eup %8195  ;;  %v2461_v25 = vrot.slane %v8194_v46, 1  ;;  %8221 = vtanh.f32 %v2426_v2 }
 0x30c   :  { %v2528_v53 = vrot.slane %v2496_v21, 7  ;;  %v2558_v48 = vmul.f32 %v10965_v1, %v2526_v44  ;;  %v8198_v52 = vpop.eup %8197  ;;  %v2465_v15 = vrot.slane %v8196_v7, 1  ;;  %v2495_v5 = vsub.f32 %v10781_v36, %v2463_v13 }
 0x30d   :  { %v2530_v61 = vrot.slane %v2498_v27, 7  ;;  %v2556_v37 = vmul.f32 %v10961_v30, %v2524_v29  ;;  %v8200_v47 = vpop.eup %8199  ;;  %v2467_v23 = vrot.slane %v8198_v52, 1  ;;  %v2493_v22 = vsub.f32 %v10776_v58, %v2461_v25 }
 0x30e   :  { %v11041_v20 = vmul.f32 %v10970_v35, %v2528_v53  ;;  %v11043_v39 = vadd.f32 %v8184_v55, %v2558_v48  ;;  %v8202_v2 = vpop.eup %8201  ;;  %v2469_v19 = vrot.slane %v8200_v47, 1  ;;  %v2497_v1 = vsub.f32 %v10784_v32, %v2465_v15 }
 0x30f   :  { %v2527_v34 = vrot.slane %v2495_v5, 7  ;;  %v11047_v21 = vmul.f32 %v10972_v33, %v2530_v61  ;;  %v8204_v36 = vpop.eup %8203  ;;  %v2471_v13 = vrot.slane %v8202_v2, 1  ;;  %v2499_v30 = vsub.f32 %v10787_v59, %v2467_v23  ;;  %v13127_v59 = vld [vmem:[#allocation69_spill] sm:$0xff] }
 0x310   :  { %v2525_v44 = vrot.slane %v2493_v22, 7  ;;  %v11050_v27 = vadd.f32 %v8186_v51, %v2556_v37  ;;  %v8206_v58 = vpop.eup %8205  ;;  %v2473_v35 = vrot.slane %v8204_v36, 1  ;;  %v2501_v55 = vsub.f32 %v10790_v60, %v2469_v19 }
 0x311   :  { %v2529_v25 = vrot.slane %v2497_v1, 7  ;;  %v2559_v29 = vmul.f32 %v10993_v40, %v2527_v34  ;;  %v11054_v53 = vpop.eup %8207  ;;  %v2475_v32 = vrot.slane %v8206_v58, 1  ;;  %v2503_v33 = vsub.f32 %v10792_v56, %v2471_v13  ;;  %v13128_v40 = vld [vmem:[#allocation70_spill] sm:$0xff] }
 0x312   :  { %v2531_v15 = vrot.slane %v2499_v30, 7  ;;  %v2557_v48 = vmul.f32 %v10989_v63, %v2525_v44  ;;  %v11058_v5 = vpop.eup %8209  ;;  %v2505_v51 = vsub.f32 %v13127_v59, %v2473_v35  ;;  %v2533_v61 = vrot.slane %v2501_v55, 7 }
 0x313   :  { %v2561_v37 = vmul.f32 %v10997_v9, %v2529_v25  ;;  %v11062_v23 = vadd.f32 %v8192_v24, %v2559_v29  ;;  %v11064_v60 = vpop.eup %8211  ;;  %v2507_v22 = vsub.f32 %v13128_v40, %v2475_v32  ;;  %v2535_v19 = vrot.slane %v2503_v33, 7 }
 0x314   :  { %v2563_v1 = vmul.f32 %v11001_v50, %v2531_v15  ;;  %v11068_v56 = vadd.f32 %v8194_v46, %v2557_v48  ;;  %v11070_v34 = vpop.eup %8213  ;;  %v2537_v63 = vrot.slane %v2505_v51, 7  ;;  %v2565_v13 = vmul.f32 %v11005_v54, %v2533_v61 }
 0x315   :  { %v11073_v30 = vadd.f32 %v8196_v7, %v2561_v37  ;;  %v2591_v9 = vpack.c.bf16 %v11062_v23, %v11062_v23  ;;  %v11077_v24 = vpop.eup %8215  ;;  %v2539_v44 = vrot.slane %v2507_v22, 7  ;;  %v2567_v35 = vmul.f32 %v11009_v12, %v2535_v19 }
 0x316   :  { %v11080_v55 = vadd.f32 %v8198_v52, %v2563_v1  ;;  %v2589_v50 = vpack.c.bf16 %v11068_v56, %v11068_v56  ;;  %v8218_v46 = vpop.eup %8217  ;;  %v2569_v25 = vmul.f32 %v11013_v45, %v2537_v63  ;;  %v11085_v29 = vadd.f32 %v8200_v47, %v2565_v13 }
 0x317   :  { %v2593_v54 = vpack.c.bf16 %v11073_v30, %v11073_v30  ;;  %v2623_v7 = vunpack.c.l.b16 %v2591_v9  ;;  %v8220_v32 = vpop.eup %8219  ;;  %v2571_v33 = vmul.f32 %v11017_v57, %v2539_v44  ;;  %v11090_v15 = vadd.f32 %v8202_v2, %v2567_v35 }
 0x318   :  { %v2595_v12 = vpack.c.bf16 %v11080_v55, %v11080_v55  ;;  %v2621_v52 = vunpack.c.l.b16 %v2589_v50  ;;  %v8222_v48 = vpop.eup %8221  ;;  %v11094_v59 = vadd.f32 %v8204_v36, %v2569_v25  ;;  %v2597_v45 = vpack.c.bf16 %v11085_v29, %v11085_v29 }
 0x319   :  { %v2625_v47 = vunpack.c.l.b16 %v2593_v54  ;;  %v2468_v51 = vrot.slane %v11077_v24, 1  ;;  %v11099_v61 = vadd.f32 %v8206_v58, %v2571_v33  ;;  %v2599_v57 = vpack.c.bf16 %v11090_v15, %v11090_v15 }
 0x31a   :  { %v2627_v2 = vunpack.c.l.b16 %v2595_v12  ;;  %v2650_v37 = vrot.slane %v2621_v52, 1  ;;  %v2601_v40 = vpack.c.bf16 %v11094_v59, %v11094_v59  ;;  %v2629_v22 = vunpack.c.l.b16 %v2597_v45 }
 0x31b   :  { %v2652_v19 = vrot.slane %v2625_v47, 7  ;;  %v2470_v36 = vrot.slane %v8218_v46, 1  ;;  %v2603_v1 = vpack.c.bf16 %v11099_v61, %v11099_v61  ;;  %v2631_v63 = vunpack.c.l.b16 %v2599_v57 }
 0x31c   :  { %v2651_v13 = vsel %vm1771_vm0, %v2623_v7, %v2650_v37  ;;  %v2654_v9 = vrot.slane %v2627_v2, 6  ;;  %v2633_v58 = vunpack.c.l.b16 %v2601_v40  ;;  %v2656_v35 = vrot.slane %v2629_v22, 5 }
 0x31d   :  { %v2653_v44 = vsel %vm1774_vm1, %v2652_v19, %v2651_v13  ;;  %v2472_v50 = vrot.slane %v8220_v32, 1  ;;  %v2635_v25 = vunpack.c.l.b16 %v2603_v1  ;;  %v2658_v33 = vrot.slane %v2631_v63, 4 }
 0x31e   :  { %v2655_v54 = vsel %vm1777_vm2, %v2654_v9, %v2653_v44  ;;  %v2474_v12 = vrot.slane %v8222_v48, 1  ;;  %v2660_v45 = vrot.slane %v2633_v58, 3  ;;  %v2500_v47 = vsub.f32 %v10844_v26, %v2468_v51 }
 0x31f   :  { %v2657_v52 = vsel %vm1780_vm3, %v2656_v35, %v2655_v54  ;;  %v2502_v57 = vsub.f32 %v10847_v0, %v2470_v36  ;;  %v2662_v2 = vrot.slane %v2635_v25, 2  ;;  %v2504_v37 = vsub.f32 %v10850_v16, %v2472_v50 }
 0x320   :  { %v2659_v7 = vsel %vm1783_vm4, %v2658_v33, %v2657_v52  ;;  %v2506_v40 = vsub.f32 %v10852_v10, %v2474_v12  ;;  %v2532_v19 = vrot.slane %v2500_v47, 7  ;;  %v11119_v63 = vadd.f32 %v11024_v31, %v11041_v20 }
 0x321   :  { %v2661_v22 = vsel %vm1786_vm5, %v2660_v45, %v2659_v7  ;;  %v2534_v1 = vrot.slane %v2502_v57, 7  ;;  %v2536_v26 = vrot.slane %v2504_v37, 7  ;;  %v11124_v0 = vadd.f32 %v11027_v41, %v11047_v21 }
 0x322   :  { %v2663_v13 = vsel %vm1789_vm6, %v2662_v2, %v2661_v22  ;;  %v2538_v51 = vrot.slane %v2506_v40, 7  ;;  %v2564_v16 = vmul.f32 %v11054_v53, %v2532_v19  ;;  %v2588_v9 = vpack.c.bf16 %v11050_v27, %v11050_v27 }
 0x323   :  { %v2665_v36 = vpack.c.b16 %v2663_v13, %v2663_v13  ;;  %v2566_v10 = vmul.f32 %v11058_v5, %v2534_v1  ;;  %v2568_v58 = vmul.f32 %v11064_v60, %v2536_v26  ;;  %v2590_v20 = vpack.c.bf16 %v11043_v39, %v11043_v39 }
 0x324   :  { %v2570_v31 = vmul.f32 %v11070_v34, %v2538_v51  ;;  %v2592_v44 = vpack.c.bf16 %v11119_v63, %v11119_v63  ;;  %v11137_v41 = vadd.f32 %v11077_v24, %v2564_v16  ;;  %v2594_v53 = vpack.c.bf16 %v11124_v0, %v11124_v0 }
 0x325   :  { %2700 = vmatprep.mubr.bf16.mxu1 %v2665_v36  ;;  %2741 = vmatprep.mubr.bf16.mxu0 %v2665_v36  ;;  %v11139_v21 = vadd.f32 %v8218_v46, %v2566_v10  ;;  %v2620_v5 = vunpack.c.l.b16 %v2588_v9  ;;  %v11143_v60 = vadd.f32 %v8220_v32, %v2568_v58  ;;  %v2622_v35 = vunpack.c.l.b16 %v2590_v20  ;;  %v9279_v9 = vld [vmem:[#allocation8 + $0x160] ss:$24 sps:$4 sm:$0xff]   ;;  %v9280_v58 = vld [vmem:[#allocation8 + $0x134] ss:$24 sps:$4 sm:$0xff]   ;;  %v9282_v20 = vld [vmem:[#allocation8 + $0x124] ss:$24 sps:$4 sm:$0xff]  }
 0x326   :  { %v11145_v34 = vadd.f32 %v8222_v48, %v2570_v31  ;;  %v2624_v50 = vunpack.c.l.b16 %v2592_v44  ;;  %v2596_v25 = vpack.c.bf16 %v11137_v41, %v11137_v41  ;;  %v2626_v24 = vunpack.c.l.b16 %v2594_v53  ;;  %v9281_v31 = vld [vmem:[#allocation8 + $0x150] ss:$24 sps:$4 sm:$0xff]   ;;  %v9284_v53 = vld [vmem:[#allocation8 + $0x104] ss:$24 sps:$4 sm:$0xff]  }
 0x327   :  { %v2598_v54 = vpack.c.bf16 %v11139_v21, %v11139_v21  ;;  %v2636_v33 = vrot.slane %v2620_v5, 1  ;;  %v2600_v46 = vpack.c.bf16 %v11143_v60, %v11143_v60  ;;  %v9283_v44 = vld [vmem:[#allocation8 + $0x130] ss:$24 sps:$4 sm:$0xff]   ;;  %v9285_v5 = vld [vmem:[#allocation8 + $0x120] ss:$24 sps:$4 sm:$0xff]  }
 0x328   :  { %13129 = vst [vmem:[#allocation63_spill] sm:$0xff] %v11145_v34  ;;  %v2602_v12 = vpack.c.bf16 %v11145_v34, %v11145_v34  ;;  %v2638_v32 = vrot.slane %v2624_v50, 7  ;;  %v2628_v52 = vunpack.c.l.b16 %v2596_v25  ;;  %v2640_v47 = vrot.slane %v2626_v24, 6  ;;  %v9287_v50 = vld [vmem:[#allocation8 + $0x100] ss:$24 sps:$4 sm:$0xff]  }
 0x329   :  { %v2630_v48 = vunpack.c.l.b16 %v2598_v54  ;;  %v2637_v45 = vsel %vm1771_vm0, %v2622_v35, %v2636_v33  ;;  %v2632_v57 = vunpack.c.l.b16 %v2600_v46  ;;  %v9286_v35 = vld [vmem:[#allocation8 + $0xf4] ss:$24 sps:$4 sm:$0xff]   ;;  %v9289_v54 = vld [vmem:[#allocation8 + $0xf0] ss:$24 sps:$4 sm:$0xff]   ;;  %v9292_v33 = vld [vmem:[#allocation8 + $0xa4] ss:$24 sps:$4 sm:$0xff]  }
 0x32a   :  { %v2634_v7 = vunpack.c.l.b16 %v2602_v12  ;;  %v2639_v2 = vsel %vm1774_vm1, %v2638_v32, %v2637_v45  ;;  %v2642_v40 = vrot.slane %v2628_v52, 5  ;;  %v9288_v25 = vld [vmem:[#allocation8 + $0xd4] ss:$24 sps:$4 sm:$0xff]   ;;  %v9291_v24 = vld [vmem:[#allocation8 + $0xd0] ss:$24 sps:$4 sm:$0xff]  }
 0x32b   :  { %v2641_v37 = vsel %vm1777_vm2, %v2640_v47, %v2639_v2  ;;  %v2644_v22 = vrot.slane %v2630_v48, 4  ;;  %v2646_v1 = vrot.slane %v2632_v57, 3  ;;  %v9293_v46 = vld [vmem:[#allocation8 + $0xc0] ss:$24 sps:$4 sm:$0xff]   ;;  %v9294_v12 = vld [vmem:[#allocation8 + $0x94] ss:$24 sps:$4 sm:$0xff]  }
 0x32c   :  { %v2643_v19 = vsel %vm1780_vm3, %v2642_v40, %v2641_v37  ;;  %v2648_v26 = vrot.slane %v2634_v7, 2  ;;  %v9295_v32 = vld [vmem:[#allocation8 + $0xa0] ss:$24 sps:$4 sm:$0xff]   ;;  %v9296_v52 = vld [vmem:[#allocation8 + $0x74] ss:$24 sps:$4 sm:$0xff]  }
 0x32d   :  { %v2645_v13 = vsel %vm1783_vm4, %v2644_v22, %v2643_v19  ;;  %v9297_v48 = vld [vmem:[#allocation8 + $0x90] ss:$24 sps:$4 sm:$0xff]   ;;  %v9298_v45 = vld [vmem:[#allocation8 + $0x64] ss:$24 sps:$4 sm:$0xff]   ;;  %v9301_v7 = vld [vmem:[#allocation8 + $0x60] ss:$24 sps:$4 sm:$0xff]  }
 0x32e   :  { %v2647_v51 = vsel %vm1786_vm5, %v2646_v1, %v2645_v13  ;;  %v9299_v47 = vld [vmem:[#allocation8 + $0x70] ss:$24 sps:$4 sm:$0xff]   ;;  %v9300_v57 = vld [vmem:[#allocation8 + $0x44] ss:$24 sps:$4 sm:$0xff]   ;;  %v9302_v2 = vld [vmem:[#allocation8 + $0x34] ss:$24 sps:$4 sm:$0xff]  }
 0x32f   :  { %v2649_v16 = vsel %vm1789_vm6, %v2648_v26, %v2647_v51  ;;  %v9303_v37 = vld [vmem:[#allocation8 + $0x40] ss:$24 sps:$4 sm:$0xff]   ;;  %v9304_v40 = vld [vmem:[#allocation8 + $0x14] ss:$24 sps:$4 sm:$0xff]   ;;  %v9305_v22 = vld [vmem:[#allocation8 + $0x30] ss:$24 sps:$4 sm:$0xff]  }
 0x330   :  { %v11162_v10 = vpack.c.b16 %v2649_v16, %v2649_v16  ;;  %v9306_v19 = vld [vmem:[#allocation8 + $0x4] ss:$24 sps:$4 sm:$0xff]   ;;  %v9307_v1 = vld [vmem:[#allocation8 + $0x10] ss:$24 sps:$4 sm:$0xff]   ;;  %v9309_v26 = vld [vmem:[#allocation8] ss:$24 sps:$4 sm:$0xff]  }
 0x331   :  { %v9308_v13 = vld [vmem:[#allocation8 + $0x2e4] ss:$24 sps:$4 sm:$0xff]   ;;  %v9310_v51 = vld [vmem:[#allocation8 + $0x2d4] ss:$24 sps:$4 sm:$0xff]   ;;  %v9311_v16 = vld [vmem:[#allocation8 + $0x2e0] ss:$24 sps:$4 sm:$0xff]  }
 0x332   :  { %2701 = vmatmul.mubr.bf16.vlgmr.msra.gmra.mxu1 %v11162_v10  ;;  %2742 = vmatmul.mubr.bf16.vlgmr.msra.gmra.mxu0 %v11162_v10 }
 0x333   :  { %2751 = vmatpush1.bf16.msra.mxu1 %v9279_v9  ;;  %2782 = vmatprep.mubr.bf16.mxu1 %v2665_v36  ;;  %v9290_v36 = vld [vmem:[#allocation8 + $0xc4] ss:$24 sps:$4 sm:$0xff]   ;;  %v9312_v9 = vld [vmem:[#allocation8 + $0x2b4] ss:$24 sps:$4 sm:$0xff]  }
 0x334   :  { %2752 = vmatprep.subr.bf16.mxu1 %v9280_v58  ;;  %3384 = vmatpush1.bf16.msra.mxu0 %v9281_v31  ;;  %v9313_v58 = vld [vmem:[#allocation8 + $0x2d0] ss:$24 sps:$4 sm:$0xff]   ;;  %v9314_v31 = vld [vmem:[#allocation8 + $0x2a4] ss:$24 sps:$4 sm:$0xff]  }
 0x335   :  { %3385 = vmatprep.subr.bf16.mxu0 %v9282_v20  ;;  %v9315_v20 = vld [vmem:[#allocation8 + $0x2b0] ss:$24 sps:$4 sm:$0xff]  }
 0x337   :  { %2753 = vmatpush1.bf16.msra.mxu1 %v9283_v44  ;;  %v9316_v44 = vld [vmem:[#allocation8 + $0x284] ss:$24 sps:$4 sm:$0xff]  }
 0x338   :  { %2754 = vmatprep.subr.bf16.mxu1 %v9284_v53  ;;  %3386 = vmatpush1.bf16.msra.mxu0 %v9285_v5  ;;  %v9317_v53 = vld [vmem:[#allocation8 + $0x2a0] ss:$24 sps:$4 sm:$0xff]   ;;  %v9318_v5 = vld [vmem:[#allocation8 + $0x274] ss:$24 sps:$4 sm:$0xff]  }
 0x339   :  { %3387 = vmatprep.subr.bf16.mxu0 %v9286_v35  ;;  %v9319_v35 = vld [vmem:[#allocation8 + $0x280] ss:$24 sps:$4 sm:$0xff]  }
 0x33b   :  { %2755 = vmatpush1.bf16.msra.mxu1 %v9287_v50  ;;  %v9320_v50 = vld [vmem:[#allocation8 + $0x254] ss:$24 sps:$4 sm:$0xff]  }
 0x33c   :  { %2756 = vmatprep.subr.bf16.mxu1 %v9288_v25  ;;  %3388 = vmatpush1.bf16.msra.mxu0 %v9289_v54  ;;  %v9321_v25 = vld [vmem:[#allocation8 + $0x270] ss:$24 sps:$4 sm:$0xff]   ;;  %v9322_v54 = vld [vmem:[#allocation8 + $0x244] ss:$24 sps:$4 sm:$0xff]  }
 0x33d   :  { %3389 = vmatprep.subr.bf16.mxu0 %v9290_v36  ;;  %v9323_v36 = vld [vmem:[#allocation8 + $0x250] ss:$24 sps:$4 sm:$0xff]  }
 0x33f   :  { %2757 = vmatpush1.bf16.msra.mxu1 %v9291_v24  ;;  %v9324_v24 = vld [vmem:[#allocation8 + $0x224] ss:$24 sps:$4 sm:$0xff]  }
 0x340   :  { %2758 = vmatprep.subr.bf16.mxu1 %v9292_v33  ;;  %3390 = vmatpush1.bf16.msra.mxu0 %v9293_v46  ;;  %v9325_v33 = vld [vmem:[#allocation8 + $0x240] ss:$24 sps:$4 sm:$0xff]   ;;  %v9326_v46 = vld [vmem:[#allocation8 + $0x214] ss:$24 sps:$4 sm:$0xff]  }
 0x341   :  { %3391 = vmatprep.subr.bf16.mxu0 %v9294_v12  ;;  %v9327_v12 = vld [vmem:[#allocation8 + $0x220] ss:$24 sps:$4 sm:$0xff]  }
 0x343   :  { %2759 = vmatpush1.bf16.msra.mxu1 %v9295_v32  ;;  %v9328_v32 = vld [vmem:[#allocation8 + $0x1f4] ss:$24 sps:$4 sm:$0xff]  }
 0x344   :  { %2760 = vmatprep.subr.bf16.mxu1 %v9296_v52  ;;  %3392 = vmatpush1.bf16.msra.mxu0 %v9297_v48  ;;  %v9329_v52 = vld [vmem:[#allocation8 + $0x210] ss:$24 sps:$4 sm:$0xff]   ;;  %v9330_v48 = vld [vmem:[#allocation8 + $0x1e4] ss:$24 sps:$4 sm:$0xff]  }
 0x345   :  { %3393 = vmatprep.subr.bf16.mxu0 %v9298_v45  ;;  %v9331_v45 = vld [vmem:[#allocation8 + $0x1f0] ss:$24 sps:$4 sm:$0xff]  }
 0x347   :  { %2761 = vmatpush1.bf16.msra.mxu1 %v9299_v47  ;;  %v9332_v47 = vld [vmem:[#allocation8 + $0x1c4] ss:$24 sps:$4 sm:$0xff]  }
 0x348   :  { %2762 = vmatprep.subr.bf16.mxu1 %v9300_v57  ;;  %3394 = vmatpush1.bf16.msra.mxu0 %v9301_v7  ;;  %v9333_v57 = vld [vmem:[#allocation8 + $0x1e0] ss:$24 sps:$4 sm:$0xff]   ;;  %v9334_v7 = vld [vmem:[#allocation8 + $0x1b4] ss:$24 sps:$4 sm:$0xff]  }
 0x349   :  { %3395 = vmatprep.subr.bf16.mxu0 %v9302_v2  ;;  %v9335_v2 = vld [vmem:[#allocation8 + $0x1c0] ss:$24 sps:$4 sm:$0xff]  }
 0x34b   :  { %2763 = vmatpush1.bf16.msra.mxu1 %v9303_v37  ;;  %v9336_v37 = vld [vmem:[#allocation8 + $0x194] ss:$24 sps:$4 sm:$0xff]  }
 0x34c   :  { %2764 = vmatprep.subr.bf16.mxu1 %v9304_v40  ;;  %3396 = vmatpush1.bf16.msra.mxu0 %v9305_v22  ;;  %v9337_v40 = vld [vmem:[#allocation8 + $0x1b0] ss:$24 sps:$4 sm:$0xff]   ;;  %v9338_v22 = vld [vmem:[#allocation8 + $0x184] ss:$24 sps:$4 sm:$0xff]  }
 0x34d   :  { %3397 = vmatprep.subr.bf16.mxu0 %v9306_v19  ;;  %v9339_v19 = vld [vmem:[#allocation8 + $0x190] ss:$24 sps:$4 sm:$0xff]  }
 0x34f   :  { %2765 = vmatpush1.bf16.msra.mxu1 %v9307_v1  ;;  %v9340_v1 = vld [vmem:[#allocation8 + $0x15c] ss:$24 sps:$4 sm:$0xff]  }
 0x350   :  { %2766 = vmatprep.subr.bf16.mxu1 %v9308_v13  ;;  %3398 = vmatpush1.bf16.msra.mxu0 %v9309_v26  ;;  %v9341_v13 = vld [vmem:[#allocation8 + $0x180] ss:$24 sps:$4 sm:$0xff]   ;;  %v9342_v26 = vld [vmem:[#allocation8 + $0x164] ss:$24 sps:$4 sm:$0xff]  }
 0x351   :  { %3399 = vmatprep.subr.bf16.mxu0 %v9310_v51  ;;  %v9343_v51 = vld [vmem:[#allocation8 + $0x158] ss:$24 sps:$4 sm:$0xff]  }
 0x353   :  { %2767 = vmatpush2.bf16.msra.mxu1 %v9311_v16  ;;  %v9344_v16 = vld [vmem:[#allocation8 + $0x12c] ss:$24 sps:$4 sm:$0xff]  }
 0x354   :  { %2768 = vmatprep.subr.bf16.mxu1 %v9312_v9  ;;  %3400 = vmatpush2.bf16.msra.mxu0 %v9313_v58  ;;  %v9345_v9 = vld [vmem:[#allocation8 + $0x128] ss:$24 sps:$4 sm:$0xff]   ;;  %v9346_v58 = vld [vmem:[#allocation8 + $0xfc] ss:$24 sps:$4 sm:$0xff]  }
 0x355   :  { %3401 = vmatprep.subr.bf16.mxu0 %v9314_v31  ;;  %v9347_v31 = vld [vmem:[#allocation8 + $0xf8] ss:$24 sps:$4 sm:$0xff]  }
 0x357   :  { %2769 = vmatpush2.bf16.msra.mxu1 %v9315_v20  ;;  %v9348_v20 = vld [vmem:[#allocation8 + $0xcc] ss:$24 sps:$4 sm:$0xff]  }
 0x358   :  { %2770 = vmatprep.subr.bf16.mxu1 %v9316_v44  ;;  %3402 = vmatpush2.bf16.msra.mxu0 %v9317_v53  ;;  %v9349_v44 = vld [vmem:[#allocation8 + $0xc8] ss:$24 sps:$4 sm:$0xff]   ;;  %v9350_v53 = vld [vmem:[#allocation8 + $0x9c] ss:$24 sps:$4 sm:$0xff]  }
 0x359   :  { %3403 = vmatprep.subr.bf16.mxu0 %v9318_v5  ;;  %v9351_v5 = vld [vmem:[#allocation8 + $0x98] ss:$24 sps:$4 sm:$0xff]  }
 0x35b   :  { %2771 = vmatpush2.bf16.msra.mxu1 %v9319_v35  ;;  %v9352_v35 = vld [vmem:[#allocation8 + $0x6c] ss:$24 sps:$4 sm:$0xff]  }
 0x35c   :  { %2772 = vmatprep.subr.bf16.mxu1 %v9320_v50  ;;  %3404 = vmatpush2.bf16.msra.mxu0 %v9321_v25  ;;  %v9354_v50 = vld [vmem:[#allocation8 + $0x3c] ss:$24 sps:$4 sm:$0xff]   ;;  %v9355_v25 = vld [vmem:[#allocation8 + $0x38] ss:$24 sps:$4 sm:$0xff]  }
 0x35d   :  { %3405 = vmatprep.subr.bf16.mxu0 %v9322_v54  ;;  %v9356_v54 = vld [vmem:[#allocation8 + $0xc] ss:$24 sps:$4 sm:$0xff]  }
 0x35f   :  { %2773 = vmatpush2.bf16.msra.mxu1 %v9323_v36  ;;  %v9357_v36 = vld [vmem:[#allocation8 + $0x8] ss:$24 sps:$4 sm:$0xff]  }
 0x360   :  { %2774 = vmatprep.subr.bf16.mxu1 %v9324_v24  ;;  %3406 = vmatpush2.bf16.msra.mxu0 %v9325_v33  ;;  %v9358_v24 = vld [vmem:[#allocation8 + $0x2dc] ss:$24 sps:$4 sm:$0xff]   ;;  %v9359_v33 = vld [vmem:[#allocation8 + $0x2d8] ss:$24 sps:$4 sm:$0xff]  }
 0x361   :  { %3407 = vmatprep.subr.bf16.mxu0 %v9326_v46  ;;  %v9360_v46 = vld [vmem:[#allocation8 + $0x2ac] ss:$24 sps:$4 sm:$0xff]  }
 0x363   :  { %2775 = vmatpush2.bf16.msra.mxu1 %v9327_v12  ;;  %v9361_v12 = vld [vmem:[#allocation8 + $0x2a8] ss:$24 sps:$4 sm:$0xff]  }
 0x364   :  { %2776 = vmatprep.subr.bf16.mxu1 %v9328_v32  ;;  %3408 = vmatpush2.bf16.msra.mxu0 %v9329_v52  ;;  %v9362_v32 = vld [vmem:[#allocation8 + $0x27c] ss:$24 sps:$4 sm:$0xff]   ;;  %v9363_v52 = vld [vmem:[#allocation8 + $0x278] ss:$24 sps:$4 sm:$0xff]  }
 0x365   :  { %3409 = vmatprep.subr.bf16.mxu0 %v9330_v48  ;;  %v9364_v48 = vld [vmem:[#allocation8 + $0x24c] ss:$24 sps:$4 sm:$0xff]  }
 0x367   :  { %2777 = vmatpush2.bf16.msra.mxu1 %v9331_v45  ;;  %v9365_v45 = vld [vmem:[#allocation8 + $0x248] ss:$24 sps:$4 sm:$0xff]  }
 0x368   :  { %2778 = vmatprep.subr.bf16.mxu1 %v9332_v47  ;;  %3410 = vmatpush2.bf16.msra.mxu0 %v9333_v57  ;;  %v9366_v47 = vld [vmem:[#allocation8 + $0x21c] ss:$24 sps:$4 sm:$0xff]   ;;  %v9367_v57 = vld [vmem:[#allocation8 + $0x218] ss:$24 sps:$4 sm:$0xff]  }
 0x369   :  { %3411 = vmatprep.subr.bf16.mxu0 %v9334_v7  ;;  %v9368_v7 = vld [vmem:[#allocation8 + $0x1ec] ss:$24 sps:$4 sm:$0xff]  }
 0x36b   :  { %2779 = vmatpush2.bf16.msra.mxu1 %v9335_v2  ;;  %v9369_v2 = vld [vmem:[#allocation8 + $0x1e8] ss:$24 sps:$4 sm:$0xff]  }
 0x36c   :  { %2780 = vmatprep.subr.bf16.mxu1 %v9336_v37  ;;  %3412 = vmatpush2.bf16.msra.mxu0 %v9337_v40  ;;  %v9370_v37 = vld [vmem:[#allocation8 + $0x1bc] ss:$24 sps:$4 sm:$0xff]   ;;  %v9371_v40 = vld [vmem:[#allocation8 + $0x1b8] ss:$24 sps:$4 sm:$0xff]  }
 0x36d   :  { %3413 = vmatprep.subr.bf16.mxu0 %v9338_v22  ;;  %v9372_v22 = vld [vmem:[#allocation8 + $0x18c] ss:$24 sps:$4 sm:$0xff]  }
 0x36f   :  { %2781 = vmatpush2.bf16.msra.mxu1 %v9339_v19  ;;  %v9373_v19 = vld [vmem:[#allocation8 + $0x188] ss:$24 sps:$4 sm:$0xff]  }
 0x370   :  { %3424 = vmatprep.subr.bf16.mxu1 %v9340_v1  ;;  %3414 = vmatpush2.bf16.msra.mxu0 %v9341_v13  ;;  %v9374_v1 = vld [vmem:[#allocation8 + $0x154] ss:$24 sps:$4 sm:$0xff]  }
 0x371   :  { %3465 = vmatprep.subr.bf16.mxu0 %v9342_v26 }
 0x372   :  { %2783 = vmatmul.mubr.bf16.vlgmr.msra.gmra.mxu1 %v11162_v10  ;;  %v9353_v10 = vld [vmem:[#allocation8 + $0x68] ss:$24 sps:$4 sm:$0xff]  }
 0x373   :  { %3425 = vmatpush1.bf16.msra.mxu1 %v9343_v51 }
 0x374   :  { %3426 = vmatprep.subr.bf16.mxu1 %v9344_v16 }
 0x377   :  { %3427 = vmatpush1.bf16.msra.mxu1 %v9345_v9 }
 0x378   :  { %3428 = vmatprep.subr.bf16.mxu1 %v9346_v58 }
 0x37b   :  { %3429 = vmatpush1.bf16.msra.mxu1 %v9347_v31 }
 0x37c   :  { %3430 = vmatprep.subr.bf16.mxu1 %v9348_v20 }
 0x37f   :  { %3431 = vmatpush1.bf16.msra.mxu1 %v9349_v44 }
 0x380   :  { %3432 = vmatprep.subr.bf16.mxu1 %v9350_v53 }
 0x383   :  { %3433 = vmatpush1.bf16.msra.mxu1 %v9351_v5 }
 0x384   :  { %3434 = vmatprep.subr.bf16.mxu1 %v9352_v35 }
 0x387   :  { %3435 = vmatpush1.bf16.msra.mxu1 %v9353_v10 }
 0x388   :  { %3436 = vmatprep.subr.bf16.mxu1 %v9354_v50 }
 0x38b   :  { %3437 = vmatpush1.bf16.msra.mxu1 %v9355_v25 }
 0x38c   :  { %3438 = vmatprep.subr.bf16.mxu1 %v9356_v54 }
 0x38f   :  { %3439 = vmatpush1.bf16.msra.mxu1 %v9357_v36 }
 0x390   :  { %3440 = vmatprep.subr.bf16.mxu1 %v9358_v24 }
 0x393   :  { %3441 = vmatpush2.bf16.msra.mxu1 %v9359_v33 }
 0x394   :  { %3442 = vmatprep.subr.bf16.mxu1 %v9360_v46  ;;  %v13130_v46 = vld [vmem:[#allocation28_spill] sm:$0xff] }
 0x397   :  { %3443 = vmatpush2.bf16.msra.mxu1 %v9361_v12 }
 0x398   :  { %3444 = vmatprep.subr.bf16.mxu1 %v9362_v32  ;;  %v13131_v32 = vld [vmem:[#allocation29_spill] sm:$0xff] }
 0x39b   :  { %3445 = vmatpush2.bf16.msra.mxu1 %v9363_v52 }
 0x39c   :  { %3446 = vmatprep.subr.bf16.mxu1 %v9364_v48  ;;  %v13132_v48 = vld [vmem:[#allocation30_spill] sm:$0xff] }
 0x39f   :  { %3447 = vmatpush2.bf16.msra.mxu1 %v9365_v45 }
 0x3a0   :  { %3448 = vmatprep.subr.bf16.mxu1 %v9366_v47 }
 0x3a3   :  { %3449 = vmatpush2.bf16.msra.mxu1 %v9367_v57 }
 0x3a4   :  { %3450 = vmatprep.subr.bf16.mxu1 %v9368_v7 }
 0x3a7   :  { %3451 = vmatpush2.bf16.msra.mxu1 %v9369_v2  ;;  %v13133_v2 = vld [vmem:[#allocation31_spill] sm:$0xff] }
 0x3a8   :  { %3452 = vmatprep.subr.bf16.mxu1 %v9370_v37 }
 0x3ab   :  { %3453 = vmatpush2.bf16.msra.mxu1 %v9371_v40 }
 0x3ac   :  { %3454 = vmatprep.subr.bf16.mxu1 %v9372_v22 }
 0x3af   :  { %3455 = vmatpush2.bf16.msra.mxu1 %v9373_v19 }
 0x3b0   :  { %4098 = vmatprep.subr.bf16.mxu1 %v9374_v1 }
 0x3f2   :  { %v2702_v13 = vpop.f32.mrf.mxu1  ;;  %v2743_v26 = vpop.f32.mrf.mxu0 }
 0x3f3   :  { %v2703_v51 = vadd.f32 %v2702_v13, %v13092_v8  ;;  %v11169_v16 = vadd.f32 %v2743_v26, %v10461_v38  ;;  %v13164_v38 = vld [vmem:[#allocation61_spill] sm:$0xff] }
 0x3f4   :  { %v2704_v9 = vpop.f32.mrf.mxu1  ;;  %v11171_v58 = vpop.f32.mrf.mxu0 }
 0x3f5   :  { %v2793_v31 = vrot.slane %v2703_v51, 6  ;;  %v2795_v20 = vrot.slane %v2703_v51, 7  ;;  %v2797_v44 = vrot.slane %v2703_v51, 1  ;;  %v2799_v53 = vrot.slane %v2703_v51, 2 }
 0x3f6   :  { %v2801_v5 = vrot.slane %v2703_v51, 3  ;;  %v2803_v35 = vrot.slane %v2703_v51, 4  ;;  %v2805_v10 = vrot.slane %v2703_v51, 5  ;;  %v2827_v50 = vadd.f32 %v2703_v51, %v10386_v14  ;;  %v2706_v25 = vpop.f32.mrf.mxu1  ;;  %v2747_v54 = vpop.f32.mrf.mxu0  ;;  %v13161_v14 = vld [vmem:[#allocation62_spill] sm:$0xff] }
 0x3f7   :  { %v2823_v36 = vadd.f32 %v2793_v31, %v13094_v17  ;;  %v2825_v24 = vadd.f32 %v2795_v20, %v13093_v4  ;;  %v2829_v33 = vadd.f32 %v2797_v44, %v10389_v3  ;;  %v2831_v12 = vadd.f32 %v2799_v53, %v13130_v46  ;;  %v13134_v53 = vld [vmem:[#allocation41_spill] sm:$0xff] }
 0x3f8   :  { %v2833_v52 = vadd.f32 %v2801_v5, %v13131_v32  ;;  %v2835_v45 = vadd.f32 %v2803_v35, %v13132_v48  ;;  %v7430_v47 = vmul.f32 -1.442695, %v2827_v50  ;;  %v2707_v57 = vpop.f32.mrf.mxu1  ;;  %v2748_v7 = vpop.f32.mrf.mxu0  ;;  %v2837_v37 = vadd.f32 %v2805_v10, %v13133_v2  ;;  %v13135_v50 = vld [vmem:[#allocation45_spill] sm:$0xff]  ;;  %v13156_v2 = vld [vmem:[#allocation55_spill] sm:$0xff] }
 0x3f9   :  { %v7426_v40 = vmul.f32 -1.442695, %v2823_v36  ;;  %v7428_v22 = vmul.f32 -1.442695, %v2825_v24  ;;  %v7432_v19 = vmul.f32 -1.442695, %v2829_v33 }
 0x3fa   :  { %8223 = vpow2.f32 %v7430_v47  ;;  %v7434_v1 = vmul.f32 -1.442695, %v2831_v12  ;;  %v7436_v13 = vmul.f32 -1.442695, %v2833_v52  ;;  %v2937_v26 = vrot.slane %v11169_v16, 6  ;;  %v13136_v36 = vld [vmem:[#allocation47_spill] sm:$0xff] }
 0x3fb   :  { %8225 = vpow2.f32 %v7426_v40  ;;  %v2939_v51 = vrot.slane %v11169_v16, 7  ;;  %v7438_v31 = vmul.f32 -1.442695, %v2835_v45  ;;  %v7440_v20 = vmul.f32 -1.442695, %v2837_v37  ;;  %v13137_v12 = vld [vmem:[#allocation49_spill] sm:$0xff] }
 0x3fc   :  { %8227 = vpow2.f32 %v7428_v22  ;;  %v2941_v44 = vrot.slane %v11169_v16, 1  ;;  %v2967_v5 = vadd.f32 %v2937_v26, %v13134_v53  ;;  %v2943_v35 = vrot.slane %v11169_v16, 2  ;;  %v13138_v45 = vld [vmem:[#allocation52_spill] sm:$0xff]  ;;  %v13139_v57 = vld [vmem:[#allocation54_spill] sm:$0xff]  ;;  %v13141_v26 = vld [vmem:[#allocation21_spill] sm:$0xff] }
 0x3fd   :  { %8229 = vpow2.f32 %v7432_v19  ;;  %v2945_v10 = vrot.slane %v11169_v16, 3  ;;  %v2969_v25 = vadd.f32 %v2939_v51, %v13135_v50  ;;  %v2947_v54 = vrot.slane %v11169_v16, 4  ;;  %v13140_v40 = vld [vmem:[#allocation56_spill] sm:$0xff]  ;;  %v13146_v50 = vld [vmem:[#allocation35_spill] sm:$0xff] }
 0x3fe   :  { %8231 = vpow2.f32 %v7434_v1  ;;  %v2971_v24 = vadd.f32 %v11169_v16, %v13136_v36  ;;  %v7442_v33 = vmul.f32 -1.442695, %v2967_v5  ;;  %v2973_v52 = vadd.f32 %v2941_v44, %v13137_v12 }
 0x3ff   :  { %8233 = vpow2.f32 %v7436_v13  ;;  %v2975_v47 = vadd.f32 %v2943_v35, %v13138_v45  ;;  %v2977_v7 = vadd.f32 %v2945_v10, %v13139_v57  ;;  %v7444_v37 = vmul.f32 -1.442695, %v2969_v25 }
 0x400   :  { %8235 = vpow2.f32 %v7438_v31  ;;  %v2979_v22 = vadd.f32 %v2947_v54, %v13140_v40  ;;  %v7446_v19 = vmul.f32 -1.442695, %v2971_v24  ;;  %v7448_v1 = vmul.f32 -1.442695, %v2973_v52 }
 0x401   :  { %8237 = vpow2.f32 %v7440_v20  ;;  %v7450_v13 = vmul.f32 -1.442695, %v2975_v47  ;;  %v2705_v51 = vadd.f32 %v2704_v9, %v13141_v26  ;;  %v7452_v36 = vmul.f32 -1.442695, %v2977_v7 }
 0x402   :  { %8239 = vpow2.f32 %v7442_v33  ;;  %v7454_v20 = vmul.f32 -1.442695, %v2979_v22 }
 0x403   :  { %8241 = vpow2.f32 %v7444_v37  ;;  %v2794_v10 = vrot.slane %v2705_v51, 6  ;;  %v2796_v24 = vrot.slane %v2705_v51, 7  ;;  %v2798_v7 = vrot.slane %v2705_v51, 1 }
 0x404   :  { %8243 = vpow2.f32 %v7446_v19  ;;  %v13142_v19 = vld [vmem:[#allocation43_spill] sm:$0xff]  ;;  %v2802_v40 = vrot.slane %v2705_v51, 3 }
 0x405   :  { %8245 = vpow2.f32 %v7448_v1  ;;  %v11198_v22 = vadd.f32 %v11171_v58, %v13142_v19  ;;  %v2806_v19 = vrot.slane %v2705_v51, 5 }
 0x406   :  { %8247 = vpow2.f32 %v7450_v13  ;;  %v2800_v13 = vrot.slane %v2705_v51, 2 }
 0x407   :  { %v8224_v31 = vpop.eup %8223  ;;  %8249 = vpow2.f32 %v7452_v36 }
 0x408   :  { %v8226_v5 = vpop.eup %8225  ;;  %v2891_v12 = vadd.f32 1.0, %v8224_v31  ;;  %8251 = vpow2.f32 %v7454_v20 }
 0x409   :  { %v8228_v44 = vpop.eup %8227  ;;  %v2887_v33 = vadd.f32 1.0, %v8226_v5  ;;  %v13143_v5 = vld [vmem:[#allocation32_spill] sm:$0xff] }
 0x40a   :  { %v8230_v35 = vpop.eup %8229  ;;  %v2889_v54 = vadd.f32 1.0, %v8228_v44  ;;  %8253 = vrcp.f32 %v2891_v12  ;;  %v2824_v26 = vadd.f32 %v2794_v10, %v13143_v5  ;;  %v2804_v12 = vrot.slane %v2705_v51, 4 }
 0x40b   :  { %v8232_v25 = vpop.eup %8231  ;;  %v2893_v47 = vadd.f32 1.0, %v8230_v35  ;;  %8255 = vrcp.f32 %v2887_v33  ;;  %v13144_v35 = vld [vmem:[#allocation33_spill] sm:$0xff]  ;;  %v13147_v33 = vld [vmem:[#allocation36_spill] sm:$0xff] }
 0x40c   :  { %v8234_v52 = vpop.eup %8233  ;;  %v2895_v37 = vadd.f32 1.0, %v8232_v25  ;;  %8257 = vrcp.f32 %v2889_v54  ;;  %v2826_v20 = vadd.f32 %v2796_v24, %v13144_v35  ;;  %v13145_v25 = vld [vmem:[#allocation34_spill] sm:$0xff]  ;;  %v2832_v53 = vadd.f32 %v2800_v13, %v13147_v33  ;;  %v13148_v54 = vld [vmem:[#allocation37_spill] sm:$0xff] }
 0x40d   :  { %v8236_v9 = vpop.eup %8235  ;;  %v2897_v31 = vadd.f32 1.0, %v8234_v52  ;;  %8259 = vrcp.f32 %v2893_v47  ;;  %v2828_v45 = vadd.f32 %v2705_v51, %v13145_v25  ;;  %v2830_v52 = vadd.f32 %v2798_v7, %v13146_v50  ;;  %v13149_v25 = vld [vmem:[#allocation38_spill] sm:$0xff]  ;;  %v13150_v7 = vld [vmem:[#allocation39_spill] sm:$0xff] }
 0x40e   :  { %v8238_v1 = vpop.eup %8237  ;;  %v2899_v36 = vadd.f32 1.0, %v8236_v9  ;;  %8261 = vrcp.f32 %v2895_v37  ;;  %v7427_v10 = vmul.f32 -1.442695, %v2824_v26  ;;  %v2938_v9 = vrot.slane %v11198_v22, 6 }
 0x40f   :  { %v8240_v44 = vpop.eup %8239  ;;  %v2901_v57 = vadd.f32 1.0, %v8238_v1  ;;  %8263 = vrcp.f32 %v2897_v31  ;;  %v2834_v5 = vadd.f32 %v2802_v40, %v13148_v54  ;;  %v7429_v24 = vmul.f32 -1.442695, %v2826_v20  ;;  %v13151_v20 = vld [vmem:[#allocation42_spill] sm:$0xff] }
 0x410   :  { %v3031_v58 = vadd.f32 1.0, %v8240_v44  ;;  %8265 = vrcp.f32 %v2899_v36  ;;  %v2940_v47 = vrot.slane %v11198_v22, 7  ;;  %v8242_v1 = vpop.eup %8241  ;;  %v2836_v37 = vadd.f32 %v2804_v12, %v13149_v25  ;;  %v13152_v12 = vld [vmem:[#allocation46_spill] sm:$0xff] }
 0x411   :  { %8267 = vrcp.f32 %v2901_v57  ;;  %v7431_v44 = vmul.f32 -1.442695, %v2828_v45  ;;  %v8244_v51 = vpop.eup %8243  ;;  %v2838_v31 = vadd.f32 %v2806_v19, %v13150_v7  ;;  %v7433_v50 = vmul.f32 -1.442695, %v2830_v52 }
 0x412   :  { %8269 = vrcp.f32 %v3031_v58  ;;  %v2942_v26 = vrot.slane %v11198_v22, 1  ;;  %v8246_v13 = vpop.eup %8245  ;;  %v7435_v36 = vmul.f32 -1.442695, %v2832_v53  ;;  %v2944_v40 = vrot.slane %v11198_v22, 2 }
 0x413   :  { %8271 = vpow2.f32 %v7427_v10  ;;  %v2968_v54 = vadd.f32 %v2938_v9, %v13151_v20  ;;  %v11213_v33 = vpop.eup %8247  ;;  %v7437_v57 = vmul.f32 -1.442695, %v2834_v5  ;;  %v2946_v45 = vrot.slane %v11198_v22, 3  ;;  %v13153_v10 = vld [vmem:[#allocation48_spill] sm:$0xff]  ;;  %v13154_v5 = vld [vmem:[#allocation51_spill] sm:$0xff] }
 0x414   :  { %8273 = vpow2.f32 %v7429_v24  ;;  %v2970_v58 = vadd.f32 %v2940_v47, %v13152_v12  ;;  %v11217_v25 = vpop.eup %8249  ;;  %v7439_v19 = vmul.f32 -1.442695, %v2836_v37  ;;  %v2948_v52 = vrot.slane %v11198_v22, 4  ;;  %v13155_v47 = vld [vmem:[#allocation53_spill] sm:$0xff] }
 0x415   :  { %8275 = vpow2.f32 %v7431_v44  ;;  %v2972_v53 = vadd.f32 %v11198_v22, %v13153_v10  ;;  %v11222_v7 = vpop.eup %8251  ;;  %v7441_v9 = vmul.f32 -1.442695, %v2838_v31  ;;  %v2950_v24 = vrot.slane %v11198_v22, 5 }
 0x416   :  { %8277 = vpow2.f32 %v7433_v50  ;;  %v2974_v20 = vadd.f32 %v2942_v26, %v13154_v5  ;;  %v2976_v12 = vadd.f32 %v2944_v40, %v13155_v47  ;;  %v7443_v44 = vmul.f32 -1.442695, %v2968_v54  ;;  %v13157_v50 = vld [vmem:[#allocation57_spill] sm:$0xff] }
 0x417   :  { %v11226_v35 = vpop.eup %8253  ;;  %8279 = vpow2.f32 %v7435_v36  ;;  %v2978_v48 = vadd.f32 %v2946_v45, %v13156_v2  ;;  %v7445_v10 = vmul.f32 -1.442695, %v2970_v58  ;;  %v2980_v31 = vadd.f32 %v2948_v52, %v13157_v50  ;;  %v13158_v36 = vld [vmem:[#allocation58_spill] sm:$0xff] }
 0x418   :  { %v11229_v37 = vpop.eup %8255  ;;  %8281 = vpow2.f32 %v7437_v57  ;;  %v7447_v22 = vmul.f32 -1.442695, %v2972_v53  ;;  %v7449_v26 = vmul.f32 -1.442695, %v2974_v20  ;;  %v2982_v5 = vadd.f32 %v2950_v24, %v13158_v36 }
 0x419   :  { %v11232_v32 = vpop.eup %8257  ;;  %8283 = vpow2.f32 %v7439_v19  ;;  %v7451_v54 = vmul.f32 -1.442695, %v2976_v12  ;;  %v7453_v45 = vmul.f32 -1.442695, %v2978_v48  ;;  %v7455_v19 = vmul.f32 -1.442695, %v2980_v31 }
 0x41a   :  { %v11235_v46 = vpop.eup %8259  ;;  %8285 = vpow2.f32 %v7441_v9  ;;  %v7457_v53 = vmul.f32 -1.442695, %v2982_v5  ;;  %v3033_v20 = vadd.f32 1.0, %v8242_v1  ;;  %v3035_v36 = vadd.f32 1.0, %v8244_v51 }
 0x41b   :  { %v11238_v40 = vpop.eup %8261  ;;  %8287 = vpow2.f32 %v7443_v44  ;;  %v3037_v44 = vadd.f32 1.0, %v8246_v13 }
 0x41c   :  { %v11240_v57 = vpop.eup %8263  ;;  %8289 = vpow2.f32 %v7445_v10 }
 0x41d   :  { %v11242_v58 = vpop.eup %8265  ;;  %8291 = vpow2.f32 %v7447_v22 }
 0x41e   :  { %v11244_v52 = vpop.eup %8267  ;;  %8293 = vpow2.f32 %v7449_v26 }
 0x41f   :  { %v11246_v9 = vpop.eup %8269  ;;  %8295 = vpow2.f32 %v7451_v54 }
 0x420   :  { %v8272_v24 = vpop.eup %8271  ;;  %8297 = vpow2.f32 %v7453_v45 }
 0x421   :  { %v8274_v12 = vpop.eup %8273  ;;  %8299 = vpow2.f32 %v7455_v19  ;;  %v2888_v48 = vadd.f32 1.0, %v8272_v24 }
 0x422   :  { %v8276_v10 = vpop.eup %8275  ;;  %8301 = vpow2.f32 %v7457_v53  ;;  %v2890_v31 = vadd.f32 1.0, %v8274_v12  ;;  %v2949_v53 = vrot.slane %v11169_v16, 5 }
 0x423   :  { %v8278_v50 = vpop.eup %8277  ;;  %8303 = vrcp.f32 %v3033_v20  ;;  %v2892_v26 = vadd.f32 1.0, %v8276_v10 }
 0x424   :  { %v8280_v22 = vpop.eup %8279  ;;  %8305 = vrcp.f32 %v3035_v36  ;;  %v2894_v2 = vadd.f32 1.0, %v8278_v50 }
 0x425   :  { %v8282_v5 = vpop.eup %8281  ;;  %8307 = vrcp.f32 %v3037_v44  ;;  %v2896_v54 = vadd.f32 1.0, %v8280_v22 }
 0x426   :  { %v8284_v1 = vpop.eup %8283  ;;  %8309 = vrcp.f32 %v2888_v48  ;;  %v2898_v45 = vadd.f32 1.0, %v8282_v5  ;;  %v13159_v5 = vld [vmem:[#allocation59_spill] sm:$0xff] }
 0x427   :  { %v8286_v51 = vpop.eup %8285  ;;  %8311 = vrcp.f32 %v2890_v31  ;;  %v2900_v19 = vadd.f32 1.0, %v8284_v1  ;;  %v2981_v31 = vadd.f32 %v2949_v53, %v13159_v5 }
 0x428   :  { %v8288_v13 = vpop.eup %8287  ;;  %8313 = vrcp.f32 %v2892_v26  ;;  %v2902_v20 = vadd.f32 1.0, %v8286_v51 }
 0x429   :  { %v8290_v24 = vpop.eup %8289  ;;  %8315 = vrcp.f32 %v2894_v2  ;;  %v3032_v36 = vadd.f32 1.0, %v8288_v13 }
 0x42a   :  { %v8292_v12 = vpop.eup %8291  ;;  %8317 = vrcp.f32 %v2896_v54  ;;  %v3034_v50 = vadd.f32 1.0, %v8290_v24 }
 0x42b   :  { %v8294_v10 = vpop.eup %8293  ;;  %8319 = vrcp.f32 %v2898_v45  ;;  %v3036_v48 = vadd.f32 1.0, %v8292_v12  ;;  %v13160_v45 = vld [vmem:[#allocation44_spill] sm:$0xff]  ;;  %v7456_v12 = vmul.f32 -1.442695, %v2981_v31 }
 0x42c   :  { %v8296_v44 = vpop.eup %8295  ;;  %8321 = vrcp.f32 %v2900_v19  ;;  %v3038_v1 = vadd.f32 1.0, %v8294_v10 }
 0x42d   :  { %v8298_v22 = vpop.eup %8297  ;;  %8323 = vrcp.f32 %v2902_v20  ;;  %v3040_v47 = vadd.f32 1.0, %v8296_v44 }
 0x42e   :  { %v8300_v26 = vpop.eup %8299  ;;  %8325 = vrcp.f32 %v3032_v36  ;;  %v3042_v51 = vadd.f32 1.0, %v8298_v22 }
 0x42f   :  { %v8302_v16 = vpop.eup %8301  ;;  %8327 = vrcp.f32 %v3034_v50  ;;  %v3044_v19 = vadd.f32 1.0, %v8300_v26 }
 0x430   :  { %v11250_v54 = vpop.eup %8303  ;;  %8329 = vrcp.f32 %v3036_v48  ;;  %v3046_v20 = vadd.f32 1.0, %v8302_v16 }
 0x431   :  { %v11255_v24 = vpop.eup %8305  ;;  %8331 = vrcp.f32 %v3038_v1 }
 0x432   :  { %v2784_v2 = vpop.f32.mrf.mxu1  ;;  %v11257_v10 = vpop.eup %8307  ;;  %8333 = vrcp.f32 %v3040_v47  ;;  %v13162_v47 = vld [vmem:[#allocation50_spill] sm:$0xff] }
 0x433   :  { %v11253_v13 = vadd.f32 %v2784_v2, %v13160_v45  ;;  %v8310_v48 = vpop.eup %8309  ;;  %8335 = vrcp.f32 %v3042_v51 }
 0x434   :  { %v2786_v53 = vpop.f32.mrf.mxu1  ;;  %v8312_v2 = vpop.eup %8311  ;;  %8337 = vrcp.f32 %v3044_v19 }
 0x435   :  { %v3081_v36 = vrot.slane %v11253_v13, 6  ;;  %v3083_v50 = vrot.slane %v11253_v13, 7  ;;  %v3085_v44 = vrot.slane %v11253_v13, 1  ;;  %v3115_v22 = vmul.f32 %v11226_v35, %v11253_v13  ;;  %v8314_v45 = vpop.eup %8313 }
 0x436   :  { %v2788_v26 = vpop.f32.mrf.mxu1  ;;  %v3087_v5 = vrot.slane %v11253_v13, 2  ;;  %v2787_v17 = vadd.f32 %v2786_v53, %v13162_v47  ;;  %8339 = vrcp.f32 %v3046_v20  ;;  %v8316_v35 = vpop.eup %8315 }
 0x437   :  { %v3111_v31 = vmul.f32 %v11229_v37, %v3081_v36  ;;  %v3113_v1 = vmul.f32 %v11232_v32, %v3083_v50  ;;  %v3117_v16 = vmul.f32 %v11235_v46, %v3085_v44  ;;  %v3131_v4 = vadd.f32 %v3115_v22, %v13161_v14  ;;  %v13163_v26 = vld [vmem:[#allocation60_spill] sm:$0xff]  ;;  %v8318_v32 = vpop.eup %8317 }
 0x438   :  { %v2789_v3 = vpop.f32.mrf.mxu1  ;;  %v13165_v37 = vld [vmem:[#allocation64_spill] sm:$0xff]  ;;  %8341 = vpow2.f32 %v7456_v12  ;;  %v3082_v46 = vrot.slane %v2787_v17, 6  ;;  %v3084_v19 = vrot.slane %v2787_v17, 7  ;;  %v3086_v50 = vrot.slane %v2787_v17, 1  ;;  %v8320_v44 = vpop.eup %8319 }
 0x439   :  { %v3127_v51 = vadd.f32 %v3111_v31, %v13163_v26  ;;  %v3129_v8 = vadd.f32 %v3113_v1, %v13164_v38  ;;  %v3133_v36 = vadd.f32 %v3117_v16, %v13165_v37  ;;  %8343 = vtanh.f32 %v3131_v4  ;;  %v8322_v3 = vpop.eup %8321 }
 0x43a   :  { %v3088_v22 = vrot.slane %v2787_v17, 2  ;;  %v3090_v14 = vrot.slane %v2787_v17, 3  ;;  %v3116_v53 = vmul.f32 %v8314_v45, %v2787_v17  ;;  %v3112_v20 = vmul.f32 %v8310_v48, %v3082_v46  ;;  %v8324_v26 = vpop.eup %8323 }
 0x43b   :  { %8345 = vtanh.f32 %v3127_v51  ;;  %v3114_v47 = vmul.f32 %v8312_v2, %v3084_v19  ;;  %v3118_v31 = vmul.f32 %v8316_v35, %v3086_v50  ;;  %v3092_v16 = vrot.slane %v2787_v17, 4  ;;  %v11274_v4 = vpop.eup %8325 }
 0x43c   :  { %8347 = vtanh.f32 %v3129_v8  ;;  %v3120_v1 = vmul.f32 %v8318_v32, %v3088_v22  ;;  %v3132_v12 = vadd.f32 %v3116_v53, %v13117_v11  ;;  %v3128_v38 = vadd.f32 %v3112_v20, %v10614_v49  ;;  %v11278_v45 = vpop.eup %8327 }
 0x43d   :  { %8349 = vtanh.f32 %v3133_v36  ;;  %v3130_v51 = vadd.f32 %v3114_v47, %v10623_v42  ;;  %v3094_v37 = vrot.slane %v2787_v17, 5  ;;  %v3122_v34 = vmul.f32 %v8320_v44, %v3090_v14  ;;  %v11282_v35 = vpop.eup %8329 }
 0x43e   :  { %8351 = vtanh.f32 %v3132_v12  ;;  %v3124_v8 = vmul.f32 %v8322_v3, %v3092_v16  ;;  %v3134_v48 = vadd.f32 %v3118_v31, %v13118_v6  ;;  %v3136_v2 = vadd.f32 %v3120_v1, %v13119_v18  ;;  %v11286_v19 = vpop.eup %8331  ;;  %v13166_v1 = vld [vmem:[#allocation17_spill] sm:$0xff]  ;;  %v13167_v16 = vld [vmem:[#allocation20_spill] sm:$0xff] }
 0x43f   :  { %v3089_v36 = vrot.slane %v11253_v13, 3  ;;  %8353 = vtanh.f32 %v3128_v38  ;;  %v3126_v32 = vmul.f32 %v8324_v26, %v3094_v37  ;;  %v3138_v46 = vadd.f32 %v3122_v34, %v13120_v43  ;;  %v11290_v47 = vpop.eup %8333 }
 0x440   :  { %v3091_v14 = vrot.slane %v11253_v13, 4  ;;  %8355 = vtanh.f32 %v3130_v51  ;;  %v3140_v17 = vadd.f32 %v3124_v8, %v13121_v62  ;;  %v3093_v50 = vrot.slane %v11253_v13, 5  ;;  %v11294_v22 = vpop.eup %8335 }
 0x441   :  { %v3142_v44 = vadd.f32 %v3126_v32, %v13122_v28  ;;  %8357 = vtanh.f32 %v3134_v48  ;;  %v3119_v38 = vmul.f32 %v11238_v40, %v3087_v5  ;;  %v3039_v34 = vadd.f32 1.0, %v11213_v33  ;;  %v11298_v26 = vpop.eup %8337 }
 0x442   :  { %8359 = vtanh.f32 %v3136_v2  ;;  %v3121_v37 = vmul.f32 %v11240_v57, %v3089_v36  ;;  %v3041_v53 = vadd.f32 1.0, %v11217_v25  ;;  %v3043_v13 = vadd.f32 1.0, %v11222_v7  ;;  %v13168_v7 = vld [vmem:[#allocation27_spill] sm:$0xff] }
 0x443   :  { %8361 = vtanh.f32 %v3138_v46  ;;  %v11302_v3 = vpop.eup %8339  ;;  %v3123_v20 = vmul.f32 %v11242_v58, %v3091_v14  ;;  %v3125_v40 = vmul.f32 %v11244_v52, %v3093_v50  ;;  %v3135_v12 = vadd.f32 %v3119_v38, %v13166_v1  ;;  %v13169_v52 = vld [vmem:[#allocation68_spill] sm:$0xff] }
 0x444   :  { %8363 = vtanh.f32 %v3140_v17  ;;  %v3137_v25 = vadd.f32 %v3121_v37, %v13167_v16 }
 0x445   :  { %v8342_v31 = vpop.eup %8341  ;;  %8365 = vtanh.f32 %v3142_v44  ;;  %v3139_v48 = vadd.f32 %v3123_v20, %v13168_v7  ;;  %v3141_v36 = vadd.f32 %v3125_v40, %v13169_v52 }
 0x446   :  { %v8344_v5 = vpop.eup %8343  ;;  %v3045_v33 = vadd.f32 1.0, %v8342_v31  ;;  %8367 = vrcp.f32 %v3039_v34 }
 0x447   :  { %8369 = vrcp.f32 %v3041_v53  ;;  %v3179_v51 = vrot.slane %v8344_v5, 1 }
 0x448   :  { %v8346_v57 = vpop.eup %8345  ;;  %8371 = vrcp.f32 %v3043_v13 }
 0x449   :  { %v11309_v8 = vpop.eup %8347  ;;  %v3175_v58 = vrot.slane %v8346_v57, 1  ;;  %8373 = vrcp.f32 %v3045_v33  ;;  %v3211_v46 = vsub.f32 %v11119_v63, %v3179_v51 }
 0x44a   :  { %v11312_v2 = vpop.eup %8349  ;;  %v3177_v32 = vrot.slane %v11309_v8, 1  ;;  %8375 = vtanh.f32 %v3135_v12 }
 0x44b   :  { %v3181_v14 = vrot.slane %v11312_v2, 1  ;;  %v3207_v17 = vsub.f32 %v11050_v27, %v3175_v58  ;;  %v8352_v50 = vpop.eup %8351  ;;  %8377 = vtanh.f32 %v3137_v25  ;;  %v3243_v38 = vrot.slane %v3211_v46, 7 }
 0x44c   :  { %v3209_v44 = vsub.f32 %v11043_v39, %v3177_v32  ;;  %v8354_v34 = vpop.eup %8353  ;;  %v3180_v37 = vrot.slane %v8352_v50, 1  ;;  %8379 = vtanh.f32 %v3139_v48 }
 0x44d   :  { %v3213_v53 = vsub.f32 %v11124_v0, %v3181_v14  ;;  %v3239_v13 = vrot.slane %v3207_v17, 7  ;;  %v8356_v20 = vpop.eup %8355  ;;  %v3176_v31 = vrot.slane %v8354_v34, 1  ;;  %8381 = vtanh.f32 %v3141_v36 }
 0x44e   :  { %v3241_v63 = vrot.slane %v3209_v44, 7  ;;  %v3275_v40 = vmul.f32 %v11255_v24, %v3243_v38  ;;  %v8358_v33 = vpop.eup %8357  ;;  %v3178_v12 = vrot.slane %v8356_v20, 1  ;;  %v3212_v27 = vsub.f32 %v11073_v30, %v3180_v37 }
 0x44f   :  { %v3245_v25 = vrot.slane %v3213_v53, 7  ;;  %v3271_v39 = vmul.f32 %v11246_v9, %v3239_v13  ;;  %v8360_v51 = vpop.eup %8359  ;;  %v3182_v58 = vrot.slane %v8358_v33, 1  ;;  %v3208_v48 = vsub.f32 %v11068_v56, %v3176_v31 }
 0x450   :  { %v11326_v0 = vmul.f32 %v11250_v54, %v3241_v63  ;;  %v11328_v32 = vadd.f32 %v8344_v5, %v3275_v40  ;;  %v8362_v36 = vpop.eup %8361  ;;  %v3184_v46 = vrot.slane %v8360_v51, 1  ;;  %v3210_v24 = vsub.f32 %v11062_v23, %v3178_v12 }
 0x451   :  { %v3244_v14 = vrot.slane %v3212_v27, 7  ;;  %v11332_v17 = vmul.f32 %v11257_v10, %v3245_v25  ;;  %v8364_v30 = vpop.eup %8363  ;;  %v3186_v44 = vrot.slane %v8362_v36, 1  ;;  %v3214_v9 = vsub.f32 %v11080_v55, %v3182_v58 }
 0x452   :  { %v3240_v38 = vrot.slane %v3208_v48, 7  ;;  %v11335_v37 = vadd.f32 %v8346_v57, %v3271_v39  ;;  %v8366_v56 = vpop.eup %8365  ;;  %v3188_v54 = vrot.slane %v8364_v30, 1  ;;  %v3216_v5 = vsub.f32 %v11085_v29, %v3184_v46 }
 0x453   :  { %v3242_v53 = vrot.slane %v3210_v24, 7  ;;  %v3276_v13 = vmul.f32 %v11282_v35, %v3244_v14  ;;  %v11339_v31 = vpop.eup %8367  ;;  %v3190_v23 = vrot.slane %v8366_v56, 1  ;;  %v3218_v10 = vsub.f32 %v11090_v15, %v3186_v44 }
 0x454   :  { %v3246_v63 = vrot.slane %v3214_v9, 7  ;;  %v3272_v40 = vmul.f32 %v11274_v4, %v3240_v38  ;;  %v11343_v12 = vpop.eup %8369  ;;  %v3220_v55 = vsub.f32 %v11094_v59, %v3188_v54  ;;  %v3248_v57 = vrot.slane %v3216_v5, 7 }
 0x455   :  { %v3274_v27 = vmul.f32 %v11278_v45, %v3242_v53  ;;  %v11347_v25 = vadd.f32 %v8352_v50, %v3276_v13  ;;  %v11349_v29 = vpop.eup %8371  ;;  %v3222_v35 = vsub.f32 %v11099_v61, %v3190_v23  ;;  %v3250_v39 = vrot.slane %v3218_v10, 7 }
 0x456   :  { %v3278_v58 = vmul.f32 %v11286_v19, %v3246_v63  ;;  %v11353_v15 = vadd.f32 %v8354_v34, %v3272_v40  ;;  %v11355_v48 = vpop.eup %8373  ;;  %v3252_v4 = vrot.slane %v3220_v55, 7  ;;  %v3280_v46 = vmul.f32 %v11290_v47, %v3248_v57 }
 0x457   :  { %v11358_v59 = vadd.f32 %v8356_v20, %v3274_v27  ;;  %v3308_v45 = vpack.c.bf16 %v11347_v25, %v11347_v25  ;;  %v8376_v50 = vpop.eup %8375  ;;  %v3254_v24 = vrot.slane %v3222_v35, 7  ;;  %v3282_v14 = vmul.f32 %v11294_v22, %v3250_v39 }
 0x458   :  { %v11363_v61 = vadd.f32 %v8358_v33, %v3278_v58  ;;  %v3304_v19 = vpack.c.bf16 %v11353_v15, %v11353_v15  ;;  %v8378_v34 = vpop.eup %8377  ;;  %v3284_v44 = vmul.f32 %v11298_v26, %v3252_v4  ;;  %v11368_v9 = vadd.f32 %v8360_v51, %v3280_v46 }
 0x459   :  { %v3306_v47 = vpack.c.bf16 %v11358_v59, %v11358_v59  ;;  %v3340_v20 = vunpack.c.l.b16 %v3308_v45  ;;  %v8380_v38 = vpop.eup %8379  ;;  %v3286_v54 = vmul.f32 %v11302_v3, %v3254_v24  ;;  %v11373_v5 = vadd.f32 %v8362_v36, %v3282_v14 }
 0x45a   :  { %v3310_v22 = vpack.c.bf16 %v11363_v61, %v11363_v61  ;;  %v3336_v33 = vunpack.c.l.b16 %v3304_v19  ;;  %v8382_v53 = vpop.eup %8381  ;;  %v11377_v13 = vadd.f32 %v8364_v30, %v3284_v44  ;;  %v3312_v26 = vpack.c.bf16 %v11368_v9, %v11368_v9 }
 0x45b   :  { %v3338_v51 = vunpack.c.l.b16 %v3306_v47  ;;  %v3183_v23 = vrot.slane %v8376_v50, 1  ;;  %v11381_v10 = vadd.f32 %v8366_v56, %v3286_v54  ;;  %v3314_v63 = vpack.c.bf16 %v11373_v5, %v11373_v5 }
 0x45c   :  { %v3342_v3 = vunpack.c.l.b16 %v3310_v22  ;;  %v3365_v36 = vrot.slane %v3336_v33, 2  ;;  %v3316_v40 = vpack.c.bf16 %v11377_v13, %v11377_v13  ;;  %v3344_v55 = vunpack.c.l.b16 %v3312_v26 }
 0x45d   :  { %13170 = vst [vmem:[#allocation65_spill] sm:$0xff] %v11381_v10  ;;  %v3366_v57 = vrot.slane %v3338_v51, 1  ;;  %v3185_v27 = vrot.slane %v8378_v34, 1  ;;  %v3318_v30 = vpack.c.bf16 %v11381_v10, %v11381_v10  ;;  %v3346_v35 = vunpack.c.l.b16 %v3314_v63  ;;  %v13171_v63 = vld [vmem:[#allocation63_spill] sm:$0xff] }
 0x45e   :  { %v3369_v39 = vrot.slane %v3342_v3, 7  ;;  %v3187_v58 = vrot.slane %v8380_v38, 1  ;;  %v3348_v4 = vunpack.c.l.b16 %v3316_v40  ;;  %v3371_v46 = vrot.slane %v3344_v55, 6 }
 0x45f   :  { %v3367_v56 = vsel %vm1771_vm0, %v3366_v57, %v3365_v36  ;;  %v3189_v45 = vrot.slane %v8382_v53, 1  ;;  %v3350_v24 = vunpack.c.l.b16 %v3318_v30  ;;  %v3373_v19 = vrot.slane %v3346_v35, 5 }
 0x460   :  { %v3368_v14 = vsel %vm1774_vm1, %v3340_v20, %v3367_v56  ;;  %v3215_v44 = vsub.f32 %v11137_v41, %v3183_v23  ;;  %v3375_v54 = vrot.slane %v3348_v4, 4  ;;  %v3217_v22 = vsub.f32 %v11139_v21, %v3185_v27 }
 0x461   :  { %v3370_v47 = vsel %vm1777_vm2, %v3369_v39, %v3368_v14  ;;  %v3219_v33 = vsub.f32 %v11143_v60, %v3187_v58  ;;  %v3377_v51 = vrot.slane %v3350_v24, 3  ;;  %v3221_v3 = vsub.f32 %v13171_v63, %v3189_v45 }
 0x462   :  { %v3372_v26 = vsel %vm1780_vm3, %v3371_v46, %v3370_v47  ;;  %v3247_v36 = vrot.slane %v3215_v44, 7  ;;  %v3249_v55 = vrot.slane %v3217_v22, 7  ;;  %v11400_v41 = vadd.f32 %v11309_v8, %v11326_v0 }
 0x463   :  { %v3374_v40 = vsel %vm1783_vm4, %v3373_v19, %v3372_v26  ;;  %v3251_v20 = vrot.slane %v3219_v33, 7  ;;  %v3253_v57 = vrot.slane %v3221_v3, 7  ;;  %v11406_v60 = vadd.f32 %v11312_v2, %v11332_v17 }
 0x464   :  { %v3376_v23 = vsel %vm1786_vm5, %v3375_v54, %v3374_v40  ;;  %v3279_v21 = vmul.f32 %v11339_v31, %v3247_v36  ;;  %v3281_v30 = vmul.f32 %v11343_v12, %v3249_v55  ;;  %v3303_v39 = vpack.c.bf16 %v11335_v37, %v11335_v37 }
 0x465   :  { %v3378_v27 = vsel %vm1789_vm6, %v3377_v51, %v3376_v23  ;;  %v3283_v35 = vmul.f32 %v11349_v29, %v3251_v20  ;;  %v3285_v0 = vmul.f32 %v11355_v48, %v3253_v57  ;;  %v3305_v31 = vpack.c.bf16 %v11400_v41, %v11400_v41 }
 0x466   :  { %v3380_v8 = vpack.c.b16 %v3378_v27, %v3378_v27  ;;  %v11414_v58 = vadd.f32 %v8376_v50, %v3279_v21  ;;  %v11418_v4 = vadd.f32 %v8378_v34, %v3281_v30  ;;  %v3307_v17 = vpack.c.bf16 %v11328_v32, %v11328_v32  ;;  %v9375_v27 = vld [vmem:[#allocation8 + $0x160] ss:$24 sps:$4 sm:$0xff]   ;;  %v9376_v30 = vld [vmem:[#allocation8 + $0x134] ss:$24 sps:$4 sm:$0xff]  }
 0x467   :  { %v11420_v2 = vadd.f32 %v8380_v38, %v3283_v35  ;;  %v3309_v12 = vpack.c.bf16 %v11406_v60, %v11406_v60  ;;  %v11426_v29 = vadd.f32 %v8382_v53, %v3285_v0  ;;  %v3335_v50 = vunpack.c.l.b16 %v3303_v39  ;;  %v9377_v35 = vld [vmem:[#allocation8 + $0x150] ss:$24 sps:$4 sm:$0xff]   ;;  %v9378_v39 = vld [vmem:[#allocation8 + $0x124] ss:$24 sps:$4 sm:$0xff]  }
 0x468   :  { %13172 = vst [vmem:[#allocation19_spill] sm:$0xff] %v11414_v58  ;;  %13173 = vst [vmem:[#allocation22_spill] sm:$0xff] %v11418_v4  ;;  %3415 = vmatprep.mubr.bf16.mxu0 %v3380_v8  ;;  %3456 = vmatprep.mubr.bf16.mxu1 %v3380_v8  ;;  %v3311_v48 = vpack.c.bf16 %v11414_v58, %v11414_v58  ;;  %v3337_v56 = vunpack.c.l.b16 %v3305_v31  ;;  %v3313_v34 = vpack.c.bf16 %v11418_v4, %v11418_v4  ;;  %v9379_v0 = vld [vmem:[#allocation8 + $0x130] ss:$24 sps:$4 sm:$0xff]   ;;  %v9380_v31 = vld [vmem:[#allocation8 + $0x104] ss:$24 sps:$4 sm:$0xff]  }
 0x469   :  { %13174 = vst [vmem:[#allocation66_spill] sm:$0xff] %v11420_v2  ;;  %13175 = vst [vmem:[#allocation67_spill] sm:$0xff] %v11426_v29  ;;  %v3315_v38 = vpack.c.bf16 %v11420_v2, %v11420_v2  ;;  %v3341_v46 = vunpack.c.l.b16 %v3309_v12  ;;  %v3317_v45 = vpack.c.bf16 %v11426_v29, %v11426_v29  ;;  %v3351_v14 = vrot.slane %v3335_v50, 2  ;;  %v9382_v12 = vld [vmem:[#allocation8 + $0xf4] ss:$24 sps:$4 sm:$0xff]  }
 0x46a   :  { %v3343_v24 = vunpack.c.l.b16 %v3311_v48  ;;  %v3352_v19 = vrot.slane %v3337_v56, 1  ;;  %v3339_v53 = vunpack.c.l.b16 %v3307_v17  ;;  %v3345_v44 = vunpack.c.l.b16 %v3313_v34  ;;  %v9381_v17 = vld [vmem:[#allocation8 + $0x120] ss:$24 sps:$4 sm:$0xff]   ;;  %v9384_v50 = vld [vmem:[#allocation8 + $0xd4] ss:$24 sps:$4 sm:$0xff]  }
 0x46b   :  { %v3347_v47 = vunpack.c.l.b16 %v3315_v38  ;;  %v3349_v54 = vunpack.c.l.b16 %v3317_v45  ;;  %v3355_v33 = vrot.slane %v3341_v46, 7  ;;  %v9383_v48 = vld [vmem:[#allocation8 + $0x100] ss:$24 sps:$4 sm:$0xff]   ;;  %v9385_v56 = vld [vmem:[#allocation8 + $0xf0] ss:$24 sps:$4 sm:$0xff]  }
 0x46c   :  { %v3353_v22 = vsel %vm1771_vm0, %v3352_v19, %v3351_v14  ;;  %v3357_v51 = vrot.slane %v3343_v24, 6  ;;  %v3359_v3 = vrot.slane %v3345_v44, 5  ;;  %v9387_v34 = vld [vmem:[#allocation8 + $0xd0] ss:$24 sps:$4 sm:$0xff]   ;;  %v9388_v38 = vld [vmem:[#allocation8 + $0xa4] ss:$24 sps:$4 sm:$0xff]  }
 0x46d   :  { %v3354_v26 = vsel %vm1774_vm1, %v3339_v53, %v3353_v22  ;;  %v3361_v40 = vrot.slane %v3347_v47, 4  ;;  %v3363_v20 = vrot.slane %v3349_v54, 3  ;;  %v9389_v46 = vld [vmem:[#allocation8 + $0xc0] ss:$24 sps:$4 sm:$0xff]   ;;  %v9390_v45 = vld [vmem:[#allocation8 + $0x94] ss:$24 sps:$4 sm:$0xff]  }
 0x46e   :  { %v3356_v63 = vsel %vm1777_vm2, %v3355_v33, %v3354_v26  ;;  %v9391_v24 = vld [vmem:[#allocation8 + $0xa0] ss:$24 sps:$4 sm:$0xff]   ;;  %v9392_v14 = vld [vmem:[#allocation8 + $0x74] ss:$24 sps:$4 sm:$0xff]   ;;  %v9393_v19 = vld [vmem:[#allocation8 + $0x90] ss:$24 sps:$4 sm:$0xff]  }
 0x46f   :  { %v3358_v36 = vsel %vm1780_vm3, %v3357_v51, %v3356_v63  ;;  %v9394_v53 = vld [vmem:[#allocation8 + $0x64] ss:$24 sps:$4 sm:$0xff]   ;;  %v9395_v44 = vld [vmem:[#allocation8 + $0x70] ss:$24 sps:$4 sm:$0xff]   ;;  %v9397_v54 = vld [vmem:[#allocation8 + $0x60] ss:$24 sps:$4 sm:$0xff]  }
 0x470   :  { %v3360_v55 = vsel %vm1783_vm4, %v3359_v3, %v3358_v36  ;;  %v9396_v47 = vld [vmem:[#allocation8 + $0x44] ss:$24 sps:$4 sm:$0xff]   ;;  %v9398_v22 = vld [vmem:[#allocation8 + $0x34] ss:$24 sps:$4 sm:$0xff]   ;;  %v9399_v33 = vld [vmem:[#allocation8 + $0x40] ss:$24 sps:$4 sm:$0xff]  }
 0x471   :  { %v3362_v23 = vsel %vm1786_vm5, %v3361_v40, %v3360_v55  ;;  %v9400_v26 = vld [vmem:[#allocation8 + $0x14] ss:$24 sps:$4 sm:$0xff]   ;;  %v9401_v51 = vld [vmem:[#allocation8 + $0x30] ss:$24 sps:$4 sm:$0xff]   ;;  %v9402_v63 = vld [vmem:[#allocation8 + $0x4] ss:$24 sps:$4 sm:$0xff]  }
 0x472   :  { %v3364_v57 = vsel %vm1789_vm6, %v3363_v20, %v3362_v23  ;;  %v9403_v3 = vld [vmem:[#allocation8 + $0x10] ss:$24 sps:$4 sm:$0xff]   ;;  %v9404_v36 = vld [vmem:[#allocation8 + $0x2e4] ss:$24 sps:$4 sm:$0xff]   ;;  %v9405_v40 = vld [vmem:[#allocation8] ss:$24 sps:$4 sm:$0xff]  }
 0x473   :  { %v11443_v21 = vpack.c.b16 %v3364_v57, %v3364_v57  ;;  %v9406_v55 = vld [vmem:[#allocation8 + $0x2d4] ss:$24 sps:$4 sm:$0xff]   ;;  %v9407_v20 = vld [vmem:[#allocation8 + $0x2e0] ss:$24 sps:$4 sm:$0xff]   ;;  %v9409_v57 = vld [vmem:[#allocation8 + $0x2d0] ss:$24 sps:$4 sm:$0xff]  }
 0x474   :  { %v9408_v23 = vld [vmem:[#allocation8 + $0x2b4] ss:$24 sps:$4 sm:$0xff]  }
 0x475   :  { %3416 = vmatmul.mubr.bf16.vlgmr.msra.gmra.mxu0 %v11443_v21  ;;  %3457 = vmatmul.mubr.bf16.vlgmr.msra.gmra.mxu1 %v11443_v21  ;;  %v13216_v4 = vld [vmem:[#allocation61_spill] sm:$0xff] }
 0x476   :  { %3466 = vmatpush1.bf16.msra.mxu0 %v9375_v27  ;;  %3497 = vmatprep.mubr.bf16.mxu0 %v3380_v8  ;;  %v9386_v8 = vld [vmem:[#allocation8 + $0xc4] ss:$24 sps:$4 sm:$0xff]  }
 0x477   :  { %3467 = vmatprep.subr.bf16.mxu0 %v9376_v30  ;;  %4099 = vmatpush1.bf16.msra.mxu1 %v9377_v35  ;;  %v9410_v27 = vld [vmem:[#allocation8 + $0x2a4] ss:$24 sps:$4 sm:$0xff]   ;;  %v9411_v30 = vld [vmem:[#allocation8 + $0x2b0] ss:$24 sps:$4 sm:$0xff]  }
 0x478   :  { %4100 = vmatprep.subr.bf16.mxu1 %v9378_v39  ;;  %v9412_v35 = vld [vmem:[#allocation8 + $0x284] ss:$24 sps:$4 sm:$0xff]   ;;  %v9413_v39 = vld [vmem:[#allocation8 + $0x2a0] ss:$24 sps:$4 sm:$0xff]  }
 0x47a   :  { %3468 = vmatpush1.bf16.msra.mxu0 %v9379_v0  ;;  %v9414_v0 = vld [vmem:[#allocation8 + $0x274] ss:$24 sps:$4 sm:$0xff]  }
 0x47b   :  { %3469 = vmatprep.subr.bf16.mxu0 %v9380_v31  ;;  %4101 = vmatpush1.bf16.msra.mxu1 %v9381_v17  ;;  %v9415_v31 = vld [vmem:[#allocation8 + $0x280] ss:$24 sps:$4 sm:$0xff]   ;;  %v9416_v17 = vld [vmem:[#allocation8 + $0x254] ss:$24 sps:$4 sm:$0xff]  }
 0x47c   :  { %4102 = vmatprep.subr.bf16.mxu1 %v9382_v12  ;;  %v9417_v12 = vld [vmem:[#allocation8 + $0x270] ss:$24 sps:$4 sm:$0xff]  }
 0x47e   :  { %3470 = vmatpush1.bf16.msra.mxu0 %v9383_v48  ;;  %v9418_v48 = vld [vmem:[#allocation8 + $0x244] ss:$24 sps:$4 sm:$0xff]  }
 0x47f   :  { %3471 = vmatprep.subr.bf16.mxu0 %v9384_v50  ;;  %4103 = vmatpush1.bf16.msra.mxu1 %v9385_v56  ;;  %v9419_v50 = vld [vmem:[#allocation8 + $0x250] ss:$24 sps:$4 sm:$0xff]   ;;  %v9420_v56 = vld [vmem:[#allocation8 + $0x224] ss:$24 sps:$4 sm:$0xff]  }
 0x480   :  { %4104 = vmatprep.subr.bf16.mxu1 %v9386_v8  ;;  %v9421_v8 = vld [vmem:[#allocation8 + $0x240] ss:$24 sps:$4 sm:$0xff]  }
 0x482   :  { %3472 = vmatpush1.bf16.msra.mxu0 %v9387_v34  ;;  %v9422_v34 = vld [vmem:[#allocation8 + $0x214] ss:$24 sps:$4 sm:$0xff]  }
 0x483   :  { %3473 = vmatprep.subr.bf16.mxu0 %v9388_v38  ;;  %4105 = vmatpush1.bf16.msra.mxu1 %v9389_v46  ;;  %v9423_v38 = vld [vmem:[#allocation8 + $0x220] ss:$24 sps:$4 sm:$0xff]   ;;  %v9424_v46 = vld [vmem:[#allocation8 + $0x1f4] ss:$24 sps:$4 sm:$0xff]  }
 0x484   :  { %4106 = vmatprep.subr.bf16.mxu1 %v9390_v45  ;;  %v9425_v45 = vld [vmem:[#allocation8 + $0x210] ss:$24 sps:$4 sm:$0xff]  }
 0x486   :  { %3474 = vmatpush1.bf16.msra.mxu0 %v9391_v24  ;;  %v9426_v24 = vld [vmem:[#allocation8 + $0x1e4] ss:$24 sps:$4 sm:$0xff]  }
 0x487   :  { %3475 = vmatprep.subr.bf16.mxu0 %v9392_v14  ;;  %4107 = vmatpush1.bf16.msra.mxu1 %v9393_v19  ;;  %v9427_v14 = vld [vmem:[#allocation8 + $0x1f0] ss:$24 sps:$4 sm:$0xff]   ;;  %v9428_v19 = vld [vmem:[#allocation8 + $0x1c4] ss:$24 sps:$4 sm:$0xff]  }
 0x488   :  { %4108 = vmatprep.subr.bf16.mxu1 %v9394_v53  ;;  %v9429_v53 = vld [vmem:[#allocation8 + $0x1e0] ss:$24 sps:$4 sm:$0xff]  }
 0x48a   :  { %3476 = vmatpush1.bf16.msra.mxu0 %v9395_v44  ;;  %v9430_v44 = vld [vmem:[#allocation8 + $0x1b4] ss:$24 sps:$4 sm:$0xff]  }
 0x48b   :  { %3477 = vmatprep.subr.bf16.mxu0 %v9396_v47  ;;  %4109 = vmatpush1.bf16.msra.mxu1 %v9397_v54  ;;  %v9431_v47 = vld [vmem:[#allocation8 + $0x1c0] ss:$24 sps:$4 sm:$0xff]   ;;  %v9432_v54 = vld [vmem:[#allocation8 + $0x194] ss:$24 sps:$4 sm:$0xff]  }
 0x48c   :  { %4110 = vmatprep.subr.bf16.mxu1 %v9398_v22  ;;  %v9433_v22 = vld [vmem:[#allocation8 + $0x1b0] ss:$24 sps:$4 sm:$0xff]  }
 0x48e   :  { %3478 = vmatpush1.bf16.msra.mxu0 %v9399_v33  ;;  %v9434_v33 = vld [vmem:[#allocation8 + $0x184] ss:$24 sps:$4 sm:$0xff]  }
 0x48f   :  { %3479 = vmatprep.subr.bf16.mxu0 %v9400_v26  ;;  %4111 = vmatpush1.bf16.msra.mxu1 %v9401_v51  ;;  %v9435_v26 = vld [vmem:[#allocation8 + $0x190] ss:$24 sps:$4 sm:$0xff]   ;;  %v9436_v51 = vld [vmem:[#allocation8 + $0x15c] ss:$24 sps:$4 sm:$0xff]  }
 0x490   :  { %4112 = vmatprep.subr.bf16.mxu1 %v9402_v63  ;;  %v9437_v63 = vld [vmem:[#allocation8 + $0x180] ss:$24 sps:$4 sm:$0xff]  }
 0x492   :  { %3480 = vmatpush1.bf16.msra.mxu0 %v9403_v3  ;;  %v9438_v3 = vld [vmem:[#allocation8 + $0x164] ss:$24 sps:$4 sm:$0xff]  }
 0x493   :  { %3481 = vmatprep.subr.bf16.mxu0 %v9404_v36  ;;  %4113 = vmatpush1.bf16.msra.mxu1 %v9405_v40  ;;  %v9439_v36 = vld [vmem:[#allocation8 + $0x158] ss:$24 sps:$4 sm:$0xff]   ;;  %v9440_v40 = vld [vmem:[#allocation8 + $0x12c] ss:$24 sps:$4 sm:$0xff]  }
 0x494   :  { %4114 = vmatprep.subr.bf16.mxu1 %v9406_v55  ;;  %v9441_v55 = vld [vmem:[#allocation8 + $0x128] ss:$24 sps:$4 sm:$0xff]  }
 0x496   :  { %3482 = vmatpush2.bf16.msra.mxu0 %v9407_v20  ;;  %v9442_v20 = vld [vmem:[#allocation8 + $0xfc] ss:$24 sps:$4 sm:$0xff]  }
 0x497   :  { %3483 = vmatprep.subr.bf16.mxu0 %v9408_v23  ;;  %4115 = vmatpush2.bf16.msra.mxu1 %v9409_v57  ;;  %v9443_v23 = vld [vmem:[#allocation8 + $0xf8] ss:$24 sps:$4 sm:$0xff]   ;;  %v9444_v57 = vld [vmem:[#allocation8 + $0xcc] ss:$24 sps:$4 sm:$0xff]  }
 0x498   :  { %4116 = vmatprep.subr.bf16.mxu1 %v9410_v27  ;;  %v9445_v27 = vld [vmem:[#allocation8 + $0xc8] ss:$24 sps:$4 sm:$0xff]  }
 0x49a   :  { %3484 = vmatpush2.bf16.msra.mxu0 %v9411_v30  ;;  %v9446_v30 = vld [vmem:[#allocation8 + $0x9c] ss:$24 sps:$4 sm:$0xff]  }
 0x49b   :  { %3485 = vmatprep.subr.bf16.mxu0 %v9412_v35  ;;  %4117 = vmatpush2.bf16.msra.mxu1 %v9413_v39  ;;  %v9447_v35 = vld [vmem:[#allocation8 + $0x98] ss:$24 sps:$4 sm:$0xff]   ;;  %v9448_v39 = vld [vmem:[#allocation8 + $0x6c] ss:$24 sps:$4 sm:$0xff]  }
 0x49c   :  { %4118 = vmatprep.subr.bf16.mxu1 %v9414_v0  ;;  %v9450_v0 = vld [vmem:[#allocation8 + $0x3c] ss:$24 sps:$4 sm:$0xff]  }
 0x49e   :  { %3486 = vmatpush2.bf16.msra.mxu0 %v9415_v31  ;;  %v9451_v31 = vld [vmem:[#allocation8 + $0x38] ss:$24 sps:$4 sm:$0xff]  }
 0x49f   :  { %3487 = vmatprep.subr.bf16.mxu0 %v9416_v17  ;;  %4119 = vmatpush2.bf16.msra.mxu1 %v9417_v12  ;;  %v9452_v17 = vld [vmem:[#allocation8 + $0xc] ss:$24 sps:$4 sm:$0xff]   ;;  %v9453_v12 = vld [vmem:[#allocation8 + $0x8] ss:$24 sps:$4 sm:$0xff]  }
 0x4a0   :  { %4120 = vmatprep.subr.bf16.mxu1 %v9418_v48  ;;  %v9454_v48 = vld [vmem:[#allocation8 + $0x2dc] ss:$24 sps:$4 sm:$0xff]  }
 0x4a2   :  { %3488 = vmatpush2.bf16.msra.mxu0 %v9419_v50  ;;  %v9455_v50 = vld [vmem:[#allocation8 + $0x2d8] ss:$24 sps:$4 sm:$0xff]  }
 0x4a3   :  { %3489 = vmatprep.subr.bf16.mxu0 %v9420_v56  ;;  %4121 = vmatpush2.bf16.msra.mxu1 %v9421_v8  ;;  %v9456_v56 = vld [vmem:[#allocation8 + $0x2ac] ss:$24 sps:$4 sm:$0xff]   ;;  %v9457_v8 = vld [vmem:[#allocation8 + $0x2a8] ss:$24 sps:$4 sm:$0xff]  }
 0x4a4   :  { %4122 = vmatprep.subr.bf16.mxu1 %v9422_v34  ;;  %v9458_v34 = vld [vmem:[#allocation8 + $0x27c] ss:$24 sps:$4 sm:$0xff]  }
 0x4a6   :  { %3490 = vmatpush2.bf16.msra.mxu0 %v9423_v38  ;;  %v9459_v38 = vld [vmem:[#allocation8 + $0x278] ss:$24 sps:$4 sm:$0xff]  }
 0x4a7   :  { %3491 = vmatprep.subr.bf16.mxu0 %v9424_v46  ;;  %4123 = vmatpush2.bf16.msra.mxu1 %v9425_v45  ;;  %v9460_v46 = vld [vmem:[#allocation8 + $0x24c] ss:$24 sps:$4 sm:$0xff]   ;;  %v9461_v45 = vld [vmem:[#allocation8 + $0x248] ss:$24 sps:$4 sm:$0xff]  }
 0x4a8   :  { %4124 = vmatprep.subr.bf16.mxu1 %v9426_v24  ;;  %v9462_v24 = vld [vmem:[#allocation8 + $0x21c] ss:$24 sps:$4 sm:$0xff]  }
 0x4aa   :  { %3492 = vmatpush2.bf16.msra.mxu0 %v9427_v14  ;;  %v9463_v14 = vld [vmem:[#allocation8 + $0x218] ss:$24 sps:$4 sm:$0xff]  }
 0x4ab   :  { %3493 = vmatprep.subr.bf16.mxu0 %v9428_v19  ;;  %4125 = vmatpush2.bf16.msra.mxu1 %v9429_v53  ;;  %v9464_v19 = vld [vmem:[#allocation8 + $0x1ec] ss:$24 sps:$4 sm:$0xff]   ;;  %v9465_v53 = vld [vmem:[#allocation8 + $0x1e8] ss:$24 sps:$4 sm:$0xff]  }
 0x4ac   :  { %4126 = vmatprep.subr.bf16.mxu1 %v9430_v44  ;;  %v9466_v44 = vld [vmem:[#allocation8 + $0x1bc] ss:$24 sps:$4 sm:$0xff]  }
 0x4ae   :  { %3494 = vmatpush2.bf16.msra.mxu0 %v9431_v47  ;;  %v9467_v47 = vld [vmem:[#allocation8 + $0x1b8] ss:$24 sps:$4 sm:$0xff]  }
 0x4af   :  { %3495 = vmatprep.subr.bf16.mxu0 %v9432_v54  ;;  %4127 = vmatpush2.bf16.msra.mxu1 %v9433_v22  ;;  %v9468_v54 = vld [vmem:[#allocation8 + $0x18c] ss:$24 sps:$4 sm:$0xff]   ;;  %v9469_v22 = vld [vmem:[#allocation8 + $0x188] ss:$24 sps:$4 sm:$0xff]  }
 0x4b0   :  { %4128 = vmatprep.subr.bf16.mxu1 %v9434_v33  ;;  %v9470_v33 = vld [vmem:[#allocation8 + $0x154] ss:$24 sps:$4 sm:$0xff]  }
 0x4b2   :  { %3496 = vmatpush2.bf16.msra.mxu0 %v9435_v26 }
 0x4b3   :  { %4139 = vmatprep.subr.bf16.mxu0 %v9436_v51  ;;  %4129 = vmatpush2.bf16.msra.mxu1 %v9437_v63  ;;  %v13176_v63 = vld [vmem:[#allocation18_spill] sm:$0xff] }
 0x4b4   :  { %4180 = vmatprep.subr.bf16.mxu1 %v9438_v3 }
 0x4b5   :  { %3498 = vmatmul.mubr.bf16.vlgmr.msra.gmra.mxu0 %v11443_v21  ;;  %v9449_v21 = vld [vmem:[#allocation8 + $0x68] ss:$24 sps:$4 sm:$0xff]  }
 0x4b6   :  { %4140 = vmatpush1.bf16.msra.mxu0 %v9439_v36  ;;  %v13177_v36 = vld [vmem:[#allocation40_spill] sm:$0xff] }
 0x4b7   :  { %4141 = vmatprep.subr.bf16.mxu0 %v9440_v40 }
 0x4ba   :  { %4142 = vmatpush1.bf16.msra.mxu0 %v9441_v55 }
 0x4bb   :  { %4143 = vmatprep.subr.bf16.mxu0 %v9442_v20 }
 0x4be   :  { %4144 = vmatpush1.bf16.msra.mxu0 %v9443_v23 }
 0x4bf   :  { %4145 = vmatprep.subr.bf16.mxu0 %v9444_v57 }
 0x4c2   :  { %4146 = vmatpush1.bf16.msra.mxu0 %v9445_v27 }
 0x4c3   :  { %4147 = vmatprep.subr.bf16.mxu0 %v9446_v30 }
 0x4c6   :  { %4148 = vmatpush1.bf16.msra.mxu0 %v9447_v35 }
 0x4c7   :  { %4149 = vmatprep.subr.bf16.mxu0 %v9448_v39 }
 0x4ca   :  { %4150 = vmatpush1.bf16.msra.mxu0 %v9449_v21 }
 0x4cb   :  { %4151 = vmatprep.subr.bf16.mxu0 %v9450_v0  ;;  %v13178_v0 = vld [vmem:[#allocation26_spill] sm:$0xff] }
 0x4ce   :  { %4152 = vmatpush1.bf16.msra.mxu0 %v9451_v31 }
 0x4cf   :  { %4153 = vmatprep.subr.bf16.mxu0 %v9452_v17 }
 0x4d2   :  { %4154 = vmatpush1.bf16.msra.mxu0 %v9453_v12 }
 0x4d3   :  { %4155 = vmatprep.subr.bf16.mxu0 %v9454_v48  ;;  %v13179_v48 = vld [vmem:[#allocation23_spill] sm:$0xff] }
 0x4d6   :  { %4156 = vmatpush2.bf16.msra.mxu0 %v9455_v50 }
 0x4d7   :  { %4157 = vmatprep.subr.bf16.mxu0 %v9456_v56  ;;  %v13180_v56 = vld [vmem:[#allocation24_spill] sm:$0xff] }
 0x4da   :  { %4158 = vmatpush2.bf16.msra.mxu0 %v9457_v8 }
 0x4db   :  { %4159 = vmatprep.subr.bf16.mxu0 %v9458_v34  ;;  %v13181_v34 = vld [vmem:[#allocation25_spill] sm:$0xff] }
 0x4de   :  { %4160 = vmatpush2.bf16.msra.mxu0 %v9459_v38 }
 0x4df   :  { %4161 = vmatprep.subr.bf16.mxu0 %v9460_v46  ;;  %v13182_v46 = vld [vmem:[#allocation28_spill] sm:$0xff] }
 0x4e2   :  { %4162 = vmatpush2.bf16.msra.mxu0 %v9461_v45 }
 0x4e3   :  { %4163 = vmatprep.subr.bf16.mxu0 %v9462_v24  ;;  %v13183_v24 = vld [vmem:[#allocation29_spill] sm:$0xff] }
 0x4e6   :  { %4164 = vmatpush2.bf16.msra.mxu0 %v9463_v14 }
 0x4e7   :  { %4165 = vmatprep.subr.bf16.mxu0 %v9464_v19  ;;  %v13184_v19 = vld [vmem:[#allocation30_spill] sm:$0xff] }
 0x4ea   :  { %4166 = vmatpush2.bf16.msra.mxu0 %v9465_v53 }
 0x4eb   :  { %4167 = vmatprep.subr.bf16.mxu0 %v9466_v44 }
 0x4ee   :  { %4168 = vmatpush2.bf16.msra.mxu0 %v9467_v47 }
 0x4ef   :  { %4169 = vmatprep.subr.bf16.mxu0 %v9468_v54 }
 0x4f2   :  { %4170 = vmatpush2.bf16.msra.mxu0 %v9469_v22  ;;  %v13185_v22 = vld [vmem:[#allocation31_spill] sm:$0xff] }
 0x4f3   :  { %4813 = vmatprep.subr.bf16.mxu0 %v9470_v33 }
 0x535   :  { %v3417_v26 = vpop.f32.mrf.mxu0  ;;  %v3458_v51 = vpop.f32.mrf.mxu1 }
 0x536   :  { %v3418_v3 = vadd.f32 %v3417_v26, %v13176_v63  ;;  %v11450_v40 = vadd.f32 %v3458_v51, %v13177_v36  ;;  %v13213_v36 = vld [vmem:[#allocation64_spill] sm:$0xff] }
 0x537   :  { %v3419_v55 = vpop.f32.mrf.mxu0  ;;  %v11452_v20 = vpop.f32.mrf.mxu1 }
 0x538   :  { %v3508_v23 = vrot.slane %v3418_v3, 5  ;;  %v3510_v57 = vrot.slane %v3418_v3, 6  ;;  %v3512_v27 = vrot.slane %v3418_v3, 7  ;;  %v3514_v30 = vrot.slane %v3418_v3, 1 }
 0x539   :  { %v3516_v35 = vrot.slane %v3418_v3, 2  ;;  %v3518_v39 = vrot.slane %v3418_v3, 3  ;;  %v3520_v21 = vrot.slane %v3418_v3, 4  ;;  %v3544_v31 = vadd.f32 %v3418_v3, %v13178_v0  ;;  %v3421_v17 = vpop.f32.mrf.mxu0  ;;  %v3462_v12 = vpop.f32.mrf.mxu1 }
 0x53a   :  { %v3538_v50 = vadd.f32 %v3508_v23, %v13179_v48  ;;  %v3540_v8 = vadd.f32 %v3510_v57, %v13180_v56  ;;  %v3542_v38 = vadd.f32 %v3512_v27, %v13181_v34  ;;  %v3546_v45 = vadd.f32 %v3514_v30, %v13182_v46  ;;  %v13186_v17 = vld [vmem:[#allocation41_spill] sm:$0xff]  ;;  %v13208_v34 = vld [vmem:[#allocation55_spill] sm:$0xff] }
 0x53b   :  { %v3548_v14 = vadd.f32 %v3516_v35, %v13183_v24  ;;  %v3550_v53 = vadd.f32 %v3518_v39, %v13184_v19  ;;  %v7464_v44 = vmul.f32 -1.442695, %v3544_v31  ;;  %v3422_v47 = vpop.f32.mrf.mxu0  ;;  %v3463_v54 = vpop.f32.mrf.mxu1  ;;  %v3552_v33 = vadd.f32 %v3520_v21, %v13185_v22  ;;  %v13198_v24 = vld [vmem:[#allocation35_spill] sm:$0xff] }
 0x53c   :  { %v7458_v26 = vmul.f32 -1.442695, %v3538_v50  ;;  %v7460_v51 = vmul.f32 -1.442695, %v3540_v8  ;;  %v7462_v3 = vmul.f32 -1.442695, %v3542_v38 }
 0x53d   :  { %8383 = vpow2.f32 %v7464_v44  ;;  %v7466_v23 = vmul.f32 -1.442695, %v3546_v45  ;;  %v7468_v57 = vmul.f32 -1.442695, %v3548_v14  ;;  %v3652_v27 = vrot.slane %v11450_v40, 5  ;;  %v13187_v8 = vld [vmem:[#allocation45_spill] sm:$0xff] }
 0x53e   :  { %8385 = vpow2.f32 %v7458_v26  ;;  %v3654_v30 = vrot.slane %v11450_v40, 6  ;;  %v7470_v35 = vmul.f32 -1.442695, %v3550_v53  ;;  %v3656_v39 = vrot.slane %v11450_v40, 7  ;;  %v13188_v14 = vld [vmem:[#allocation47_spill] sm:$0xff]  ;;  %v13189_v47 = vld [vmem:[#allocation49_spill] sm:$0xff] }
 0x53f   :  { %8387 = vpow2.f32 %v7460_v51  ;;  %v7472_v31 = vmul.f32 -1.442695, %v3552_v33  ;;  %v3682_v12 = vadd.f32 %v3652_v27, %v13186_v17  ;;  %v3658_v21 = vrot.slane %v11450_v40, 1  ;;  %v13190_v33 = vld [vmem:[#allocation52_spill] sm:$0xff]  ;;  %v13191_v51 = vld [vmem:[#allocation54_spill] sm:$0xff] }
 0x540   :  { %8389 = vpow2.f32 %v7462_v3  ;;  %v3660_v50 = vrot.slane %v11450_v40, 2  ;;  %v3684_v38 = vadd.f32 %v3654_v30, %v13187_v8  ;;  %v3662_v45 = vrot.slane %v11450_v40, 3  ;;  %v13193_v8 = vld [vmem:[#allocation21_spill] sm:$0xff] }
 0x541   :  { %8391 = vpow2.f32 %v7466_v23  ;;  %v3686_v44 = vadd.f32 %v3656_v39, %v13188_v14  ;;  %v7474_v53 = vmul.f32 -1.442695, %v3682_v12  ;;  %v3688_v54 = vadd.f32 %v11450_v40, %v13189_v47 }
 0x542   :  { %8393 = vpow2.f32 %v7468_v57  ;;  %v3690_v26 = vadd.f32 %v3658_v21, %v13190_v33  ;;  %v3692_v3 = vadd.f32 %v3660_v50, %v13191_v51  ;;  %v7476_v23 = vmul.f32 -1.442695, %v3684_v38  ;;  %v13192_v57 = vld [vmem:[#allocation56_spill] sm:$0xff] }
 0x543   :  { %8395 = vpow2.f32 %v7470_v35  ;;  %v3694_v27 = vadd.f32 %v3662_v45, %v13192_v57  ;;  %v7478_v17 = vmul.f32 -1.442695, %v3686_v44  ;;  %v7480_v30 = vmul.f32 -1.442695, %v3688_v54 }
 0x544   :  { %8397 = vpow2.f32 %v7472_v31  ;;  %v7482_v35 = vmul.f32 -1.442695, %v3690_v26  ;;  %v3420_v22 = vadd.f32 %v3419_v55, %v13193_v8  ;;  %v7484_v39 = vmul.f32 -1.442695, %v3692_v3 }
 0x545   :  { %8399 = vpow2.f32 %v7474_v53  ;;  %v7486_v12 = vmul.f32 -1.442695, %v3694_v27 }
 0x546   :  { %8401 = vpow2.f32 %v7476_v23  ;;  %v3509_v50 = vrot.slane %v3420_v22, 5  ;;  %v3511_v44 = vrot.slane %v3420_v22, 6  ;;  %v3513_v55 = vrot.slane %v3420_v22, 7 }
 0x547   :  { %8403 = vpow2.f32 %v7478_v17  ;;  %v13194_v17 = vld [vmem:[#allocation43_spill] sm:$0xff]  ;;  %v3517_v57 = vrot.slane %v3420_v22, 2 }
 0x548   :  { %8405 = vpow2.f32 %v7480_v30  ;;  %v11479_v27 = vadd.f32 %v11452_v20, %v13194_v17  ;;  %v3521_v17 = vrot.slane %v3420_v22, 4 }
 0x549   :  { %8407 = vpow2.f32 %v7482_v35  ;;  %v3515_v35 = vrot.slane %v3420_v22, 1 }
 0x54a   :  { %v8384_v19 = vpop.eup %8383  ;;  %8409 = vpow2.f32 %v7484_v39 }
 0x54b   :  { %v8386_v31 = vpop.eup %8385  ;;  %v3608_v14 = vadd.f32 1.0, %v8384_v19  ;;  %8411 = vpow2.f32 %v7486_v12 }
 0x54c   :  { %v8388_v47 = vpop.eup %8387  ;;  %v3602_v53 = vadd.f32 1.0, %v8386_v31  ;;  %v13195_v31 = vld [vmem:[#allocation32_spill] sm:$0xff] }
 0x54d   :  { %v8390_v21 = vpop.eup %8389  ;;  %v3604_v45 = vadd.f32 1.0, %v8388_v47  ;;  %8413 = vrcp.f32 %v3608_v14  ;;  %v3539_v8 = vadd.f32 %v3509_v50, %v13195_v31  ;;  %v13197_v14 = vld [vmem:[#allocation34_spill] sm:$0xff] }
 0x54e   :  { %v8392_v38 = vpop.eup %8391  ;;  %v3606_v26 = vadd.f32 1.0, %v8390_v21  ;;  %8415 = vrcp.f32 %v3602_v53  ;;  %v13196_v21 = vld [vmem:[#allocation33_spill] sm:$0xff]  ;;  %v3543_v33 = vadd.f32 %v3513_v55, %v13197_v14  ;;  %v13199_v53 = vld [vmem:[#allocation36_spill] sm:$0xff]  ;;  %v13201_v55 = vld [vmem:[#allocation38_spill] sm:$0xff]  ;;  %v3657_v14 = vrot.slane %v11479_v27, 7 }
 0x54f   :  { %v8394_v54 = vpop.eup %8393  ;;  %v3610_v3 = vadd.f32 1.0, %v8392_v38  ;;  %8417 = vrcp.f32 %v3604_v45  ;;  %v3541_v12 = vadd.f32 %v3511_v44, %v13196_v21  ;;  %v3519_v38 = vrot.slane %v3420_v22, 3  ;;  %v13200_v45 = vld [vmem:[#allocation37_spill] sm:$0xff] }
 0x550   :  { %v8396_v23 = vpop.eup %8395  ;;  %v3612_v30 = vadd.f32 1.0, %v8394_v54  ;;  %8419 = vrcp.f32 %v3606_v26  ;;  %v3545_v54 = vadd.f32 %v3420_v22, %v13198_v24  ;;  %v3547_v0 = vadd.f32 %v3515_v35, %v13199_v53 }
 0x551   :  { %v8398_v19 = vpop.eup %8397  ;;  %v3614_v39 = vadd.f32 1.0, %v8396_v23  ;;  %8421 = vrcp.f32 %v3610_v3  ;;  %v7459_v50 = vmul.f32 -1.442695, %v3539_v8  ;;  %v3653_v23 = vrot.slane %v11479_v27, 5 }
 0x552   :  { %v8400_v47 = vpop.eup %8399  ;;  %v3616_v51 = vadd.f32 1.0, %v8398_v19  ;;  %8423 = vrcp.f32 %v3612_v30  ;;  %v3549_v31 = vadd.f32 %v3517_v57, %v13200_v45  ;;  %v7461_v44 = vmul.f32 -1.442695, %v3541_v12  ;;  %v13202_v30 = vld [vmem:[#allocation39_spill] sm:$0xff]  ;;  %v13203_v12 = vld [vmem:[#allocation42_spill] sm:$0xff] }
 0x553   :  { %v3746_v20 = vadd.f32 1.0, %v8400_v47  ;;  %8425 = vrcp.f32 %v3614_v39  ;;  %v3655_v26 = vrot.slane %v11479_v27, 6  ;;  %v8402_v19 = vpop.eup %8401  ;;  %v3551_v3 = vadd.f32 %v3519_v38, %v13201_v55  ;;  %v13204_v38 = vld [vmem:[#allocation46_spill] sm:$0xff] }
 0x554   :  { %8427 = vrcp.f32 %v3616_v51  ;;  %v7463_v47 = vmul.f32 -1.442695, %v3543_v33  ;;  %v8404_v22 = vpop.eup %8403  ;;  %v3553_v35 = vadd.f32 %v3521_v17, %v13202_v30  ;;  %v7465_v8 = vmul.f32 -1.442695, %v3545_v54  ;;  %v13205_v54 = vld [vmem:[#allocation48_spill] sm:$0xff] }
 0x555   :  { %8429 = vrcp.f32 %v3746_v20  ;;  %v8406_v53 = vpop.eup %8405  ;;  %v7467_v39 = vmul.f32 -1.442695, %v3547_v0  ;;  %v3659_v57 = vrot.slane %v11479_v27, 1  ;;  %v3683_v45 = vadd.f32 %v3653_v23, %v13203_v12 }
 0x556   :  { %8431 = vpow2.f32 %v7459_v50  ;;  %v11494_v24 = vpop.eup %8407  ;;  %v7469_v51 = vmul.f32 -1.442695, %v3549_v31  ;;  %v3661_v33 = vrot.slane %v11479_v27, 2  ;;  %v3685_v55 = vadd.f32 %v3655_v26, %v13204_v38  ;;  %v13207_v26 = vld [vmem:[#allocation53_spill] sm:$0xff] }
 0x557   :  { %8433 = vpow2.f32 %v7461_v44  ;;  %v11498_v21 = vpop.eup %8409  ;;  %v7471_v17 = vmul.f32 -1.442695, %v3551_v3  ;;  %v3663_v20 = vrot.slane %v11479_v27, 3  ;;  %v3687_v0 = vadd.f32 %v3657_v14, %v13205_v54  ;;  %v13206_v44 = vld [vmem:[#allocation51_spill] sm:$0xff] }
 0x558   :  { %8435 = vpow2.f32 %v7463_v47  ;;  %v11502_v50 = vpop.eup %8411  ;;  %v7473_v23 = vmul.f32 -1.442695, %v3553_v35  ;;  %v3665_v12 = vrot.slane %v11479_v27, 4  ;;  %v3689_v31 = vadd.f32 %v11479_v27, %v13206_v44  ;;  %v13209_v35 = vld [vmem:[#allocation57_spill] sm:$0xff] }
 0x559   :  { %8437 = vpow2.f32 %v7465_v8  ;;  %v3691_v38 = vadd.f32 %v3659_v57, %v13207_v26  ;;  %v7475_v47 = vmul.f32 -1.442695, %v3683_v45  ;;  %v3693_v14 = vadd.f32 %v3661_v33, %v13208_v34 }
 0x55a   :  { %v11507_v30 = vpop.eup %8413  ;;  %8439 = vpow2.f32 %v7467_v39  ;;  %v7477_v54 = vmul.f32 -1.442695, %v3685_v55  ;;  %v3695_v8 = vadd.f32 %v3663_v20, %v13209_v35  ;;  %v7479_v48 = vmul.f32 -1.442695, %v3687_v0  ;;  %v13210_v39 = vld [vmem:[#allocation58_spill] sm:$0xff] }
 0x55b   :  { %v11510_v3 = vpop.eup %8415  ;;  %8441 = vpow2.f32 %v7469_v51  ;;  %v7481_v27 = vmul.f32 -1.442695, %v3689_v31  ;;  %v3697_v44 = vadd.f32 %v3665_v12, %v13210_v39  ;;  %v7483_v45 = vmul.f32 -1.442695, %v3691_v38 }
 0x55c   :  { %v11513_v56 = vpop.eup %8417  ;;  %8443 = vpow2.f32 %v7471_v17  ;;  %v7485_v55 = vmul.f32 -1.442695, %v3693_v14  ;;  %v7487_v17 = vmul.f32 -1.442695, %v3695_v8  ;;  %v3748_v31 = vadd.f32 1.0, %v8402_v19 }
 0x55d   :  { %v11516_v46 = vpop.eup %8419  ;;  %8445 = vpow2.f32 %v7473_v23  ;;  %v7489_v0 = vmul.f32 -1.442695, %v3697_v44  ;;  %v3750_v39 = vadd.f32 1.0, %v8404_v22 }
 0x55e   :  { %v11519_v57 = vpop.eup %8421  ;;  %8447 = vpow2.f32 %v7475_v47  ;;  %v3752_v47 = vadd.f32 1.0, %v8406_v53 }
 0x55f   :  { %v11521_v51 = vpop.eup %8423  ;;  %8449 = vpow2.f32 %v7477_v54 }
 0x560   :  { %v11523_v33 = vpop.eup %8425  ;;  %8451 = vpow2.f32 %v7479_v48 }
 0x561   :  { %v11525_v20 = vpop.eup %8427  ;;  %8453 = vpow2.f32 %v7481_v27 }
 0x562   :  { %v11527_v23 = vpop.eup %8429  ;;  %8455 = vpow2.f32 %v7483_v45 }
 0x563   :  { %v8432_v12 = vpop.eup %8431  ;;  %8457 = vpow2.f32 %v7485_v55 }
 0x564   :  { %v8434_v38 = vpop.eup %8433  ;;  %8459 = vpow2.f32 %v7487_v17  ;;  %v3603_v14 = vadd.f32 1.0, %v8432_v12 }
 0x565   :  { %v8436_v54 = vpop.eup %8435  ;;  %8461 = vpow2.f32 %v7489_v0  ;;  %v3605_v48 = vadd.f32 1.0, %v8434_v38  ;;  %v3664_v0 = vrot.slane %v11450_v40, 4 }
 0x566   :  { %v8438_v35 = vpop.eup %8437  ;;  %8463 = vrcp.f32 %v3748_v31  ;;  %v3607_v27 = vadd.f32 1.0, %v8436_v54 }
 0x567   :  { %v8440_v8 = vpop.eup %8439  ;;  %8465 = vrcp.f32 %v3750_v39  ;;  %v3609_v34 = vadd.f32 1.0, %v8438_v35 }
 0x568   :  { %v8442_v44 = vpop.eup %8441  ;;  %8467 = vrcp.f32 %v3752_v47  ;;  %v3611_v45 = vadd.f32 1.0, %v8440_v8 }
 0x569   :  { %v8444_v19 = vpop.eup %8443  ;;  %8469 = vrcp.f32 %v3603_v14  ;;  %v3613_v55 = vadd.f32 1.0, %v8442_v44  ;;  %v13211_v44 = vld [vmem:[#allocation59_spill] sm:$0xff] }
 0x56a   :  { %v8446_v22 = vpop.eup %8445  ;;  %8471 = vrcp.f32 %v3605_v48  ;;  %v3615_v17 = vadd.f32 1.0, %v8444_v19  ;;  %v3696_v48 = vadd.f32 %v3664_v0, %v13211_v44 }
 0x56b   :  { %v8448_v53 = vpop.eup %8447  ;;  %8473 = vrcp.f32 %v3607_v27  ;;  %v3617_v31 = vadd.f32 1.0, %v8446_v22 }
 0x56c   :  { %v8450_v12 = vpop.eup %8449  ;;  %8475 = vrcp.f32 %v3609_v34  ;;  %v3747_v39 = vadd.f32 1.0, %v8448_v53  ;;  %v13212_v53 = vld [vmem:[#allocation44_spill] sm:$0xff] }
 0x56d   :  { %v8452_v38 = vpop.eup %8451  ;;  %8477 = vrcp.f32 %v3611_v45  ;;  %v3749_v35 = vadd.f32 1.0, %v8450_v12 }
 0x56e   :  { %v8454_v54 = vpop.eup %8453  ;;  %8479 = vrcp.f32 %v3613_v55  ;;  %v3751_v14 = vadd.f32 1.0, %v8452_v38  ;;  %v7488_v38 = vmul.f32 -1.442695, %v3696_v48 }
 0x56f   :  { %v8456_v47 = vpop.eup %8455  ;;  %8481 = vrcp.f32 %v3615_v17  ;;  %v3753_v19 = vadd.f32 1.0, %v8454_v54 }
 0x570   :  { %v8458_v8 = vpop.eup %8457  ;;  %8483 = vrcp.f32 %v3617_v31  ;;  %v3755_v26 = vadd.f32 1.0, %v8456_v47 }
 0x571   :  { %v8460_v27 = vpop.eup %8459  ;;  %8485 = vrcp.f32 %v3747_v39  ;;  %v3757_v22 = vadd.f32 1.0, %v8458_v8 }
 0x572   :  { %v8462_v40 = vpop.eup %8461  ;;  %8487 = vrcp.f32 %v3749_v35  ;;  %v3759_v12 = vadd.f32 1.0, %v8460_v27 }
 0x573   :  { %v11531_v45 = vpop.eup %8463  ;;  %8489 = vrcp.f32 %v3751_v14  ;;  %v3761_v31 = vadd.f32 1.0, %v8462_v40 }
 0x574   :  { %v11536_v17 = vpop.eup %8465  ;;  %8491 = vrcp.f32 %v3753_v19 }
 0x575   :  { %v3499_v34 = vpop.f32.mrf.mxu0  ;;  %v11538_v54 = vpop.eup %8467  ;;  %8493 = vrcp.f32 %v3755_v26  ;;  %v13214_v26 = vld [vmem:[#allocation50_spill] sm:$0xff] }
 0x576   :  { %v11534_v55 = vadd.f32 %v3499_v34, %v13212_v53  ;;  %v8470_v8 = vpop.eup %8469  ;;  %8495 = vrcp.f32 %v3757_v22 }
 0x577   :  { %v3501_v0 = vpop.f32.mrf.mxu0  ;;  %v8472_v34 = vpop.eup %8471  ;;  %8497 = vrcp.f32 %v3759_v12 }
 0x578   :  { %v3796_v39 = vrot.slane %v11534_v55, 5  ;;  %v3798_v35 = vrot.slane %v11534_v55, 6  ;;  %v3800_v47 = vrot.slane %v11534_v55, 7  ;;  %v3832_v27 = vmul.f32 %v11507_v30, %v11534_v55  ;;  %v8474_v44 = vpop.eup %8473 }
 0x579   :  { %v3503_v14 = vpop.f32.mrf.mxu0  ;;  %v3802_v53 = vrot.slane %v11534_v55, 1  ;;  %v3502_v29 = vadd.f32 %v3501_v0, %v13214_v26  ;;  %8499 = vrcp.f32 %v3761_v31  ;;  %v8476_v30 = vpop.eup %8475 }
 0x57a   :  { %v3826_v48 = vmul.f32 %v11510_v3, %v3796_v39  ;;  %v3828_v19 = vmul.f32 %v11513_v56, %v3798_v35  ;;  %v3830_v40 = vmul.f32 %v11516_v46, %v3800_v47  ;;  %v3848_v63 = vadd.f32 %v3832_v27, %v13213_v36  ;;  %v13215_v14 = vld [vmem:[#allocation60_spill] sm:$0xff]  ;;  %v13217_v3 = vld [vmem:[#allocation62_spill] sm:$0xff]  ;;  %v8478_v56 = vpop.eup %8477 }
 0x57b   :  { %v3504_v2 = vpop.f32.mrf.mxu0  ;;  %8501 = vpow2.f32 %v7488_v38  ;;  %v3797_v46 = vrot.slane %v3502_v29, 5  ;;  %v3799_v12 = vrot.slane %v3502_v29, 6  ;;  %v3801_v35 = vrot.slane %v3502_v29, 7  ;;  %v8480_v47 = vpop.eup %8479 }
 0x57c   :  { %v3842_v22 = vadd.f32 %v3826_v48, %v13215_v14  ;;  %v3844_v58 = vadd.f32 %v3828_v19, %v13216_v4  ;;  %v3846_v39 = vadd.f32 %v3830_v40, %v13217_v3  ;;  %8503 = vtanh.f32 %v3848_v63  ;;  %v8482_v2 = vpop.eup %8481 }
 0x57d   :  { %v3803_v27 = vrot.slane %v3502_v29, 1  ;;  %v3805_v36 = vrot.slane %v3502_v29, 2  ;;  %v3833_v0 = vmul.f32 %v8476_v30, %v3502_v29  ;;  %v3827_v31 = vmul.f32 %v8470_v8, %v3797_v46  ;;  %v8484_v14 = vpop.eup %8483 }
 0x57e   :  { %8505 = vtanh.f32 %v3842_v22  ;;  %v3829_v26 = vmul.f32 %v8472_v34, %v3799_v12  ;;  %v3831_v48 = vmul.f32 %v8474_v44, %v3801_v35  ;;  %v3807_v40 = vrot.slane %v3502_v29, 3  ;;  %v11555_v63 = vpop.eup %8485 }
 0x57f   :  { %8507 = vtanh.f32 %v3844_v58  ;;  %v3835_v19 = vmul.f32 %v8478_v56, %v3803_v27  ;;  %v3849_v38 = vadd.f32 %v3833_v0, %v13118_v6  ;;  %v3843_v3 = vadd.f32 %v3827_v31, %v10614_v49  ;;  %v11560_v10 = vpop.eup %8487 }
 0x580   :  { %8509 = vtanh.f32 %v3846_v39  ;;  %v3845_v22 = vadd.f32 %v3829_v26, %v10623_v42  ;;  %v3847_v4 = vadd.f32 %v3831_v48, %v13117_v11  ;;  %v3809_v30 = vrot.slane %v3502_v29, 4  ;;  %v11563_v34 = vpop.eup %8489 }
 0x581   :  { %v3837_v58 = vmul.f32 %v8480_v47, %v3805_v36  ;;  %v3839_v8 = vmul.f32 %v8482_v2, %v3807_v40  ;;  %v3851_v44 = vadd.f32 %v3835_v19, %v13119_v18  ;;  %8511 = vtanh.f32 %v3849_v38  ;;  %v11566_v46 = vpop.eup %8491 }
 0x582   :  { %v3804_v39 = vrot.slane %v11534_v55, 2  ;;  %8513 = vtanh.f32 %v3843_v3  ;;  %v3841_v56 = vmul.f32 %v8484_v14, %v3809_v30  ;;  %v3806_v26 = vrot.slane %v11534_v55, 3  ;;  %v11571_v36 = vpop.eup %8493 }
 0x583   :  { %8515 = vtanh.f32 %v3845_v22  ;;  %v3853_v29 = vadd.f32 %v3837_v58, %v13120_v43  ;;  %v3855_v12 = vadd.f32 %v3839_v8, %v13121_v62  ;;  %v3808_v35 = vrot.slane %v11534_v55, 4  ;;  %v11575_v27 = vpop.eup %8495 }
 0x584   :  { %v3857_v47 = vadd.f32 %v3841_v56, %v13122_v28  ;;  %8517 = vtanh.f32 %v3847_v4  ;;  %v3834_v14 = vmul.f32 %v11519_v57, %v3802_v53  ;;  %v3754_v3 = vadd.f32 1.0, %v11494_v24  ;;  %v11579_v0 = vpop.eup %8497 }
 0x585   :  { %8519 = vtanh.f32 %v3851_v44  ;;  %v3836_v2 = vmul.f32 %v11521_v51, %v3804_v39  ;;  %v3756_v31 = vadd.f32 1.0, %v11498_v21  ;;  %v3758_v55 = vadd.f32 1.0, %v11502_v50 }
 0x586   :  { %8521 = vtanh.f32 %v3853_v29  ;;  %v11583_v48 = vpop.eup %8499  ;;  %v3838_v4 = vmul.f32 %v11523_v33, %v3806_v26  ;;  %v3840_v57 = vmul.f32 %v11525_v20, %v3808_v35  ;;  %v3850_v38 = vadd.f32 %v3834_v14, %v13166_v1 }
 0x587   :  { %8523 = vtanh.f32 %v3855_v12  ;;  %v3852_v21 = vadd.f32 %v3836_v2, %v13167_v16 }
 0x588   :  { %v8502_v19 = vpop.eup %8501  ;;  %8525 = vtanh.f32 %v3857_v47  ;;  %v3854_v50 = vadd.f32 %v3838_v4, %v13168_v7  ;;  %v3856_v20 = vadd.f32 %v3840_v57, %v13169_v52 }
 0x589   :  { %v8504_v53 = vpop.eup %8503  ;;  %v3760_v24 = vadd.f32 1.0, %v8502_v19  ;;  %8527 = vrcp.f32 %v3754_v3 }
 0x58a   :  { %8529 = vrcp.f32 %v3756_v31  ;;  %v3896_v40 = vrot.slane %v8504_v53, 1 }
 0x58b   :  { %v8506_v51 = vpop.eup %8505  ;;  %8531 = vrcp.f32 %v3758_v55 }
 0x58c   :  { %v11590_v22 = vpop.eup %8507  ;;  %v3890_v33 = vrot.slane %v8506_v51, 1  ;;  %8533 = vrcp.f32 %v3760_v24  ;;  %v3928_v8 = vsub.f32 %v11406_v60, %v3896_v40 }
 0x58d   :  { %v11593_v30 = vpop.eup %8509  ;;  %v3892_v58 = vrot.slane %v11590_v22, 1  ;;  %8535 = vtanh.f32 %v3850_v38 }
 0x58e   :  { %v3894_v44 = vrot.slane %v11593_v30, 1  ;;  %v3922_v39 = vsub.f32 %v11335_v37, %v3890_v33  ;;  %v8512_v56 = vpop.eup %8511  ;;  %8537 = vtanh.f32 %v3852_v21  ;;  %v3960_v29 = vrot.slane %v3928_v8, 7 }
 0x58f   :  { %v3924_v26 = vsub.f32 %v11400_v41, %v3892_v58  ;;  %v8514_v12 = vpop.eup %8513  ;;  %v3897_v35 = vrot.slane %v8512_v56, 1  ;;  %8539 = vtanh.f32 %v3854_v50 }
 0x590   :  { %v3926_v47 = vsub.f32 %v11328_v32, %v3894_v44  ;;  %v3954_v14 = vrot.slane %v3922_v39, 7  ;;  %v8516_v3 = vpop.eup %8515  ;;  %v3891_v2 = vrot.slane %v8514_v12, 1  ;;  %8541 = vtanh.f32 %v3856_v20 }
 0x591   :  { %v3956_v60 = vrot.slane %v3924_v26, 7  ;;  %v3992_v31 = vmul.f32 %v11538_v54, %v3960_v29  ;;  %v8518_v55 = vpop.eup %8517  ;;  %v3893_v4 = vrot.slane %v8516_v3, 1  ;;  %v3929_v37 = vsub.f32 %v11363_v61, %v3897_v35 }
 0x592   :  { %v3958_v19 = vrot.slane %v3926_v47, 7  ;;  %v3986_v41 = vmul.f32 %v11527_v23, %v3954_v14  ;;  %v8520_v57 = vpop.eup %8519  ;;  %v3895_v24 = vrot.slane %v8518_v55, 1  ;;  %v3923_v38 = vsub.f32 %v11353_v15, %v3891_v2 }
 0x593   :  { %v11607_v32 = vmul.f32 %v11531_v45, %v3956_v60  ;;  %v11609_v21 = vadd.f32 %v8504_v53, %v3992_v31  ;;  %v8522_v40 = vpop.eup %8521  ;;  %v3899_v50 = vrot.slane %v8520_v57, 1  ;;  %v3925_v54 = vsub.f32 %v11358_v59, %v3893_v4 }
 0x594   :  { %v3961_v33 = vrot.slane %v3929_v37, 7  ;;  %v11613_v20 = vmul.f32 %v11536_v17, %v3958_v19  ;;  %v8524_v61 = vpop.eup %8523  ;;  %v3901_v58 = vrot.slane %v8522_v40, 1  ;;  %v3927_v23 = vsub.f32 %v11347_v25, %v3895_v24 }
 0x595   :  { %v3955_v8 = vrot.slane %v3923_v38, 7  ;;  %v11616_v44 = vadd.f32 %v8506_v51, %v3986_v41  ;;  %v8526_v15 = vpop.eup %8525  ;;  %v3903_v45 = vrot.slane %v8524_v61, 1  ;;  %v3931_v53 = vsub.f32 %v11368_v9, %v3899_v50 }
 0x596   :  { %v3957_v39 = vrot.slane %v3925_v54, 7  ;;  %v3993_v26 = vmul.f32 %v11566_v46, %v3961_v33  ;;  %v11620_v29 = vpop.eup %8527  ;;  %v3905_v59 = vrot.slane %v8526_v15, 1  ;;  %v3933_v17 = vsub.f32 %v11373_v5, %v3901_v58  ;;  %v13218_v46 = vld [vmem:[#allocation65_spill] sm:$0xff] }
 0x597   :  { %v3959_v35 = vrot.slane %v3927_v23, 7  ;;  %v3987_v47 = vmul.f32 %v11555_v63, %v3955_v8  ;;  %v11624_v14 = vpop.eup %8529  ;;  %v3935_v25 = vsub.f32 %v11377_v13, %v3903_v45  ;;  %v3963_v51 = vrot.slane %v3931_v53, 7 }
 0x598   :  { %v3989_v2 = vmul.f32 %v11560_v10, %v3957_v39  ;;  %v11628_v60 = vadd.f32 %v8512_v56, %v3993_v26  ;;  %v11630_v9 = vpop.eup %8531  ;;  %v3937_v31 = vsub.f32 %v13218_v46, %v3905_v59  ;;  %v3965_v4 = vrot.slane %v3933_v17, 7 }
 0x599   :  { %v3991_v37 = vmul.f32 %v11563_v34, %v3959_v35  ;;  %v11634_v5 = vadd.f32 %v8514_v12, %v3987_v47  ;;  %v11636_v19 = vpop.eup %8533  ;;  %v3967_v63 = vrot.slane %v3935_v25, 7  ;;  %v3995_v41 = vmul.f32 %v11571_v36, %v3963_v51 }
 0x59a   :  { %v11639_v13 = vadd.f32 %v8516_v3, %v3989_v2  ;;  %v4025_v10 = vpack.c.bf16 %v11628_v60, %v11628_v60  ;;  %v8536_v56 = vpop.eup %8535  ;;  %v3969_v24 = vrot.slane %v3937_v31, 7  ;;  %v3997_v38 = vmul.f32 %v11575_v27, %v3965_v4 }
 0x59b   :  { %v11644_v50 = vadd.f32 %v8518_v55, %v3991_v37  ;;  %v4019_v34 = vpack.c.bf16 %v11634_v5, %v11634_v5  ;;  %v8538_v12 = vpop.eup %8537  ;;  %v3999_v54 = vmul.f32 %v11579_v0, %v3967_v63  ;;  %v11649_v33 = vadd.f32 %v8520_v57, %v3995_v41 }
 0x59c   :  { %v4021_v36 = vpack.c.bf16 %v11639_v13, %v11639_v13  ;;  %v4057_v3 = vunpack.c.l.b16 %v4025_v10  ;;  %v8540_v58 = vpop.eup %8539  ;;  %v4001_v23 = vmul.f32 %v11583_v48, %v3969_v24  ;;  %v11654_v8 = vadd.f32 %v8522_v40, %v3997_v38  ;;  %v13222_v24 = vld [vmem:[#allocation19_spill] sm:$0xff] }
 0x59d   :  { %v4023_v27 = vpack.c.bf16 %v11644_v50, %v11644_v50  ;;  %v4051_v55 = vunpack.c.l.b16 %v4019_v34  ;;  %v8542_v45 = vpop.eup %8541  ;;  %v11658_v53 = vadd.f32 %v8524_v61, %v3999_v54  ;;  %v4027_v0 = vpack.c.bf16 %v11649_v33, %v11649_v33 }
 0x59e   :  { %13219 = vst [vmem:[#allocation69_spill] sm:$0xff] %v11654_v8  ;;  %v4053_v57 = vunpack.c.l.b16 %v4021_v36  ;;  %v3898_v39 = vrot.slane %v8536_v56, 1  ;;  %v11662_v26 = vadd.f32 %v8526_v15, %v4001_v23  ;;  %v4029_v59 = vpack.c.bf16 %v11654_v8, %v11654_v8  ;;  %v13223_v36 = vld [vmem:[#allocation22_spill] sm:$0xff] }
 0x59f   :  { %13220 = vst [vmem:[#allocation70_spill] sm:$0xff] %v11658_v53  ;;  %v4055_v48 = vunpack.c.l.b16 %v4023_v27  ;;  %v4080_v40 = vrot.slane %v4051_v55, 3  ;;  %v4031_v17 = vpack.c.bf16 %v11658_v53, %v11658_v53  ;;  %v4059_v35 = vunpack.c.l.b16 %v4027_v0  ;;  %v13224_v27 = vld [vmem:[#allocation66_spill] sm:$0xff]  ;;  %v13267_v53 = vld [vmem:[#allocation61_spill] sm:$0xff] }
 0x5a0   :  { %13221 = vst [vmem:[#allocation20_spill] sm:$0xff] %v11662_v26  ;;  %v4081_v47 = vrot.slane %v4053_v57, 2  ;;  %v3900_v25 = vrot.slane %v8538_v12, 1  ;;  %v4033_v61 = vpack.c.bf16 %v11662_v26, %v11662_v26  ;;  %v4061_v51 = vunpack.c.l.b16 %v4029_v59  ;;  %v13225_v59 = vld [vmem:[#allocation67_spill] sm:$0xff] }
 0x5a1   :  { %v4083_v2 = vrot.slane %v4055_v48, 1  ;;  %v3902_v46 = vrot.slane %v8540_v58, 1  ;;  %v4063_v31 = vunpack.c.l.b16 %v4031_v17  ;;  %v4086_v4 = vrot.slane %v4059_v35, 7 }
 0x5a2   :  { %v4082_v15 = vsel %vm1771_vm0, %v4081_v47, %v4080_v40  ;;  %v3904_v37 = vrot.slane %v8542_v45, 1  ;;  %v4065_v63 = vunpack.c.l.b16 %v4033_v61  ;;  %v4088_v10 = vrot.slane %v4061_v51, 6 }
 0x5a3   :  { %v4084_v41 = vsel %vm1774_vm1, %v4083_v2, %v4082_v15  ;;  %v3930_v38 = vsub.f32 %v13222_v24, %v3898_v39  ;;  %v4090_v54 = vrot.slane %v4063_v31, 5  ;;  %v3932_v23 = vsub.f32 %v13223_v36, %v3900_v25 }
 0x5a4   :  { %v4085_v34 = vsel %vm1777_vm2, %v4057_v3, %v4084_v41  ;;  %v3934_v55 = vsub.f32 %v13224_v27, %v3902_v46  ;;  %v4092_v57 = vrot.slane %v4065_v63, 4  ;;  %v3936_v48 = vsub.f32 %v13225_v59, %v3904_v37 }
 0x5a5   :  { %v4087_v0 = vsel %vm1780_vm3, %v4086_v4, %v4085_v34  ;;  %v3962_v40 = vrot.slane %v3930_v38, 7  ;;  %v3964_v35 = vrot.slane %v3932_v23, 7  ;;  %v11681_v39 = vadd.f32 %v11590_v22, %v11607_v32 }
 0x5a6   :  { %v4089_v17 = vsel %vm1783_vm4, %v4088_v10, %v4087_v0  ;;  %v3966_v47 = vrot.slane %v3934_v55, 7  ;;  %v3968_v61 = vrot.slane %v3936_v48, 7  ;;  %v11687_v51 = vadd.f32 %v11593_v30, %v11613_v20 }
 0x5a7   :  { %v4091_v3 = vsel %vm1786_vm5, %v4090_v54, %v4089_v17  ;;  %v3994_v25 = vmul.f32 %v11620_v29, %v3962_v40  ;;  %v3996_v46 = vmul.f32 %v11624_v14, %v3964_v35  ;;  %v4018_v15 = vpack.c.bf16 %v11616_v44, %v11616_v44 }
 0x5a8   :  { %v4093_v2 = vsel %vm1789_vm6, %v4092_v57, %v4091_v3  ;;  %v3998_v31 = vmul.f32 %v11630_v9, %v3966_v47  ;;  %v4000_v32 = vmul.f32 %v11636_v19, %v3968_v61  ;;  %v4020_v29 = vpack.c.bf16 %v11681_v39, %v11681_v39 }
 0x5a9   :  { %v4095_v22 = vpack.c.b16 %v4093_v2, %v4093_v2  ;;  %v11695_v4 = vadd.f32 %v8536_v56, %v3994_v25  ;;  %v11699_v37 = vadd.f32 %v8538_v12, %v3996_v46  ;;  %v4022_v20 = vpack.c.bf16 %v11687_v51, %v11687_v51  ;;  %v9471_v2 = vld [vmem:[#allocation8 + $0x160] ss:$24 sps:$4 sm:$0xff]   ;;  %v9472_v46 = vld [vmem:[#allocation8 + $0x134] ss:$24 sps:$4 sm:$0xff]  }
 0x5aa   :  { %v11701_v30 = vadd.f32 %v8540_v58, %v3998_v31  ;;  %v4024_v14 = vpack.c.bf16 %v11609_v21, %v11609_v21  ;;  %v11707_v9 = vadd.f32 %v8542_v45, %v4000_v32  ;;  %v4050_v56 = vunpack.c.l.b16 %v4018_v15  ;;  %v9473_v31 = vld [vmem:[#allocation8 + $0x150] ss:$24 sps:$4 sm:$0xff]   ;;  %v9474_v15 = vld [vmem:[#allocation8 + $0x124] ss:$24 sps:$4 sm:$0xff]  }
 0x5ab   :  { %13226 = vst [vmem:[#allocation27_spill] sm:$0xff] %v11699_v37  ;;  %4130 = vmatprep.mubr.bf16.mxu1 %v4095_v22  ;;  %4171 = vmatprep.mubr.bf16.mxu0 %v4095_v22  ;;  %v4026_v19 = vpack.c.bf16 %v11695_v4, %v11695_v4  ;;  %v4052_v63 = vunpack.c.l.b16 %v4020_v29  ;;  %v4028_v12 = vpack.c.bf16 %v11699_v37, %v11699_v37  ;;  %v4054_v41 = vunpack.c.l.b16 %v4022_v20  ;;  %v9475_v32 = vld [vmem:[#allocation8 + $0x130] ss:$24 sps:$4 sm:$0xff]   ;;  %v9476_v29 = vld [vmem:[#allocation8 + $0x104] ss:$24 sps:$4 sm:$0xff]  }
 0x5ac   :  { %13227 = vst [vmem:[#allocation68_spill] sm:$0xff] %v11701_v30  ;;  %13228 = vst [vmem:[#allocation63_spill] sm:$0xff] %v11707_v9  ;;  %v4030_v58 = vpack.c.bf16 %v11701_v30, %v11701_v30  ;;  %v4032_v10 = vpack.c.bf16 %v11707_v9, %v11707_v9  ;;  %v4066_v38 = vrot.slane %v4050_v56, 3  ;;  %v4056_v23 = vunpack.c.l.b16 %v4024_v14  ;;  %v9477_v20 = vld [vmem:[#allocation8 + $0x120] ss:$24 sps:$4 sm:$0xff]  }
 0x5ad   :  { %v4058_v24 = vunpack.c.l.b16 %v4026_v19  ;;  %v4067_v34 = vrot.slane %v4052_v63, 2  ;;  %v4060_v45 = vunpack.c.l.b16 %v4028_v12  ;;  %v4069_v36 = vrot.slane %v4054_v41, 1  ;;  %v9478_v14 = vld [vmem:[#allocation8 + $0xf4] ss:$24 sps:$4 sm:$0xff]   ;;  %v9479_v19 = vld [vmem:[#allocation8 + $0x100] ss:$24 sps:$4 sm:$0xff]  }
 0x5ae   :  { %v4062_v54 = vunpack.c.l.b16 %v4030_v58  ;;  %v4064_v27 = vunpack.c.l.b16 %v4032_v10  ;;  %v9480_v56 = vld [vmem:[#allocation8 + $0xd4] ss:$24 sps:$4 sm:$0xff]   ;;  %v9481_v63 = vld [vmem:[#allocation8 + $0xf0] ss:$24 sps:$4 sm:$0xff]   ;;  %v9484_v58 = vld [vmem:[#allocation8 + $0xa4] ss:$24 sps:$4 sm:$0xff]  }
 0x5af   :  { %v4068_v55 = vsel %vm1771_vm0, %v4067_v34, %v4066_v38  ;;  %v4072_v57 = vrot.slane %v4058_v24, 7  ;;  %v4074_v48 = vrot.slane %v4060_v45, 6  ;;  %v9483_v12 = vld [vmem:[#allocation8 + $0xd0] ss:$24 sps:$4 sm:$0xff]   ;;  %v9485_v41 = vld [vmem:[#allocation8 + $0xc0] ss:$24 sps:$4 sm:$0xff]  }
 0x5b0   :  { %v4070_v0 = vsel %vm1774_vm1, %v4069_v36, %v4068_v55  ;;  %v4076_v17 = vrot.slane %v4062_v54, 5  ;;  %v4078_v47 = vrot.slane %v4064_v27, 4  ;;  %v9486_v10 = vld [vmem:[#allocation8 + $0x94] ss:$24 sps:$4 sm:$0xff]   ;;  %v9487_v24 = vld [vmem:[#allocation8 + $0xa0] ss:$24 sps:$4 sm:$0xff]  }
 0x5b1   :  { %v4071_v59 = vsel %vm1777_vm2, %v4056_v23, %v4070_v0  ;;  %v9488_v38 = vld [vmem:[#allocation8 + $0x74] ss:$24 sps:$4 sm:$0xff]   ;;  %v9489_v34 = vld [vmem:[#allocation8 + $0x90] ss:$24 sps:$4 sm:$0xff]   ;;  %v9490_v45 = vld [vmem:[#allocation8 + $0x64] ss:$24 sps:$4 sm:$0xff]  }
 0x5b2   :  { %v4073_v40 = vsel %vm1780_vm3, %v4072_v57, %v4071_v59  ;;  %v9491_v54 = vld [vmem:[#allocation8 + $0x70] ss:$24 sps:$4 sm:$0xff]   ;;  %v9492_v36 = vld [vmem:[#allocation8 + $0x44] ss:$24 sps:$4 sm:$0xff]   ;;  %v9493_v23 = vld [vmem:[#allocation8 + $0x60] ss:$24 sps:$4 sm:$0xff]  }
 0x5b3   :  { %v4075_v35 = vsel %vm1783_vm4, %v4074_v48, %v4073_v40  ;;  %v9494_v27 = vld [vmem:[#allocation8 + $0x34] ss:$24 sps:$4 sm:$0xff]   ;;  %v9495_v55 = vld [vmem:[#allocation8 + $0x40] ss:$24 sps:$4 sm:$0xff]   ;;  %v9497_v57 = vld [vmem:[#allocation8 + $0x30] ss:$24 sps:$4 sm:$0xff]  }
 0x5b4   :  { %v4077_v3 = vsel %vm1786_vm5, %v4076_v17, %v4075_v35  ;;  %v9496_v0 = vld [vmem:[#allocation8 + $0x14] ss:$24 sps:$4 sm:$0xff]   ;;  %v9498_v59 = vld [vmem:[#allocation8 + $0x4] ss:$24 sps:$4 sm:$0xff]   ;;  %v9499_v48 = vld [vmem:[#allocation8 + $0x10] ss:$24 sps:$4 sm:$0xff]  }
 0x5b5   :  { %v4079_v61 = vsel %vm1789_vm6, %v4078_v47, %v4077_v3  ;;  %v9500_v40 = vld [vmem:[#allocation8 + $0x2e4] ss:$24 sps:$4 sm:$0xff]   ;;  %v9501_v17 = vld [vmem:[#allocation8] ss:$24 sps:$4 sm:$0xff]   ;;  %v9502_v35 = vld [vmem:[#allocation8 + $0x2d4] ss:$24 sps:$4 sm:$0xff]  }
 0x5b6   :  { %v11724_v25 = vpack.c.b16 %v4079_v61, %v4079_v61  ;;  %v9503_v47 = vld [vmem:[#allocation8 + $0x2e0] ss:$24 sps:$4 sm:$0xff]   ;;  %v9504_v3 = vld [vmem:[#allocation8 + $0x2b4] ss:$24 sps:$4 sm:$0xff]   ;;  %v9505_v61 = vld [vmem:[#allocation8 + $0x2d0] ss:$24 sps:$4 sm:$0xff]  }
 0x5b7   :  { %v13265_v30 = vld [vmem:[#allocation50_spill] sm:$0xff] }
 0x5b8   :  { %4131 = vmatmul.mubr.bf16.vlgmr.msra.gmra.mxu1 %v11724_v25  ;;  %4172 = vmatmul.mubr.bf16.vlgmr.msra.gmra.mxu0 %v11724_v25 }
 0x5b9   :  { %4181 = vmatpush1.bf16.msra.mxu1 %v9471_v2  ;;  %4212 = vmatprep.mubr.bf16.mxu1 %v4095_v22  ;;  %v9482_v22 = vld [vmem:[#allocation8 + $0xc4] ss:$24 sps:$4 sm:$0xff]  }
 0x5ba   :  { %4182 = vmatprep.subr.bf16.mxu1 %v9472_v46  ;;  %4814 = vmatpush1.bf16.msra.mxu0 %v9473_v31  ;;  %v9506_v2 = vld [vmem:[#allocation8 + $0x2a4] ss:$24 sps:$4 sm:$0xff]   ;;  %v9507_v46 = vld [vmem:[#allocation8 + $0x2b0] ss:$24 sps:$4 sm:$0xff]  }
 0x5bb   :  { %4815 = vmatprep.subr.bf16.mxu0 %v9474_v15  ;;  %v9508_v31 = vld [vmem:[#allocation8 + $0x284] ss:$24 sps:$4 sm:$0xff]   ;;  %v9509_v15 = vld [vmem:[#allocation8 + $0x2a0] ss:$24 sps:$4 sm:$0xff]  }
 0x5bd   :  { %4183 = vmatpush1.bf16.msra.mxu1 %v9475_v32  ;;  %v9510_v32 = vld [vmem:[#allocation8 + $0x274] ss:$24 sps:$4 sm:$0xff]  }
 0x5be   :  { %4184 = vmatprep.subr.bf16.mxu1 %v9476_v29  ;;  %4816 = vmatpush1.bf16.msra.mxu0 %v9477_v20  ;;  %v9511_v29 = vld [vmem:[#allocation8 + $0x280] ss:$24 sps:$4 sm:$0xff]   ;;  %v9512_v20 = vld [vmem:[#allocation8 + $0x254] ss:$24 sps:$4 sm:$0xff]  }
 0x5bf   :  { %4817 = vmatprep.subr.bf16.mxu0 %v9478_v14  ;;  %v9513_v14 = vld [vmem:[#allocation8 + $0x270] ss:$24 sps:$4 sm:$0xff]  }
 0x5c1   :  { %4185 = vmatpush1.bf16.msra.mxu1 %v9479_v19  ;;  %v9514_v19 = vld [vmem:[#allocation8 + $0x244] ss:$24 sps:$4 sm:$0xff]  }
 0x5c2   :  { %4186 = vmatprep.subr.bf16.mxu1 %v9480_v56  ;;  %4818 = vmatpush1.bf16.msra.mxu0 %v9481_v63  ;;  %v9515_v56 = vld [vmem:[#allocation8 + $0x250] ss:$24 sps:$4 sm:$0xff]   ;;  %v9516_v63 = vld [vmem:[#allocation8 + $0x224] ss:$24 sps:$4 sm:$0xff]  }
 0x5c3   :  { %4819 = vmatprep.subr.bf16.mxu0 %v9482_v22  ;;  %v9517_v22 = vld [vmem:[#allocation8 + $0x240] ss:$24 sps:$4 sm:$0xff]  }
 0x5c5   :  { %4187 = vmatpush1.bf16.msra.mxu1 %v9483_v12  ;;  %v9518_v12 = vld [vmem:[#allocation8 + $0x214] ss:$24 sps:$4 sm:$0xff]  }
 0x5c6   :  { %4188 = vmatprep.subr.bf16.mxu1 %v9484_v58  ;;  %4820 = vmatpush1.bf16.msra.mxu0 %v9485_v41  ;;  %v9519_v58 = vld [vmem:[#allocation8 + $0x220] ss:$24 sps:$4 sm:$0xff]   ;;  %v9520_v41 = vld [vmem:[#allocation8 + $0x1f4] ss:$24 sps:$4 sm:$0xff]  }
 0x5c7   :  { %4821 = vmatprep.subr.bf16.mxu0 %v9486_v10  ;;  %v9521_v10 = vld [vmem:[#allocation8 + $0x210] ss:$24 sps:$4 sm:$0xff]  }
 0x5c9   :  { %4189 = vmatpush1.bf16.msra.mxu1 %v9487_v24  ;;  %v9522_v24 = vld [vmem:[#allocation8 + $0x1e4] ss:$24 sps:$4 sm:$0xff]  }
 0x5ca   :  { %4190 = vmatprep.subr.bf16.mxu1 %v9488_v38  ;;  %4822 = vmatpush1.bf16.msra.mxu0 %v9489_v34  ;;  %v9523_v38 = vld [vmem:[#allocation8 + $0x1f0] ss:$24 sps:$4 sm:$0xff]   ;;  %v9524_v34 = vld [vmem:[#allocation8 + $0x1c4] ss:$24 sps:$4 sm:$0xff]  }
 0x5cb   :  { %4823 = vmatprep.subr.bf16.mxu0 %v9490_v45  ;;  %v9525_v45 = vld [vmem:[#allocation8 + $0x1e0] ss:$24 sps:$4 sm:$0xff]  }
 0x5cd   :  { %4191 = vmatpush1.bf16.msra.mxu1 %v9491_v54  ;;  %v9526_v54 = vld [vmem:[#allocation8 + $0x1b4] ss:$24 sps:$4 sm:$0xff]  }
 0x5ce   :  { %4192 = vmatprep.subr.bf16.mxu1 %v9492_v36  ;;  %4824 = vmatpush1.bf16.msra.mxu0 %v9493_v23  ;;  %v9527_v36 = vld [vmem:[#allocation8 + $0x1c0] ss:$24 sps:$4 sm:$0xff]   ;;  %v9528_v23 = vld [vmem:[#allocation8 + $0x194] ss:$24 sps:$4 sm:$0xff]  }
 0x5cf   :  { %4825 = vmatprep.subr.bf16.mxu0 %v9494_v27  ;;  %v9529_v27 = vld [vmem:[#allocation8 + $0x1b0] ss:$24 sps:$4 sm:$0xff]  }
 0x5d1   :  { %4193 = vmatpush1.bf16.msra.mxu1 %v9495_v55  ;;  %v9530_v55 = vld [vmem:[#allocation8 + $0x184] ss:$24 sps:$4 sm:$0xff]  }
 0x5d2   :  { %4194 = vmatprep.subr.bf16.mxu1 %v9496_v0  ;;  %4826 = vmatpush1.bf16.msra.mxu0 %v9497_v57  ;;  %v9531_v0 = vld [vmem:[#allocation8 + $0x190] ss:$24 sps:$4 sm:$0xff]   ;;  %v9532_v57 = vld [vmem:[#allocation8 + $0x15c] ss:$24 sps:$4 sm:$0xff]  }
 0x5d3   :  { %4827 = vmatprep.subr.bf16.mxu0 %v9498_v59  ;;  %v9533_v59 = vld [vmem:[#allocation8 + $0x180] ss:$24 sps:$4 sm:$0xff]  }
 0x5d5   :  { %4195 = vmatpush1.bf16.msra.mxu1 %v9499_v48  ;;  %v9534_v48 = vld [vmem:[#allocation8 + $0x164] ss:$24 sps:$4 sm:$0xff]  }
 0x5d6   :  { %4196 = vmatprep.subr.bf16.mxu1 %v9500_v40  ;;  %4828 = vmatpush1.bf16.msra.mxu0 %v9501_v17  ;;  %v9535_v40 = vld [vmem:[#allocation8 + $0x158] ss:$24 sps:$4 sm:$0xff]   ;;  %v9536_v17 = vld [vmem:[#allocation8 + $0x12c] ss:$24 sps:$4 sm:$0xff]  }
 0x5d7   :  { %4829 = vmatprep.subr.bf16.mxu0 %v9502_v35  ;;  %v9537_v35 = vld [vmem:[#allocation8 + $0x128] ss:$24 sps:$4 sm:$0xff]  }
 0x5d9   :  { %4197 = vmatpush2.bf16.msra.mxu1 %v9503_v47  ;;  %v9538_v47 = vld [vmem:[#allocation8 + $0xfc] ss:$24 sps:$4 sm:$0xff]  }
 0x5da   :  { %4198 = vmatprep.subr.bf16.mxu1 %v9504_v3  ;;  %4830 = vmatpush2.bf16.msra.mxu0 %v9505_v61  ;;  %v9539_v3 = vld [vmem:[#allocation8 + $0xf8] ss:$24 sps:$4 sm:$0xff]   ;;  %v9540_v61 = vld [vmem:[#allocation8 + $0xcc] ss:$24 sps:$4 sm:$0xff]  }
 0x5db   :  { %4831 = vmatprep.subr.bf16.mxu0 %v9506_v2  ;;  %v9541_v2 = vld [vmem:[#allocation8 + $0xc8] ss:$24 sps:$4 sm:$0xff]  }
 0x5dd   :  { %4199 = vmatpush2.bf16.msra.mxu1 %v9507_v46  ;;  %v9542_v46 = vld [vmem:[#allocation8 + $0x9c] ss:$24 sps:$4 sm:$0xff]  }
 0x5de   :  { %4200 = vmatprep.subr.bf16.mxu1 %v9508_v31  ;;  %4832 = vmatpush2.bf16.msra.mxu0 %v9509_v15  ;;  %v9543_v31 = vld [vmem:[#allocation8 + $0x98] ss:$24 sps:$4 sm:$0xff]   ;;  %v9544_v15 = vld [vmem:[#allocation8 + $0x6c] ss:$24 sps:$4 sm:$0xff]  }
 0x5df   :  { %4833 = vmatprep.subr.bf16.mxu0 %v9510_v32  ;;  %v9546_v32 = vld [vmem:[#allocation8 + $0x3c] ss:$24 sps:$4 sm:$0xff]  }
 0x5e1   :  { %4201 = vmatpush2.bf16.msra.mxu1 %v9511_v29  ;;  %v9547_v29 = vld [vmem:[#allocation8 + $0x38] ss:$24 sps:$4 sm:$0xff]  }
 0x5e2   :  { %4202 = vmatprep.subr.bf16.mxu1 %v9512_v20  ;;  %4834 = vmatpush2.bf16.msra.mxu0 %v9513_v14  ;;  %v9548_v20 = vld [vmem:[#allocation8 + $0xc] ss:$24 sps:$4 sm:$0xff]   ;;  %v9549_v14 = vld [vmem:[#allocation8 + $0x8] ss:$24 sps:$4 sm:$0xff]  }
 0x5e3   :  { %4835 = vmatprep.subr.bf16.mxu0 %v9514_v19  ;;  %v9550_v19 = vld [vmem:[#allocation8 + $0x2dc] ss:$24 sps:$4 sm:$0xff]  }
 0x5e5   :  { %4203 = vmatpush2.bf16.msra.mxu1 %v9515_v56  ;;  %v9551_v56 = vld [vmem:[#allocation8 + $0x2d8] ss:$24 sps:$4 sm:$0xff]  }
 0x5e6   :  { %4204 = vmatprep.subr.bf16.mxu1 %v9516_v63  ;;  %4836 = vmatpush2.bf16.msra.mxu0 %v9517_v22  ;;  %v9552_v63 = vld [vmem:[#allocation8 + $0x2ac] ss:$24 sps:$4 sm:$0xff]   ;;  %v9553_v22 = vld [vmem:[#allocation8 + $0x2a8] ss:$24 sps:$4 sm:$0xff]  }
 0x5e7   :  { %4837 = vmatprep.subr.bf16.mxu0 %v9518_v12  ;;  %v9554_v12 = vld [vmem:[#allocation8 + $0x27c] ss:$24 sps:$4 sm:$0xff]  }
 0x5e9   :  { %4205 = vmatpush2.bf16.msra.mxu1 %v9519_v58  ;;  %v9555_v58 = vld [vmem:[#allocation8 + $0x278] ss:$24 sps:$4 sm:$0xff]  }
 0x5ea   :  { %4206 = vmatprep.subr.bf16.mxu1 %v9520_v41  ;;  %4838 = vmatpush2.bf16.msra.mxu0 %v9521_v10  ;;  %v9556_v41 = vld [vmem:[#allocation8 + $0x24c] ss:$24 sps:$4 sm:$0xff]   ;;  %v9557_v10 = vld [vmem:[#allocation8 + $0x248] ss:$24 sps:$4 sm:$0xff]  }
 0x5eb   :  { %4839 = vmatprep.subr.bf16.mxu0 %v9522_v24  ;;  %v9558_v24 = vld [vmem:[#allocation8 + $0x21c] ss:$24 sps:$4 sm:$0xff]  }
 0x5ed   :  { %4207 = vmatpush2.bf16.msra.mxu1 %v9523_v38  ;;  %v9559_v38 = vld [vmem:[#allocation8 + $0x218] ss:$24 sps:$4 sm:$0xff]  }
 0x5ee   :  { %4208 = vmatprep.subr.bf16.mxu1 %v9524_v34  ;;  %4840 = vmatpush2.bf16.msra.mxu0 %v9525_v45  ;;  %v9560_v34 = vld [vmem:[#allocation8 + $0x1ec] ss:$24 sps:$4 sm:$0xff]   ;;  %v9561_v45 = vld [vmem:[#allocation8 + $0x1e8] ss:$24 sps:$4 sm:$0xff]  }
 0x5ef   :  { %4841 = vmatprep.subr.bf16.mxu0 %v9526_v54  ;;  %v9562_v54 = vld [vmem:[#allocation8 + $0x1bc] ss:$24 sps:$4 sm:$0xff]  }
 0x5f1   :  { %4209 = vmatpush2.bf16.msra.mxu1 %v9527_v36  ;;  %v9563_v36 = vld [vmem:[#allocation8 + $0x1b8] ss:$24 sps:$4 sm:$0xff]  }
 0x5f2   :  { %4210 = vmatprep.subr.bf16.mxu1 %v9528_v23  ;;  %4842 = vmatpush2.bf16.msra.mxu0 %v9529_v27  ;;  %v9564_v23 = vld [vmem:[#allocation8 + $0x18c] ss:$24 sps:$4 sm:$0xff]   ;;  %v9565_v27 = vld [vmem:[#allocation8 + $0x188] ss:$24 sps:$4 sm:$0xff]  }
 0x5f3   :  { %4843 = vmatprep.subr.bf16.mxu0 %v9530_v55  ;;  %v9566_v55 = vld [vmem:[#allocation8 + $0x154] ss:$24 sps:$4 sm:$0xff]  }
 0x5f5   :  { %4211 = vmatpush2.bf16.msra.mxu1 %v9531_v0 }
 0x5f6   :  { %4854 = vmatprep.subr.bf16.mxu1 %v9532_v57  ;;  %4844 = vmatpush2.bf16.msra.mxu0 %v9533_v59  ;;  %v13229_v59 = vld [vmem:[#allocation18_spill] sm:$0xff] }
 0x5f7   :  { %4895 = vmatprep.subr.bf16.mxu0 %v9534_v48 }
 0x5f8   :  { %4213 = vmatmul.mubr.bf16.vlgmr.msra.gmra.mxu1 %v11724_v25  ;;  %v9545_v25 = vld [vmem:[#allocation8 + $0x68] ss:$24 sps:$4 sm:$0xff]  }
 0x5f9   :  { %4855 = vmatpush1.bf16.msra.mxu1 %v9535_v40  ;;  %v13230_v40 = vld [vmem:[#allocation40_spill] sm:$0xff] }
 0x5fa   :  { %4856 = vmatprep.subr.bf16.mxu1 %v9536_v17 }
 0x5fd   :  { %4857 = vmatpush1.bf16.msra.mxu1 %v9537_v35 }
 0x5fe   :  { %4858 = vmatprep.subr.bf16.mxu1 %v9538_v47 }
 0x601   :  { %4859 = vmatpush1.bf16.msra.mxu1 %v9539_v3 }
 0x602   :  { %4860 = vmatprep.subr.bf16.mxu1 %v9540_v61 }
 0x605   :  { %4861 = vmatpush1.bf16.msra.mxu1 %v9541_v2 }
 0x606   :  { %4862 = vmatprep.subr.bf16.mxu1 %v9542_v46 }
 0x609   :  { %4863 = vmatpush1.bf16.msra.mxu1 %v9543_v31 }
 0x60a   :  { %4864 = vmatprep.subr.bf16.mxu1 %v9544_v15 }
 0x60d   :  { %4865 = vmatpush1.bf16.msra.mxu1 %v9545_v25 }
 0x60e   :  { %4866 = vmatprep.subr.bf16.mxu1 %v9546_v32  ;;  %v13231_v32 = vld [vmem:[#allocation28_spill] sm:$0xff] }
 0x611   :  { %4867 = vmatpush1.bf16.msra.mxu1 %v9547_v29 }
 0x612   :  { %4868 = vmatprep.subr.bf16.mxu1 %v9548_v20 }
 0x615   :  { %4869 = vmatpush1.bf16.msra.mxu1 %v9549_v14 }
 0x616   :  { %4870 = vmatprep.subr.bf16.mxu1 %v9550_v19  ;;  %v13232_v19 = vld [vmem:[#allocation23_spill] sm:$0xff] }
 0x619   :  { %4871 = vmatpush2.bf16.msra.mxu1 %v9551_v56 }
 0x61a   :  { %4872 = vmatprep.subr.bf16.mxu1 %v9552_v63  ;;  %v13233_v63 = vld [vmem:[#allocation24_spill] sm:$0xff] }
 0x61d   :  { %4873 = vmatpush2.bf16.msra.mxu1 %v9553_v22 }
 0x61e   :  { %4874 = vmatprep.subr.bf16.mxu1 %v9554_v12  ;;  %v13234_v12 = vld [vmem:[#allocation25_spill] sm:$0xff] }
 0x621   :  { %4875 = vmatpush2.bf16.msra.mxu1 %v9555_v58 }
 0x622   :  { %4876 = vmatprep.subr.bf16.mxu1 %v9556_v41  ;;  %v13235_v41 = vld [vmem:[#allocation26_spill] sm:$0xff] }
 0x625   :  { %4877 = vmatpush2.bf16.msra.mxu1 %v9557_v10 }
 0x626   :  { %4878 = vmatprep.subr.bf16.mxu1 %v9558_v24  ;;  %v13236_v24 = vld [vmem:[#allocation29_spill] sm:$0xff] }
 0x629   :  { %4879 = vmatpush2.bf16.msra.mxu1 %v9559_v38 }
 0x62a   :  { %4880 = vmatprep.subr.bf16.mxu1 %v9560_v34  ;;  %v13237_v34 = vld [vmem:[#allocation30_spill] sm:$0xff] }
 0x62d   :  { %4881 = vmatpush2.bf16.msra.mxu1 %v9561_v45 }
 0x62e   :  { %4882 = vmatprep.subr.bf16.mxu1 %v9562_v54 }
 0x631   :  { %4883 = vmatpush2.bf16.msra.mxu1 %v9563_v36 }
 0x632   :  { %4884 = vmatprep.subr.bf16.mxu1 %v9564_v23 }
 0x635   :  { %4885 = vmatpush2.bf16.msra.mxu1 %v9565_v27  ;;  %v13238_v27 = vld [vmem:[#allocation31_spill] sm:$0xff] }
 0x636   :  { %5528 = vmatprep.subr.bf16.mxu1 %v9566_v55 }
 0x678   :  { %v4132_v0 = vpop.f32.mrf.mxu1  ;;  %v4173_v57 = vpop.f32.mrf.mxu0 }
 0x679   :  { %v4133_v48 = vadd.f32 %v4132_v0, %v13229_v59  ;;  %v11731_v17 = vadd.f32 %v4173_v57, %v13230_v40 }
 0x67a   :  { %v4134_v35 = vpop.f32.mrf.mxu1  ;;  %v11733_v47 = vpop.f32.mrf.mxu0 }
 0x67b   :  { %v4223_v3 = vrot.slane %v4133_v48, 4  ;;  %v4225_v61 = vrot.slane %v4133_v48, 5  ;;  %v4227_v2 = vrot.slane %v4133_v48, 6  ;;  %v4229_v46 = vrot.slane %v4133_v48, 7 }
 0x67c   :  { %v4231_v31 = vrot.slane %v4133_v48, 1  ;;  %v4233_v15 = vrot.slane %v4133_v48, 2  ;;  %v4235_v25 = vrot.slane %v4133_v48, 3  ;;  %v4261_v29 = vadd.f32 %v4133_v48, %v13231_v32  ;;  %v4136_v20 = vpop.f32.mrf.mxu1  ;;  %v4177_v14 = vpop.f32.mrf.mxu0 }
 0x67d   :  { %v4253_v56 = vadd.f32 %v4223_v3, %v13232_v19  ;;  %v4255_v22 = vadd.f32 %v4225_v61, %v13233_v63  ;;  %v4257_v58 = vadd.f32 %v4227_v2, %v13234_v12  ;;  %v4259_v10 = vadd.f32 %v4229_v46, %v13235_v41 }
 0x67e   :  { %v4263_v38 = vadd.f32 %v4231_v31, %v13236_v24  ;;  %v4265_v45 = vadd.f32 %v4233_v15, %v13237_v34  ;;  %v7498_v54 = vmul.f32 -1.442695, %v4261_v29  ;;  %v4137_v36 = vpop.f32.mrf.mxu1  ;;  %v4178_v23 = vpop.f32.mrf.mxu0  ;;  %v4267_v55 = vadd.f32 %v4235_v25, %v13238_v27  ;;  %v13239_v25 = vld [vmem:[#allocation41_spill] sm:$0xff] }
 0x67f   :  { %v7490_v0 = vmul.f32 -1.442695, %v4253_v56  ;;  %v7492_v57 = vmul.f32 -1.442695, %v4255_v22  ;;  %v7494_v48 = vmul.f32 -1.442695, %v4257_v58 }
 0x680   :  { %v7496_v20 = vmul.f32 -1.442695, %v4259_v10  ;;  %8543 = vpow2.f32 %v7498_v54  ;;  %v7500_v3 = vmul.f32 -1.442695, %v4263_v38  ;;  %v4367_v61 = vrot.slane %v11731_v17, 4  ;;  %v13240_v22 = vld [vmem:[#allocation45_spill] sm:$0xff] }
 0x681   :  { %8545 = vpow2.f32 %v7490_v0  ;;  %v4369_v2 = vrot.slane %v11731_v17, 5  ;;  %v7502_v46 = vmul.f32 -1.442695, %v4265_v45  ;;  %v4371_v31 = vrot.slane %v11731_v17, 6  ;;  %v13241_v38 = vld [vmem:[#allocation47_spill] sm:$0xff]  ;;  %v13242_v45 = vld [vmem:[#allocation49_spill] sm:$0xff] }
 0x682   :  { %8547 = vpow2.f32 %v7492_v57  ;;  %v4373_v15 = vrot.slane %v11731_v17, 7  ;;  %v7504_v29 = vmul.f32 -1.442695, %v4267_v55  ;;  %v4397_v14 = vadd.f32 %v4367_v61, %v13239_v25  ;;  %v13243_v57 = vld [vmem:[#allocation52_spill] sm:$0xff] }
 0x683   :  { %8549 = vpow2.f32 %v7494_v48  ;;  %v4375_v56 = vrot.slane %v11731_v17, 1  ;;  %v4399_v58 = vadd.f32 %v4369_v2, %v13240_v22  ;;  %v4377_v10 = vrot.slane %v11731_v17, 2  ;;  %v13244_v48 = vld [vmem:[#allocation54_spill] sm:$0xff]  ;;  %v13245_v61 = vld [vmem:[#allocation56_spill] sm:$0xff] }
 0x684   :  { %8551 = vpow2.f32 %v7496_v20  ;;  %v4401_v54 = vadd.f32 %v4371_v31, %v13241_v38  ;;  %v4403_v36 = vadd.f32 %v4373_v15, %v13242_v45  ;;  %v7506_v23 = vmul.f32 -1.442695, %v4397_v14  ;;  %v13246_v31 = vld [vmem:[#allocation21_spill] sm:$0xff]  ;;  %v13250_v45 = vld [vmem:[#allocation34_spill] sm:$0xff] }
 0x685   :  { %8553 = vpow2.f32 %v7500_v3  ;;  %v7508_v0 = vmul.f32 -1.442695, %v4399_v58  ;;  %v4405_v55 = vadd.f32 %v11731_v17, %v13243_v57  ;;  %v4407_v20 = vadd.f32 %v4375_v56, %v13244_v48 }
 0x686   :  { %8555 = vpow2.f32 %v7502_v46  ;;  %v4409_v25 = vadd.f32 %v4377_v10, %v13245_v61  ;;  %v7510_v3 = vmul.f32 -1.442695, %v4401_v54  ;;  %v7512_v2 = vmul.f32 -1.442695, %v4403_v36 }
 0x687   :  { %8557 = vpow2.f32 %v7504_v29  ;;  %v7514_v22 = vmul.f32 -1.442695, %v4405_v55  ;;  %v7516_v27 = vmul.f32 -1.442695, %v4407_v20  ;;  %v4135_v46 = vadd.f32 %v4134_v35, %v13246_v31 }
 0x688   :  { %8559 = vpow2.f32 %v7506_v23  ;;  %v7518_v15 = vmul.f32 -1.442695, %v4409_v25  ;;  %v4379_v59 = vrot.slane %v11731_v17, 3 }
 0x689   :  { %8561 = vpow2.f32 %v7508_v0  ;;  %v4224_v10 = vrot.slane %v4135_v46, 4  ;;  %v4226_v36 = vrot.slane %v4135_v46, 5  ;;  %v4228_v35 = vrot.slane %v4135_v46, 6 }
 0x68a   :  { %8563 = vpow2.f32 %v7510_v3  ;;  %v4232_v61 = vrot.slane %v4135_v46, 1 }
 0x68b   :  { %8565 = vpow2.f32 %v7512_v2  ;;  %v4258_v34 = vadd.f32 %v4228_v35, %v13250_v45  ;;  %v13254_v35 = vld [vmem:[#allocation38_spill] sm:$0xff] }
 0x68c   :  { %8567 = vpow2.f32 %v7514_v22  ;;  %v13247_v22 = vld [vmem:[#allocation32_spill] sm:$0xff] }
 0x68d   :  { %v8544_v38 = vpop.eup %8543  ;;  %8569 = vpow2.f32 %v7516_v27 }
 0x68e   :  { %v8546_v14 = vpop.eup %8545  ;;  %v4325_v29 = vadd.f32 1.0, %v8544_v38  ;;  %8571 = vpow2.f32 %v7518_v15  ;;  %v4230_v38 = vrot.slane %v4135_v46, 7 }
 0x68f   :  { %v8548_v58 = vpop.eup %8547  ;;  %v4317_v57 = vadd.f32 1.0, %v8546_v14  ;;  %v4254_v14 = vadd.f32 %v4224_v10, %v13247_v22  ;;  %v13251_v10 = vld [vmem:[#allocation35_spill] sm:$0xff] }
 0x690   :  { %v8550_v56 = vpop.eup %8549  ;;  %v4319_v23 = vadd.f32 1.0, %v8548_v58  ;;  %8573 = vrcp.f32 %v4325_v29  ;;  %v13248_v58 = vld [vmem:[#allocation43_spill] sm:$0xff]  ;;  %v4260_v22 = vadd.f32 %v4230_v38, %v13251_v10 }
 0x691   :  { %v8552_v0 = vpop.eup %8551  ;;  %v4321_v54 = vadd.f32 1.0, %v8550_v56  ;;  %8575 = vrcp.f32 %v4317_v57  ;;  %v11761_v27 = vadd.f32 %v11733_v47, %v13248_v58  ;;  %v4234_v57 = vrot.slane %v4135_v46, 2  ;;  %v13252_v47 = vld [vmem:[#allocation36_spill] sm:$0xff] }
 0x692   :  { %v8554_v55 = vpop.eup %8553  ;;  %v4323_v20 = vadd.f32 1.0, %v8552_v0  ;;  %8577 = vrcp.f32 %v4319_v23  ;;  %v13249_v0 = vld [vmem:[#allocation33_spill] sm:$0xff]  ;;  %v4262_v58 = vadd.f32 %v4135_v46, %v13252_v47  ;;  %v7491_v32 = vmul.f32 -1.442695, %v4254_v14 }
 0x693   :  { %v8556_v3 = vpop.eup %8555  ;;  %v4327_v25 = vadd.f32 1.0, %v8554_v55  ;;  %8579 = vrcp.f32 %v4321_v54  ;;  %v4256_v29 = vadd.f32 %v4226_v36, %v13249_v0  ;;  %v4368_v54 = vrot.slane %v11761_v27, 4 }
 0x694   :  { %v8558_v2 = vpop.eup %8557  ;;  %v4329_v31 = vadd.f32 1.0, %v8556_v3  ;;  %8581 = vrcp.f32 %v4323_v20  ;;  %v4236_v3 = vrot.slane %v4135_v46, 3  ;;  %v4370_v20 = vrot.slane %v11761_v27, 5 }
 0x695   :  { %v8560_v56 = vpop.eup %8559  ;;  %v4331_v15 = vadd.f32 1.0, %v8558_v2  ;;  %8583 = vrcp.f32 %v4327_v25  ;;  %v13253_v2 = vld [vmem:[#allocation37_spill] sm:$0xff]  ;;  %v7493_v0 = vmul.f32 -1.442695, %v4256_v29  ;;  %v4266_v25 = vadd.f32 %v4234_v57, %v13254_v35  ;;  %v13256_v29 = vld [vmem:[#allocation42_spill] sm:$0xff] }
 0x696   :  { %v8562_v48 = vpop.eup %8561  ;;  %v4461_v55 = vadd.f32 1.0, %v8560_v56  ;;  %8585 = vrcp.f32 %v4329_v31  ;;  %v4264_v36 = vadd.f32 %v4232_v61, %v13253_v2  ;;  %v4372_v45 = vrot.slane %v11761_v27, 6  ;;  %v13255_v31 = vld [vmem:[#allocation39_spill] sm:$0xff]  ;;  %v13257_v57 = vld [vmem:[#allocation46_spill] sm:$0xff] }
 0x697   :  { %v4463_v23 = vadd.f32 1.0, %v8562_v48  ;;  %8587 = vrcp.f32 %v4331_v15  ;;  %v8564_v56 = vpop.eup %8563  ;;  %v7495_v48 = vmul.f32 -1.442695, %v4258_v34  ;;  %v4268_v46 = vadd.f32 %v4236_v3, %v13255_v31  ;;  %v13258_v31 = vld [vmem:[#allocation48_spill] sm:$0xff] }
 0x698   :  { %8589 = vrcp.f32 %v4461_v55  ;;  %v8566_v38 = vpop.eup %8565  ;;  %v7497_v14 = vmul.f32 -1.442695, %v4260_v22  ;;  %v4374_v47 = vrot.slane %v11761_v27, 7  ;;  %v7499_v61 = vmul.f32 -1.442695, %v4262_v58 }
 0x699   :  { %8591 = vrcp.f32 %v4463_v23  ;;  %v11774_v15 = vpop.eup %8567  ;;  %v4398_v2 = vadd.f32 %v4368_v54, %v13256_v29  ;;  %v7501_v55 = vmul.f32 -1.442695, %v4264_v36  ;;  %v4376_v34 = vrot.slane %v11761_v27, 1  ;;  %v13259_v54 = vld [vmem:[#allocation51_spill] sm:$0xff]  ;;  %v13260_v36 = vld [vmem:[#allocation53_spill] sm:$0xff] }
 0x69a   :  { %8593 = vpow2.f32 %v7491_v32  ;;  %v11777_v10 = vpop.eup %8569  ;;  %v4400_v35 = vadd.f32 %v4370_v20, %v13257_v57  ;;  %v7503_v22 = vmul.f32 -1.442695, %v4266_v25  ;;  %v4378_v3 = vrot.slane %v11761_v27, 2 }
 0x69b   :  { %8595 = vpow2.f32 %v7493_v0  ;;  %v11781_v23 = vpop.eup %8571  ;;  %v4402_v41 = vadd.f32 %v4372_v45, %v13258_v31  ;;  %v7505_v58 = vmul.f32 -1.442695, %v4268_v46  ;;  %v4404_v29 = vadd.f32 %v4374_v47, %v13259_v54  ;;  %v13262_v46 = vld [vmem:[#allocation57_spill] sm:$0xff] }
 0x69c   :  { %8597 = vpow2.f32 %v7495_v48  ;;  %v4406_v20 = vadd.f32 %v11761_v27, %v13260_v36  ;;  %v7507_v57 = vmul.f32 -1.442695, %v4398_v2  ;;  %v4380_v25 = vrot.slane %v11761_v27, 3  ;;  %v13261_v48 = vld [vmem:[#allocation55_spill] sm:$0xff] }
 0x69d   :  { %v11785_v32 = vpop.eup %8573  ;;  %8599 = vpow2.f32 %v7497_v14  ;;  %v4408_v45 = vadd.f32 %v4376_v34, %v13261_v48  ;;  %v7509_v31 = vmul.f32 -1.442695, %v4400_v35  ;;  %v4410_v47 = vadd.f32 %v4378_v3, %v13262_v46  ;;  %v13263_v34 = vld [vmem:[#allocation58_spill] sm:$0xff] }
 0x69e   :  { %v11788_v0 = vpop.eup %8575  ;;  %8601 = vpow2.f32 %v7499_v61  ;;  %v7511_v14 = vmul.f32 -1.442695, %v4402_v41  ;;  %v7513_v61 = vmul.f32 -1.442695, %v4404_v29  ;;  %v7515_v2 = vmul.f32 -1.442695, %v4406_v20 }
 0x69f   :  { %v11792_v12 = vpop.eup %8577  ;;  %8603 = vpow2.f32 %v7501_v55  ;;  %v7517_v27 = vmul.f32 -1.442695, %v4408_v45  ;;  %v4412_v35 = vadd.f32 %v4380_v25, %v13263_v34  ;;  %v4465_v41 = vadd.f32 1.0, %v8564_v56 }
 0x6a0   :  { %v11796_v63 = vpop.eup %8579  ;;  %8605 = vpow2.f32 %v7503_v22  ;;  %v7519_v22 = vmul.f32 -1.442695, %v4410_v47  ;;  %v4467_v29 = vadd.f32 1.0, %v8566_v38 }
 0x6a1   :  { %v11799_v54 = vpop.eup %8581  ;;  %8607 = vpow2.f32 %v7505_v58  ;;  %v7521_v20 = vmul.f32 -1.442695, %v4412_v35 }
 0x6a2   :  { %v11801_v36 = vpop.eup %8583  ;;  %8609 = vpow2.f32 %v7507_v57 }
 0x6a3   :  { %v11803_v55 = vpop.eup %8585  ;;  %8611 = vpow2.f32 %v7509_v31 }
 0x6a4   :  { %v11806_v48 = vpop.eup %8587  ;;  %8613 = vpow2.f32 %v7511_v14 }
 0x6a5   :  { %v11808_v3 = vpop.eup %8589  ;;  %8615 = vpow2.f32 %v7513_v61 }
 0x6a6   :  { %v11810_v58 = vpop.eup %8591  ;;  %8617 = vpow2.f32 %v7515_v2 }
 0x6a7   :  { %v8594_v57 = vpop.eup %8593  ;;  %8619 = vpow2.f32 %v7517_v27 }
 0x6a8   :  { %v8596_v46 = vpop.eup %8595  ;;  %v4318_v31 = vadd.f32 1.0, %v8594_v57  ;;  %8621 = vpow2.f32 %v7519_v22 }
 0x6a9   :  { %v8598_v45 = vpop.eup %8597  ;;  %8623 = vrcp.f32 %v4465_v41  ;;  %v4320_v25 = vadd.f32 1.0, %v8596_v46 }
 0x6aa   :  { %v8600_v34 = vpop.eup %8599  ;;  %8625 = vrcp.f32 %v4467_v29  ;;  %v4322_v47 = vadd.f32 1.0, %v8598_v45 }
 0x6ab   :  { %v8602_v14 = vpop.eup %8601  ;;  %v4324_v19 = vadd.f32 1.0, %v8600_v34  ;;  %8627 = vpow2.f32 %v7521_v20 }
 0x6ac   :  { %v8604_v56 = vpop.eup %8603  ;;  %v4326_v61 = vadd.f32 1.0, %v8602_v14  ;;  %8629 = vrcp.f32 %v4318_v31 }
 0x6ad   :  { %v8606_v38 = vpop.eup %8605  ;;  %v4328_v2 = vadd.f32 1.0, %v8604_v56  ;;  %8631 = vrcp.f32 %v4320_v25 }
 0x6ae   :  { %v8608_v27 = vpop.eup %8607  ;;  %v4330_v35 = vadd.f32 1.0, %v8606_v38  ;;  %8633 = vrcp.f32 %v4322_v47 }
 0x6af   :  { %v8610_v57 = vpop.eup %8609  ;;  %v4332_v22 = vadd.f32 1.0, %v8608_v27  ;;  %8635 = vrcp.f32 %v4324_v19 }
 0x6b0   :  { %v8612_v41 = vpop.eup %8611  ;;  %8637 = vrcp.f32 %v4326_v61  ;;  %v4462_v46 = vadd.f32 1.0, %v8610_v57 }
 0x6b1   :  { %v8614_v29 = vpop.eup %8613  ;;  %8639 = vrcp.f32 %v4328_v2  ;;  %v4464_v45 = vadd.f32 1.0, %v8612_v41  ;;  %v13264_v2 = vld [vmem:[#allocation44_spill] sm:$0xff] }
 0x6b2   :  { %v8616_v34 = vpop.eup %8615  ;;  %8641 = vrcp.f32 %v4330_v35  ;;  %v4466_v20 = vadd.f32 1.0, %v8614_v29 }
 0x6b3   :  { %v8618_v14 = vpop.eup %8617  ;;  %8643 = vrcp.f32 %v4332_v22  ;;  %v4468_v31 = vadd.f32 1.0, %v8616_v34 }
 0x6b4   :  { %v8620_v56 = vpop.eup %8619  ;;  %8645 = vrcp.f32 %v4462_v46  ;;  %v4470_v25 = vadd.f32 1.0, %v8618_v14 }
 0x6b5   :  { %v8622_v38 = vpop.eup %8621  ;;  %8647 = vrcp.f32 %v4464_v45  ;;  %v4472_v27 = vadd.f32 1.0, %v8620_v56 }
 0x6b6   :  { %v11812_v47 = vpop.eup %8623  ;;  %8649 = vrcp.f32 %v4466_v20  ;;  %v4474_v41 = vadd.f32 1.0, %v8622_v38 }
 0x6b7   :  { %v11814_v61 = vpop.eup %8625  ;;  %8651 = vrcp.f32 %v4468_v31 }
 0x6b8   :  { %v4214_v19 = vpop.f32.mrf.mxu1  ;;  %v11819_v35 = vpop.eup %8627  ;;  %8653 = vrcp.f32 %v4470_v25 }
 0x6b9   :  { %v11817_v57 = vadd.f32 %v4214_v19, %v13264_v2  ;;  %v8630_v46 = vpop.eup %8629  ;;  %8655 = vrcp.f32 %v4472_v27  ;;  %v13266_v27 = vld [vmem:[#allocation60_spill] sm:$0xff] }
 0x6ba   :  { %v4216_v22 = vpop.f32.mrf.mxu1  ;;  %v8632_v14 = vpop.eup %8631  ;;  %8657 = vrcp.f32 %v4474_v41 }
 0x6bb   :  { %v4511_v29 = vrot.slane %v11817_v57, 4  ;;  %v4513_v45 = vrot.slane %v11817_v57, 5  ;;  %v4515_v34 = vrot.slane %v11817_v57, 6  ;;  %v4517_v20 = vrot.slane %v11817_v57, 7  ;;  %v8634_v31 = vpop.eup %8633 }
 0x6bc   :  { %v4549_v56 = vmul.f32 %v11785_v32, %v11817_v57  ;;  %v4218_v19 = vpop.f32.mrf.mxu1  ;;  %v8636_v40 = vpop.eup %8635  ;;  %v4217_v37 = vadd.f32 %v4216_v22, %v13265_v30 }
 0x6bd   :  { %v4541_v2 = vmul.f32 %v11788_v0, %v4511_v29  ;;  %v4543_v25 = vmul.f32 %v11792_v12, %v4513_v45  ;;  %v4545_v38 = vmul.f32 %v11796_v63, %v4515_v34  ;;  %v4547_v24 = vmul.f32 %v11799_v54, %v4517_v20  ;;  %v8638_v32 = vpop.eup %8637  ;;  %v13268_v29 = vld [vmem:[#allocation62_spill] sm:$0xff]  ;;  %v13269_v45 = vld [vmem:[#allocation64_spill] sm:$0xff] }
 0x6be   :  { %v4565_v9 = vadd.f32 %v4549_v56, %v13166_v1  ;;  %v4219_v26 = vpop.f32.mrf.mxu1  ;;  %v8640_v34 = vpop.eup %8639  ;;  %v4512_v54 = vrot.slane %v4217_v37, 4  ;;  %v4514_v20 = vrot.slane %v4217_v37, 5  ;;  %v4516_v17 = vrot.slane %v4217_v37, 6 }
 0x6bf   :  { %v4557_v19 = vadd.f32 %v4541_v2, %v13266_v27  ;;  %v4559_v0 = vadd.f32 %v4543_v25, %v13267_v53  ;;  %v4561_v12 = vadd.f32 %v4545_v38, %v13268_v29  ;;  %v4563_v63 = vadd.f32 %v4547_v24, %v13269_v45  ;;  %v8642_v8 = vpop.eup %8641 }
 0x6c0   :  { %8659 = vtanh.f32 %v4565_v9  ;;  %v4518_v56 = vrot.slane %v4217_v37, 7  ;;  %v4520_v22 = vrot.slane %v4217_v37, 1  ;;  %v4550_v26 = vmul.f32 %v8638_v32, %v4217_v37  ;;  %v8644_v41 = vpop.eup %8643 }
 0x6c1   :  { %8661 = vtanh.f32 %v4557_v19  ;;  %v4542_v1 = vmul.f32 %v8630_v46, %v4512_v54  ;;  %v4544_v2 = vmul.f32 %v8632_v14, %v4514_v20  ;;  %v4546_v27 = vmul.f32 %v8634_v31, %v4516_v17  ;;  %v11838_v25 = vpop.eup %8645 }
 0x6c2   :  { %8663 = vtanh.f32 %v4559_v0  ;;  %v4548_v38 = vmul.f32 %v8636_v40, %v4518_v56  ;;  %v4522_v24 = vrot.slane %v4217_v37, 2  ;;  %v4524_v45 = vrot.slane %v4217_v37, 3  ;;  %v11840_v9 = vpop.eup %8647 }
 0x6c3   :  { %8665 = vtanh.f32 %v4561_v12  ;;  %v4558_v29 = vadd.f32 %v4542_v1, %v10614_v49  ;;  %v4560_v19 = vadd.f32 %v4544_v2, %v10623_v42  ;;  %v4562_v32 = vadd.f32 %v4546_v27, %v13117_v11  ;;  %v11845_v53 = vpop.eup %8649 }
 0x6c4   :  { %8667 = vtanh.f32 %v4563_v63  ;;  %v4552_v46 = vmul.f32 %v8640_v34, %v4520_v22  ;;  %v4554_v14 = vmul.f32 %v8642_v8, %v4522_v24  ;;  %v4556_v31 = vmul.f32 %v8644_v41, %v4524_v45  ;;  %v11848_v12 = vpop.eup %8651  ;;  %v13270_v63 = vld [vmem:[#allocation59_spill] sm:$0xff] }
 0x6c5   :  { %v4564_v0 = vadd.f32 %v4548_v38, %v13118_v6  ;;  %8669 = vtanh.f32 %v4558_v29  ;;  %v4566_v37 = vadd.f32 %v4550_v26, %v13119_v18  ;;  %v11851_v40 = vpop.eup %8653  ;;  %v4411_v1 = vadd.f32 %v4379_v59, %v13270_v63 }
 0x6c6   :  { %v4519_v54 = vrot.slane %v11817_v57, 1  ;;  %8671 = vtanh.f32 %v4560_v19  ;;  %v4568_v27 = vadd.f32 %v4552_v46, %v13120_v43  ;;  %v4521_v34 = vrot.slane %v11817_v57, 2  ;;  %v11858_v45 = vpop.eup %8655 }
 0x6c7   :  { %v4570_v8 = vadd.f32 %v4554_v14, %v13121_v62  ;;  %8673 = vtanh.f32 %v4562_v32  ;;  %v4523_v29 = vrot.slane %v11817_v57, 3  ;;  %v4572_v20 = vadd.f32 %v4556_v31, %v13122_v28  ;;  %v11863_v59 = vpop.eup %8657 }
 0x6c8   :  { %8675 = vtanh.f32 %v4564_v0  ;;  %v4476_v17 = vadd.f32 1.0, %v11819_v35  ;;  %v7520_v56 = vmul.f32 -1.442695, %v4411_v1  ;;  %v4551_v22 = vmul.f32 %v11801_v36, %v4519_v54 }
 0x6c9   :  { %8677 = vtanh.f32 %v4566_v37  ;;  %v4469_v26 = vadd.f32 1.0, %v11774_v15  ;;  %v4553_v41 = vmul.f32 %v11803_v55, %v4521_v34  ;;  %v4471_v57 = vadd.f32 1.0, %v11777_v10 }
 0x6ca   :  { %8679 = vtanh.f32 %v4568_v27  ;;  %v4555_v38 = vmul.f32 %v11806_v48, %v4523_v29  ;;  %v4473_v24 = vadd.f32 1.0, %v11781_v23  ;;  %v4567_v15 = vadd.f32 %v4551_v22, %v13167_v16 }
 0x6cb   :  { %8681 = vtanh.f32 %v4570_v8  ;;  %v4569_v55 = vadd.f32 %v4553_v41, %v13168_v7 }
 0x6cc   :  { %8683 = vtanh.f32 %v4572_v20  ;;  %v4571_v23 = vadd.f32 %v4555_v38, %v13169_v52 }
 0x6cd   :  { %v11868_v2 = vpop.eup %8659  ;;  %8685 = vrcp.f32 %v4476_v17 }
 0x6ce   :  { %v8662_v35 = vpop.eup %8661  ;;  %v4613_v19 = vrot.slane %v11868_v2, 1  ;;  %8687 = vpow2.f32 %v7520_v56 }
 0x6cf   :  { %v8664_v36 = vpop.eup %8663  ;;  %v4605_v32 = vrot.slane %v8662_v35, 1  ;;  %8689 = vrcp.f32 %v4469_v26 }
 0x6d0   :  { %v11875_v46 = vpop.eup %8665  ;;  %v4607_v14 = vrot.slane %v8664_v36, 1  ;;  %v11879_v10 = vsub.f32 %v11695_v4, %v4613_v19  ;;  %8691 = vrcp.f32 %v4471_v57 }
 0x6d1   :  { %v11881_v48 = vpop.eup %8667  ;;  %v4609_v31 = vrot.slane %v11875_v46, 1  ;;  %v4637_v0 = vsub.f32 %v11616_v44, %v4605_v32  ;;  %8693 = vrcp.f32 %v4473_v24 }
 0x6d2   :  { %v4611_v37 = vrot.slane %v11881_v48, 1  ;;  %v4639_v1 = vsub.f32 %v11681_v39, %v4607_v14  ;;  %v8670_v54 = vpop.eup %8669  ;;  %8695 = vtanh.f32 %v4567_v15  ;;  %v4677_v34 = vrot.slane %v11879_v10, 7 }
 0x6d3   :  { %v4641_v27 = vsub.f32 %v11687_v51, %v4609_v31  ;;  %v4669_v4 = vrot.slane %v4637_v0, 7  ;;  %v8672_v8 = vpop.eup %8671  ;;  %v4606_v29 = vrot.slane %v8670_v54, 1  ;;  %8697 = vtanh.f32 %v4569_v55 }
 0x6d4   :  { %v4643_v20 = vsub.f32 %v11609_v21, %v4611_v37  ;;  %v4671_v17 = vrot.slane %v4639_v1, 7  ;;  %v8674_v56 = vpop.eup %8673  ;;  %v4608_v44 = vrot.slane %v8672_v8, 1  ;;  %8699 = vtanh.f32 %v4571_v23 }
 0x6d5   :  { %v4673_v22 = vrot.slane %v4641_v27, 7  ;;  %v4701_v26 = vmul.f32 %v11808_v3, %v4669_v4  ;;  %v8676_v39 = vpop.eup %8675  ;;  %v4610_v41 = vrot.slane %v8674_v56, 1  ;;  %v4638_v57 = vsub.f32 %v11634_v5, %v4606_v29 }
 0x6d6   :  { %v4675_v51 = vrot.slane %v4643_v20, 7  ;;  %v4703_v38 = vmul.f32 %v11810_v58, %v4671_v17  ;;  %v8678_v24 = vpop.eup %8677  ;;  %v4612_v19 = vrot.slane %v8676_v39, 1  ;;  %v4640_v15 = vsub.f32 %v11639_v13, %v4608_v44  ;;  %v13271_v20 = vld [vmem:[#allocation69_spill] sm:$0xff] }
 0x6d7   :  { %v11896_v21 = vmul.f32 %v11812_v47, %v4673_v22  ;;  %v11898_v32 = vadd.f32 %v8662_v35, %v4701_v26  ;;  %v8680_v55 = vpop.eup %8679  ;;  %v4614_v14 = vrot.slane %v8678_v24, 1  ;;  %v4642_v3 = vsub.f32 %v11644_v50, %v4610_v41  ;;  %v13272_v26 = vld [vmem:[#allocation70_spill] sm:$0xff] }
 0x6d8   :  { %v4670_v23 = vrot.slane %v4638_v57, 7  ;;  %v11902_v31 = vmul.f32 %v11814_v61, %v4675_v51  ;;  %v8682_v5 = vpop.eup %8681  ;;  %v4616_v0 = vrot.slane %v8680_v55, 1  ;;  %v4644_v58 = vsub.f32 %v11628_v60, %v4612_v19 }
 0x6d9   :  { %v4672_v37 = vrot.slane %v4640_v15, 7  ;;  %v11905_v1 = vadd.f32 %v8664_v36, %v4703_v38  ;;  %v8684_v13 = vpop.eup %8683  ;;  %v4618_v47 = vrot.slane %v8682_v5, 1  ;;  %v4646_v35 = vsub.f32 %v11649_v33, %v4614_v14  ;;  %v13273_v33 = vld [vmem:[#allocation20_spill] sm:$0xff] }
 0x6da   :  { %v4674_v27 = vrot.slane %v4642_v3, 7  ;;  %v4702_v4 = vmul.f32 %v11838_v25, %v4670_v23  ;;  %v8686_v29 = vpop.eup %8685  ;;  %v4620_v50 = vrot.slane %v8684_v13, 1  ;;  %v4648_v17 = vsub.f32 %v13271_v20, %v4616_v0 }
 0x6db   :  { %v4676_v61 = vrot.slane %v4644_v58, 7  ;;  %v4704_v44 = vmul.f32 %v11840_v9, %v4672_v37  ;;  %v8688_v22 = vpop.eup %8687  ;;  %v4650_v60 = vsub.f32 %v13272_v26, %v4618_v47  ;;  %v4678_v41 = vrot.slane %v4646_v35, 7 }
 0x6dc   :  { %v4706_v36 = vmul.f32 %v11845_v53, %v4674_v27  ;;  %v11913_v57 = vadd.f32 %v8670_v54, %v4702_v4  ;;  %v8690_v51 = vpop.eup %8689  ;;  %v4652_v38 = vsub.f32 %v13273_v33, %v4620_v50  ;;  %v4680_v19 = vrot.slane %v4648_v17, 7 }
 0x6dd   :  { %v4708_v25 = vmul.f32 %v11848_v12, %v4676_v61  ;;  %v11917_v15 = vadd.f32 %v8672_v8, %v4704_v44  ;;  %v8692_v14 = vpop.eup %8691  ;;  %v4682_v3 = vrot.slane %v4650_v60, 7  ;;  %v4710_v9 = vmul.f32 %v11851_v40, %v4678_v41 }
 0x6de   :  { %v11920_v23 = vadd.f32 %v8674_v56, %v4706_v36  ;;  %v4734_v0 = vpack.c.bf16 %v11913_v57, %v11913_v57  ;;  %v8694_v53 = vpop.eup %8693  ;;  %v4684_v54 = vrot.slane %v4652_v38, 7  ;;  %v4712_v58 = vmul.f32 %v11858_v45, %v4680_v19 }
 0x6df   :  { %v11925_v37 = vadd.f32 %v8676_v39, %v4708_v25  ;;  %v4736_v12 = vpack.c.bf16 %v11917_v15, %v11917_v15  ;;  %v8696_v8 = vpop.eup %8695  ;;  %v4714_v47 = vmul.f32 %v11863_v59, %v4682_v3  ;;  %v11930_v35 = vadd.f32 %v8678_v24, %v4710_v9 }
 0x6e0   :  { %v4738_v40 = vpack.c.bf16 %v11920_v23, %v11920_v23  ;;  %v4766_v56 = vunpack.c.l.b16 %v4734_v0  ;;  %v8698_v27 = vpop.eup %8697  ;;  %v4716_v4 = vmul.f32 %v8686_v29, %v4684_v54  ;;  %v11934_v50 = vadd.f32 %v8680_v55, %v4712_v58 }
 0x6e1   :  { %13274 = vst [vmem:[#allocation65_spill] sm:$0xff] %v11925_v37  ;;  %13275 = vst [vmem:[#allocation19_spill] sm:$0xff] %v11930_v35  ;;  %v4740_v45 = vpack.c.bf16 %v11925_v37, %v11925_v37  ;;  %v4768_v39 = vunpack.c.l.b16 %v4736_v12  ;;  %v11938_v20 = vpop.eup %8699  ;;  %v11940_v17 = vadd.f32 %v8682_v5, %v4714_v47  ;;  %v4742_v59 = vpack.c.bf16 %v11930_v35, %v11930_v35 }
 0x6e2   :  { %13276 = vst [vmem:[#allocation22_spill] sm:$0xff] %v11934_v50  ;;  %v4770_v24 = vunpack.c.l.b16 %v4738_v40  ;;  %v4795_v61 = vrot.slane %v4766_v56, 4  ;;  %v11944_v44 = vadd.f32 %v8684_v13, %v4716_v4  ;;  %v4744_v29 = vpack.c.bf16 %v11934_v50, %v11934_v50  ;;  %v13279_v56 = vld [vmem:[#allocation27_spill] sm:$0xff] }
 0x6e3   :  { %13277 = vst [vmem:[#allocation66_spill] sm:$0xff] %v11940_v17  ;;  %v4772_v55 = vunpack.c.l.b16 %v4740_v45  ;;  %v4796_v26 = vrot.slane %v4768_v39, 3  ;;  %v4746_v60 = vpack.c.bf16 %v11940_v17, %v11940_v17  ;;  %v4774_v41 = vunpack.c.l.b16 %v4742_v59  ;;  %v13280_v59 = vld [vmem:[#allocation68_spill] sm:$0xff] }
 0x6e4   :  { %13278 = vst [vmem:[#allocation67_spill] sm:$0xff] %v11944_v44  ;;  %v4798_v36 = vrot.slane %v4770_v24, 2  ;;  %v4475_v33 = vadd.f32 1.0, %v8688_v22  ;;  %v4748_v5 = vpack.c.bf16 %v11944_v44, %v11944_v44  ;;  %v4776_v38 = vunpack.c.l.b16 %v4744_v29  ;;  %v13323_v44 = vld [vmem:[#allocation61_spill] sm:$0xff] }
 0x6e5   :  { %v4797_v19 = vsel %vm1771_vm0, %v4796_v26, %v4795_v61  ;;  %v4800_v25 = vrot.slane %v4772_v55, 1  ;;  %v4778_v13 = vunpack.c.l.b16 %v4746_v60  ;;  %v4615_v9 = vrot.slane %v8696_v8, 1 }
 0x6e6   :  { %v4799_v3 = vsel %vm1774_vm1, %v4798_v36, %v4797_v19  ;;  %8701 = vrcp.f32 %v4475_v33  ;;  %v4780_v0 = vunpack.c.l.b16 %v4748_v5  ;;  %v4803_v58 = vrot.slane %v4776_v38, 7 }
 0x6e7   :  { %v4801_v54 = vsel %vm1777_vm2, %v4800_v25, %v4799_v3  ;;  %v4617_v12 = vrot.slane %v8698_v27, 1  ;;  %v4805_v22 = vrot.slane %v4778_v13, 6  ;;  %v4619_v40 = vrot.slane %v11938_v20, 1 }
 0x6e8   :  { %v4802_v47 = vsel %vm1780_vm3, %v4774_v41, %v4801_v54  ;;  %v4647_v4 = vsub.f32 %v13279_v56, %v4615_v9  ;;  %v4807_v39 = vrot.slane %v4780_v0, 5  ;;  %v4709_v61 = vmul.f32 %v8690_v51, %v4677_v34  ;;  %v13281_v41 = vld [vmem:[#allocation63_spill] sm:$0xff] }
 0x6e9   :  { %v4804_v45 = vsel %vm1783_vm4, %v4803_v58, %v4802_v47  ;;  %v4649_v24 = vsub.f32 %v13280_v59, %v4617_v12  ;;  %v11965_v26 = vadd.f32 %v11875_v46, %v11896_v21  ;;  %v4651_v36 = vsub.f32 %v13281_v41, %v4619_v40 }
 0x6ea   :  { %v4806_v29 = vsel %vm1786_vm5, %v4805_v22, %v4804_v45  ;;  %v4679_v55 = vrot.slane %v4647_v4, 7  ;;  %v11971_v5 = vadd.f32 %v11881_v48, %v11902_v31  ;;  %v11974_v10 = vadd.f32 %v11868_v2, %v4709_v61 }
 0x6eb   :  { %v4808_v60 = vsel %vm1789_vm6, %v4807_v39, %v4806_v29  ;;  %v4681_v33 = vrot.slane %v4649_v24, 7  ;;  %v4733_v34 = vpack.c.bf16 %v11898_v32, %v11898_v32  ;;  %v4735_v46 = vpack.c.bf16 %v11905_v1, %v11905_v1 }
 0x6ec   :  { %v4810_v38 = vpack.c.b16 %v4808_v60, %v4808_v60  ;;  %v4711_v19 = vmul.f32 %v8692_v14, %v4679_v55  ;;  %13282 = vst [vmem:[#allocation59_spill] sm:$0xff] %v11974_v10  ;;  %v4737_v21 = vpack.c.bf16 %v11965_v26, %v11965_v26  ;;  %v4739_v25 = vpack.c.bf16 %v11971_v5, %v11971_v5 }
 0x6ed   :  { %v4713_v51 = vmul.f32 %v8694_v53, %v4681_v33  ;;  %v4765_v31 = vunpack.c.l.b16 %v4733_v34  ;;  %v4767_v14 = vunpack.c.l.b16 %v4735_v46  ;;  %v4683_v53 = vrot.slane %v4651_v36, 7  ;;  %v9568_v46 = vld [vmem:[#allocation8 + $0x134] ss:$24 sps:$4 sm:$0xff]  }
 0x6ee   :  { %4845 = vmatprep.mubr.bf16.mxu0 %v4810_v38  ;;  %4886 = vmatprep.mubr.bf16.mxu1 %v4810_v38  ;;  %v11984_v48 = vadd.f32 %v8696_v8, %v4711_v19  ;;  %v4769_v13 = vunpack.c.l.b16 %v4737_v21  ;;  %v4771_v3 = vunpack.c.l.b16 %v4739_v25  ;;  %v4741_v9 = vpack.c.bf16 %v11974_v10, %v11974_v10  ;;  %v9569_v21 = vld [vmem:[#allocation8 + $0x150] ss:$24 sps:$4 sm:$0xff]   ;;  %v9570_v25 = vld [vmem:[#allocation8 + $0x124] ss:$24 sps:$4 sm:$0xff]  }
 0x6ef   :  { %v11986_v2 = vadd.f32 %v8698_v27, %v4713_v51  ;;  %v4781_v54 = vrot.slane %v4765_v31, 4  ;;  %v4782_v12 = vrot.slane %v4767_v14, 3  ;;  %v9571_v31 = vld [vmem:[#allocation8 + $0x130] ss:$24 sps:$4 sm:$0xff]   ;;  %v9572_v14 = vld [vmem:[#allocation8 + $0x104] ss:$24 sps:$4 sm:$0xff]  }
 0x6f0   :  { %13283 = vst [vmem:[#allocation69_spill] sm:$0xff] %v11984_v48  ;;  %v4743_v0 = vpack.c.bf16 %v11984_v48, %v11984_v48  ;;  %v4784_v8 = vrot.slane %v4769_v13, 2  ;;  %v4786_v40 = vrot.slane %v4771_v3, 1  ;;  %v4773_v4 = vunpack.c.l.b16 %v4741_v9  ;;  %v9573_v13 = vld [vmem:[#allocation8 + $0x120] ss:$24 sps:$4 sm:$0xff]  }
 0x6f1   :  { %13284 = vst [vmem:[#allocation70_spill] sm:$0xff] %v11986_v2  ;;  %v4745_v58 = vpack.c.bf16 %v11986_v2, %v11986_v2  ;;  %v4783_v27 = vsel %vm1771_vm0, %v4782_v12, %v4781_v54  ;;  %v9574_v3 = vld [vmem:[#allocation8 + $0xf4] ss:$24 sps:$4 sm:$0xff]   ;;  %v9579_v54 = vld [vmem:[#allocation8 + $0xd0] ss:$24 sps:$4 sm:$0xff]  }
 0x6f2   :  { %v4775_v47 = vunpack.c.l.b16 %v4743_v0  ;;  %v4785_v45 = vsel %vm1774_vm1, %v4784_v8, %v4783_v27  ;;  %v9576_v9 = vld [vmem:[#allocation8 + $0xd4] ss:$24 sps:$4 sm:$0xff]   ;;  %v9577_v0 = vld [vmem:[#allocation8 + $0xf0] ss:$24 sps:$4 sm:$0xff]   ;;  %v9581_v12 = vld [vmem:[#allocation8 + $0xc0] ss:$24 sps:$4 sm:$0xff]  }
 0x6f3   :  { %v8702_v22 = vpop.eup %8701  ;;  %v4777_v39 = vunpack.c.l.b16 %v4745_v58  ;;  %v4787_v59 = vsel %vm1777_vm2, %v4786_v40, %v4785_v45  ;;  %v9580_v58 = vld [vmem:[#allocation8 + $0xa4] ss:$24 sps:$4 sm:$0xff]   ;;  %v9582_v8 = vld [vmem:[#allocation8 + $0x94] ss:$24 sps:$4 sm:$0xff]   ;;  %v9585_v27 = vld [vmem:[#allocation8 + $0x90] ss:$24 sps:$4 sm:$0xff]  }
 0x6f4   :  { %v4715_v56 = vmul.f32 %v8702_v22, %v4683_v53  ;;  %v4788_v61 = vsel %vm1780_vm3, %v4773_v4, %v4787_v59  ;;  %v4789_v29 = vrot.slane %v4775_v47, 7  ;;  %v9575_v53 = vld [vmem:[#allocation8 + $0x100] ss:$24 sps:$4 sm:$0xff]   ;;  %v9584_v22 = vld [vmem:[#allocation8 + $0x74] ss:$24 sps:$4 sm:$0xff]  }
 0x6f5   :  { %v4791_v41 = vrot.slane %v4777_v39, 6  ;;  %v9583_v47 = vld [vmem:[#allocation8 + $0xa0] ss:$24 sps:$4 sm:$0xff]   ;;  %v9586_v40 = vld [vmem:[#allocation8 + $0x64] ss:$24 sps:$4 sm:$0xff]  }
 0x6f6   :  { %v11998_v24 = vadd.f32 %v11938_v20, %v4715_v56  ;;  %v4790_v60 = vsel %vm1783_vm4, %v4789_v29, %v4788_v61  ;;  %v9567_v20 = vld [vmem:[#allocation8 + $0x160] ss:$24 sps:$4 sm:$0xff]   ;;  %v9587_v56 = vld [vmem:[#allocation8 + $0x70] ss:$24 sps:$4 sm:$0xff]   ;;  %v9588_v4 = vld [vmem:[#allocation8 + $0x44] ss:$24 sps:$4 sm:$0xff]  }
 0x6f7   :  { %v4792_v33 = vsel %vm1786_vm5, %v4791_v41, %v4790_v60  ;;  %v9589_v45 = vld [vmem:[#allocation8 + $0x60] ss:$24 sps:$4 sm:$0xff]   ;;  %v9590_v39 = vld [vmem:[#allocation8 + $0x34] ss:$24 sps:$4 sm:$0xff]   ;;  %v9593_v29 = vld [vmem:[#allocation8 + $0x30] ss:$24 sps:$4 sm:$0xff]  }
 0x6f8   :  { %13285 = vst [vmem:[#allocation20_spill] sm:$0xff] %v11998_v24  ;;  %v4747_v55 = vpack.c.bf16 %v11998_v24, %v11998_v24  ;;  %v9591_v59 = vld [vmem:[#allocation8 + $0x40] ss:$24 sps:$4 sm:$0xff]   ;;  %v9592_v61 = vld [vmem:[#allocation8 + $0x14] ss:$24 sps:$4 sm:$0xff]  }
 0x6f9   :  { %v9595_v60 = vld [vmem:[#allocation8 + $0x10] ss:$24 sps:$4 sm:$0xff]   ;;  %v9596_v41 = vld [vmem:[#allocation8 + $0x2e4] ss:$24 sps:$4 sm:$0xff]  }
 0x6fa   :  { %v4779_v36 = vunpack.c.l.b16 %v4747_v55  ;;  %v9594_v55 = vld [vmem:[#allocation8 + $0x4] ss:$24 sps:$4 sm:$0xff]  }
 0x6fc   :  { %v4793_v19 = vrot.slane %v4779_v36, 5  ;;  %v9597_v36 = vld [vmem:[#allocation8] ss:$24 sps:$4 sm:$0xff]  }
 0x6fe   :  { %v4794_v34 = vsel %vm1789_vm6, %v4793_v19, %v4792_v33  ;;  %v9598_v33 = vld [vmem:[#allocation8 + $0x2d4] ss:$24 sps:$4 sm:$0xff]   ;;  %v9599_v19 = vld [vmem:[#allocation8 + $0x2e0] ss:$24 sps:$4 sm:$0xff]  }
 0x6ff   :  { %v12006_v51 = vpack.c.b16 %v4794_v34, %v4794_v34  ;;  %v9600_v34 = vld [vmem:[#allocation8 + $0x2b4] ss:$24 sps:$4 sm:$0xff]  }
 0x701   :  { %4846 = vmatmul.mubr.bf16.vlgmr.msra.gmra.mxu0 %v12006_v51  ;;  %4887 = vmatmul.mubr.bf16.vlgmr.msra.gmra.mxu1 %v12006_v51 }
 0x702   :  { %4896 = vmatpush1.bf16.msra.mxu0 %v9567_v20  ;;  %4927 = vmatprep.mubr.bf16.mxu0 %v4810_v38  ;;  %v9578_v38 = vld [vmem:[#allocation8 + $0xc4] ss:$24 sps:$4 sm:$0xff]   ;;  %v9601_v20 = vld [vmem:[#allocation8 + $0x2d0] ss:$24 sps:$4 sm:$0xff]  }
 0x703   :  { %4897 = vmatprep.subr.bf16.mxu0 %v9568_v46  ;;  %5529 = vmatpush1.bf16.msra.mxu1 %v9569_v21  ;;  %v9602_v46 = vld [vmem:[#allocation8 + $0x2a4] ss:$24 sps:$4 sm:$0xff]   ;;  %v9603_v21 = vld [vmem:[#allocation8 + $0x2b0] ss:$24 sps:$4 sm:$0xff]  }
 0x704   :  { %5530 = vmatprep.subr.bf16.mxu1 %v9570_v25  ;;  %v9604_v25 = vld [vmem:[#allocation8 + $0x284] ss:$24 sps:$4 sm:$0xff]  }
 0x706   :  { %4898 = vmatpush1.bf16.msra.mxu0 %v9571_v31  ;;  %v9605_v31 = vld [vmem:[#allocation8 + $0x2a0] ss:$24 sps:$4 sm:$0xff]  }
 0x707   :  { %4899 = vmatprep.subr.bf16.mxu0 %v9572_v14  ;;  %5531 = vmatpush1.bf16.msra.mxu1 %v9573_v13  ;;  %v9606_v14 = vld [vmem:[#allocation8 + $0x274] ss:$24 sps:$4 sm:$0xff]   ;;  %v9607_v13 = vld [vmem:[#allocation8 + $0x280] ss:$24 sps:$4 sm:$0xff]  }
 0x708   :  { %5532 = vmatprep.subr.bf16.mxu1 %v9574_v3  ;;  %v9608_v3 = vld [vmem:[#allocation8 + $0x254] ss:$24 sps:$4 sm:$0xff]  }
 0x70a   :  { %4900 = vmatpush1.bf16.msra.mxu0 %v9575_v53  ;;  %v9609_v53 = vld [vmem:[#allocation8 + $0x270] ss:$24 sps:$4 sm:$0xff]  }
 0x70b   :  { %4901 = vmatprep.subr.bf16.mxu0 %v9576_v9  ;;  %5533 = vmatpush1.bf16.msra.mxu1 %v9577_v0  ;;  %v9610_v9 = vld [vmem:[#allocation8 + $0x244] ss:$24 sps:$4 sm:$0xff]   ;;  %v9611_v0 = vld [vmem:[#allocation8 + $0x250] ss:$24 sps:$4 sm:$0xff]  }
 0x70c   :  { %5534 = vmatprep.subr.bf16.mxu1 %v9578_v38  ;;  %v9612_v38 = vld [vmem:[#allocation8 + $0x224] ss:$24 sps:$4 sm:$0xff]  }
 0x70e   :  { %4902 = vmatpush1.bf16.msra.mxu0 %v9579_v54  ;;  %v9613_v54 = vld [vmem:[#allocation8 + $0x240] ss:$24 sps:$4 sm:$0xff]  }
 0x70f   :  { %4903 = vmatprep.subr.bf16.mxu0 %v9580_v58  ;;  %5535 = vmatpush1.bf16.msra.mxu1 %v9581_v12  ;;  %v9614_v58 = vld [vmem:[#allocation8 + $0x214] ss:$24 sps:$4 sm:$0xff]   ;;  %v9615_v12 = vld [vmem:[#allocation8 + $0x220] ss:$24 sps:$4 sm:$0xff]  }
 0x710   :  { %5536 = vmatprep.subr.bf16.mxu1 %v9582_v8  ;;  %v9616_v8 = vld [vmem:[#allocation8 + $0x1f4] ss:$24 sps:$4 sm:$0xff]  }
 0x712   :  { %4904 = vmatpush1.bf16.msra.mxu0 %v9583_v47  ;;  %v9617_v47 = vld [vmem:[#allocation8 + $0x210] ss:$24 sps:$4 sm:$0xff]  }
 0x713   :  { %4905 = vmatprep.subr.bf16.mxu0 %v9584_v22  ;;  %5537 = vmatpush1.bf16.msra.mxu1 %v9585_v27  ;;  %v9618_v22 = vld [vmem:[#allocation8 + $0x1e4] ss:$24 sps:$4 sm:$0xff]   ;;  %v9619_v27 = vld [vmem:[#allocation8 + $0x1f0] ss:$24 sps:$4 sm:$0xff]  }
 0x714   :  { %5538 = vmatprep.subr.bf16.mxu1 %v9586_v40  ;;  %v9620_v40 = vld [vmem:[#allocation8 + $0x1c4] ss:$24 sps:$4 sm:$0xff]  }
 0x716   :  { %4906 = vmatpush1.bf16.msra.mxu0 %v9587_v56  ;;  %v9621_v56 = vld [vmem:[#allocation8 + $0x1e0] ss:$24 sps:$4 sm:$0xff]  }
 0x717   :  { %4907 = vmatprep.subr.bf16.mxu0 %v9588_v4  ;;  %5539 = vmatpush1.bf16.msra.mxu1 %v9589_v45  ;;  %v9622_v4 = vld [vmem:[#allocation8 + $0x1b4] ss:$24 sps:$4 sm:$0xff]   ;;  %v9623_v45 = vld [vmem:[#allocation8 + $0x1c0] ss:$24 sps:$4 sm:$0xff]  }
 0x718   :  { %5540 = vmatprep.subr.bf16.mxu1 %v9590_v39  ;;  %v9624_v39 = vld [vmem:[#allocation8 + $0x194] ss:$24 sps:$4 sm:$0xff]  }
 0x71a   :  { %4908 = vmatpush1.bf16.msra.mxu0 %v9591_v59  ;;  %v9625_v59 = vld [vmem:[#allocation8 + $0x1b0] ss:$24 sps:$4 sm:$0xff]  }
 0x71b   :  { %4909 = vmatprep.subr.bf16.mxu0 %v9592_v61  ;;  %5541 = vmatpush1.bf16.msra.mxu1 %v9593_v29  ;;  %v9626_v61 = vld [vmem:[#allocation8 + $0x184] ss:$24 sps:$4 sm:$0xff]   ;;  %v9627_v29 = vld [vmem:[#allocation8 + $0x190] ss:$24 sps:$4 sm:$0xff]  }
 0x71c   :  { %5542 = vmatprep.subr.bf16.mxu1 %v9594_v55  ;;  %v9628_v55 = vld [vmem:[#allocation8 + $0x15c] ss:$24 sps:$4 sm:$0xff]  }
 0x71e   :  { %4910 = vmatpush1.bf16.msra.mxu0 %v9595_v60  ;;  %v9629_v60 = vld [vmem:[#allocation8 + $0x180] ss:$24 sps:$4 sm:$0xff]  }
 0x71f   :  { %4911 = vmatprep.subr.bf16.mxu0 %v9596_v41  ;;  %5543 = vmatpush1.bf16.msra.mxu1 %v9597_v36  ;;  %v9630_v41 = vld [vmem:[#allocation8 + $0x164] ss:$24 sps:$4 sm:$0xff]   ;;  %v9631_v36 = vld [vmem:[#allocation8 + $0x158] ss:$24 sps:$4 sm:$0xff]  }
 0x720   :  { %5544 = vmatprep.subr.bf16.mxu1 %v9598_v33  ;;  %v9632_v33 = vld [vmem:[#allocation8 + $0x12c] ss:$24 sps:$4 sm:$0xff]  }
 0x722   :  { %4912 = vmatpush2.bf16.msra.mxu0 %v9599_v19  ;;  %v9633_v19 = vld [vmem:[#allocation8 + $0x128] ss:$24 sps:$4 sm:$0xff]  }
 0x723   :  { %4913 = vmatprep.subr.bf16.mxu0 %v9600_v34  ;;  %5545 = vmatpush2.bf16.msra.mxu1 %v9601_v20  ;;  %v9634_v34 = vld [vmem:[#allocation8 + $0xfc] ss:$24 sps:$4 sm:$0xff]   ;;  %v9635_v20 = vld [vmem:[#allocation8 + $0xf8] ss:$24 sps:$4 sm:$0xff]  }
 0x724   :  { %5546 = vmatprep.subr.bf16.mxu1 %v9602_v46  ;;  %v9636_v46 = vld [vmem:[#allocation8 + $0xcc] ss:$24 sps:$4 sm:$0xff]  }
 0x726   :  { %4914 = vmatpush2.bf16.msra.mxu0 %v9603_v21  ;;  %v9637_v21 = vld [vmem:[#allocation8 + $0xc8] ss:$24 sps:$4 sm:$0xff]  }
 0x727   :  { %4915 = vmatprep.subr.bf16.mxu0 %v9604_v25  ;;  %5547 = vmatpush2.bf16.msra.mxu1 %v9605_v31  ;;  %v9638_v25 = vld [vmem:[#allocation8 + $0x9c] ss:$24 sps:$4 sm:$0xff]   ;;  %v9639_v31 = vld [vmem:[#allocation8 + $0x98] ss:$24 sps:$4 sm:$0xff]  }
 0x728   :  { %5548 = vmatprep.subr.bf16.mxu1 %v9606_v14  ;;  %v9640_v14 = vld [vmem:[#allocation8 + $0x6c] ss:$24 sps:$4 sm:$0xff]  }
 0x72a   :  { %4916 = vmatpush2.bf16.msra.mxu0 %v9607_v13  ;;  %v9642_v13 = vld [vmem:[#allocation8 + $0x3c] ss:$24 sps:$4 sm:$0xff]  }
 0x72b   :  { %4917 = vmatprep.subr.bf16.mxu0 %v9608_v3  ;;  %5549 = vmatpush2.bf16.msra.mxu1 %v9609_v53  ;;  %v9643_v3 = vld [vmem:[#allocation8 + $0x38] ss:$24 sps:$4 sm:$0xff]   ;;  %v9644_v53 = vld [vmem:[#allocation8 + $0xc] ss:$24 sps:$4 sm:$0xff]  }
 0x72c   :  { %5550 = vmatprep.subr.bf16.mxu1 %v9610_v9  ;;  %v9645_v9 = vld [vmem:[#allocation8 + $0x8] ss:$24 sps:$4 sm:$0xff]  }
 0x72e   :  { %4918 = vmatpush2.bf16.msra.mxu0 %v9611_v0  ;;  %v9646_v0 = vld [vmem:[#allocation8 + $0x2dc] ss:$24 sps:$4 sm:$0xff]  }
 0x72f   :  { %4919 = vmatprep.subr.bf16.mxu0 %v9612_v38  ;;  %5551 = vmatpush2.bf16.msra.mxu1 %v9613_v54  ;;  %v9647_v38 = vld [vmem:[#allocation8 + $0x2d8] ss:$24 sps:$4 sm:$0xff]   ;;  %v9648_v54 = vld [vmem:[#allocation8 + $0x2ac] ss:$24 sps:$4 sm:$0xff]  }
 0x730   :  { %5552 = vmatprep.subr.bf16.mxu1 %v9614_v58  ;;  %v9649_v58 = vld [vmem:[#allocation8 + $0x2a8] ss:$24 sps:$4 sm:$0xff]  }
 0x732   :  { %4920 = vmatpush2.bf16.msra.mxu0 %v9615_v12  ;;  %v9650_v12 = vld [vmem:[#allocation8 + $0x27c] ss:$24 sps:$4 sm:$0xff]  }
 0x733   :  { %4921 = vmatprep.subr.bf16.mxu0 %v9616_v8  ;;  %5553 = vmatpush2.bf16.msra.mxu1 %v9617_v47  ;;  %v9651_v8 = vld [vmem:[#allocation8 + $0x278] ss:$24 sps:$4 sm:$0xff]   ;;  %v9652_v47 = vld [vmem:[#allocation8 + $0x24c] ss:$24 sps:$4 sm:$0xff]  }
 0x734   :  { %5554 = vmatprep.subr.bf16.mxu1 %v9618_v22  ;;  %v9653_v22 = vld [vmem:[#allocation8 + $0x248] ss:$24 sps:$4 sm:$0xff]  }
 0x736   :  { %4922 = vmatpush2.bf16.msra.mxu0 %v9619_v27  ;;  %v9654_v27 = vld [vmem:[#allocation8 + $0x21c] ss:$24 sps:$4 sm:$0xff]  }
 0x737   :  { %4923 = vmatprep.subr.bf16.mxu0 %v9620_v40  ;;  %5555 = vmatpush2.bf16.msra.mxu1 %v9621_v56  ;;  %v9655_v40 = vld [vmem:[#allocation8 + $0x218] ss:$24 sps:$4 sm:$0xff]   ;;  %v9656_v56 = vld [vmem:[#allocation8 + $0x1ec] ss:$24 sps:$4 sm:$0xff]  }
 0x738   :  { %5556 = vmatprep.subr.bf16.mxu1 %v9622_v4  ;;  %v9657_v4 = vld [vmem:[#allocation8 + $0x1e8] ss:$24 sps:$4 sm:$0xff]  }
 0x73a   :  { %4924 = vmatpush2.bf16.msra.mxu0 %v9623_v45  ;;  %v9658_v45 = vld [vmem:[#allocation8 + $0x1bc] ss:$24 sps:$4 sm:$0xff]  }
 0x73b   :  { %4925 = vmatprep.subr.bf16.mxu0 %v9624_v39  ;;  %5557 = vmatpush2.bf16.msra.mxu1 %v9625_v59  ;;  %v9659_v39 = vld [vmem:[#allocation8 + $0x1b8] ss:$24 sps:$4 sm:$0xff]   ;;  %v9660_v59 = vld [vmem:[#allocation8 + $0x18c] ss:$24 sps:$4 sm:$0xff]  }
 0x73c   :  { %5558 = vmatprep.subr.bf16.mxu1 %v9626_v61  ;;  %v9661_v61 = vld [vmem:[#allocation8 + $0x188] ss:$24 sps:$4 sm:$0xff]  }
 0x73e   :  { %4926 = vmatpush2.bf16.msra.mxu0 %v9627_v29  ;;  %v9662_v29 = vld [vmem:[#allocation8 + $0x154] ss:$24 sps:$4 sm:$0xff]  }
 0x73f   :  { %5569 = vmatprep.subr.bf16.mxu0 %v9628_v55  ;;  %5559 = vmatpush2.bf16.msra.mxu1 %v9629_v60 }
 0x740   :  { %5610 = vmatprep.subr.bf16.mxu1 %v9630_v41  ;;  %v13286_v41 = vld [vmem:[#allocation18_spill] sm:$0xff] }
 0x741   :  { %4928 = vmatmul.mubr.bf16.vlgmr.msra.gmra.mxu0 %v12006_v51  ;;  %v9641_v51 = vld [vmem:[#allocation8 + $0x68] ss:$24 sps:$4 sm:$0xff]  }
 0x742   :  { %5570 = vmatpush1.bf16.msra.mxu0 %v9631_v36 }
 0x743   :  { %5571 = vmatprep.subr.bf16.mxu0 %v9632_v33  ;;  %v13287_v33 = vld [vmem:[#allocation40_spill] sm:$0xff] }
 0x746   :  { %5572 = vmatpush1.bf16.msra.mxu0 %v9633_v19 }
 0x747   :  { %5573 = vmatprep.subr.bf16.mxu0 %v9634_v34 }
 0x74a   :  { %5574 = vmatpush1.bf16.msra.mxu0 %v9635_v20 }
 0x74b   :  { %5575 = vmatprep.subr.bf16.mxu0 %v9636_v46 }
 0x74e   :  { %5576 = vmatpush1.bf16.msra.mxu0 %v9637_v21 }
 0x74f   :  { %5577 = vmatprep.subr.bf16.mxu0 %v9638_v25 }
 0x752   :  { %5578 = vmatpush1.bf16.msra.mxu0 %v9639_v31 }
 0x753   :  { %5579 = vmatprep.subr.bf16.mxu0 %v9640_v14 }
 0x756   :  { %5580 = vmatpush1.bf16.msra.mxu0 %v9641_v51 }
 0x757   :  { %5581 = vmatprep.subr.bf16.mxu0 %v9642_v13 }
 0x75a   :  { %5582 = vmatpush1.bf16.msra.mxu0 %v9643_v3  ;;  %v13288_v3 = vld [vmem:[#allocation29_spill] sm:$0xff] }
 0x75b   :  { %5583 = vmatprep.subr.bf16.mxu0 %v9644_v53 }
 0x75e   :  { %5584 = vmatpush1.bf16.msra.mxu0 %v9645_v9 }
 0x75f   :  { %5585 = vmatprep.subr.bf16.mxu0 %v9646_v0 }
 0x762   :  { %5586 = vmatpush2.bf16.msra.mxu0 %v9647_v38  ;;  %v13289_v38 = vld [vmem:[#allocation23_spill] sm:$0xff] }
 0x763   :  { %5587 = vmatprep.subr.bf16.mxu0 %v9648_v54 }
 0x766   :  { %5588 = vmatpush2.bf16.msra.mxu0 %v9649_v58  ;;  %v13290_v58 = vld [vmem:[#allocation24_spill] sm:$0xff] }
 0x767   :  { %5589 = vmatprep.subr.bf16.mxu0 %v9650_v12 }
 0x76a   :  { %5590 = vmatpush2.bf16.msra.mxu0 %v9651_v8  ;;  %v13291_v8 = vld [vmem:[#allocation25_spill] sm:$0xff] }
 0x76b   :  { %5591 = vmatprep.subr.bf16.mxu0 %v9652_v47 }
 0x76e   :  { %5592 = vmatpush2.bf16.msra.mxu0 %v9653_v22  ;;  %v13292_v22 = vld [vmem:[#allocation26_spill] sm:$0xff] }
 0x76f   :  { %5593 = vmatprep.subr.bf16.mxu0 %v9654_v27 }
 0x772   :  { %5594 = vmatpush2.bf16.msra.mxu0 %v9655_v40  ;;  %v13293_v40 = vld [vmem:[#allocation28_spill] sm:$0xff] }
 0x773   :  { %5595 = vmatprep.subr.bf16.mxu0 %v9656_v56 }
 0x776   :  { %5596 = vmatpush2.bf16.msra.mxu0 %v9657_v4  ;;  %v13294_v4 = vld [vmem:[#allocation30_spill] sm:$0xff] }
 0x777   :  { %5597 = vmatprep.subr.bf16.mxu0 %v9658_v45 }
 0x77a   :  { %5598 = vmatpush2.bf16.msra.mxu0 %v9659_v39 }
 0x77b   :  { %5599 = vmatprep.subr.bf16.mxu0 %v9660_v59 }
 0x77e   :  { %5600 = vmatpush2.bf16.msra.mxu0 %v9661_v61 }
 0x77f   :  { %6243 = vmatprep.subr.bf16.mxu0 %v9662_v29  ;;  %v13295_v29 = vld [vmem:[#allocation31_spill] sm:$0xff] }
 0x7c1   :  { %v4847_v55 = vpop.f32.mrf.mxu0  ;;  %v4888_v60 = vpop.f32.mrf.mxu1 }
 0x7c2   :  { %v4848_v36 = vadd.f32 %v4847_v55, %v13286_v41  ;;  %v12013_v19 = vadd.f32 %v4888_v60, %v13287_v33 }
 0x7c3   :  { %v4849_v34 = vpop.f32.mrf.mxu0  ;;  %v12015_v20 = vpop.f32.mrf.mxu1 }
 0x7c4   :  { %v4938_v46 = vrot.slane %v4848_v36, 3  ;;  %v4940_v21 = vrot.slane %v4848_v36, 4  ;;  %v4942_v25 = vrot.slane %v4848_v36, 5  ;;  %v4944_v31 = vrot.slane %v4848_v36, 6 }
 0x7c5   :  { %v4946_v14 = vrot.slane %v4848_v36, 7  ;;  %v4948_v51 = vrot.slane %v4848_v36, 1  ;;  %v4950_v13 = vrot.slane %v4848_v36, 2  ;;  %v4978_v53 = vadd.f32 %v4848_v36, %v13288_v3  ;;  %v4851_v9 = vpop.f32.mrf.mxu0  ;;  %v4892_v0 = vpop.f32.mrf.mxu1 }
 0x7c6   :  { %v4968_v54 = vadd.f32 %v4938_v46, %v13289_v38  ;;  %v4970_v12 = vadd.f32 %v4940_v21, %v13290_v58  ;;  %v4972_v47 = vadd.f32 %v4942_v25, %v13291_v8  ;;  %v4974_v27 = vadd.f32 %v4944_v31, %v13292_v22  ;;  %v13308_v22 = vld [vmem:[#allocation35_spill] sm:$0xff] }
 0x7c7   :  { %v4976_v56 = vadd.f32 %v4946_v14, %v13293_v40  ;;  %v4980_v45 = vadd.f32 %v4948_v51, %v13294_v4  ;;  %v7532_v39 = vmul.f32 -1.442695, %v4978_v53  ;;  %v4852_v59 = vpop.f32.mrf.mxu0  ;;  %v4893_v61 = vpop.f32.mrf.mxu1  ;;  %v4982_v55 = vadd.f32 %v4950_v13, %v13295_v29  ;;  %v13301_v29 = vld [vmem:[#allocation54_spill] sm:$0xff]  ;;  %v13316_v58 = vld [vmem:[#allocation51_spill] sm:$0xff] }
 0x7c8   :  { %v7522_v60 = vmul.f32 -1.442695, %v4968_v54  ;;  %v7524_v36 = vmul.f32 -1.442695, %v4970_v12  ;;  %v7526_v9 = vmul.f32 -1.442695, %v4972_v47  ;;  %v5122_v3 = vadd.f32 %v12013_v19, %v13301_v29 }
 0x7c9   :  { %v7528_v0 = vmul.f32 -1.442695, %v4974_v27  ;;  %8703 = vpow2.f32 %v7532_v39  ;;  %v7530_v46 = vmul.f32 -1.442695, %v4976_v56  ;;  %v5082_v21 = vrot.slane %v12013_v19, 3  ;;  %v13296_v54 = vld [vmem:[#allocation41_spill] sm:$0xff] }
 0x7ca   :  { %8705 = vpow2.f32 %v7522_v60  ;;  %v5084_v25 = vrot.slane %v12013_v19, 4  ;;  %v7534_v31 = vmul.f32 -1.442695, %v4980_v45  ;;  %v5086_v14 = vrot.slane %v12013_v19, 5  ;;  %v13297_v47 = vld [vmem:[#allocation45_spill] sm:$0xff]  ;;  %v13298_v39 = vld [vmem:[#allocation47_spill] sm:$0xff] }
 0x7cb   :  { %8707 = vpow2.f32 %v7524_v36  ;;  %v5088_v51 = vrot.slane %v12013_v19, 6  ;;  %v7536_v53 = vmul.f32 -1.442695, %v4982_v55  ;;  %v5090_v13 = vrot.slane %v12013_v19, 7  ;;  %v13299_v45 = vld [vmem:[#allocation49_spill] sm:$0xff] }
 0x7cc   :  { %8709 = vpow2.f32 %v7526_v9  ;;  %v5112_v12 = vadd.f32 %v5082_v21, %v13296_v54  ;;  %v5114_v27 = vadd.f32 %v5084_v25, %v13297_v47  ;;  %v5092_v56 = vrot.slane %v12013_v19, 1  ;;  %v13300_v9 = vld [vmem:[#allocation52_spill] sm:$0xff] }
 0x7cd   :  { %8711 = vpow2.f32 %v7528_v0  ;;  %v5116_v59 = vadd.f32 %v5086_v14, %v13298_v39  ;;  %v5118_v61 = vadd.f32 %v5088_v51, %v13299_v45  ;;  %v5120_v55 = vadd.f32 %v5090_v13, %v13300_v9  ;;  %v13302_v0 = vld [vmem:[#allocation56_spill] sm:$0xff]  ;;  %v13303_v14 = vld [vmem:[#allocation21_spill] sm:$0xff]  ;;  %v13307_v45 = vld [vmem:[#allocation34_spill] sm:$0xff] }
 0x7ce   :  { %8713 = vpow2.f32 %v7530_v46  ;;  %v7538_v60 = vmul.f32 -1.442695, %v5112_v12  ;;  %v7540_v36 = vmul.f32 -1.442695, %v5114_v27  ;;  %v5124_v21 = vadd.f32 %v5092_v56, %v13302_v0 }
 0x7cf   :  { %8715 = vpow2.f32 %v7534_v31  ;;  %v7542_v46 = vmul.f32 -1.442695, %v5116_v59  ;;  %v7544_v25 = vmul.f32 -1.442695, %v5118_v61  ;;  %v7546_v47 = vmul.f32 -1.442695, %v5120_v55 }
 0x7d0   :  { %8717 = vpow2.f32 %v7536_v53  ;;  %v7548_v54 = vmul.f32 -1.442695, %v5122_v3  ;;  %v4850_v31 = vadd.f32 %v4849_v34, %v13303_v14  ;;  %v7550_v51 = vmul.f32 -1.442695, %v5124_v21  ;;  %v13305_v14 = vld [vmem:[#allocation32_spill] sm:$0xff] }
 0x7d1   :  { %8719 = vpow2.f32 %v7538_v60  ;;  %v5094_v41 = vrot.slane %v12013_v19, 2 }
 0x7d2   :  { %8721 = vpow2.f32 %v7540_v36  ;;  %v4939_v56 = vrot.slane %v4850_v31, 3  ;;  %v4941_v61 = vrot.slane %v4850_v31, 4  ;;  %v4943_v34 = vrot.slane %v4850_v31, 5 }
 0x7d3   :  { %8723 = vpow2.f32 %v7542_v46 }
 0x7d4   :  { %8725 = vpow2.f32 %v7544_v25  ;;  %v13304_v25 = vld [vmem:[#allocation43_spill] sm:$0xff]  ;;  %v4973_v40 = vadd.f32 %v4943_v34, %v13307_v45  ;;  %v13311_v34 = vld [vmem:[#allocation38_spill] sm:$0xff] }
 0x7d5   :  { %8727 = vpow2.f32 %v7546_v47 }
 0x7d6   :  { %v8704_v39 = vpop.eup %8703  ;;  %8729 = vpow2.f32 %v7548_v54  ;;  %v4947_v54 = vrot.slane %v4850_v31, 7 }
 0x7d7   :  { %v8706_v12 = vpop.eup %8705  ;;  %v5042_v53 = vadd.f32 1.0, %v8704_v39  ;;  %8731 = vpow2.f32 %v7550_v51  ;;  %v4945_v39 = vrot.slane %v4850_v31, 6 }
 0x7d8   :  { %v8708_v13 = vpop.eup %8707  ;;  %v5032_v27 = vadd.f32 1.0, %v8706_v12  ;;  %v12042_v12 = vadd.f32 %v12015_v20, %v13304_v25  ;;  %v4951_v25 = vrot.slane %v4850_v31, 2 }
 0x7d9   :  { %v8710_v29 = vpop.eup %8709  ;;  %v5034_v60 = vadd.f32 1.0, %v8708_v13  ;;  %8733 = vrcp.f32 %v5042_v53 }
 0x7da   :  { %v8712_v36 = vpop.eup %8711  ;;  %v5036_v59 = vadd.f32 1.0, %v8710_v29  ;;  %8735 = vrcp.f32 %v5032_v27  ;;  %v4969_v29 = vadd.f32 %v4939_v56, %v13305_v14  ;;  %v4949_v27 = vrot.slane %v4850_v31, 1 }
 0x7db   :  { %v8714_v3 = vpop.eup %8713  ;;  %v5038_v55 = vadd.f32 1.0, %v8712_v36  ;;  %8737 = vrcp.f32 %v5034_v60  ;;  %v13306_v36 = vld [vmem:[#allocation33_spill] sm:$0xff]  ;;  %v13309_v60 = vld [vmem:[#allocation36_spill] sm:$0xff]  ;;  %v5087_v45 = vrot.slane %v12042_v12, 5 }
 0x7dc   :  { %v8716_v46 = vpop.eup %8715  ;;  %v5040_v21 = vadd.f32 1.0, %v8714_v3  ;;  %8739 = vrcp.f32 %v5036_v59  ;;  %v4971_v53 = vadd.f32 %v4941_v61, %v13306_v36  ;;  %v4977_v8 = vadd.f32 %v4947_v54, %v13309_v60  ;;  %v13310_v59 = vld [vmem:[#allocation37_spill] sm:$0xff] }
 0x7dd   :  { %v8718_v47 = vpop.eup %8717  ;;  %v5044_v13 = vadd.f32 1.0, %v8716_v46  ;;  %8741 = vrcp.f32 %v5038_v55  ;;  %v4975_v46 = vadd.f32 %v4945_v39, %v13308_v22  ;;  %v7523_v56 = vmul.f32 -1.442695, %v4969_v29 }
 0x7de   :  { %v8720_v51 = vpop.eup %8719  ;;  %v5046_v0 = vadd.f32 1.0, %v8718_v47  ;;  %8743 = vrcp.f32 %v5040_v21  ;;  %v5083_v47 = vrot.slane %v12042_v12, 3  ;;  %v4979_v61 = vadd.f32 %v4850_v31, %v13310_v59  ;;  %v13313_v59 = vld [vmem:[#allocation42_spill] sm:$0xff] }
 0x7df   :  { %v8722_v9 = vpop.eup %8721  ;;  %v5176_v3 = vadd.f32 1.0, %v8720_v51  ;;  %8745 = vrcp.f32 %v5044_v13  ;;  %v7525_v36 = vmul.f32 -1.442695, %v4971_v53  ;;  %v5085_v55 = vrot.slane %v12042_v12, 4  ;;  %v13312_v13 = vld [vmem:[#allocation39_spill] sm:$0xff] }
 0x7e0   :  { %v5178_v20 = vadd.f32 1.0, %v8722_v9  ;;  %8747 = vrcp.f32 %v5046_v0  ;;  %v8724_v51 = vpop.eup %8723  ;;  %v4981_v21 = vadd.f32 %v4949_v27, %v13311_v34  ;;  %v7527_v9 = vmul.f32 -1.442695, %v4973_v40  ;;  %v13314_v27 = vld [vmem:[#allocation46_spill] sm:$0xff] }
 0x7e1   :  { %8749 = vrcp.f32 %v5176_v3  ;;  %v8726_v39 = vpop.eup %8725  ;;  %v4983_v54 = vadd.f32 %v4951_v25, %v13312_v13  ;;  %v7529_v29 = vmul.f32 -1.442695, %v4975_v46  ;;  %v5089_v60 = vrot.slane %v12042_v12, 6  ;;  %v13315_v13 = vld [vmem:[#allocation48_spill] sm:$0xff] }
 0x7e2   :  { %8751 = vrcp.f32 %v5178_v20  ;;  %v12056_v0 = vpop.eup %8727  ;;  %v7531_v31 = vmul.f32 -1.442695, %v4977_v8  ;;  %v5091_v53 = vrot.slane %v12042_v12, 7  ;;  %v5113_v3 = vadd.f32 %v5083_v47, %v13313_v59 }
 0x7e3   :  { %8753 = vpow2.f32 %v7523_v56  ;;  %v12060_v22 = vpop.eup %8729  ;;  %v7533_v40 = vmul.f32 -1.442695, %v4979_v61  ;;  %v5115_v34 = vadd.f32 %v5085_v55, %v13314_v27  ;;  %v7535_v25 = vmul.f32 -1.442695, %v4981_v21 }
 0x7e4   :  { %8755 = vpow2.f32 %v7525_v36  ;;  %v12063_v20 = vpop.eup %8731  ;;  %v5093_v46 = vrot.slane %v12042_v12, 1  ;;  %v5117_v14 = vadd.f32 %v5087_v45, %v13315_v13  ;;  %v7537_v8 = vmul.f32 -1.442695, %v4983_v54  ;;  %v13317_v36 = vld [vmem:[#allocation53_spill] sm:$0xff] }
 0x7e5   :  { %8757 = vpow2.f32 %v7527_v9  ;;  %v5119_v47 = vadd.f32 %v5089_v60, %v13316_v58  ;;  %v5121_v61 = vadd.f32 %v5091_v53, %v13317_v36  ;;  %v7539_v55 = vmul.f32 -1.442695, %v5113_v3  ;;  %v13318_v9 = vld [vmem:[#allocation55_spill] sm:$0xff]  ;;  %v13319_v54 = vld [vmem:[#allocation57_spill] sm:$0xff] }
 0x7e6   :  { %v12067_v56 = vpop.eup %8733  ;;  %8759 = vpow2.f32 %v7529_v29  ;;  %v5095_v21 = vrot.slane %v12042_v12, 2  ;;  %v5123_v45 = vadd.f32 %v12042_v12, %v13318_v9  ;;  %v7541_v13 = vmul.f32 -1.442695, %v5115_v34  ;;  %v13320_v12 = vld [vmem:[#allocation58_spill] sm:$0xff] }
 0x7e7   :  { %v12070_v59 = vpop.eup %8735  ;;  %8761 = vpow2.f32 %v7531_v31  ;;  %v5125_v60 = vadd.f32 %v5093_v46, %v13319_v54  ;;  %v7543_v29 = vmul.f32 -1.442695, %v5117_v14  ;;  %v7545_v31 = vmul.f32 -1.442695, %v5119_v47 }
 0x7e8   :  { %v12073_v27 = vpop.eup %8737  ;;  %8763 = vpow2.f32 %v7533_v40  ;;  %v7547_v3 = vmul.f32 -1.442695, %v5121_v61  ;;  %v7549_v36 = vmul.f32 -1.442695, %v5123_v45  ;;  %v5127_v34 = vadd.f32 %v5095_v21, %v13320_v12 }
 0x7e9   :  { %v12078_v38 = vpop.eup %8739  ;;  %8765 = vpow2.f32 %v7535_v25  ;;  %v7551_v25 = vmul.f32 -1.442695, %v5125_v60  ;;  %v5180_v14 = vadd.f32 1.0, %v8724_v51  ;;  %v5182_v47 = vadd.f32 1.0, %v8726_v39 }
 0x7ea   :  { %v12081_v58 = vpop.eup %8741  ;;  %8767 = vpow2.f32 %v7537_v8  ;;  %v7553_v61 = vmul.f32 -1.442695, %v5127_v34 }
 0x7eb   :  { %v12083_v53 = vpop.eup %8743  ;;  %8769 = vpow2.f32 %v7539_v55 }
 0x7ec   :  { %v12085_v40 = vpop.eup %8745  ;;  %8771 = vpow2.f32 %v7541_v13 }
 0x7ed   :  { %v12088_v9 = vpop.eup %8747  ;;  %8773 = vpow2.f32 %v7543_v29 }
 0x7ee   :  { %v12090_v46 = vpop.eup %8749  ;;  %8775 = vpow2.f32 %v7545_v31 }
 0x7ef   :  { %v12092_v8 = vpop.eup %8751  ;;  %8777 = vpow2.f32 %v7547_v3 }
 0x7f0   :  { %v8754_v55 = vpop.eup %8753  ;;  %8779 = vpow2.f32 %v7549_v36 }
 0x7f1   :  { %v8756_v54 = vpop.eup %8755  ;;  %v5033_v13 = vadd.f32 1.0, %v8754_v55  ;;  %8781 = vpow2.f32 %v7551_v25 }
 0x7f2   :  { %v8758_v45 = vpop.eup %8757  ;;  %8783 = vrcp.f32 %v5180_v14  ;;  %v5035_v21 = vadd.f32 1.0, %v8756_v54 }
 0x7f3   :  { %v8760_v12 = vpop.eup %8759  ;;  %8785 = vrcp.f32 %v5182_v47  ;;  %v5037_v60 = vadd.f32 1.0, %v8758_v45 }
 0x7f4   :  { %v8762_v29 = vpop.eup %8761  ;;  %v5039_v4 = vadd.f32 1.0, %v8760_v12  ;;  %8787 = vpow2.f32 %v7553_v61 }
 0x7f5   :  { %v8764_v51 = vpop.eup %8763  ;;  %v5041_v31 = vadd.f32 1.0, %v8762_v29  ;;  %8789 = vrcp.f32 %v5033_v13 }
 0x7f6   :  { %v8766_v39 = vpop.eup %8765  ;;  %v5043_v3 = vadd.f32 1.0, %v8764_v51  ;;  %8791 = vrcp.f32 %v5035_v21 }
 0x7f7   :  { %v8768_v36 = vpop.eup %8767  ;;  %v5045_v34 = vadd.f32 1.0, %v8766_v39  ;;  %8793 = vrcp.f32 %v5037_v60 }
 0x7f8   :  { %v8770_v55 = vpop.eup %8769  ;;  %v5047_v25 = vadd.f32 1.0, %v8768_v36  ;;  %8795 = vrcp.f32 %v5039_v4 }
 0x7f9   :  { %v8772_v14 = vpop.eup %8771  ;;  %8797 = vrcp.f32 %v5041_v31  ;;  %v5177_v54 = vadd.f32 1.0, %v8770_v55 }
 0x7fa   :  { %v8774_v47 = vpop.eup %8773  ;;  %8799 = vrcp.f32 %v5043_v3  ;;  %v5179_v45 = vadd.f32 1.0, %v8772_v14  ;;  %v13321_v3 = vld [vmem:[#allocation44_spill] sm:$0xff] }
 0x7fb   :  { %v8776_v12 = vpop.eup %8775  ;;  %8801 = vrcp.f32 %v5045_v34  ;;  %v5181_v61 = vadd.f32 1.0, %v8774_v47 }
 0x7fc   :  { %v8778_v29 = vpop.eup %8777  ;;  %8803 = vrcp.f32 %v5047_v25  ;;  %v5183_v13 = vadd.f32 1.0, %v8776_v12 }
 0x7fd   :  { %v8780_v51 = vpop.eup %8779  ;;  %8805 = vrcp.f32 %v5177_v54  ;;  %v5185_v21 = vadd.f32 1.0, %v8778_v29 }
 0x7fe   :  { %v8782_v39 = vpop.eup %8781  ;;  %8807 = vrcp.f32 %v5179_v45  ;;  %v5187_v36 = vadd.f32 1.0, %v8780_v51 }
 0x7ff   :  { %v12094_v60 = vpop.eup %8783  ;;  %8809 = vrcp.f32 %v5181_v61  ;;  %v5189_v25 = vadd.f32 1.0, %v8782_v39 }
 0x800   :  { %v12096_v31 = vpop.eup %8785  ;;  %8811 = vrcp.f32 %v5183_v13 }
 0x801   :  { %v4929_v4 = vpop.f32.mrf.mxu0  ;;  %v8788_v34 = vpop.eup %8787  ;;  %8813 = vrcp.f32 %v5185_v21 }
 0x802   :  { %v12099_v55 = vadd.f32 %v4929_v4, %v13321_v3  ;;  %v8790_v47 = vpop.eup %8789  ;;  %8815 = vrcp.f32 %v5187_v36  ;;  %v5191_v48 = vadd.f32 1.0, %v8788_v34 }
 0x803   :  { %v4931_v14 = vpop.f32.mrf.mxu0  ;;  %v8792_v61 = vpop.eup %8791  ;;  %8817 = vrcp.f32 %v5189_v25 }
 0x804   :  { %v5226_v54 = vrot.slane %v12099_v55, 3  ;;  %v5228_v45 = vrot.slane %v12099_v55, 4  ;;  %v5230_v12 = vrot.slane %v12099_v55, 5  ;;  %v5232_v29 = vrot.slane %v12099_v55, 6  ;;  %v8794_v33 = vpop.eup %8793 }
 0x805   :  { %v4933_v51 = vpop.f32.mrf.mxu0  ;;  %v8796_v3 = vpop.eup %8795  ;;  %v4932_v24 = vadd.f32 %v4931_v14, %v13265_v30 }
 0x806   :  { %v5256_v4 = vmul.f32 %v12070_v59, %v5226_v54  ;;  %v5258_v13 = vmul.f32 %v12073_v27, %v5228_v45  ;;  %v5260_v39 = vmul.f32 %v12078_v38, %v5230_v12  ;;  %v5262_v21 = vmul.f32 %v12081_v58, %v5232_v29  ;;  %v8798_v10 = vpop.eup %8797  ;;  %v13322_v51 = vld [vmem:[#allocation60_spill] sm:$0xff]  ;;  %v13324_v59 = vld [vmem:[#allocation62_spill] sm:$0xff] }
 0x807   :  { %v4934_v2 = vpop.f32.mrf.mxu0  ;;  %v13325_v27 = vld [vmem:[#allocation64_spill] sm:$0xff]  ;;  %v8800_v38 = vpop.eup %8799  ;;  %v5227_v12 = vrot.slane %v4932_v24, 3  ;;  %v5229_v58 = vrot.slane %v4932_v24, 4  ;;  %v5231_v29 = vrot.slane %v4932_v24, 5  ;;  %v5233_v50 = vrot.slane %v4932_v24, 6 }
 0x808   :  { %v5272_v36 = vadd.f32 %v5256_v4, %v13322_v51  ;;  %v5274_v17 = vadd.f32 %v5258_v13, %v13323_v44  ;;  %v5276_v54 = vadd.f32 %v5260_v39, %v13324_v59  ;;  %v5278_v45 = vadd.f32 %v5262_v21, %v13325_v27  ;;  %v8802_v19 = vpop.eup %8801 }
 0x809   :  { %v5235_v14 = vrot.slane %v4932_v24, 7  ;;  %v5237_v2 = vrot.slane %v4932_v24, 1  ;;  %v5239_v34 = vrot.slane %v4932_v24, 2  ;;  %v8804_v25 = vpop.eup %8803  ;;  %v5257_v30 = vmul.f32 %v8790_v47, %v5227_v12 }
 0x80a   :  { %8819 = vtanh.f32 %v5272_v36  ;;  %v5259_v4 = vmul.f32 %v8792_v61, %v5229_v58  ;;  %v5261_v51 = vmul.f32 %v8794_v33, %v5231_v29  ;;  %v12115_v13 = vpop.eup %8805  ;;  %v5263_v39 = vmul.f32 %v8796_v3, %v5233_v50 }
 0x80b   :  { %8821 = vtanh.f32 %v5274_v17  ;;  %v5265_v21 = vmul.f32 %v8798_v10, %v5235_v14  ;;  %v5267_v27 = vmul.f32 %v8800_v38, %v4932_v24  ;;  %v12117_v59 = vpop.eup %8807  ;;  %v5273_v44 = vadd.f32 %v5257_v30, %v10614_v49 }
 0x80c   :  { %8823 = vtanh.f32 %v5276_v54  ;;  %v5275_v36 = vadd.f32 %v5259_v4, %v10623_v42  ;;  %v5277_v35 = vadd.f32 %v5261_v51, %v13117_v11  ;;  %v12122_v37 = vpop.eup %8809  ;;  %v5269_v17 = vmul.f32 %v8802_v19, %v5237_v2  ;;  %v13326_v2 = vld [vmem:[#allocation17_spill] sm:$0xff] }
 0x80d   :  { %8825 = vtanh.f32 %v5278_v45  ;;  %v5271_v33 = vmul.f32 %v8804_v25, %v5239_v34  ;;  %v5279_v47 = vadd.f32 %v5263_v39, %v13118_v6  ;;  %v12125_v61 = vpop.eup %8811  ;;  %v5126_v50 = vadd.f32 %v5094_v41, %v13270_v63 }
 0x80e   :  { %8827 = vrcp.f32 %v5191_v48  ;;  %v5234_v10 = vrot.slane %v12099_v55, 7  ;;  %v5281_v30 = vadd.f32 %v5265_v21, %v13119_v18  ;;  %v12130_v24 = vpop.eup %8813  ;;  %v5283_v3 = vadd.f32 %v5267_v27, %v13120_v43 }
 0x80f   :  { %8829 = vtanh.f32 %v5273_v44  ;;  %v5236_v48 = vrot.slane %v12099_v55, 1  ;;  %v5285_v51 = vadd.f32 %v5269_v17, %v13121_v62  ;;  %v12135_v54 = vpop.eup %8815  ;;  %v5238_v45 = vrot.slane %v12099_v55, 2 }
 0x810   :  { %8831 = vtanh.f32 %v5275_v36  ;;  %v5287_v41 = vadd.f32 %v5271_v33, %v13122_v28  ;;  %v7552_v44 = vmul.f32 -1.442695, %v5126_v50  ;;  %v5264_v38 = vmul.f32 %v12083_v53, %v5234_v10  ;;  %v12140_v12 = vpop.eup %8817 }
 0x811   :  { %8833 = vtanh.f32 %v5277_v35  ;;  %v5266_v27 = vmul.f32 %v12067_v56, %v12099_v55  ;;  %v5184_v58 = vadd.f32 1.0, %v12056_v0  ;;  %v5186_v35 = vadd.f32 1.0, %v12060_v22 }
 0x812   :  { %8835 = vtanh.f32 %v5279_v47  ;;  %v5268_v29 = vmul.f32 %v12085_v40, %v5236_v48  ;;  %v5188_v19 = vadd.f32 1.0, %v12063_v20  ;;  %v5270_v14 = vmul.f32 %v12088_v9, %v5238_v45 }
 0x813   :  { %8837 = vtanh.f32 %v5281_v30  ;;  %v5280_v34 = vadd.f32 %v5264_v38, %v13326_v2  ;;  %v5282_v56 = vadd.f32 %v5266_v27, %v13167_v16 }
 0x814   :  { %8839 = vtanh.f32 %v5283_v3  ;;  %v5284_v22 = vadd.f32 %v5268_v29, %v13168_v7  ;;  %v5286_v20 = vadd.f32 %v5270_v14, %v13169_v52 }
 0x815   :  { %8841 = vtanh.f32 %v5285_v51 }
 0x816   :  { %8843 = vtanh.f32 %v5287_v41 }
 0x817   :  { %v8820_v53 = vpop.eup %8819  ;;  %8845 = vpow2.f32 %v7552_v44 }
 0x818   :  { %v8822_v25 = vpop.eup %8821  ;;  %8847 = vrcp.f32 %v5184_v58  ;;  %v5320_v55 = vrot.slane %v8820_v53, 1 }
 0x819   :  { %v12151_v0 = vpop.eup %8823  ;;  %8849 = vrcp.f32 %v5186_v35  ;;  %v5322_v40 = vrot.slane %v8822_v25, 1 }
 0x81a   :  { %v12154_v4 = vpop.eup %8825  ;;  %8851 = vrcp.f32 %v5188_v19  ;;  %v5324_v9 = vrot.slane %v12151_v0, 1  ;;  %v5352_v39 = vsub.f32 %v11898_v32, %v5320_v55 }
 0x81b   :  { %v12159_v21 = vpop.eup %8827  ;;  %8853 = vtanh.f32 %v5280_v34  ;;  %v5326_v36 = vrot.slane %v12154_v4, 1  ;;  %v5354_v17 = vsub.f32 %v11905_v1, %v5322_v40 }
 0x81c   :  { %v8830_v33 = vpop.eup %8829  ;;  %8855 = vtanh.f32 %v5282_v56  ;;  %v5356_v47 = vsub.f32 %v11965_v26, %v5324_v9  ;;  %v5384_v50 = vrot.slane %v5352_v39, 7  ;;  %v13328_v39 = vld [vmem:[#allocation19_spill] sm:$0xff] }
 0x81d   :  { %v8832_v10 = vpop.eup %8831  ;;  %v5321_v30 = vrot.slane %v8830_v33, 1  ;;  %8857 = vtanh.f32 %v5284_v22  ;;  %v5358_v3 = vsub.f32 %v11971_v5, %v5326_v36  ;;  %v5386_v48 = vrot.slane %v5354_v17, 7 }
 0x81e   :  { %v8834_v51 = vpop.eup %8833  ;;  %v5323_v32 = vrot.slane %v8832_v10, 1  ;;  %8859 = vtanh.f32 %v5286_v20  ;;  %v5388_v45 = vrot.slane %v5356_v47, 7  ;;  %v5416_v41 = vmul.f32 %v12090_v46, %v5384_v50  ;;  %v13329_v50 = vld [vmem:[#allocation22_spill] sm:$0xff] }
 0x81f   :  { %v8836_v44 = vpop.eup %8835  ;;  %v5325_v38 = vrot.slane %v8834_v51, 1  ;;  %v5353_v1 = vsub.f32 %v11913_v57, %v5321_v30  ;;  %v5390_v27 = vrot.slane %v5358_v3, 7  ;;  %v5418_v26 = vmul.f32 %v12092_v8, %v5386_v48  ;;  %v13327_v8 = vld [vmem:[#allocation65_spill] sm:$0xff] }
 0x820   :  { %v8838_v58 = vpop.eup %8837  ;;  %v5327_v35 = vrot.slane %v8836_v44, 1  ;;  %v5355_v29 = vsub.f32 %v11917_v15, %v5323_v32  ;;  %v12170_v5 = vmul.f32 %v12094_v60, %v5388_v45  ;;  %v12172_v19 = vadd.f32 %v8820_v53, %v5416_v41  ;;  %v13330_v32 = vld [vmem:[#allocation66_spill] sm:$0xff] }
 0x821   :  { %v8840_v14 = vpop.eup %8839  ;;  %v5329_v34 = vrot.slane %v8838_v58, 1  ;;  %v5357_v46 = vsub.f32 %v11920_v23, %v5325_v38  ;;  %v5385_v56 = vrot.slane %v5353_v1, 7  ;;  %v12176_v55 = vmul.f32 %v12096_v31, %v5390_v27  ;;  %v13331_v27 = vld [vmem:[#allocation67_spill] sm:$0xff] }
 0x822   :  { %v8842_v57 = vpop.eup %8841  ;;  %v5331_v22 = vrot.slane %v8840_v14, 1  ;;  %v5359_v40 = vsub.f32 %v13327_v8, %v5327_v35  ;;  %v5387_v20 = vrot.slane %v5355_v29, 7  ;;  %v12179_v9 = vadd.f32 %v8822_v25, %v5418_v26 }
 0x823   :  { %v8844_v15 = vpop.eup %8843  ;;  %v5333_v60 = vrot.slane %v8842_v57, 1  ;;  %v5361_v53 = vsub.f32 %v13328_v39, %v5329_v34  ;;  %v5389_v36 = vrot.slane %v5357_v46, 7  ;;  %v5417_v17 = vmul.f32 %v12115_v13, %v5385_v56 }
 0x824   :  { %v8846_v47 = vpop.eup %8845  ;;  %v5335_v23 = vrot.slane %v8844_v15, 1  ;;  %v5363_v30 = vsub.f32 %v13329_v50, %v5331_v22  ;;  %v5391_v31 = vrot.slane %v5359_v40, 7  ;;  %v5419_v3 = vmul.f32 %v12117_v59, %v5387_v20 }
 0x825   :  { %v12185_v48 = vpop.eup %8847  ;;  %v5365_v45 = vsub.f32 %v13330_v32, %v5333_v60  ;;  %v5393_v25 = vrot.slane %v5361_v53, 7  ;;  %v5421_v41 = vmul.f32 %v12122_v37, %v5389_v36  ;;  %v12189_v38 = vadd.f32 %v8830_v33, %v5417_v17 }
 0x826   :  { %v12191_v1 = vpop.eup %8849  ;;  %v5367_v13 = vsub.f32 %v13331_v27, %v5335_v23  ;;  %v5395_v26 = vrot.slane %v5363_v30, 7  ;;  %v5423_v35 = vmul.f32 %v12125_v61, %v5391_v31  ;;  %v12195_v29 = vadd.f32 %v8832_v10, %v5419_v3 }
 0x827   :  { %v12197_v34 = vpop.eup %8851  ;;  %v5397_v59 = vrot.slane %v5365_v45, 7  ;;  %v5425_v46 = vmul.f32 %v12130_v24, %v5393_v25  ;;  %v12200_v56 = vadd.f32 %v8834_v51, %v5421_v41  ;;  %v5449_v37 = vpack.c.bf16 %v12189_v38, %v12189_v38 }
 0x828   :  { %v12204_v33 = vpop.eup %8853  ;;  %v5399_v22 = vrot.slane %v5367_v13, 7  ;;  %v5427_v8 = vmul.f32 %v12135_v54, %v5395_v26  ;;  %v12207_v40 = vadd.f32 %v8836_v44, %v5423_v35  ;;  %v5451_v61 = vpack.c.bf16 %v12195_v29, %v12195_v29 }
 0x829   :  { %v12211_v10 = vpop.eup %8855  ;;  %v5429_v20 = vmul.f32 %v12140_v12, %v5397_v59  ;;  %v12214_v24 = vadd.f32 %v8838_v58, %v5425_v46  ;;  %v5453_v51 = vpack.c.bf16 %v12200_v56, %v12200_v56  ;;  %v5481_v60 = vunpack.c.l.b16 %v5449_v37 }
 0x82a   :  { %13332 = vst [vmem:[#allocation27_spill] sm:$0xff] %v12207_v40  ;;  %v12218_v39 = vpop.eup %8857  ;;  %v5431_v53 = vmul.f32 %v12159_v21, %v5399_v22  ;;  %v12221_v54 = vadd.f32 %v8840_v14, %v5427_v8  ;;  %v5455_v44 = vpack.c.bf16 %v12207_v40, %v12207_v40  ;;  %v5483_v36 = vunpack.c.l.b16 %v5451_v61 }
 0x82b   :  { %13333 = vst [vmem:[#allocation68_spill] sm:$0xff] %v12214_v24  ;;  %v12225_v17 = vpop.eup %8859  ;;  %v12227_v23 = vadd.f32 %v8842_v57, %v5429_v20  ;;  %v5457_v12 = vpack.c.bf16 %v12214_v24, %v12214_v24  ;;  %v5485_v58 = vunpack.c.l.b16 %v5453_v51  ;;  %v5510_v50 = vrot.slane %v5481_v60, 5 }
 0x82c   :  { %13334 = vst [vmem:[#allocation63_spill] sm:$0xff] %v12221_v54  ;;  %v12231_v30 = vadd.f32 %v8844_v15, %v5431_v53  ;;  %v5459_v21 = vpack.c.bf16 %v12221_v54, %v12221_v54  ;;  %v5487_v14 = vunpack.c.l.b16 %v5455_v44  ;;  %v5511_v31 = vrot.slane %v5483_v36, 4  ;;  %v13337_v53 = vld [vmem:[#allocation59_spill] sm:$0xff]  ;;  %v13338_v36 = vld [vmem:[#allocation69_spill] sm:$0xff] }
 0x82d   :  { %13335 = vst [vmem:[#allocation17_spill] sm:$0xff] %v12227_v23  ;;  %v5461_v3 = vpack.c.bf16 %v12227_v23, %v12227_v23  ;;  %v5489_v32 = vunpack.c.l.b16 %v5457_v12  ;;  %v5513_v45 = vrot.slane %v5485_v58, 3  ;;  %v5190_v25 = vadd.f32 1.0, %v8846_v47  ;;  %v13384_v23 = vld [vmem:[#allocation61_spill] sm:$0xff] }
 0x82e   :  { %13336 = vst [vmem:[#allocation65_spill] sm:$0xff] %v12231_v30  ;;  %v5463_v57 = vpack.c.bf16 %v12231_v30, %v12231_v30  ;;  %v5491_v41 = vunpack.c.l.b16 %v5459_v21  ;;  %v5512_v27 = vsel %vm1771_vm0, %v5511_v31, %v5510_v50  ;;  %v5515_v13 = vrot.slane %v5487_v14, 2  ;;  %v13339_v50 = vld [vmem:[#allocation70_spill] sm:$0xff] }
 0x82f   :  { %v5493_v15 = vunpack.c.l.b16 %v5461_v3  ;;  %v5514_v26 = vsel %vm1774_vm1, %v5513_v45, %v5512_v27  ;;  %v5517_v35 = vrot.slane %v5489_v32, 1  ;;  %8861 = vrcp.f32 %v5190_v25 }
 0x830   :  { %v5495_v59 = vunpack.c.l.b16 %v5463_v57  ;;  %v5516_v46 = vsel %vm1777_vm2, %v5515_v13, %v5514_v26  ;;  %v5328_v37 = vrot.slane %v12204_v33, 1  ;;  %v5330_v22 = vrot.slane %v12211_v10, 1  ;;  %v13340_v57 = vld [vmem:[#allocation20_spill] sm:$0xff] }
 0x831   :  { %v5518_v47 = vsel %vm1780_vm3, %v5517_v35, %v5516_v46  ;;  %v5520_v8 = vrot.slane %v5493_v15, 7  ;;  %v5332_v61 = vrot.slane %v12218_v39, 1  ;;  %v5334_v20 = vrot.slane %v12225_v17, 1 }
 0x832   :  { %v5519_v51 = vsel %vm1783_vm4, %v5491_v41, %v5518_v47  ;;  %v5522_v60 = vrot.slane %v5495_v59, 6  ;;  %v5360_v44 = vsub.f32 %v13337_v53, %v5328_v37  ;;  %v5362_v12 = vsub.f32 %v13338_v36, %v5330_v22 }
 0x833   :  { %v5521_v58 = vsel %vm1786_vm5, %v5520_v8, %v5519_v51  ;;  %v5364_v21 = vsub.f32 %v13339_v50, %v5332_v61  ;;  %v12254_v14 = vadd.f32 %v12151_v0, %v12170_v5  ;;  %v12259_v45 = vadd.f32 %v12154_v4, %v12176_v55 }
 0x834   :  { %v5523_v31 = vsel %vm1789_vm6, %v5522_v60, %v5521_v58  ;;  %v5392_v3 = vrot.slane %v5360_v44, 7  ;;  %v5394_v32 = vrot.slane %v5362_v12, 7  ;;  %v5366_v41 = vsub.f32 %v13340_v57, %v5334_v20 }
 0x835   :  { %v5525_v25 = vpack.c.b16 %v5523_v31, %v5523_v31  ;;  %v5396_v27 = vrot.slane %v5364_v21, 7  ;;  %v5448_v13 = vpack.c.bf16 %v12172_v19, %v12172_v19  ;;  %v5450_v5 = vpack.c.bf16 %v12179_v9, %v12179_v9 }
 0x836   :  { %v5424_v15 = vmul.f32 %v12185_v48, %v5392_v3  ;;  %v5426_v0 = vmul.f32 %v12191_v1, %v5394_v32  ;;  %v5452_v26 = vpack.c.bf16 %v12254_v14, %v12254_v14  ;;  %v5454_v55 = vpack.c.bf16 %v12259_v45, %v12259_v45 }
 0x837   :  { %5560 = vmatprep.mubr.bf16.mxu1 %v5525_v25  ;;  %5601 = vmatprep.mubr.bf16.mxu0 %v5525_v25  ;;  %v5428_v4 = vmul.f32 %v12197_v34, %v5396_v27  ;;  %v5480_v35 = vunpack.c.l.b16 %v5448_v13  ;;  %v5482_v1 = vunpack.c.l.b16 %v5450_v5  ;;  %v5398_v37 = vrot.slane %v5366_v41, 7 }
 0x838   :  { %v12274_v59 = vadd.f32 %v12204_v33, %v5424_v15  ;;  %v12277_v48 = vadd.f32 %v12211_v10, %v5426_v0  ;;  %v5484_v46 = vunpack.c.l.b16 %v5452_v26  ;;  %v5486_v47 = vunpack.c.l.b16 %v5454_v55  ;;  %v9664_v26 = vld [vmem:[#allocation8 + $0x134] ss:$24 sps:$4 sm:$0xff]   ;;  %v9666_v55 = vld [vmem:[#allocation8 + $0x124] ss:$24 sps:$4 sm:$0xff]  }
 0x839   :  { %v12280_v22 = vadd.f32 %v12218_v39, %v5428_v4  ;;  %v5496_v8 = vrot.slane %v5480_v35, 5  ;;  %v5497_v61 = vrot.slane %v5482_v1, 4  ;;  %v9665_v4 = vld [vmem:[#allocation8 + $0x150] ss:$24 sps:$4 sm:$0xff]   ;;  %v9668_v1 = vld [vmem:[#allocation8 + $0x104] ss:$24 sps:$4 sm:$0xff]  }
 0x83a   :  { %13341 = vst [vmem:[#allocation19_spill] sm:$0xff] %v12274_v59  ;;  %13342 = vst [vmem:[#allocation22_spill] sm:$0xff] %v12277_v48  ;;  %v5456_v34 = vpack.c.bf16 %v12274_v59, %v12274_v59  ;;  %v5499_v20 = vrot.slane %v5484_v46, 3  ;;  %v5458_v33 = vpack.c.bf16 %v12277_v48, %v12277_v48  ;;  %v5501_v44 = vrot.slane %v5486_v47, 2  ;;  %v9667_v35 = vld [vmem:[#allocation8 + $0x130] ss:$24 sps:$4 sm:$0xff]  }
 0x83b   :  { %13343 = vst [vmem:[#allocation66_spill] sm:$0xff] %v12280_v22  ;;  %v5460_v10 = vpack.c.bf16 %v12280_v22, %v12280_v22  ;;  %v5498_v53 = vsel %vm1771_vm0, %v5497_v61, %v5496_v8  ;;  %v9669_v46 = vld [vmem:[#allocation8 + $0x120] ss:$24 sps:$4 sm:$0xff]   ;;  %v9672_v8 = vld [vmem:[#allocation8 + $0xd4] ss:$24 sps:$4 sm:$0xff]  }
 0x83c   :  { %v8862_v51 = vpop.eup %8861  ;;  %v5488_v60 = vunpack.c.l.b16 %v5456_v34  ;;  %v5500_v36 = vsel %vm1774_vm1, %v5499_v20, %v5498_v53  ;;  %v5490_v31 = vunpack.c.l.b16 %v5458_v33  ;;  %v9671_v47 = vld [vmem:[#allocation8 + $0x100] ss:$24 sps:$4 sm:$0xff]   ;;  %v9673_v34 = vld [vmem:[#allocation8 + $0xf0] ss:$24 sps:$4 sm:$0xff]   ;;  %v9676_v20 = vld [vmem:[#allocation8 + $0xa4] ss:$24 sps:$4 sm:$0xff]  }
 0x83d   :  { %v5430_v39 = vmul.f32 %v8862_v51, %v5398_v37  ;;  %v5492_v12 = vunpack.c.l.b16 %v5460_v10  ;;  %v5502_v58 = vsel %vm1777_vm2, %v5501_v44, %v5500_v36  ;;  %v9670_v37 = vld [vmem:[#allocation8 + $0xf4] ss:$24 sps:$4 sm:$0xff]   ;;  %v9675_v61 = vld [vmem:[#allocation8 + $0xd0] ss:$24 sps:$4 sm:$0xff]   ;;  %v9677_v33 = vld [vmem:[#allocation8 + $0xc0] ss:$24 sps:$4 sm:$0xff]  }
 0x83e   :  { %v5503_v50 = vrot.slane %v5488_v60, 1  ;;  %v9678_v10 = vld [vmem:[#allocation8 + $0x94] ss:$24 sps:$4 sm:$0xff]   ;;  %v9679_v51 = vld [vmem:[#allocation8 + $0xa0] ss:$24 sps:$4 sm:$0xff]  }
 0x83f   :  { %v12292_v21 = vadd.f32 %v12225_v17, %v5430_v39  ;;  %v5506_v41 = vrot.slane %v5492_v12, 7  ;;  %v9663_v17 = vld [vmem:[#allocation8 + $0x160] ss:$24 sps:$4 sm:$0xff]   ;;  %v9680_v60 = vld [vmem:[#allocation8 + $0x74] ss:$24 sps:$4 sm:$0xff]  }
 0x840   :  { %v5504_v3 = vsel %vm1780_vm3, %v5503_v50, %v5502_v58  ;;  %v9681_v53 = vld [vmem:[#allocation8 + $0x90] ss:$24 sps:$4 sm:$0xff]   ;;  %v9682_v44 = vld [vmem:[#allocation8 + $0x64] ss:$24 sps:$4 sm:$0xff]   ;;  %v9685_v12 = vld [vmem:[#allocation8 + $0x60] ss:$24 sps:$4 sm:$0xff]  }
 0x841   :  { %13344 = vst [vmem:[#allocation67_spill] sm:$0xff] %v12292_v21  ;;  %v5462_v32 = vpack.c.bf16 %v12292_v21, %v12292_v21  ;;  %v5505_v57 = vsel %vm1783_vm4, %v5490_v31, %v5504_v3  ;;  %v9683_v39 = vld [vmem:[#allocation8 + $0x70] ss:$24 sps:$4 sm:$0xff]   ;;  %v9684_v36 = vld [vmem:[#allocation8 + $0x44] ss:$24 sps:$4 sm:$0xff]  }
 0x842   :  { %v5507_v13 = vsel %vm1786_vm5, %v5506_v41, %v5505_v57  ;;  %v9686_v58 = vld [vmem:[#allocation8 + $0x34] ss:$24 sps:$4 sm:$0xff]   ;;  %v9687_v50 = vld [vmem:[#allocation8 + $0x40] ss:$24 sps:$4 sm:$0xff]   ;;  %v9689_v3 = vld [vmem:[#allocation8 + $0x30] ss:$24 sps:$4 sm:$0xff]  }
 0x843   :  { %v5494_v27 = vunpack.c.l.b16 %v5462_v32  ;;  %v9688_v31 = vld [vmem:[#allocation8 + $0x14] ss:$24 sps:$4 sm:$0xff]   ;;  %v9690_v32 = vld [vmem:[#allocation8 + $0x4] ss:$24 sps:$4 sm:$0xff]   ;;  %v9691_v57 = vld [vmem:[#allocation8 + $0x10] ss:$24 sps:$4 sm:$0xff]  }
 0x844   :  { %v9692_v41 = vld [vmem:[#allocation8 + $0x2e4] ss:$24 sps:$4 sm:$0xff]  }
 0x845   :  { %v5508_v15 = vrot.slane %v5494_v27, 6  ;;  %v9693_v27 = vld [vmem:[#allocation8] ss:$24 sps:$4 sm:$0xff]  }
 0x846   :  { %v13382_v21 = vld [vmem:[#allocation50_spill] sm:$0xff] }
 0x847   :  { %v5509_v0 = vsel %vm1789_vm6, %v5508_v15, %v5507_v13  ;;  %v9694_v13 = vld [vmem:[#allocation8 + $0x2d4] ss:$24 sps:$4 sm:$0xff]   ;;  %v9695_v15 = vld [vmem:[#allocation8 + $0x2e0] ss:$24 sps:$4 sm:$0xff]  }
 0x848   :  { %v12300_v5 = vpack.c.b16 %v5509_v0, %v5509_v0  ;;  %v9696_v0 = vld [vmem:[#allocation8 + $0x2b4] ss:$24 sps:$4 sm:$0xff]  }
 0x84a   :  { %5561 = vmatmul.mubr.bf16.vlgmr.msra.gmra.mxu1 %v12300_v5  ;;  %5602 = vmatmul.mubr.bf16.vlgmr.msra.gmra.mxu0 %v12300_v5 }
 0x84b   :  { %5611 = vmatpush1.bf16.msra.mxu1 %v9663_v17  ;;  %5642 = vmatprep.mubr.bf16.mxu1 %v5525_v25  ;;  %v9674_v25 = vld [vmem:[#allocation8 + $0xc4] ss:$24 sps:$4 sm:$0xff]   ;;  %v9697_v17 = vld [vmem:[#allocation8 + $0x2d0] ss:$24 sps:$4 sm:$0xff]  }
 0x84c   :  { %5612 = vmatprep.subr.bf16.mxu1 %v9664_v26  ;;  %6244 = vmatpush1.bf16.msra.mxu0 %v9665_v4  ;;  %v9698_v26 = vld [vmem:[#allocation8 + $0x2a4] ss:$24 sps:$4 sm:$0xff]   ;;  %v9699_v4 = vld [vmem:[#allocation8 + $0x2b0] ss:$24 sps:$4 sm:$0xff]  }
 0x84d   :  { %6245 = vmatprep.subr.bf16.mxu0 %v9666_v55  ;;  %v9700_v55 = vld [vmem:[#allocation8 + $0x284] ss:$24 sps:$4 sm:$0xff]  }
 0x84f   :  { %5613 = vmatpush1.bf16.msra.mxu1 %v9667_v35  ;;  %v9701_v35 = vld [vmem:[#allocation8 + $0x2a0] ss:$24 sps:$4 sm:$0xff]  }
 0x850   :  { %5614 = vmatprep.subr.bf16.mxu1 %v9668_v1  ;;  %6246 = vmatpush1.bf16.msra.mxu0 %v9669_v46  ;;  %v9702_v1 = vld [vmem:[#allocation8 + $0x274] ss:$24 sps:$4 sm:$0xff]   ;;  %v9703_v46 = vld [vmem:[#allocation8 + $0x280] ss:$24 sps:$4 sm:$0xff]  }
 0x851   :  { %6247 = vmatprep.subr.bf16.mxu0 %v9670_v37  ;;  %v9704_v37 = vld [vmem:[#allocation8 + $0x254] ss:$24 sps:$4 sm:$0xff]  }
 0x853   :  { %5615 = vmatpush1.bf16.msra.mxu1 %v9671_v47  ;;  %v9705_v47 = vld [vmem:[#allocation8 + $0x270] ss:$24 sps:$4 sm:$0xff]  }
 0x854   :  { %5616 = vmatprep.subr.bf16.mxu1 %v9672_v8  ;;  %6248 = vmatpush1.bf16.msra.mxu0 %v9673_v34  ;;  %v9706_v8 = vld [vmem:[#allocation8 + $0x244] ss:$24 sps:$4 sm:$0xff]   ;;  %v9707_v34 = vld [vmem:[#allocation8 + $0x250] ss:$24 sps:$4 sm:$0xff]  }
 0x855   :  { %6249 = vmatprep.subr.bf16.mxu0 %v9674_v25  ;;  %v9708_v25 = vld [vmem:[#allocation8 + $0x224] ss:$24 sps:$4 sm:$0xff]  }
 0x857   :  { %5617 = vmatpush1.bf16.msra.mxu1 %v9675_v61  ;;  %v9709_v61 = vld [vmem:[#allocation8 + $0x240] ss:$24 sps:$4 sm:$0xff]  }
 0x858   :  { %5618 = vmatprep.subr.bf16.mxu1 %v9676_v20  ;;  %6250 = vmatpush1.bf16.msra.mxu0 %v9677_v33  ;;  %v9710_v20 = vld [vmem:[#allocation8 + $0x214] ss:$24 sps:$4 sm:$0xff]   ;;  %v9711_v33 = vld [vmem:[#allocation8 + $0x220] ss:$24 sps:$4 sm:$0xff]  }
 0x859   :  { %6251 = vmatprep.subr.bf16.mxu0 %v9678_v10  ;;  %v9712_v10 = vld [vmem:[#allocation8 + $0x1f4] ss:$24 sps:$4 sm:$0xff]  }
 0x85b   :  { %5619 = vmatpush1.bf16.msra.mxu1 %v9679_v51  ;;  %v9713_v51 = vld [vmem:[#allocation8 + $0x210] ss:$24 sps:$4 sm:$0xff]  }
 0x85c   :  { %5620 = vmatprep.subr.bf16.mxu1 %v9680_v60  ;;  %6252 = vmatpush1.bf16.msra.mxu0 %v9681_v53  ;;  %v9714_v60 = vld [vmem:[#allocation8 + $0x1e4] ss:$24 sps:$4 sm:$0xff]   ;;  %v9715_v53 = vld [vmem:[#allocation8 + $0x1f0] ss:$24 sps:$4 sm:$0xff]  }
 0x85d   :  { %6253 = vmatprep.subr.bf16.mxu0 %v9682_v44  ;;  %v9716_v44 = vld [vmem:[#allocation8 + $0x1c4] ss:$24 sps:$4 sm:$0xff]  }
 0x85f   :  { %5621 = vmatpush1.bf16.msra.mxu1 %v9683_v39  ;;  %v9717_v39 = vld [vmem:[#allocation8 + $0x1e0] ss:$24 sps:$4 sm:$0xff]  }
 0x860   :  { %5622 = vmatprep.subr.bf16.mxu1 %v9684_v36  ;;  %6254 = vmatpush1.bf16.msra.mxu0 %v9685_v12  ;;  %v9718_v36 = vld [vmem:[#allocation8 + $0x1b4] ss:$24 sps:$4 sm:$0xff]   ;;  %v9719_v12 = vld [vmem:[#allocation8 + $0x1c0] ss:$24 sps:$4 sm:$0xff]  }
 0x861   :  { %6255 = vmatprep.subr.bf16.mxu0 %v9686_v58  ;;  %v9720_v58 = vld [vmem:[#allocation8 + $0x194] ss:$24 sps:$4 sm:$0xff]  }
 0x863   :  { %5623 = vmatpush1.bf16.msra.mxu1 %v9687_v50  ;;  %v9721_v50 = vld [vmem:[#allocation8 + $0x1b0] ss:$24 sps:$4 sm:$0xff]  }
 0x864   :  { %5624 = vmatprep.subr.bf16.mxu1 %v9688_v31  ;;  %6256 = vmatpush1.bf16.msra.mxu0 %v9689_v3  ;;  %v9722_v31 = vld [vmem:[#allocation8 + $0x184] ss:$24 sps:$4 sm:$0xff]   ;;  %v9723_v3 = vld [vmem:[#allocation8 + $0x190] ss:$24 sps:$4 sm:$0xff]  }
 0x865   :  { %6257 = vmatprep.subr.bf16.mxu0 %v9690_v32  ;;  %v9724_v32 = vld [vmem:[#allocation8 + $0x15c] ss:$24 sps:$4 sm:$0xff]  }
 0x867   :  { %5625 = vmatpush1.bf16.msra.mxu1 %v9691_v57  ;;  %v9725_v57 = vld [vmem:[#allocation8 + $0x180] ss:$24 sps:$4 sm:$0xff]  }
 0x868   :  { %5626 = vmatprep.subr.bf16.mxu1 %v9692_v41  ;;  %6258 = vmatpush1.bf16.msra.mxu0 %v9693_v27  ;;  %v9726_v41 = vld [vmem:[#allocation8 + $0x164] ss:$24 sps:$4 sm:$0xff]   ;;  %v9727_v27 = vld [vmem:[#allocation8 + $0x158] ss:$24 sps:$4 sm:$0xff]  }
 0x869   :  { %6259 = vmatprep.subr.bf16.mxu0 %v9694_v13  ;;  %v9728_v13 = vld [vmem:[#allocation8 + $0x12c] ss:$24 sps:$4 sm:$0xff]  }
 0x86b   :  { %5627 = vmatpush2.bf16.msra.mxu1 %v9695_v15  ;;  %v9729_v15 = vld [vmem:[#allocation8 + $0x128] ss:$24 sps:$4 sm:$0xff]  }
 0x86c   :  { %5628 = vmatprep.subr.bf16.mxu1 %v9696_v0  ;;  %6260 = vmatpush2.bf16.msra.mxu0 %v9697_v17  ;;  %v9730_v0 = vld [vmem:[#allocation8 + $0xfc] ss:$24 sps:$4 sm:$0xff]   ;;  %v9731_v17 = vld [vmem:[#allocation8 + $0xf8] ss:$24 sps:$4 sm:$0xff]  }
 0x86d   :  { %6261 = vmatprep.subr.bf16.mxu0 %v9698_v26  ;;  %v9732_v26 = vld [vmem:[#allocation8 + $0xcc] ss:$24 sps:$4 sm:$0xff]  }
 0x86f   :  { %5629 = vmatpush2.bf16.msra.mxu1 %v9699_v4  ;;  %v9733_v4 = vld [vmem:[#allocation8 + $0xc8] ss:$24 sps:$4 sm:$0xff]  }
 0x870   :  { %5630 = vmatprep.subr.bf16.mxu1 %v9700_v55  ;;  %6262 = vmatpush2.bf16.msra.mxu0 %v9701_v35  ;;  %v9734_v55 = vld [vmem:[#allocation8 + $0x9c] ss:$24 sps:$4 sm:$0xff]   ;;  %v9735_v35 = vld [vmem:[#allocation8 + $0x98] ss:$24 sps:$4 sm:$0xff]  }
 0x871   :  { %6263 = vmatprep.subr.bf16.mxu0 %v9702_v1  ;;  %v9736_v1 = vld [vmem:[#allocation8 + $0x6c] ss:$24 sps:$4 sm:$0xff]  }
 0x873   :  { %5631 = vmatpush2.bf16.msra.mxu1 %v9703_v46  ;;  %v9738_v46 = vld [vmem:[#allocation8 + $0x3c] ss:$24 sps:$4 sm:$0xff]  }
 0x874   :  { %5632 = vmatprep.subr.bf16.mxu1 %v9704_v37  ;;  %6264 = vmatpush2.bf16.msra.mxu0 %v9705_v47  ;;  %v9739_v37 = vld [vmem:[#allocation8 + $0x38] ss:$24 sps:$4 sm:$0xff]   ;;  %v9740_v47 = vld [vmem:[#allocation8 + $0xc] ss:$24 sps:$4 sm:$0xff]  }
 0x875   :  { %6265 = vmatprep.subr.bf16.mxu0 %v9706_v8  ;;  %v9741_v8 = vld [vmem:[#allocation8 + $0x8] ss:$24 sps:$4 sm:$0xff]  }
 0x877   :  { %5633 = vmatpush2.bf16.msra.mxu1 %v9707_v34  ;;  %v9742_v34 = vld [vmem:[#allocation8 + $0x2dc] ss:$24 sps:$4 sm:$0xff]  }
 0x878   :  { %5634 = vmatprep.subr.bf16.mxu1 %v9708_v25  ;;  %6266 = vmatpush2.bf16.msra.mxu0 %v9709_v61  ;;  %v9743_v25 = vld [vmem:[#allocation8 + $0x2d8] ss:$24 sps:$4 sm:$0xff]   ;;  %v9744_v61 = vld [vmem:[#allocation8 + $0x2ac] ss:$24 sps:$4 sm:$0xff]  }
 0x879   :  { %6267 = vmatprep.subr.bf16.mxu0 %v9710_v20  ;;  %v9745_v20 = vld [vmem:[#allocation8 + $0x2a8] ss:$24 sps:$4 sm:$0xff]  }
 0x87b   :  { %5635 = vmatpush2.bf16.msra.mxu1 %v9711_v33  ;;  %v9746_v33 = vld [vmem:[#allocation8 + $0x27c] ss:$24 sps:$4 sm:$0xff]  }
 0x87c   :  { %5636 = vmatprep.subr.bf16.mxu1 %v9712_v10  ;;  %6268 = vmatpush2.bf16.msra.mxu0 %v9713_v51  ;;  %v9747_v10 = vld [vmem:[#allocation8 + $0x278] ss:$24 sps:$4 sm:$0xff]   ;;  %v9748_v51 = vld [vmem:[#allocation8 + $0x24c] ss:$24 sps:$4 sm:$0xff]  }
 0x87d   :  { %6269 = vmatprep.subr.bf16.mxu0 %v9714_v60  ;;  %v9749_v60 = vld [vmem:[#allocation8 + $0x248] ss:$24 sps:$4 sm:$0xff]  }
 0x87f   :  { %5637 = vmatpush2.bf16.msra.mxu1 %v9715_v53  ;;  %v9750_v53 = vld [vmem:[#allocation8 + $0x21c] ss:$24 sps:$4 sm:$0xff]  }
 0x880   :  { %5638 = vmatprep.subr.bf16.mxu1 %v9716_v44  ;;  %6270 = vmatpush2.bf16.msra.mxu0 %v9717_v39  ;;  %v9751_v44 = vld [vmem:[#allocation8 + $0x218] ss:$24 sps:$4 sm:$0xff]   ;;  %v9752_v39 = vld [vmem:[#allocation8 + $0x1ec] ss:$24 sps:$4 sm:$0xff]  }
 0x881   :  { %6271 = vmatprep.subr.bf16.mxu0 %v9718_v36  ;;  %v9753_v36 = vld [vmem:[#allocation8 + $0x1e8] ss:$24 sps:$4 sm:$0xff]  }
 0x883   :  { %5639 = vmatpush2.bf16.msra.mxu1 %v9719_v12  ;;  %v9754_v12 = vld [vmem:[#allocation8 + $0x1bc] ss:$24 sps:$4 sm:$0xff]  }
 0x884   :  { %5640 = vmatprep.subr.bf16.mxu1 %v9720_v58  ;;  %6272 = vmatpush2.bf16.msra.mxu0 %v9721_v50  ;;  %v9755_v58 = vld [vmem:[#allocation8 + $0x1b8] ss:$24 sps:$4 sm:$0xff]   ;;  %v9756_v50 = vld [vmem:[#allocation8 + $0x18c] ss:$24 sps:$4 sm:$0xff]  }
 0x885   :  { %6273 = vmatprep.subr.bf16.mxu0 %v9722_v31  ;;  %v9757_v31 = vld [vmem:[#allocation8 + $0x188] ss:$24 sps:$4 sm:$0xff]  }
 0x887   :  { %5641 = vmatpush2.bf16.msra.mxu1 %v9723_v3 }
 0x888   :  { %6284 = vmatprep.subr.bf16.mxu1 %v9724_v32  ;;  %6274 = vmatpush2.bf16.msra.mxu0 %v9725_v57  ;;  %v13345_v57 = vld [vmem:[#allocation18_spill] sm:$0xff] }
 0x889   :  { %6325 = vmatprep.subr.bf16.mxu0 %v9726_v41 }
 0x88a   :  { %5643 = vmatmul.mubr.bf16.vlgmr.msra.gmra.mxu1 %v12300_v5  ;;  %v9737_v5 = vld [vmem:[#allocation8 + $0x68] ss:$24 sps:$4 sm:$0xff]  }
 0x88b   :  { %6285 = vmatpush1.bf16.msra.mxu1 %v9727_v27  ;;  %v13346_v27 = vld [vmem:[#allocation40_spill] sm:$0xff] }
 0x88c   :  { %6286 = vmatprep.subr.bf16.mxu1 %v9728_v13 }
 0x88f   :  { %6287 = vmatpush1.bf16.msra.mxu1 %v9729_v15 }
 0x890   :  { %6288 = vmatprep.subr.bf16.mxu1 %v9730_v0 }
 0x893   :  { %6289 = vmatpush1.bf16.msra.mxu1 %v9731_v17 }
 0x894   :  { %6290 = vmatprep.subr.bf16.mxu1 %v9732_v26 }
 0x897   :  { %6291 = vmatpush1.bf16.msra.mxu1 %v9733_v4 }
 0x898   :  { %6292 = vmatprep.subr.bf16.mxu1 %v9734_v55 }
 0x89b   :  { %6293 = vmatpush1.bf16.msra.mxu1 %v9735_v35 }
 0x89c   :  { %6294 = vmatprep.subr.bf16.mxu1 %v9736_v1 }
 0x89f   :  { %6295 = vmatpush1.bf16.msra.mxu1 %v9737_v5 }
 0x8a0   :  { %6296 = vmatprep.subr.bf16.mxu1 %v9738_v46  ;;  %v13347_v46 = vld [vmem:[#allocation30_spill] sm:$0xff] }
 0x8a3   :  { %6297 = vmatpush1.bf16.msra.mxu1 %v9739_v37 }
 0x8a4   :  { %6298 = vmatprep.subr.bf16.mxu1 %v9740_v47 }
 0x8a7   :  { %6299 = vmatpush1.bf16.msra.mxu1 %v9741_v8 }
 0x8a8   :  { %6300 = vmatprep.subr.bf16.mxu1 %v9742_v34  ;;  %v13348_v34 = vld [vmem:[#allocation23_spill] sm:$0xff] }
 0x8ab   :  { %6301 = vmatpush2.bf16.msra.mxu1 %v9743_v25 }
 0x8ac   :  { %6302 = vmatprep.subr.bf16.mxu1 %v9744_v61  ;;  %v13349_v61 = vld [vmem:[#allocation24_spill] sm:$0xff] }
 0x8af   :  { %6303 = vmatpush2.bf16.msra.mxu1 %v9745_v20 }
 0x8b0   :  { %6304 = vmatprep.subr.bf16.mxu1 %v9746_v33  ;;  %v13350_v33 = vld [vmem:[#allocation25_spill] sm:$0xff] }
 0x8b3   :  { %6305 = vmatpush2.bf16.msra.mxu1 %v9747_v10 }
 0x8b4   :  { %6306 = vmatprep.subr.bf16.mxu1 %v9748_v51  ;;  %v13351_v51 = vld [vmem:[#allocation26_spill] sm:$0xff] }
 0x8b7   :  { %6307 = vmatpush2.bf16.msra.mxu1 %v9749_v60 }
 0x8b8   :  { %6308 = vmatprep.subr.bf16.mxu1 %v9750_v53  ;;  %v13352_v53 = vld [vmem:[#allocation28_spill] sm:$0xff] }
 0x8bb   :  { %6309 = vmatpush2.bf16.msra.mxu1 %v9751_v44 }
 0x8bc   :  { %6310 = vmatprep.subr.bf16.mxu1 %v9752_v39  ;;  %v13353_v39 = vld [vmem:[#allocation29_spill] sm:$0xff] }
 0x8bf   :  { %6311 = vmatpush2.bf16.msra.mxu1 %v9753_v36 }
 0x8c0   :  { %6312 = vmatprep.subr.bf16.mxu1 %v9754_v12 }
 0x8c3   :  { %6313 = vmatpush2.bf16.msra.mxu1 %v9755_v58 }
 0x8c4   :  { %6314 = vmatprep.subr.bf16.mxu1 %v9756_v50 }
 0x8c7   :  { %6315 = vmatpush2.bf16.msra.mxu1 %v9757_v31  ;;  %v13354_v31 = vld [vmem:[#allocation31_spill] sm:$0xff] }
 0x90a   :  { %v5562_v3 = vpop.f32.mrf.mxu1  ;;  %v5603_v32 = vpop.f32.mrf.mxu0 }
 0x90b   :  { %v5563_v41 = vadd.f32 %v5562_v3, %v13345_v57  ;;  %v12307_v13 = vadd.f32 %v5603_v32, %v13346_v27 }
 0x90c   :  { %v5564_v15 = vpop.f32.mrf.mxu1  ;;  %v12309_v0 = vpop.f32.mrf.mxu0 }
 0x90d   :  { %v5653_v17 = vrot.slane %v5563_v41, 2  ;;  %v5655_v26 = vrot.slane %v5563_v41, 3  ;;  %v5657_v4 = vrot.slane %v5563_v41, 4  ;;  %v5659_v55 = vrot.slane %v5563_v41, 5 }
 0x90e   :  { %v5661_v35 = vrot.slane %v5563_v41, 6  ;;  %v5663_v1 = vrot.slane %v5563_v41, 7  ;;  %v5665_v5 = vrot.slane %v5563_v41, 1  ;;  %v5695_v37 = vadd.f32 %v5563_v41, %v13347_v46  ;;  %v5566_v47 = vpop.f32.mrf.mxu1  ;;  %v5607_v8 = vpop.f32.mrf.mxu0  ;;  %v13360_v46 = vld [vmem:[#allocation54_spill] sm:$0xff] }
 0x90f   :  { %v5683_v25 = vadd.f32 %v5653_v17, %v13348_v34  ;;  %v5685_v20 = vadd.f32 %v5655_v26, %v13349_v61  ;;  %v5687_v10 = vadd.f32 %v5657_v4, %v13350_v33  ;;  %v5689_v60 = vadd.f32 %v5659_v55, %v13351_v51  ;;  %v13367_v51 = vld [vmem:[#allocation35_spill] sm:$0xff] }
 0x910   :  { %v5691_v44 = vadd.f32 %v5661_v35, %v13352_v53  ;;  %v5693_v36 = vadd.f32 %v5663_v1, %v13353_v39  ;;  %v7566_v12 = vmul.f32 -1.442695, %v5695_v37  ;;  %v5567_v58 = vpop.f32.mrf.mxu1  ;;  %v5608_v50 = vpop.f32.mrf.mxu0  ;;  %v5697_v3 = vadd.f32 %v5665_v5, %v13354_v31  ;;  %v13375_v61 = vld [vmem:[#allocation51_spill] sm:$0xff] }
 0x911   :  { %v7554_v32 = vmul.f32 -1.442695, %v5683_v25  ;;  %v7556_v41 = vmul.f32 -1.442695, %v5685_v20  ;;  %v7558_v47 = vmul.f32 -1.442695, %v5687_v10 }
 0x912   :  { %v7560_v8 = vmul.f32 -1.442695, %v5689_v60  ;;  %8863 = vpow2.f32 %v7566_v12  ;;  %v7562_v17 = vmul.f32 -1.442695, %v5691_v44  ;;  %v5797_v26 = vrot.slane %v12307_v13, 2  ;;  %v13355_v25 = vld [vmem:[#allocation41_spill] sm:$0xff] }
 0x913   :  { %8865 = vpow2.f32 %v7554_v32  ;;  %v5799_v4 = vrot.slane %v12307_v13, 3  ;;  %v7564_v55 = vmul.f32 -1.442695, %v5693_v36  ;;  %v5801_v35 = vrot.slane %v12307_v13, 4  ;;  %v13356_v60 = vld [vmem:[#allocation45_spill] sm:$0xff]  ;;  %v13357_v12 = vld [vmem:[#allocation47_spill] sm:$0xff] }
 0x914   :  { %8867 = vpow2.f32 %v7556_v41  ;;  %v5803_v1 = vrot.slane %v12307_v13, 5  ;;  %v7568_v37 = vmul.f32 -1.442695, %v5697_v3  ;;  %v5805_v5 = vrot.slane %v12307_v13, 6  ;;  %v13358_v36 = vld [vmem:[#allocation49_spill] sm:$0xff] }
 0x915   :  { %8869 = vpow2.f32 %v7558_v47  ;;  %v5827_v20 = vadd.f32 %v5797_v26, %v13355_v25  ;;  %v5807_v10 = vrot.slane %v12307_v13, 7  ;;  %v5829_v44 = vadd.f32 %v5799_v4, %v13356_v60  ;;  %v13359_v47 = vld [vmem:[#allocation52_spill] sm:$0xff] }
 0x916   :  { %8871 = vpow2.f32 %v7560_v8  ;;  %v5831_v58 = vadd.f32 %v5801_v35, %v13357_v12  ;;  %v5833_v50 = vadd.f32 %v5803_v1, %v13358_v36  ;;  %v5835_v3 = vadd.f32 %v5805_v5, %v13359_v47  ;;  %v13361_v26 = vld [vmem:[#allocation56_spill] sm:$0xff]  ;;  %v13362_v35 = vld [vmem:[#allocation21_spill] sm:$0xff] }
 0x917   :  { %8873 = vpow2.f32 %v7562_v17  ;;  %v7570_v32 = vmul.f32 -1.442695, %v5827_v20  ;;  %v7572_v41 = vmul.f32 -1.442695, %v5829_v44  ;;  %v5837_v39 = vadd.f32 %v5807_v10, %v13360_v46 }
 0x918   :  { %8875 = vpow2.f32 %v7564_v55  ;;  %v5839_v8 = vadd.f32 %v12307_v13, %v13361_v26  ;;  %v7574_v25 = vmul.f32 -1.442695, %v5831_v58  ;;  %v7576_v4 = vmul.f32 -1.442695, %v5833_v50 }
 0x919   :  { %8877 = vpow2.f32 %v7568_v37  ;;  %v7578_v17 = vmul.f32 -1.442695, %v5835_v3  ;;  %v7580_v60 = vmul.f32 -1.442695, %v5837_v39  ;;  %v5565_v55 = vadd.f32 %v5564_v15, %v13362_v35  ;;  %v13364_v35 = vld [vmem:[#allocation32_spill] sm:$0xff] }
 0x91a   :  { %8879 = vpow2.f32 %v7570_v32  ;;  %v7582_v1 = vmul.f32 -1.442695, %v5839_v8  ;;  %v5809_v57 = vrot.slane %v12307_v13, 1 }
 0x91b   :  { %8881 = vpow2.f32 %v7572_v41  ;;  %v5654_v26 = vrot.slane %v5565_v55, 2  ;;  %v5656_v50 = vrot.slane %v5565_v55, 3  ;;  %v5658_v15 = vrot.slane %v5565_v55, 4 }
 0x91c   :  { %8883 = vpow2.f32 %v7574_v25 }
 0x91d   :  { %8885 = vpow2.f32 %v7576_v4  ;;  %v13363_v4 = vld [vmem:[#allocation43_spill] sm:$0xff] }
 0x91e   :  { %8887 = vpow2.f32 %v7578_v17 }
 0x91f   :  { %v8864_v12 = vpop.eup %8863  ;;  %8889 = vpow2.f32 %v7580_v60  ;;  %v5662_v60 = vrot.slane %v5565_v55, 6 }
 0x920   :  { %v8866_v20 = vpop.eup %8865  ;;  %v5759_v37 = vadd.f32 1.0, %v8864_v12  ;;  %8891 = vpow2.f32 %v7582_v1  ;;  %v5660_v12 = vrot.slane %v5565_v55, 5 }
 0x921   :  { %v8868_v5 = vpop.eup %8867  ;;  %v5747_v44 = vadd.f32 1.0, %v8866_v20  ;;  %v12336_v20 = vadd.f32 %v12309_v0, %v13363_v4  ;;  %v5666_v4 = vrot.slane %v5565_v55, 1 }
 0x922   :  { %v8870_v10 = vpop.eup %8869  ;;  %v5749_v32 = vadd.f32 1.0, %v8868_v5  ;;  %8893 = vrcp.f32 %v5759_v37  ;;  %v13365_v37 = vld [vmem:[#allocation33_spill] sm:$0xff] }
 0x923   :  { %v8872_v41 = vpop.eup %8871  ;;  %v5751_v58 = vadd.f32 1.0, %v8870_v10  ;;  %8895 = vrcp.f32 %v5747_v44  ;;  %v5684_v10 = vadd.f32 %v5654_v26, %v13364_v35  ;;  %v5686_v47 = vadd.f32 %v5656_v50, %v13365_v37 }
 0x924   :  { %v8874_v39 = vpop.eup %8873  ;;  %v5753_v3 = vadd.f32 1.0, %v8872_v41  ;;  %8897 = vrcp.f32 %v5749_v32  ;;  %v5664_v41 = vrot.slane %v5565_v55, 7  ;;  %v13368_v32 = vld [vmem:[#allocation36_spill] sm:$0xff] }
 0x925   :  { %v8876_v25 = vpop.eup %8875  ;;  %v5755_v8 = vadd.f32 1.0, %v8874_v39  ;;  %8899 = vrcp.f32 %v5751_v58  ;;  %v13366_v39 = vld [vmem:[#allocation34_spill] sm:$0xff]  ;;  %v5692_v33 = vadd.f32 %v5662_v60, %v13368_v32  ;;  %v7555_v26 = vmul.f32 -1.442695, %v5684_v10  ;;  %v13369_v58 = vld [vmem:[#allocation37_spill] sm:$0xff] }
 0x926   :  { %v8878_v17 = vpop.eup %8877  ;;  %v5757_v5 = vadd.f32 1.0, %v8876_v25  ;;  %8901 = vrcp.f32 %v5753_v3  ;;  %v5688_v53 = vadd.f32 %v5658_v15, %v13366_v39  ;;  %v5690_v25 = vadd.f32 %v5660_v12, %v13367_v51  ;;  %v13370_v15 = vld [vmem:[#allocation38_spill] sm:$0xff] }
 0x927   :  { %v8880_v1 = vpop.eup %8879  ;;  %v5761_v46 = vadd.f32 1.0, %v8878_v17  ;;  %8903 = vrcp.f32 %v5755_v8  ;;  %v5798_v17 = vrot.slane %v12336_v20, 2  ;;  %v5694_v35 = vadd.f32 %v5664_v41, %v13369_v58  ;;  %v13372_v58 = vld [vmem:[#allocation42_spill] sm:$0xff] }
 0x928   :  { %v8882_v36 = vpop.eup %8881  ;;  %v5891_v44 = vadd.f32 1.0, %v8880_v1  ;;  %8905 = vrcp.f32 %v5757_v5  ;;  %v7557_v50 = vmul.f32 -1.442695, %v5686_v47  ;;  %v5800_v3 = vrot.slane %v12336_v20, 3  ;;  %v13371_v5 = vld [vmem:[#allocation39_spill] sm:$0xff] }
 0x929   :  { %v5893_v0 = vadd.f32 1.0, %v8882_v36  ;;  %8907 = vrcp.f32 %v5761_v46  ;;  %v8884_v1 = vpop.eup %8883  ;;  %v5696_v8 = vadd.f32 %v5565_v55, %v13370_v15  ;;  %v7559_v36 = vmul.f32 -1.442695, %v5688_v53 }
 0x92a   :  { %8909 = vrcp.f32 %v5891_v44  ;;  %v5802_v39 = vrot.slane %v12336_v20, 4  ;;  %v8886_v12 = vpop.eup %8885  ;;  %v5698_v60 = vadd.f32 %v5666_v4, %v13371_v5  ;;  %v7561_v10 = vmul.f32 -1.442695, %v5690_v25  ;;  %v13374_v5 = vld [vmem:[#allocation48_spill] sm:$0xff] }
 0x92b   :  { %8911 = vrcp.f32 %v5893_v0  ;;  %v5804_v32 = vrot.slane %v12336_v20, 5  ;;  %v12350_v46 = vpop.eup %8887  ;;  %v7563_v47 = vmul.f32 -1.442695, %v5692_v33  ;;  %v5806_v41 = vrot.slane %v12336_v20, 6  ;;  %v13373_v0 = vld [vmem:[#allocation46_spill] sm:$0xff] }
 0x92c   :  { %8913 = vpow2.f32 %v7555_v26  ;;  %v5828_v44 = vadd.f32 %v5798_v17, %v13372_v58  ;;  %v12354_v51 = vpop.eup %8889  ;;  %v7565_v53 = vmul.f32 -1.442695, %v5694_v35  ;;  %v5808_v55 = vrot.slane %v12336_v20, 7  ;;  %v13376_v35 = vld [vmem:[#allocation53_spill] sm:$0xff] }
 0x92d   :  { %8915 = vpow2.f32 %v7557_v50  ;;  %v5830_v15 = vadd.f32 %v5800_v3, %v13373_v0  ;;  %v12358_v4 = vpop.eup %8891  ;;  %v7567_v25 = vmul.f32 -1.442695, %v5696_v8  ;;  %v5832_v37 = vadd.f32 %v5802_v39, %v13374_v5  ;;  %v13377_v8 = vld [vmem:[#allocation55_spill] sm:$0xff] }
 0x92e   :  { %8917 = vpow2.f32 %v7559_v36  ;;  %v7569_v33 = vmul.f32 -1.442695, %v5698_v60  ;;  %v5834_v17 = vadd.f32 %v5804_v32, %v13375_v61  ;;  %v5836_v50 = vadd.f32 %v5806_v41, %v13376_v35  ;;  %v13378_v60 = vld [vmem:[#allocation57_spill] sm:$0xff] }
 0x92f   :  { %v12361_v26 = vpop.eup %8893  ;;  %8919 = vpow2.f32 %v7561_v10  ;;  %v7571_v34 = vmul.f32 -1.442695, %v5828_v44  ;;  %v5810_v3 = vrot.slane %v12336_v20, 1  ;;  %v5838_v36 = vadd.f32 %v5808_v55, %v13377_v8 }
 0x930   :  { %v12364_v58 = vpop.eup %8895  ;;  %8921 = vpow2.f32 %v7563_v47  ;;  %v7573_v39 = vmul.f32 -1.442695, %v5830_v15  ;;  %v5840_v32 = vadd.f32 %v12336_v20, %v13378_v60  ;;  %v7575_v10 = vmul.f32 -1.442695, %v5832_v37  ;;  %v13379_v15 = vld [vmem:[#allocation58_spill] sm:$0xff] }
 0x931   :  { %v12367_v31 = vpop.eup %8897  ;;  %8923 = vpow2.f32 %v7565_v53  ;;  %v7577_v47 = vmul.f32 -1.442695, %v5834_v17  ;;  %v7579_v44 = vmul.f32 -1.442695, %v5836_v50  ;;  %v7581_v55 = vmul.f32 -1.442695, %v5838_v36 }
 0x932   :  { %v12371_v5 = vpop.eup %8899  ;;  %8925 = vpow2.f32 %v7567_v25  ;;  %v5842_v8 = vadd.f32 %v5810_v3, %v13379_v15  ;;  %v7583_v25 = vmul.f32 -1.442695, %v5840_v32  ;;  %v5895_v37 = vadd.f32 1.0, %v8884_v1 }
 0x933   :  { %v12375_v61 = vpop.eup %8901  ;;  %8927 = vpow2.f32 %v7569_v33  ;;  %v5897_v17 = vadd.f32 1.0, %v8886_v12 }
 0x934   :  { %v12377_v41 = vpop.eup %8903  ;;  %8929 = vpow2.f32 %v7571_v34  ;;  %v7585_v50 = vmul.f32 -1.442695, %v5842_v8 }
 0x935   :  { %v12379_v53 = vpop.eup %8905  ;;  %8931 = vpow2.f32 %v7573_v39 }
 0x936   :  { %v12382_v35 = vpop.eup %8907  ;;  %8933 = vpow2.f32 %v7575_v10 }
 0x937   :  { %v12384_v20 = vpop.eup %8909  ;;  %8935 = vpow2.f32 %v7577_v47 }
 0x938   :  { %v12386_v33 = vpop.eup %8911  ;;  %8937 = vpow2.f32 %v7579_v44 }
 0x939   :  { %v8914_v34 = vpop.eup %8913  ;;  %8939 = vpow2.f32 %v7581_v55 }
 0x93a   :  { %v8916_v60 = vpop.eup %8915  ;;  %v5748_v39 = vadd.f32 1.0, %v8914_v34  ;;  %8941 = vpow2.f32 %v7583_v25 }
 0x93b   :  { %v8918_v36 = vpop.eup %8917  ;;  %8943 = vrcp.f32 %v5895_v37  ;;  %v5750_v3 = vadd.f32 1.0, %v8916_v60 }
 0x93c   :  { %v8920_v15 = vpop.eup %8919  ;;  %8945 = vrcp.f32 %v5897_v17  ;;  %v5752_v32 = vadd.f32 1.0, %v8918_v36 }
 0x93d   :  { %v8922_v10 = vpop.eup %8921  ;;  %v5754_v0 = vadd.f32 1.0, %v8920_v15  ;;  %8947 = vpow2.f32 %v7585_v50 }
 0x93e   :  { %v8924_v1 = vpop.eup %8923  ;;  %v5756_v47 = vadd.f32 1.0, %v8922_v10  ;;  %8949 = vrcp.f32 %v5748_v39 }
 0x93f   :  { %v8926_v12 = vpop.eup %8925  ;;  %v5758_v44 = vadd.f32 1.0, %v8924_v1  ;;  %8951 = vrcp.f32 %v5750_v3 }
 0x940   :  { %v8928_v55 = vpop.eup %8927  ;;  %v5760_v8 = vadd.f32 1.0, %v8926_v12  ;;  %8953 = vrcp.f32 %v5752_v32 }
 0x941   :  { %v8930_v34 = vpop.eup %8929  ;;  %v5762_v25 = vadd.f32 1.0, %v8928_v55  ;;  %8955 = vrcp.f32 %v5754_v0 }
 0x942   :  { %v8932_v37 = vpop.eup %8931  ;;  %8957 = vrcp.f32 %v5756_v47  ;;  %v5892_v60 = vadd.f32 1.0, %v8930_v34 }
 0x943   :  { %v8934_v17 = vpop.eup %8933  ;;  %8959 = vrcp.f32 %v5758_v44  ;;  %v5894_v36 = vadd.f32 1.0, %v8932_v37  ;;  %v13381_v44 = vld [vmem:[#allocation44_spill] sm:$0xff] }
 0x944   :  { %v8936_v15 = vpop.eup %8935  ;;  %8961 = vrcp.f32 %v5760_v8  ;;  %v5896_v50 = vadd.f32 1.0, %v8934_v17 }
 0x945   :  { %v8938_v10 = vpop.eup %8937  ;;  %8963 = vrcp.f32 %v5762_v25  ;;  %v5898_v39 = vadd.f32 1.0, %v8936_v15 }
 0x946   :  { %v8940_v1 = vpop.eup %8939  ;;  %8965 = vrcp.f32 %v5892_v60  ;;  %v5900_v3 = vadd.f32 1.0, %v8938_v10 }
 0x947   :  { %v8942_v12 = vpop.eup %8941  ;;  %8967 = vrcp.f32 %v5894_v36  ;;  %v5902_v55 = vadd.f32 1.0, %v8940_v1 }
 0x948   :  { %v12388_v32 = vpop.eup %8943  ;;  %8969 = vrcp.f32 %v5896_v50  ;;  %v5904_v25 = vadd.f32 1.0, %v8942_v12 }
 0x949   :  { %v12390_v47 = vpop.eup %8945  ;;  %8971 = vrcp.f32 %v5898_v39 }
 0x94a   :  { %v5644_v0 = vpop.f32.mrf.mxu1  ;;  %13380 = vst [vmem:[#allocation59_spill] sm:$0xff] %v12390_v47  ;;  %v8948_v8 = vpop.eup %8947  ;;  %8973 = vrcp.f32 %v5900_v3 }
 0x94b   :  { %v12393_v34 = vadd.f32 %v5644_v0, %v13381_v44  ;;  %v8950_v17 = vpop.eup %8949  ;;  %8975 = vrcp.f32 %v5902_v55  ;;  %v5906_v59 = vadd.f32 1.0, %v8948_v8 }
 0x94c   :  { %v5646_v37 = vpop.f32.mrf.mxu1  ;;  %v8952_v50 = vpop.eup %8951  ;;  %8977 = vrcp.f32 %v5904_v25 }
 0x94d   :  { %v5941_v60 = vrot.slane %v12393_v34, 2  ;;  %v5943_v36 = vrot.slane %v12393_v34, 3  ;;  %v5945_v15 = vrot.slane %v12393_v34, 4  ;;  %v5947_v10 = vrot.slane %v12393_v34, 5  ;;  %v8954_v27 = vpop.eup %8953 }
 0x94e   :  { %v5648_v1 = vpop.f32.mrf.mxu1  ;;  %v8956_v44 = vpop.eup %8955  ;;  %v5647_v22 = vadd.f32 %v5646_v37, %v13382_v21 }
 0x94f   :  { %v5971_v0 = vmul.f32 %v12364_v58, %v5941_v60  ;;  %v5973_v39 = vmul.f32 %v12367_v31, %v5943_v36  ;;  %v5975_v12 = vmul.f32 %v12371_v5, %v5945_v15  ;;  %v5977_v3 = vmul.f32 %v12375_v61, %v5947_v10  ;;  %v8958_v30 = vpop.eup %8957  ;;  %v13383_v1 = vld [vmem:[#allocation60_spill] sm:$0xff]  ;;  %v13385_v58 = vld [vmem:[#allocation62_spill] sm:$0xff] }
 0x950   :  { %v5649_v48 = vpop.f32.mrf.mxu1  ;;  %v13386_v31 = vld [vmem:[#allocation64_spill] sm:$0xff]  ;;  %v8960_v5 = vpop.eup %8959  ;;  %v5942_v15 = vrot.slane %v5647_v22, 2  ;;  %v5944_v61 = vrot.slane %v5647_v22, 3  ;;  %v5946_v10 = vrot.slane %v5647_v22, 4  ;;  %v5948_v24 = vrot.slane %v5647_v22, 5 }
 0x951   :  { %v5987_v55 = vadd.f32 %v5971_v0, %v13383_v1  ;;  %v5989_v54 = vadd.f32 %v5973_v39, %v13384_v23  ;;  %v5991_v60 = vadd.f32 %v5975_v12, %v13385_v58  ;;  %v5993_v36 = vadd.f32 %v5977_v3, %v13386_v31  ;;  %v8962_v13 = vpop.eup %8961 }
 0x952   :  { %v5950_v37 = vrot.slane %v5647_v22, 6  ;;  %v5952_v48 = vrot.slane %v5647_v22, 7  ;;  %v5954_v8 = vrot.slane %v5647_v22, 1  ;;  %v8964_v25 = vpop.eup %8963  ;;  %v5972_v21 = vmul.f32 %v8950_v17, %v5942_v15 }
 0x953   :  { %8979 = vtanh.f32 %v5987_v55  ;;  %v5974_v0 = vmul.f32 %v8952_v50, %v5944_v61  ;;  %v5976_v1 = vmul.f32 %v8954_v27, %v5946_v10  ;;  %v12409_v39 = vpop.eup %8965  ;;  %v5978_v12 = vmul.f32 %v8956_v44, %v5948_v24 }
 0x954   :  { %8981 = vtanh.f32 %v5989_v54  ;;  %v5980_v3 = vmul.f32 %v8958_v30, %v5950_v37  ;;  %v5982_v31 = vmul.f32 %v8960_v5, %v5952_v48  ;;  %v12411_v58 = vpop.eup %8967  ;;  %v5988_v23 = vadd.f32 %v5972_v21, %v10614_v49 }
 0x955   :  { %8983 = vtanh.f32 %v5991_v60  ;;  %v5990_v55 = vadd.f32 %v5974_v0, %v10623_v42  ;;  %v5992_v40 = vadd.f32 %v5976_v1, %v13117_v11  ;;  %v12416_v47 = vpop.eup %8969  ;;  %v5984_v54 = vmul.f32 %v8962_v13, %v5647_v22 }
 0x956   :  { %8985 = vtanh.f32 %v5993_v36  ;;  %v5986_v27 = vmul.f32 %v8964_v25, %v5954_v8  ;;  %v5994_v17 = vadd.f32 %v5978_v12, %v13118_v6  ;;  %v12419_v50 = vpop.eup %8971  ;;  %v5841_v24 = vadd.f32 %v5809_v57, %v13270_v63 }
 0x957   :  { %8987 = vrcp.f32 %v5906_v59  ;;  %v5949_v30 = vrot.slane %v12393_v34, 6  ;;  %v5996_v21 = vadd.f32 %v5980_v3, %v13119_v18  ;;  %v12424_v44 = vpop.eup %8973  ;;  %v5951_v1 = vrot.slane %v12393_v34, 7 }
 0x958   :  { %8989 = vtanh.f32 %v5988_v23  ;;  %v5998_v59 = vadd.f32 %v5982_v31, %v13120_v43  ;;  %v6000_v22 = vadd.f32 %v5984_v54, %v13121_v62  ;;  %v12429_v60 = vpop.eup %8975  ;;  %v5953_v36 = vrot.slane %v12393_v34, 1 }
 0x959   :  { %8991 = vtanh.f32 %v5990_v55  ;;  %v6002_v57 = vadd.f32 %v5986_v27, %v13122_v28  ;;  %v7584_v23 = vmul.f32 -1.442695, %v5841_v24  ;;  %v5979_v5 = vmul.f32 %v12377_v41, %v5949_v30  ;;  %v12434_v15 = vpop.eup %8977 }
 0x95a   :  { %8993 = vtanh.f32 %v5992_v40  ;;  %v5981_v61 = vmul.f32 %v12379_v53, %v5951_v1  ;;  %v5899_v31 = vadd.f32 1.0, %v12350_v46  ;;  %v5983_v40 = vmul.f32 %v12361_v26, %v12393_v34 }
 0x95b   :  { %8995 = vtanh.f32 %v5994_v17  ;;  %v5901_v10 = vadd.f32 1.0, %v12354_v51  ;;  %v5903_v13 = vadd.f32 1.0, %v12358_v4  ;;  %v5985_v37 = vmul.f32 %v12382_v35, %v5953_v36 }
 0x95c   :  { %8997 = vtanh.f32 %v5996_v21  ;;  %v5995_v48 = vadd.f32 %v5979_v5, %v13326_v2  ;;  %v5997_v53 = vadd.f32 %v5981_v61, %v13167_v16  ;;  %v5999_v26 = vadd.f32 %v5983_v40, %v13168_v7 }
 0x95d   :  { %8999 = vtanh.f32 %v5998_v59  ;;  %v6001_v4 = vadd.f32 %v5985_v37, %v13169_v52 }
 0x95e   :  { %9001 = vtanh.f32 %v6000_v22 }
 0x95f   :  { %9003 = vtanh.f32 %v6002_v57 }
 0x960   :  { %v8980_v41 = vpop.eup %8979  ;;  %9005 = vpow2.f32 %v7584_v23 }
 0x961   :  { %v8982_v8 = vpop.eup %8981  ;;  %9007 = vrcp.f32 %v5899_v31  ;;  %v6035_v46 = vrot.slane %v8980_v41, 1 }
 0x962   :  { %v12445_v25 = vpop.eup %8983  ;;  %9009 = vrcp.f32 %v5901_v10  ;;  %v6037_v51 = vrot.slane %v8982_v8, 1 }
 0x963   :  { %v12448_v34 = vpop.eup %8985  ;;  %9011 = vrcp.f32 %v5903_v13  ;;  %v6039_v35 = vrot.slane %v12445_v25, 1  ;;  %v6067_v0 = vsub.f32 %v12172_v19, %v6035_v46 }
 0x964   :  { %v12453_v12 = vpop.eup %8987  ;;  %9013 = vtanh.f32 %v5995_v48  ;;  %v6041_v3 = vrot.slane %v12448_v34, 1  ;;  %v6069_v55 = vsub.f32 %v12179_v9, %v6037_v51 }
 0x965   :  { %v8990_v54 = vpop.eup %8989  ;;  %9015 = vtanh.f32 %v5997_v53  ;;  %v6071_v27 = vsub.f32 %v12254_v14, %v6039_v35  ;;  %v6099_v17 = vrot.slane %v6067_v0, 7  ;;  %v13387_v53 = vld [vmem:[#allocation59_spill] sm:$0xff]  ;;  %v13389_v0 = vld [vmem:[#allocation68_spill] sm:$0xff] }
 0x966   :  { %v8992_v24 = vpop.eup %8991  ;;  %v6036_v30 = vrot.slane %v8990_v54, 1  ;;  %9017 = vtanh.f32 %v5999_v26  ;;  %v6073_v21 = vsub.f32 %v12259_v45, %v6041_v3  ;;  %v6101_v1 = vrot.slane %v6069_v55, 7 }
 0x967   :  { %v8994_v59 = vpop.eup %8993  ;;  %v6038_v19 = vrot.slane %v8992_v24, 1  ;;  %9019 = vtanh.f32 %v6001_v4  ;;  %v6103_v22 = vrot.slane %v6071_v27, 7  ;;  %v6131_v36 = vmul.f32 %v12384_v20, %v6099_v17  ;;  %v13390_v17 = vld [vmem:[#allocation63_spill] sm:$0xff] }
 0x968   :  { %v8996_v57 = vpop.eup %8995  ;;  %v6040_v23 = vrot.slane %v8994_v59, 1  ;;  %v6068_v9 = vsub.f32 %v12189_v38, %v6036_v30  ;;  %v6105_v5 = vrot.slane %v6073_v21, 7  ;;  %v6133_v14 = vmul.f32 %v12386_v33, %v6101_v1  ;;  %v13388_v33 = vld [vmem:[#allocation27_spill] sm:$0xff] }
 0x969   :  { %v8998_v61 = vpop.eup %8997  ;;  %v6042_v31 = vrot.slane %v8996_v57, 1  ;;  %v6070_v40 = vsub.f32 %v12195_v29, %v6038_v19  ;;  %v12464_v45 = vmul.f32 %v12388_v32, %v6103_v22  ;;  %v12466_v10 = vadd.f32 %v8980_v41, %v6131_v36  ;;  %v13391_v22 = vld [vmem:[#allocation17_spill] sm:$0xff] }
 0x96a   :  { %v9000_v13 = vpop.eup %8999  ;;  %v6044_v37 = vrot.slane %v8998_v61, 1  ;;  %v6072_v20 = vsub.f32 %v12200_v56, %v6040_v23  ;;  %v6100_v48 = vrot.slane %v6068_v9, 7  ;;  %v12470_v46 = vmul.f32 %v13387_v53, %v6105_v5 }
 0x96b   :  { %v9002_v38 = vpop.eup %9001  ;;  %v6046_v26 = vrot.slane %v9000_v13, 1  ;;  %v6074_v51 = vsub.f32 %v13388_v33, %v6042_v31  ;;  %v6102_v4 = vrot.slane %v6070_v40, 7  ;;  %v12473_v35 = vadd.f32 %v8982_v8, %v6133_v14  ;;  %v13392_v14 = vld [vmem:[#allocation65_spill] sm:$0xff] }
 0x96c   :  { %v9004_v29 = vpop.eup %9003  ;;  %v6048_v32 = vrot.slane %v9002_v38, 1  ;;  %v6076_v41 = vsub.f32 %v13389_v0, %v6044_v37  ;;  %v6104_v3 = vrot.slane %v6072_v20, 7  ;;  %v6132_v55 = vmul.f32 %v12409_v39, %v6100_v48 }
 0x96d   :  { %v9006_v27 = vpop.eup %9005  ;;  %v6050_v56 = vrot.slane %v9004_v29, 1  ;;  %v6078_v30 = vsub.f32 %v13390_v17, %v6046_v26  ;;  %v6106_v21 = vrot.slane %v6074_v51, 7  ;;  %v6134_v1 = vmul.f32 %v12411_v58, %v6102_v4 }
 0x96e   :  { %v12479_v19 = vpop.eup %9007  ;;  %v6080_v36 = vsub.f32 %v13391_v22, %v6048_v32  ;;  %v6108_v8 = vrot.slane %v6076_v41, 7  ;;  %v6136_v23 = vmul.f32 %v12416_v47, %v6104_v3  ;;  %v12483_v9 = vadd.f32 %v8990_v54, %v6132_v55 }
 0x96f   :  { %v12485_v5 = vpop.eup %9009  ;;  %v6082_v39 = vsub.f32 %v13392_v14, %v6050_v56  ;;  %v6110_v31 = vrot.slane %v6078_v30, 7  ;;  %v6138_v40 = vmul.f32 %v12419_v50, %v6106_v21  ;;  %v12489_v37 = vadd.f32 %v8992_v24, %v6134_v1 }
 0x970   :  { %v12491_v20 = vpop.eup %9011  ;;  %v6112_v58 = vrot.slane %v6080_v36, 7  ;;  %v6140_v48 = vmul.f32 %v12424_v44, %v6108_v8  ;;  %v12494_v53 = vadd.f32 %v8994_v59, %v6136_v23  ;;  %v6164_v47 = vpack.c.bf16 %v12483_v9, %v12483_v9 }
 0x971   :  { %v12498_v54 = vpop.eup %9013  ;;  %v6114_v26 = vrot.slane %v6082_v39, 7  ;;  %v6142_v33 = vmul.f32 %v12429_v60, %v6110_v31  ;;  %v12501_v51 = vadd.f32 %v8996_v57, %v6138_v40  ;;  %v6166_v50 = vpack.c.bf16 %v12489_v37, %v12489_v37 }
 0x972   :  { %v12505_v24 = vpop.eup %9015  ;;  %v6144_v4 = vmul.f32 %v12434_v15, %v6112_v58  ;;  %v12508_v44 = vadd.f32 %v8998_v61, %v6140_v48  ;;  %v6168_v59 = vpack.c.bf16 %v12494_v53, %v12494_v53  ;;  %v6196_v32 = vunpack.c.l.b16 %v6164_v47 }
 0x973   :  { %v12512_v0 = vpop.eup %9017  ;;  %v6146_v41 = vmul.f32 %v12453_v12, %v6114_v26  ;;  %v12515_v60 = vadd.f32 %v9000_v13, %v6142_v33  ;;  %v6170_v57 = vpack.c.bf16 %v12501_v51, %v12501_v51  ;;  %v6198_v3 = vunpack.c.l.b16 %v6166_v50 }
 0x974   :  { %13393 = vst [vmem:[#allocation69_spill] sm:$0xff] %v12508_v44  ;;  %v12519_v55 = vpop.eup %9019  ;;  %v12521_v56 = vadd.f32 %v9002_v38, %v6144_v4  ;;  %v6172_v15 = vpack.c.bf16 %v12508_v44, %v12508_v44  ;;  %v6200_v61 = vunpack.c.l.b16 %v6168_v59  ;;  %v6225_v17 = vrot.slane %v6196_v32, 6 }
 0x975   :  { %13394 = vst [vmem:[#allocation70_spill] sm:$0xff] %v12515_v60  ;;  %v12525_v30 = vadd.f32 %v9004_v29, %v6146_v41  ;;  %v6174_v12 = vpack.c.bf16 %v12515_v60, %v12515_v60  ;;  %v6202_v13 = vunpack.c.l.b16 %v6170_v57  ;;  %v6226_v21 = vrot.slane %v6198_v3, 5  ;;  %v13397_v41 = vld [vmem:[#allocation19_spill] sm:$0xff]  ;;  %v13445_v60 = vld [vmem:[#allocation64_spill] sm:$0xff] }
 0x976   :  { %13395 = vst [vmem:[#allocation20_spill] sm:$0xff] %v12521_v56  ;;  %v6176_v1 = vpack.c.bf16 %v12521_v56, %v12521_v56  ;;  %v6204_v22 = vunpack.c.l.b16 %v6172_v15  ;;  %v6228_v36 = vrot.slane %v6200_v61, 4  ;;  %v5905_v8 = vadd.f32 1.0, %v9006_v27  ;;  %v13398_v61 = vld [vmem:[#allocation22_spill] sm:$0xff] }
 0x977   :  { %13396 = vst [vmem:[#allocation59_spill] sm:$0xff] %v12525_v30  ;;  %v6178_v38 = vpack.c.bf16 %v12525_v30, %v12525_v30  ;;  %v6206_v23 = vunpack.c.l.b16 %v6174_v12  ;;  %v6227_v14 = vsel %vm1771_vm0, %v6226_v21, %v6225_v17  ;;  %v6230_v39 = vrot.slane %v6202_v13, 3  ;;  %v13399_v12 = vld [vmem:[#allocation66_spill] sm:$0xff]  ;;  %v13442_v30 = vld [vmem:[#allocation60_spill] sm:$0xff] }
 0x978   :  { %v6208_v29 = vunpack.c.l.b16 %v6176_v1  ;;  %v6229_v31 = vsel %vm1774_vm1, %v6228_v36, %v6227_v14  ;;  %v6232_v40 = vrot.slane %v6204_v22, 2  ;;  %9021 = vrcp.f32 %v5905_v8 }
 0x979   :  { %v6210_v58 = vunpack.c.l.b16 %v6178_v38  ;;  %v6231_v48 = vsel %vm1777_vm2, %v6230_v39, %v6229_v31  ;;  %v6234_v47 = vrot.slane %v6206_v23, 1  ;;  %v6043_v26 = vrot.slane %v12498_v54, 1  ;;  %v13400_v38 = vld [vmem:[#allocation67_spill] sm:$0xff] }
 0x97a   :  { %v6233_v27 = vsel %vm1780_vm3, %v6232_v40, %v6231_v48  ;;  %v6045_v33 = vrot.slane %v12505_v24, 1  ;;  %v6047_v50 = vrot.slane %v12512_v0, 1  ;;  %v6049_v4 = vrot.slane %v12519_v55, 1 }
 0x97b   :  { %v6235_v59 = vsel %vm1783_vm4, %v6234_v47, %v6233_v27  ;;  %v6237_v32 = vrot.slane %v6210_v58, 7  ;;  %v6075_v57 = vsub.f32 %v13397_v41, %v6043_v26  ;;  %v12545_v3 = vadd.f32 %v12445_v25, %v12464_v45 }
 0x97c   :  { %v6236_v15 = vsel %vm1786_vm5, %v6208_v29, %v6235_v59  ;;  %v6077_v17 = vsub.f32 %v13398_v61, %v6045_v33  ;;  %v6079_v13 = vsub.f32 %v13399_v12, %v6047_v50  ;;  %v12553_v22 = vadd.f32 %v12448_v34, %v12470_v46 }
 0x97d   :  { %v6238_v21 = vsel %vm1789_vm6, %v6237_v32, %v6236_v15  ;;  %v6107_v1 = vrot.slane %v6075_v57, 7  ;;  %v6163_v36 = vpack.c.bf16 %v12466_v10, %v12466_v10  ;;  %v6081_v25 = vsub.f32 %v13400_v38, %v6049_v4 }
 0x97e   :  { %v6240_v8 = vpack.c.b16 %v6238_v21, %v6238_v21  ;;  %v6109_v45 = vrot.slane %v6077_v17, 7  ;;  %v6111_v23 = vrot.slane %v6079_v13, 7  ;;  %v6165_v39 = vpack.c.bf16 %v12473_v35, %v12473_v35 }
 0x97f   :  { %v6139_v14 = vmul.f32 %v12479_v19, %v6107_v1  ;;  %v6167_v29 = vpack.c.bf16 %v12545_v3, %v12545_v3  ;;  %v6169_v34 = vpack.c.bf16 %v12553_v22, %v12553_v22  ;;  %v6195_v40 = vunpack.c.l.b16 %v6163_v36 }
 0x980   :  { %6275 = vmatprep.mubr.bf16.mxu0 %v6240_v8  ;;  %6316 = vmatprep.mubr.bf16.mxu1 %v6240_v8  ;;  %v6141_v46 = vmul.f32 %v12485_v5, %v6109_v45  ;;  %v6143_v31 = vmul.f32 %v12491_v20, %v6111_v23  ;;  %v6197_v19 = vunpack.c.l.b16 %v6165_v39  ;;  %v6113_v26 = vrot.slane %v6081_v25, 7 }
 0x981   :  { %v12568_v58 = vadd.f32 %v12498_v54, %v6139_v14  ;;  %v6199_v48 = vunpack.c.l.b16 %v6167_v29  ;;  %v6201_v47 = vunpack.c.l.b16 %v6169_v34  ;;  %v6211_v33 = vrot.slane %v6195_v40, 6  ;;  %v9759_v34 = vld [vmem:[#allocation8 + $0x134] ss:$24 sps:$4 sm:$0xff]   ;;  %v9762_v40 = vld [vmem:[#allocation8 + $0x100] ss:$24 sps:$4 sm:$0xff]  }
 0x982   :  { %v12571_v27 = vadd.f32 %v12505_v24, %v6141_v46  ;;  %v12574_v50 = vadd.f32 %v12512_v0, %v6143_v31  ;;  %v6212_v4 = vrot.slane %v6197_v19, 5  ;;  %v9760_v46 = vld [vmem:[#allocation8 + $0x130] ss:$24 sps:$4 sm:$0xff]   ;;  %v9761_v31 = vld [vmem:[#allocation8 + $0x104] ss:$24 sps:$4 sm:$0xff]  }
 0x983   :  { %13401 = vst [vmem:[#allocation27_spill] sm:$0xff] %v12568_v58  ;;  %v6171_v5 = vpack.c.bf16 %v12568_v58, %v12568_v58  ;;  %v6214_v20 = vrot.slane %v6199_v48, 4  ;;  %v6216_v57 = vrot.slane %v6201_v47, 3  ;;  %v9763_v19 = vld [vmem:[#allocation8 + $0xd4] ss:$24 sps:$4 sm:$0xff]  }
 0x984   :  { %13402 = vst [vmem:[#allocation68_spill] sm:$0xff] %v12571_v27  ;;  %13403 = vst [vmem:[#allocation63_spill] sm:$0xff] %v12574_v50  ;;  %v6173_v54 = vpack.c.bf16 %v12571_v27, %v12571_v27  ;;  %v6213_v41 = vsel %vm1771_vm0, %v6212_v4, %v6211_v33  ;;  %v6175_v0 = vpack.c.bf16 %v12574_v50, %v12574_v50  ;;  %v9764_v48 = vld [vmem:[#allocation8 + $0xd0] ss:$24 sps:$4 sm:$0xff]   ;;  %v9765_v47 = vld [vmem:[#allocation8 + $0xa4] ss:$24 sps:$4 sm:$0xff]  }
 0x985   :  { %v9022_v59 = vpop.eup %9021  ;;  %v6203_v32 = vunpack.c.l.b16 %v6171_v5  ;;  %v6215_v61 = vsel %vm1774_vm1, %v6214_v20, %v6213_v41  ;;  %v9767_v33 = vld [vmem:[#allocation8 + $0x74] ss:$24 sps:$4 sm:$0xff]   ;;  %v9768_v5 = vld [vmem:[#allocation8 + $0x70] ss:$24 sps:$4 sm:$0xff]   ;;  %v9770_v4 = vld [vmem:[#allocation8 + $0x40] ss:$24 sps:$4 sm:$0xff]  }
 0x986   :  { %v6145_v15 = vmul.f32 %v9022_v59, %v6113_v26  ;;  %v6205_v24 = vunpack.c.l.b16 %v6173_v54  ;;  %v6217_v17 = vsel %vm1777_vm2, %v6216_v57, %v6215_v61  ;;  %v6207_v25 = vunpack.c.l.b16 %v6175_v0  ;;  %v9766_v26 = vld [vmem:[#allocation8 + $0xa0] ss:$24 sps:$4 sm:$0xff]   ;;  %v9771_v20 = vld [vmem:[#allocation8 + $0x14] ss:$24 sps:$4 sm:$0xff]   ;;  %v9772_v54 = vld [vmem:[#allocation8 + $0x10] ss:$24 sps:$4 sm:$0xff]  }
 0x987   :  { %v6218_v12 = vrot.slane %v6203_v32, 2  ;;  %v9773_v59 = vld [vmem:[#allocation8 + $0x2e4] ss:$24 sps:$4 sm:$0xff]   ;;  %v9774_v32 = vld [vmem:[#allocation8 + $0x2e0] ss:$24 sps:$4 sm:$0xff]  }
 0x988   :  { %v12586_v13 = vadd.f32 %v12519_v55, %v6145_v15  ;;  %v6220_v21 = vrot.slane %v6205_v24, 1  ;;  %v9758_v55 = vld [vmem:[#allocation8 + $0x160] ss:$24 sps:$4 sm:$0xff]   ;;  %v9775_v41 = vld [vmem:[#allocation8 + $0x2b4] ss:$24 sps:$4 sm:$0xff]  }
 0x989   :  { %v6219_v1 = vsel %vm1780_vm3, %v6218_v12, %v6217_v17  ;;  %v9776_v57 = vld [vmem:[#allocation8 + $0x2b0] ss:$24 sps:$4 sm:$0xff]   ;;  %v9777_v15 = vld [vmem:[#allocation8 + $0x284] ss:$24 sps:$4 sm:$0xff]   ;;  %v9778_v24 = vld [vmem:[#allocation8 + $0x280] ss:$24 sps:$4 sm:$0xff]  }
 0x98a   :  { %13404 = vst [vmem:[#allocation17_spill] sm:$0xff] %v12586_v13  ;;  %v6177_v36 = vpack.c.bf16 %v12586_v13, %v12586_v13  ;;  %v6221_v38 = vsel %vm1783_vm4, %v6220_v21, %v6219_v1  ;;  %v9779_v61 = vld [vmem:[#allocation8 + $0x254] ss:$24 sps:$4 sm:$0xff]   ;;  %v9780_v0 = vld [vmem:[#allocation8 + $0x250] ss:$24 sps:$4 sm:$0xff]  }
 0x98b   :  { %v6222_v23 = vsel %vm1786_vm5, %v6207_v25, %v6221_v38  ;;  %v9781_v17 = vld [vmem:[#allocation8 + $0x224] ss:$24 sps:$4 sm:$0xff]   ;;  %v9782_v12 = vld [vmem:[#allocation8 + $0x220] ss:$24 sps:$4 sm:$0xff]   ;;  %v9783_v21 = vld [vmem:[#allocation8 + $0x1f4] ss:$24 sps:$4 sm:$0xff]  }
 0x98c   :  { %v6209_v45 = vunpack.c.l.b16 %v6177_v36  ;;  %v9784_v1 = vld [vmem:[#allocation8 + $0x1f0] ss:$24 sps:$4 sm:$0xff]   ;;  %v9785_v36 = vld [vmem:[#allocation8 + $0x1c4] ss:$24 sps:$4 sm:$0xff]   ;;  %v9786_v38 = vld [vmem:[#allocation8 + $0x1c0] ss:$24 sps:$4 sm:$0xff]  }
 0x98d   :  { %v9787_v25 = vld [vmem:[#allocation8 + $0x194] ss:$24 sps:$4 sm:$0xff]  }
 0x98e   :  { %v6223_v14 = vrot.slane %v6209_v45, 7  ;;  %v9788_v45 = vld [vmem:[#allocation8 + $0x190] ss:$24 sps:$4 sm:$0xff]  }
 0x990   :  { %v6224_v39 = vsel %vm1789_vm6, %v6223_v14, %v6222_v23  ;;  %v7887_v23 = vld [vmem:[#allocation11 + $0x78] sm:$0xff]  }
 0x991   :  { %v12594_v29 = vpack.c.b16 %v6224_v39, %v6224_v39  ;;  %v7888_v14 = vld [vmem:[#allocation11 + $0x38] sm:$0xff]   ;;  %v7889_v39 = vld [vmem:[#allocation11 + $0x70] sm:$0xff]   ;;  %7635 = vmatprep.subr.bf16.mxu1 %v7887_v23 }
 0x992   :  { %v13408_v23 = vld [vmem:[#allocation23_spill] sm:$0xff] }
 0x993   :  { %6276 = vmatmul.mubr.bf16.vlgmr.msra.gmra.mxu0 %v12594_v29  ;;  %6317 = vmatmul.mubr.bf16.vlgmr.msra.gmra.mxu1 %v12594_v29 }
 0x994   :  { %6326 = vmatpush1.bf16.msra.mxu0 %v9758_v55  ;;  %6357 = vmatprep.mubr.bf16.mxu0 %v6240_v8  ;;  %v9769_v8 = vld [vmem:[#allocation8 + $0x44] ss:$24 sps:$4 sm:$0xff]  }
 0x995   :  { %6327 = vmatprep.subr.bf16.mxu0 %v9759_v34  ;;  %7636 = vmatpush3.bf16.msra.mxu1 %v7888_v14  ;;  %v7890_v55 = vld [vmem:[#allocation11 + $0x30] sm:$0xff]   ;;  %v7891_v34 = vld [vmem:[#allocation11 + $0x68] sm:$0xff]  }
 0x996   :  { %7637 = vmatprep.subr.bf16.mxu1 %v7889_v39  ;;  %v13409_v39 = vld [vmem:[#allocation24_spill] sm:$0xff] }
 0x998   :  { %6328 = vmatpush1.bf16.msra.mxu0 %v9760_v46  ;;  %v7892_v46 = vld [vmem:[#allocation11 + $0x28] sm:$0xff]  }
 0x999   :  { %6329 = vmatprep.subr.bf16.mxu0 %v9761_v31  ;;  %7638 = vmatpush3.bf16.msra.mxu1 %v7890_v55  ;;  %v7893_v31 = vld [vmem:[#allocation11 + $0x60] sm:$0xff]  }
 0x99a   :  { %7639 = vmatprep.subr.bf16.mxu1 %v7891_v34  ;;  %v13410_v34 = vld [vmem:[#allocation25_spill] sm:$0xff] }
 0x99c   :  { %6330 = vmatpush1.bf16.msra.mxu0 %v9762_v40  ;;  %v7894_v40 = vld [vmem:[#allocation11 + $0x20] sm:$0xff]  }
 0x99d   :  { %6331 = vmatprep.subr.bf16.mxu0 %v9763_v19  ;;  %7640 = vmatpush3.bf16.msra.mxu1 %v7892_v46  ;;  %v7895_v19 = vld [vmem:[#allocation11 + $0x58] sm:$0xff]  }
 0x99e   :  { %7641 = vmatprep.subr.bf16.mxu1 %v7893_v31  ;;  %v13411_v31 = vld [vmem:[#allocation26_spill] sm:$0xff] }
 0x9a0   :  { %6332 = vmatpush1.bf16.msra.mxu0 %v9764_v48  ;;  %v7896_v48 = vld [vmem:[#allocation11 + $0x18] sm:$0xff]  }
 0x9a1   :  { %6333 = vmatprep.subr.bf16.mxu0 %v9765_v47  ;;  %7642 = vmatpush3.bf16.msra.mxu1 %v7894_v40  ;;  %v7898_v47 = vld [vmem:[#allocation11 + $0x10] sm:$0xff]  }
 0x9a2   :  { %7643 = vmatprep.subr.bf16.mxu1 %v7895_v19  ;;  %v13412_v19 = vld [vmem:[#allocation28_spill] sm:$0xff] }
 0x9a4   :  { %6334 = vmatpush1.bf16.msra.mxu0 %v9766_v26  ;;  %v7899_v26 = vld [vmem:[#allocation11 + $0x48] sm:$0xff]  }
 0x9a5   :  { %6335 = vmatprep.subr.bf16.mxu0 %v9767_v33  ;;  %7644 = vmatpush3.bf16.msra.mxu1 %v7896_v48  ;;  %v7900_v33 = vld [vmem:[#allocation11 + $0x8] sm:$0xff]  }
 0x9a8   :  { %6336 = vmatpush1.bf16.msra.mxu0 %v9768_v5  ;;  %v7901_v5 = vld [vmem:[#allocation11 + $0x40] sm:$0xff]  }
 0x9a9   :  { %6337 = vmatprep.subr.bf16.mxu0 %v9769_v8  ;;  %v7902_v8 = vld [vmem:[#allocation11] sm:$0xff]  }
 0x9ac   :  { %6338 = vmatpush1.bf16.msra.mxu0 %v9770_v4 }
 0x9ad   :  { %6339 = vmatprep.subr.bf16.mxu0 %v9771_v20 }
 0x9b0   :  { %6340 = vmatpush1.bf16.msra.mxu0 %v9772_v54  ;;  %v13405_v54 = vld [vmem:[#allocation18_spill] sm:$0xff] }
 0x9b1   :  { %6341 = vmatprep.subr.bf16.mxu0 %v9773_v59 }
 0x9b4   :  { %6342 = vmatpush2.bf16.msra.mxu0 %v9774_v32  ;;  %v13406_v32 = vld [vmem:[#allocation40_spill] sm:$0xff] }
 0x9b5   :  { %6343 = vmatprep.subr.bf16.mxu0 %v9775_v41 }
 0x9b8   :  { %6344 = vmatpush2.bf16.msra.mxu0 %v9776_v57 }
 0x9b9   :  { %6345 = vmatprep.subr.bf16.mxu0 %v9777_v15 }
 0x9bc   :  { %6346 = vmatpush2.bf16.msra.mxu0 %v9778_v24 }
 0x9bd   :  { %6347 = vmatprep.subr.bf16.mxu0 %v9779_v61 }
 0x9c0   :  { %6348 = vmatpush2.bf16.msra.mxu0 %v9780_v0 }
 0x9c1   :  { %6349 = vmatprep.subr.bf16.mxu0 %v9781_v17 }
 0x9c4   :  { %6350 = vmatpush2.bf16.msra.mxu0 %v9782_v12 }
 0x9c5   :  { %6351 = vmatprep.subr.bf16.mxu0 %v9783_v21 }
 0x9c8   :  { %6352 = vmatpush2.bf16.msra.mxu0 %v9784_v1 }
 0x9c9   :  { %6353 = vmatprep.subr.bf16.mxu0 %v9785_v36  ;;  %v13407_v36 = vld [vmem:[#allocation31_spill] sm:$0xff] }
 0x9cc   :  { %6354 = vmatpush2.bf16.msra.mxu0 %v9786_v38 }
 0x9cd   :  { %6355 = vmatprep.subr.bf16.mxu0 %v9787_v25 }
 0x9d0   :  { %6356 = vmatpush2.bf16.msra.mxu0 %v9788_v45 }
 0x9d3   :  { %6358 = vmatmul.mubr.bf16.vlgmr.msra.gmra.mxu0 %v12594_v29  ;;  %v7897_v29 = vld [vmem:[#allocation11 + $0x50] sm:$0xff]  }
 0x9d4   :  { %7645 = vmatprep.subr.bf16.mxu1 %v7897_v29  ;;  %v13413_v29 = vld [vmem:[#allocation29_spill] sm:$0xff] }
 0x9d5   :  { %7646 = vmatpush3.bf16.msra.mxu1 %v7898_v47 }
 0x9d6   :  { %7647 = vmatprep.subr.bf16.mxu1 %v7899_v26 }
 0x9d9   :  { %7648 = vmatpush3.bf16.msra.mxu1 %v7900_v33 }
 0x9da   :  { %7649 = vmatprep.subr.bf16.mxu1 %v7901_v5 }
 0x9dd   :  { %7650 = vmatpush3.bf16.msra.mxu1 %v7902_v8  ;;  %v13414_v8 = vld [vmem:[#allocation30_spill] sm:$0xff] }
 0xa53   :  { %v6277_v4 = vpop.f32.mrf.mxu0  ;;  %v6318_v20 = vpop.f32.mrf.mxu1 }
 0xa54   :  { %v6278_v59 = vadd.f32 %v6277_v4, %v13405_v54  ;;  %v6319_v41 = vadd.f32 %v6318_v20, %v13406_v32 }
 0xa55   :  { %v6279_v57 = vpop.f32.mrf.mxu0  ;;  %v12601_v15 = vpop.f32.mrf.mxu1 }
 0xa56   :  { %v6368_v24 = vrot.slane %v6278_v59, 1  ;;  %v6370_v61 = vrot.slane %v6278_v59, 2  ;;  %v6372_v0 = vrot.slane %v6278_v59, 3  ;;  %v6374_v17 = vrot.slane %v6278_v59, 4 }
 0xa57   :  { %v6376_v12 = vrot.slane %v6278_v59, 5  ;;  %v6378_v21 = vrot.slane %v6278_v59, 6  ;;  %v6380_v1 = vrot.slane %v6278_v59, 7  ;;  %v6412_v38 = vadd.f32 %v6278_v59, %v13407_v36  ;;  %v6281_v25 = vpop.f32.mrf.mxu0  ;;  %v6322_v45 = vpop.f32.mrf.mxu1 }
 0xa58   :  { %v6398_v14 = vadd.f32 %v6368_v24, %v13408_v23  ;;  %v6400_v55 = vadd.f32 %v6370_v61, %v13409_v39  ;;  %v6402_v46 = vadd.f32 %v6372_v0, %v13410_v34  ;;  %v6404_v40 = vadd.f32 %v6374_v17, %v13411_v31  ;;  %v13415_v45 = vld [vmem:[#allocation41_spill] sm:$0xff] }
 0xa59   :  { %v6406_v48 = vadd.f32 %v6376_v12, %v13412_v19  ;;  %v6408_v47 = vadd.f32 %v6378_v21, %v13413_v29  ;;  %v7600_v26 = vmul.f32 -1.442695, %v6412_v38  ;;  %v6282_v33 = vpop.f32.mrf.mxu0  ;;  %v6323_v5 = vpop.f32.mrf.mxu1  ;;  %v6410_v4 = vadd.f32 %v6380_v1, %v13414_v8  ;;  %v13420_v29 = vld [vmem:[#allocation54_spill] sm:$0xff] }
 0xa5a   :  { %v7586_v20 = vmul.f32 -1.442695, %v6398_v14  ;;  %v7588_v54 = vmul.f32 -1.442695, %v6400_v55  ;;  %v7590_v59 = vmul.f32 -1.442695, %v6402_v46 }
 0xa5b   :  { %v7592_v32 = vmul.f32 -1.442695, %v6404_v40  ;;  %v7594_v24 = vmul.f32 -1.442695, %v6406_v48  ;;  %9023 = vpow2.f32 %v7600_v26  ;;  %v7596_v61 = vmul.f32 -1.442695, %v6408_v47 }
 0xa5c   :  { %9025 = vpow2.f32 %v7586_v20  ;;  %v6512_v0 = vrot.slane %v6319_v41, 1  ;;  %v6514_v36 = vrot.slane %v6319_v41, 2  ;;  %v6516_v17 = vrot.slane %v6319_v41, 3  ;;  %v13416_v14 = vld [vmem:[#allocation45_spill] sm:$0xff]  ;;  %v13417_v55 = vld [vmem:[#allocation47_spill] sm:$0xff]  ;;  %v13419_v40 = vld [vmem:[#allocation52_spill] sm:$0xff] }
 0xa5d   :  { %9027 = vpow2.f32 %v7588_v54  ;;  %v6518_v12 = vrot.slane %v6319_v41, 4  ;;  %v6520_v25 = vrot.slane %v6319_v41, 5  ;;  %v7598_v21 = vmul.f32 -1.442695, %v6410_v4  ;;  %v13418_v46 = vld [vmem:[#allocation49_spill] sm:$0xff]  ;;  %v13421_v33 = vld [vmem:[#allocation56_spill] sm:$0xff] }
 0xa5e   :  { %9029 = vpow2.f32 %v7590_v59  ;;  %v6522_v38 = vrot.slane %v6319_v41, 6  ;;  %v6542_v23 = vadd.f32 %v6512_v0, %v13415_v45  ;;  %v6524_v1 = vrot.slane %v6319_v41, 7 }
 0xa5f   :  { %9031 = vpow2.f32 %v7592_v32  ;;  %v6544_v39 = vadd.f32 %v6514_v36, %v13416_v14  ;;  %v6546_v34 = vadd.f32 %v6516_v17, %v13417_v55  ;;  %v6548_v31 = vadd.f32 %v6518_v12, %v13418_v46  ;;  %v13422_v32 = vld [vmem:[#allocation21_spill] sm:$0xff] }
 0xa60   :  { %9033 = vpow2.f32 %v7594_v24  ;;  %v6550_v19 = vadd.f32 %v6520_v25, %v13419_v40  ;;  %v7602_v48 = vmul.f32 -1.442695, %v6542_v23  ;;  %v6552_v47 = vadd.f32 %v6522_v38, %v13420_v29 }
 0xa61   :  { %9035 = vpow2.f32 %v7596_v61  ;;  %v7604_v26 = vmul.f32 -1.442695, %v6544_v39  ;;  %v6554_v5 = vadd.f32 %v6524_v1, %v13421_v33  ;;  %v7606_v8 = vmul.f32 -1.442695, %v6546_v34  ;;  %v13423_v34 = vld [vmem:[#allocation43_spill] sm:$0xff] }
 0xa62   :  { %9037 = vpow2.f32 %v7598_v21  ;;  %v6556_v4 = vadd.f32 %v6319_v41, %v13270_v63  ;;  %v7608_v20 = vmul.f32 -1.442695, %v6548_v31  ;;  %v7610_v54 = vmul.f32 -1.442695, %v6550_v19 }
 0xa63   :  { %9039 = vpow2.f32 %v7602_v48  ;;  %v7612_v59 = vmul.f32 -1.442695, %v6552_v47  ;;  %v6280_v24 = vadd.f32 %v6279_v57, %v13422_v32  ;;  %v7614_v61 = vmul.f32 -1.442695, %v6554_v5  ;;  %v13424_v48 = vld [vmem:[#allocation32_spill] sm:$0xff]  ;;  %v13425_v5 = vld [vmem:[#allocation33_spill] sm:$0xff] }
 0xa64   :  { %9041 = vpow2.f32 %v7604_v26  ;;  %v7616_v36 = vmul.f32 -1.442695, %v6556_v4  ;;  %v12622_v46 = vadd.f32 %v12601_v15, %v13423_v34  ;;  %v13431_v34 = vld [vmem:[#allocation39_spill] sm:$0xff] }
 0xa65   :  { %9043 = vpow2.f32 %v7606_v8  ;;  %v6369_v38 = vrot.slane %v6280_v24, 1  ;;  %v6371_v41 = vrot.slane %v6280_v24, 2  ;;  %v6373_v57 = vrot.slane %v6280_v24, 3 }
 0xa66   :  { %9045 = vpow2.f32 %v7608_v20  ;;  %v6375_v55 = vrot.slane %v6280_v24, 4  ;;  %v6377_v19 = vrot.slane %v6280_v24, 5  ;;  %v6379_v33 = vrot.slane %v6280_v24, 6 }
 0xa67   :  { %9047 = vpow2.f32 %v7610_v54  ;;  %v6399_v29 = vadd.f32 %v6369_v38, %v13424_v48  ;;  %v6401_v8 = vadd.f32 %v6371_v41, %v13425_v5  ;;  %v6381_v54 = vrot.slane %v6280_v24, 7  ;;  %v13429_v38 = vld [vmem:[#allocation37_spill] sm:$0xff] }
 0xa68   :  { %v9024_v0 = vpop.eup %9023  ;;  %9049 = vpow2.f32 %v7612_v59  ;;  %v13426_v59 = vld [vmem:[#allocation34_spill] sm:$0xff]  ;;  %v6515_v41 = vrot.slane %v12622_v46, 2 }
 0xa69   :  { %v9026_v17 = vpop.eup %9025  ;;  %v6476_v12 = vadd.f32 1.0, %v9024_v0  ;;  %9051 = vpow2.f32 %v7614_v61  ;;  %v6403_v32 = vadd.f32 %v6373_v57, %v13426_v59  ;;  %v13427_v61 = vld [vmem:[#allocation35_spill] sm:$0xff] }
 0xa6a   :  { %v9028_v25 = vpop.eup %9027  ;;  %v6462_v21 = vadd.f32 1.0, %v9026_v17  ;;  %9053 = vpow2.f32 %v7616_v36  ;;  %v6405_v0 = vadd.f32 %v6375_v55, %v13427_v61  ;;  %v13428_v36 = vld [vmem:[#allocation36_spill] sm:$0xff] }
 0xa6b   :  { %v9030_v45 = vpop.eup %9029  ;;  %v6464_v63 = vadd.f32 1.0, %v9028_v25  ;;  %9055 = vrcp.f32 %v6476_v12  ;;  %v6407_v17 = vadd.f32 %v6377_v19, %v13428_v36  ;;  %v7587_v12 = vmul.f32 -1.442695, %v6399_v29 }
 0xa6c   :  { %v9032_v23 = vpop.eup %9031  ;;  %v6466_v1 = vadd.f32 1.0, %v9030_v45  ;;  %9057 = vrcp.f32 %v6462_v21  ;;  %v6513_v25 = vrot.slane %v12622_v46, 1  ;;  %v6409_v45 = vadd.f32 %v6379_v33, %v13429_v38  ;;  %v13436_v38 = vld [vmem:[#allocation53_spill] sm:$0xff] }
 0xa6d   :  { %v9034_v14 = vpop.eup %9033  ;;  %v6468_v39 = vadd.f32 1.0, %v9032_v23  ;;  %9059 = vrcp.f32 %v6464_v63  ;;  %v7589_v63 = vmul.f32 -1.442695, %v6401_v8  ;;  %v6519_v19 = vrot.slane %v12622_v46, 4 }
 0xa6e   :  { %v9036_v31 = vpop.eup %9035  ;;  %v6470_v40 = vadd.f32 1.0, %v9034_v14  ;;  %9061 = vrcp.f32 %v6466_v1  ;;  %v13430_v1 = vld [vmem:[#allocation38_spill] sm:$0xff]  ;;  %v7591_v14 = vmul.f32 -1.442695, %v6403_v32  ;;  %v7595_v29 = vmul.f32 -1.442695, %v6407_v17 }
 0xa6f   :  { %v9038_v47 = vpop.eup %9037  ;;  %v6472_v26 = vadd.f32 1.0, %v9036_v31  ;;  %9063 = vrcp.f32 %v6468_v39  ;;  %v6411_v57 = vadd.f32 %v6381_v54, %v13430_v1  ;;  %v6517_v39 = vrot.slane %v12622_v46, 3  ;;  %v13435_v17 = vld [vmem:[#allocation51_spill] sm:$0xff] }
 0xa70   :  { %v9040_v4 = vpop.eup %9039  ;;  %v6474_v20 = vadd.f32 1.0, %v9038_v47  ;;  %9065 = vrcp.f32 %v6470_v40  ;;  %v6413_v31 = vadd.f32 %v6280_v24, %v13431_v34  ;;  %v7593_v40 = vmul.f32 -1.442695, %v6405_v0  ;;  %v13437_v1 = vld [vmem:[#allocation55_spill] sm:$0xff] }
 0xa71   :  { %v6606_v15 = vadd.f32 1.0, %v9040_v4  ;;  %v9042_v21 = vpop.eup %9041  ;;  %9067 = vrcp.f32 %v6472_v26  ;;  %v6521_v47 = vrot.slane %v12622_v46, 5  ;;  %v13432_v26 = vld [vmem:[#allocation42_spill] sm:$0xff]  ;;  %v7597_v8 = vmul.f32 -1.442695, %v6409_v45 }
 0xa72   :  { %v9044_v23 = vpop.eup %9043  ;;  %9069 = vrcp.f32 %v6474_v20  ;;  %v6543_v33 = vadd.f32 %v6513_v25, %v13432_v26  ;;  %v6523_v4 = vrot.slane %v12622_v46, 6  ;;  %v13433_v20 = vld [vmem:[#allocation46_spill] sm:$0xff]  ;;  %v7599_v59 = vmul.f32 -1.442695, %v6411_v57 }
 0xa73   :  { %v12634_v55 = vpop.eup %9045  ;;  %9071 = vrcp.f32 %v6606_v15  ;;  %v6545_v54 = vadd.f32 %v6515_v41, %v13433_v20  ;;  %v6525_v32 = vrot.slane %v12622_v46, 7  ;;  %v13434_v15 = vld [vmem:[#allocation48_spill] sm:$0xff]  ;;  %v7601_v36 = vmul.f32 -1.442695, %v6413_v31 }
 0xa74   :  { %v12638_v48 = vpop.eup %9047  ;;  %9073 = vpow2.f32 %v7587_v12  ;;  %v6547_v61 = vadd.f32 %v6517_v39, %v13434_v15  ;;  %v6549_v12 = vadd.f32 %v6519_v19, %v13435_v17  ;;  %v6551_v45 = vadd.f32 %v6521_v47, %v13436_v38 }
 0xa75   :  { %v12642_v5 = vpop.eup %9049  ;;  %9075 = vpow2.f32 %v7589_v63  ;;  %v7603_v63 = vmul.f32 -1.442695, %v6543_v33  ;;  %v6553_v57 = vadd.f32 %v6523_v4, %v13437_v1  ;;  %v6610_v17 = vadd.f32 1.0, %v9044_v23 }
 0xa76   :  { %v12646_v24 = vpop.eup %9051  ;;  %9077 = vpow2.f32 %v7591_v14  ;;  %v7605_v14 = vmul.f32 -1.442695, %v6545_v54  ;;  %v7607_v39 = vmul.f32 -1.442695, %v6547_v61  ;;  %v7609_v19 = vmul.f32 -1.442695, %v6549_v12 }
 0xa77   :  { %v12650_v0 = vpop.eup %9053  ;;  %9079 = vpow2.f32 %v7593_v40  ;;  %v13438_v40 = vld [vmem:[#allocation57_spill] sm:$0xff]  ;;  %v7613_v4 = vmul.f32 -1.442695, %v6553_v57 }
 0xa78   :  { %v12653_v25 = vpop.eup %9055  ;;  %9081 = vpow2.f32 %v7595_v29  ;;  %v6555_v31 = vadd.f32 %v6525_v32, %v13438_v40  ;;  %v13439_v29 = vld [vmem:[#allocation58_spill] sm:$0xff] }
 0xa79   :  { %v12656_v41 = vpop.eup %9057  ;;  %9083 = vpow2.f32 %v7597_v8  ;;  %v6557_v47 = vadd.f32 %v12622_v46, %v13439_v29  ;;  %v7611_v8 = vmul.f32 -1.442695, %v6551_v45 }
 0xa7a   :  { %v12659_v34 = vpop.eup %9059  ;;  %9085 = vpow2.f32 %v7599_v59  ;;  %v7615_v59 = vmul.f32 -1.442695, %v6555_v31 }
 0xa7b   :  { %v12662_v26 = vpop.eup %9061  ;;  %9087 = vpow2.f32 %v7601_v36  ;;  %v7617_v15 = vmul.f32 -1.442695, %v6557_v47  ;;  %v6608_v36 = vadd.f32 1.0, %v9042_v21 }
 0xa7c   :  { %v12666_v33 = vpop.eup %9063  ;;  %9089 = vpow2.f32 %v7603_v63 }
 0xa7d   :  { %v12668_v20 = vpop.eup %9065  ;;  %9091 = vpow2.f32 %v7605_v14 }
 0xa7e   :  { %v12670_v54 = vpop.eup %9067  ;;  %9093 = vpow2.f32 %v7607_v39 }
 0xa7f   :  { %v12672_v32 = vpop.eup %9069  ;;  %9095 = vpow2.f32 %v7609_v19 }
 0xa80   :  { %v12674_v61 = vpop.eup %9071  ;;  %9097 = vpow2.f32 %v7611_v8 }
 0xa81   :  { %v9074_v46 = vpop.eup %9073  ;;  %9099 = vpow2.f32 %v7613_v4 }
 0xa82   :  { %v9076_v12 = vpop.eup %9075  ;;  %v6463_v38 = vadd.f32 1.0, %v9074_v46  ;;  %9101 = vpow2.f32 %v7615_v59 }
 0xa83   :  { %v9078_v45 = vpop.eup %9077  ;;  %v6465_v63 = vadd.f32 1.0, %v9076_v12  ;;  %9103 = vpow2.f32 %v7617_v15 }
 0xa84   :  { %v9080_v1 = vpop.eup %9079  ;;  %9105 = vrcp.f32 %v6608_v36  ;;  %v6467_v57 = vadd.f32 1.0, %v9078_v45 }
 0xa85   :  { %v9082_v14 = vpop.eup %9081  ;;  %9107 = vrcp.f32 %v6610_v17  ;;  %v6469_v39 = vadd.f32 1.0, %v9080_v1 }
 0xa86   :  { %v9084_v40 = vpop.eup %9083  ;;  %v6471_v31 = vadd.f32 1.0, %v9082_v14  ;;  %9109 = vrcp.f32 %v6463_v38 }
 0xa87   :  { %v9086_v21 = vpop.eup %9085  ;;  %v6473_v19 = vadd.f32 1.0, %v9084_v40  ;;  %9111 = vrcp.f32 %v6465_v63 }
 0xa88   :  { %v9088_v23 = vpop.eup %9087  ;;  %v6475_v29 = vadd.f32 1.0, %v9086_v21  ;;  %9113 = vrcp.f32 %v6467_v57 }
 0xa89   :  { %v9090_v47 = vpop.eup %9089  ;;  %v6477_v8 = vadd.f32 1.0, %v9088_v23  ;;  %9115 = vrcp.f32 %v6469_v39 }
 0xa8a   :  { %v9092_v4 = vpop.eup %9091  ;;  %9117 = vrcp.f32 %v6471_v31  ;;  %v6607_v59 = vadd.f32 1.0, %v9090_v47 }
 0xa8b   :  { %v9094_v15 = vpop.eup %9093  ;;  %9119 = vrcp.f32 %v6473_v19  ;;  %v6609_v36 = vadd.f32 1.0, %v9092_v4  ;;  %v13440_v19 = vld [vmem:[#allocation44_spill] sm:$0xff] }
 0xa8c   :  { %v9096_v46 = vpop.eup %9095  ;;  %9121 = vrcp.f32 %v6475_v29  ;;  %v6611_v17 = vadd.f32 1.0, %v9094_v15 }
 0xa8d   :  { %v9098_v12 = vpop.eup %9097  ;;  %9123 = vrcp.f32 %v6477_v8  ;;  %v6613_v38 = vadd.f32 1.0, %v9096_v46 }
 0xa8e   :  { %v9100_v45 = vpop.eup %9099  ;;  %9125 = vrcp.f32 %v6607_v59  ;;  %v6615_v63 = vadd.f32 1.0, %v9098_v12  ;;  %v13441_v12 = vld [vmem:[#allocation50_spill] sm:$0xff] }
 0xa8f   :  { %v9102_v1 = vpop.eup %9101  ;;  %9127 = vrcp.f32 %v6609_v36  ;;  %v6617_v57 = vadd.f32 1.0, %v9100_v45 }
 0xa90   :  { %v9104_v14 = vpop.eup %9103  ;;  %9129 = vrcp.f32 %v6611_v17  ;;  %v6619_v31 = vadd.f32 1.0, %v9102_v1 }
 0xa91   :  { %v12676_v39 = vpop.eup %9105  ;;  %9131 = vrcp.f32 %v6613_v38  ;;  %v6621_v8 = vadd.f32 1.0, %v9104_v14 }
 0xa92   :  { %v12678_v21 = vpop.eup %9107  ;;  %9133 = vrcp.f32 %v6615_v63 }
 0xa93   :  { %v6359_v40 = vpop.f32.mrf.mxu0  ;;  %v9110_v29 = vpop.eup %9109  ;;  %9135 = vrcp.f32 %v6617_v57 }
 0xa94   :  { %v12681_v23 = vadd.f32 %v6359_v40, %v13440_v19  ;;  %v9112_v4 = vpop.eup %9111  ;;  %9137 = vrcp.f32 %v6619_v31  ;;  %v13444_v31 = vld [vmem:[#allocation62_spill] sm:$0xff] }
 0xa95   :  { %v6361_v47 = vpop.f32.mrf.mxu0  ;;  %v9114_v17 = vpop.eup %9113  ;;  %9139 = vrcp.f32 %v6621_v8 }
 0xa96   :  { %v6656_v59 = vrot.slane %v12681_v23, 1  ;;  %v6658_v15 = vrot.slane %v12681_v23, 2  ;;  %v6660_v36 = vrot.slane %v12681_v23, 3  ;;  %v6662_v46 = vrot.slane %v12681_v23, 4  ;;  %v9116_v1 = vpop.eup %9115 }
 0xa97   :  { %v6362_v38 = vadd.f32 %v6361_v47, %v13441_v12  ;;  %v6363_v45 = vpop.f32.mrf.mxu0  ;;  %v9118_v19 = vpop.eup %9117  ;;  %v13443_v47 = vld [vmem:[#allocation61_spill] sm:$0xff] }
 0xa98   :  { %v6686_v63 = vmul.f32 %v12656_v41, %v6656_v59  ;;  %v6688_v14 = vmul.f32 %v12659_v34, %v6658_v15  ;;  %v6690_v57 = vmul.f32 %v12662_v26, %v6660_v36  ;;  %v6692_v40 = vmul.f32 %v12666_v33, %v6662_v46  ;;  %v9120_v58 = vpop.eup %9119 }
 0xa99   :  { %v6657_v13 = vrot.slane %v6362_v38, 1  ;;  %v6659_v50 = vrot.slane %v6362_v38, 2  ;;  %v6364_v27 = vpop.f32.mrf.mxu0  ;;  %v9122_v59 = vpop.eup %9121  ;;  %v6661_v34 = vrot.slane %v6362_v38, 3  ;;  %v6663_v15 = vrot.slane %v6362_v38, 4 }
 0xa9a   :  { %v6702_v56 = vadd.f32 %v6686_v63, %v13442_v30  ;;  %v6704_v12 = vadd.f32 %v6688_v14, %v13443_v47  ;;  %v6706_v45 = vadd.f32 %v6690_v57, %v13444_v31  ;;  %v6708_v41 = vadd.f32 %v6692_v40, %v13445_v60  ;;  %v9124_v33 = vpop.eup %9123 }
 0xa9b   :  { %v6665_v26 = vrot.slane %v6362_v38, 5  ;;  %v6667_v36 = vrot.slane %v6362_v38, 6  ;;  %v6687_v46 = vmul.f32 %v9110_v29, %v6657_v13  ;;  %v6689_v44 = vmul.f32 %v9112_v4, %v6659_v50  ;;  %v12696_v8 = vpop.eup %9125 }
 0xa9c   :  { %9141 = vtanh.f32 %v6702_v56  ;;  %v6669_v27 = vrot.slane %v6362_v38, 7  ;;  %v6691_v30 = vmul.f32 %v9114_v17, %v6661_v34  ;;  %v6693_v63 = vmul.f32 %v9116_v1, %v6663_v15  ;;  %v12698_v47 = vpop.eup %9127 }
 0xa9d   :  { %9143 = vtanh.f32 %v6704_v12  ;;  %v6695_v14 = vmul.f32 %v9118_v19, %v6665_v26  ;;  %v6703_v60 = vadd.f32 %v6687_v46, %v10614_v49  ;;  %v6705_v57 = vadd.f32 %v6689_v44, %v10623_v42  ;;  %v12702_v31 = vpop.eup %9129 }
 0xa9e   :  { %9145 = vtanh.f32 %v6706_v45  ;;  %v6697_v40 = vmul.f32 %v9120_v58, %v6667_v36  ;;  %v6699_v56 = vmul.f32 %v9122_v59, %v6669_v27  ;;  %v6701_v50 = vmul.f32 %v9124_v33, %v6362_v38  ;;  %v12705_v29 = vpop.eup %9131 }
 0xa9f   :  { %9147 = vtanh.f32 %v6708_v41  ;;  %v6707_v13 = vadd.f32 %v6691_v30, %v13117_v11  ;;  %v6709_v4 = vadd.f32 %v6693_v63, %v13118_v6  ;;  %v6711_v17 = vadd.f32 %v6695_v14, %v13119_v18  ;;  %v12709_v1 = vpop.eup %9133 }
 0xaa0   :  { %9149 = vtanh.f32 %v6703_v60  ;;  %v6664_v49 = vrot.slane %v12681_v23, 5  ;;  %v6713_v42 = vadd.f32 %v6697_v40, %v13120_v43  ;;  %v12713_v44 = vpop.eup %9135  ;;  %v6666_v58 = vrot.slane %v12681_v23, 6 }
 0xaa1   :  { %9151 = vtanh.f32 %v6705_v57  ;;  %v6715_v11 = vadd.f32 %v6699_v56, %v13121_v62  ;;  %v6668_v38 = vrot.slane %v12681_v23, 7  ;;  %v6717_v6 = vadd.f32 %v6701_v50, %v13122_v28  ;;  %v12719_v18 = vpop.eup %9137 }
 0xaa2   :  { %9153 = vtanh.f32 %v6707_v13  ;;  %v6612_v19 = vadd.f32 1.0, %v12634_v55  ;;  %v6694_v12 = vmul.f32 %v12668_v20, %v6664_v49  ;;  %v6614_v43 = vadd.f32 1.0, %v12638_v48  ;;  %v12724_v45 = vpop.eup %9139 }
 0xaa3   :  { %9155 = vtanh.f32 %v6709_v4  ;;  %v6696_v62 = vmul.f32 %v12670_v54, %v6666_v58  ;;  %v6616_v41 = vadd.f32 1.0, %v12642_v5  ;;  %v6618_v28 = vadd.f32 1.0, %v12646_v24 }
 0xaa4   :  { %9157 = vtanh.f32 %v6711_v17  ;;  %v6698_v59 = vmul.f32 %v12672_v32, %v6668_v38  ;;  %v6620_v55 = vadd.f32 1.0, %v12650_v0  ;;  %v6700_v20 = vmul.f32 %v12653_v25, %v12681_v23 }
 0xaa5   :  { %9159 = vtanh.f32 %v6713_v42  ;;  %v6710_v48 = vadd.f32 %v6694_v12, %v13326_v2  ;;  %v6712_v5 = vadd.f32 %v6696_v62, %v13167_v16 }
 0xaa6   :  { %9161 = vtanh.f32 %v6715_v11  ;;  %v6714_v0 = vadd.f32 %v6698_v59, %v13168_v7  ;;  %v6716_v23 = vadd.f32 %v6700_v20, %v13169_v52 }
 0xaa7   :  { %9163 = vtanh.f32 %v6717_v6 }
 0xaa8   :  { %9165 = vrcp.f32 %v6612_v19 }
 0xaa9   :  { %v12733_v34 = vpop.eup %9141  ;;  %9167 = vrcp.f32 %v6614_v43 }
 0xaaa   :  { %v12736_v54 = vpop.eup %9143  ;;  %9169 = vrcp.f32 %v6616_v41  ;;  %v6750_v24 = vrot.slane %v12733_v34, 1 }
 0xaab   :  { %v12740_v15 = vpop.eup %9145  ;;  %9171 = vrcp.f32 %v6618_v28  ;;  %v6752_v32 = vrot.slane %v12736_v54, 1 }
 0xaac   :  { %v12744_v25 = vpop.eup %9147  ;;  %9173 = vrcp.f32 %v6620_v55  ;;  %v6754_v2 = vrot.slane %v12740_v15, 1  ;;  %v6782_v26 = vsub.f32 %v12466_v10, %v6750_v24 }
 0xaad   :  { %v9150_v36 = vpop.eup %9149  ;;  %9175 = vtanh.f32 %v6710_v48  ;;  %v6756_v16 = vrot.slane %v12744_v25, 1  ;;  %v6784_v33 = vsub.f32 %v12473_v35, %v6752_v32  ;;  %v13448_v48 = vld [vmem:[#allocation20_spill] sm:$0xff] }
 0xaae   :  { %v9152_v46 = vpop.eup %9151  ;;  %v6751_v27 = vrot.slane %v9150_v36, 1  ;;  %9177 = vtanh.f32 %v6712_v5  ;;  %v6786_v7 = vsub.f32 %v12545_v3, %v6754_v2  ;;  %v6814_v30 = vrot.slane %v6782_v26, 7 }
 0xaaf   :  { %v9154_v63 = vpop.eup %9153  ;;  %v6753_v14 = vrot.slane %v9152_v46, 1  ;;  %9179 = vtanh.f32 %v6714_v0  ;;  %v12753_v52 = vsub.f32 %v12553_v22, %v6756_v16  ;;  %v6816_v60 = vrot.slane %v6784_v33, 7 }
 0xab0   :  { %v9156_v10 = vpop.eup %9155  ;;  %v6755_v57 = vrot.slane %v9154_v63, 1  ;;  %v6783_v40 = vsub.f32 %v12483_v9, %v6751_v27  ;;  %9181 = vtanh.f32 %v6716_v23  ;;  %v6818_v56 = vrot.slane %v6786_v7, 7  ;;  %v13449_v23 = vld [vmem:[#allocation59_spill] sm:$0xff] }
 0xab1   :  { %v9158_v35 = vpop.eup %9157  ;;  %v6757_v50 = vrot.slane %v9156_v10, 1  ;;  %v6785_v13 = vsub.f32 %v12489_v37, %v6753_v14  ;;  %v6820_v3 = vrot.slane %v12753_v52, 7  ;;  %v12759_v4 = vmul.f32 %v12674_v61, %v6814_v30  ;;  %v13446_v61 = vld [vmem:[#allocation69_spill] sm:$0xff] }
 0xab2   :  { %v9160_v17 = vpop.eup %9159  ;;  %v6759_v49 = vrot.slane %v9158_v35, 1  ;;  %v6787_v22 = vsub.f32 %v12494_v53, %v6755_v57  ;;  %v6815_v42 = vrot.slane %v6783_v40, 7  ;;  %v12763_v58 = vmul.f32 %v12676_v39, %v6816_v60  ;;  %v13447_v39 = vld [vmem:[#allocation70_spill] sm:$0xff] }
 0xab3   :  { %v9162_v9 = vpop.eup %9161  ;;  %v6761_v11 = vrot.slane %v9160_v17, 1  ;;  %v6789_v38 = vsub.f32 %v12501_v51, %v6757_v50  ;;  %v6817_v6 = vrot.slane %v6785_v13, 7  ;;  %v12767_v37 = vmul.f32 %v12678_v21, %v6818_v56 }
 0xab4   :  { %v9164_v19 = vpop.eup %9163  ;;  %v6763_v12 = vrot.slane %v9162_v9, 1  ;;  %v6791_v43 = vsub.f32 %v13446_v61, %v6759_v49  ;;  %v6819_v62 = vrot.slane %v6787_v22, 7  ;;  %v6847_v41 = vmul.f32 %v12696_v8, %v6815_v42 }
 0xab5   :  { %v12771_v53 = vpop.eup %9165  ;;  %v6765_v28 = vrot.slane %v9164_v19, 1  ;;  %v6793_v59 = vsub.f32 %v13447_v39, %v6761_v11  ;;  %v6821_v55 = vrot.slane %v6789_v38, 7  ;;  %v6849_v20 = vmul.f32 %v12698_v47, %v6817_v6 }
 0xab6   :  { %v12775_v51 = vpop.eup %9167  ;;  %v6795_v21 = vsub.f32 %v13448_v48, %v6763_v12  ;;  %v6823_v5 = vrot.slane %v6791_v43, 7  ;;  %v6851_v24 = vmul.f32 %v12702_v31, %v6819_v62  ;;  %v6863_v0 = vadd.f32 %v9150_v36, %v6847_v41 }
 0xab7   :  { %v12779_v32 = vpop.eup %9169  ;;  %v6797_v8 = vsub.f32 %v13449_v23, %v6765_v28  ;;  %v6825_v2 = vrot.slane %v6793_v59, 7  ;;  %v6853_v26 = vmul.f32 %v12705_v29, %v6821_v55  ;;  %v6865_v16 = vadd.f32 %v9152_v46, %v6849_v20 }
 0xab8   :  { %v12783_v33 = vpop.eup %9171  ;;  %v6827_v27 = vrot.slane %v6795_v21, 7  ;;  %v6855_v47 = vmul.f32 %v12709_v1, %v6823_v5  ;;  %v6867_v7 = vadd.f32 %v9154_v63, %v6851_v24  ;;  %v6930_v30 = vmax.f32 %v6863_v0, 0.0 }
 0xab9   :  { %v12786_v14 = vpop.eup %9173  ;;  %v6829_v60 = vrot.slane %v6797_v8, 7  ;;  %v6857_v31 = vmul.f32 %v12713_v44, %v6825_v2  ;;  %v6869_v36 = vadd.f32 %v9156_v10, %v6853_v26  ;;  %v6932_v57 = vmax.f32 %v6865_v16, 0.0 }
 0xaba   :  { %v12789_v40 = vpop.eup %9175  ;;  %v6859_v56 = vmul.f32 %v12719_v18, %v6827_v27  ;;  %v6871_v29 = vadd.f32 %v9158_v35, %v6855_v47  ;;  %v6934_v46 = vmax.f32 %v6867_v7, 0.0  ;;  %v6946_v50 = vpack.c.bf16 %v6930_v30, %v6930_v30 }
 0xabb   :  { %v12792_v13 = vpop.eup %9177  ;;  %v6861_v1 = vmul.f32 %v12724_v45, %v6829_v60  ;;  %v6873_v63 = vadd.f32 %v9160_v17, %v6857_v31  ;;  %v6936_v49 = vmax.f32 %v6869_v36, 0.0  ;;  %v6948_v22 = vpack.c.bf16 %v6932_v57, %v6932_v57  ;;  %v13450_v31 = vld [vmem:[#allocation27_spill] sm:$0xff] }
 0xabc   :  { %v12795_v42 = vpop.eup %9179  ;;  %v6875_v11 = vadd.f32 %v9162_v9, %v6859_v56  ;;  %v6938_v44 = vmax.f32 %v6871_v29, 0.0  ;;  %v6950_v10 = vpack.c.bf16 %v6934_v46, %v6934_v46  ;;  %v7017_v38 = vunpack.c.l.b16 %v6946_v50  ;;  %v13451_v56 = vld [vmem:[#allocation68_spill] sm:$0xff]  ;;  %v13452_v46 = vld [vmem:[#allocation63_spill] sm:$0xff] }
 0xabd   :  { %v9182_v6 = vpop.eup %9181  ;;  %v6877_v12 = vadd.f32 %v9164_v19, %v6861_v1  ;;  %v6940_v61 = vmax.f32 %v6873_v63, 0.0  ;;  %v6952_v18 = vpack.c.bf16 %v6936_v49, %v6936_v49  ;;  %v7019_v35 = vunpack.c.l.b16 %v6948_v22  ;;  %v13453_v49 = vld [vmem:[#allocation17_spill] sm:$0xff] }
 0xabe   :  { %v6942_v43 = vmax.f32 %v6875_v11, 0.0  ;;  %v6954_v62 = vpack.c.bf16 %v6938_v44, %v6938_v44  ;;  %v7021_v41 = vunpack.c.l.b16 %v6950_v10  ;;  %v7046_v28 = vrot.slane %v7017_v38, 7 }
 0xabf   :  { %v6944_v39 = vmax.f32 %v6877_v12, 0.0  ;;  %v6956_v45 = vpack.c.bf16 %v6940_v61, %v6940_v61  ;;  %v7023_v17 = vunpack.c.l.b16 %v6952_v18  ;;  %v7047_v59 = vrot.slane %v7019_v35, 6 }
 0xac0   :  { %v6958_v55 = vpack.c.bf16 %v6942_v43, %v6942_v43  ;;  %v7025_v20 = vunpack.c.l.b16 %v6954_v62  ;;  %v7049_v48 = vrot.slane %v7021_v41, 5  ;;  %v6758_v9 = vrot.slane %v12789_v40, 1 }
 0xac1   :  { %v6960_v21 = vpack.c.bf16 %v6944_v39, %v6944_v39  ;;  %v7027_v5 = vunpack.c.l.b16 %v6956_v45  ;;  %v7048_v19 = vsel %vm1771_vm0, %v7047_v59, %v7046_v28  ;;  %v7051_v24 = vrot.slane %v7023_v17, 4 }
 0xac2   :  { %v7029_v0 = vunpack.c.l.b16 %v6958_v55  ;;  %v7050_v23 = vsel %vm1774_vm1, %v7049_v48, %v7048_v19  ;;  %v7053_v8 = vrot.slane %v7025_v20, 3  ;;  %v6760_v2 = vrot.slane %v12792_v13, 1 }
 0xac3   :  { %v7031_v26 = vunpack.c.l.b16 %v6960_v21  ;;  %v7052_v16 = vsel %vm1777_vm2, %v7051_v24, %v7050_v23  ;;  %v7055_v27 = vrot.slane %v7027_v5, 2  ;;  %v6762_v47 = vrot.slane %v12795_v42, 1 }
 0xac4   :  { %v7054_v7 = vsel %vm1780_vm3, %v7053_v8, %v7052_v16  ;;  %v7057_v30 = vrot.slane %v7029_v0, 1  ;;  %v6764_v60 = vrot.slane %v9182_v6, 1  ;;  %v6790_v36 = vsub.f32 %v13450_v31, %v6758_v9 }
 0xac5   :  { %v7056_v57 = vsel %vm1783_vm4, %v7055_v27, %v7054_v7  ;;  %v6792_v29 = vsub.f32 %v13451_v56, %v6760_v2  ;;  %v6794_v50 = vsub.f32 %v13452_v46, %v6762_v47  ;;  %v6852_v1 = vmul.f32 %v12771_v53, %v6820_v3  ;;  %v7618_v46 = vld [vmem:[%s12847_s6] ss:$0 sm:$0xff] }
 0xac6   :  { %v7058_v63 = vsel %vm1786_vm5, %v7057_v30, %v7056_v57  ;;  %v6796_v22 = vsub.f32 %v13453_v49, %v6764_v60  ;;  %v6822_v11 = vrot.slane %v6790_v36, 7  ;;  %v6862_v44 = vadd.f32 %v12733_v34, %v12759_v4 }
 0xac7   :  { %v7059_v10 = vsel %vm1789_vm6, %v7031_v26, %v7058_v63  ;;  %v6824_v38 = vrot.slane %v6792_v29, 7  ;;  %v6826_v12 = vrot.slane %v6794_v50, 7  ;;  %v6864_v61 = vadd.f32 %v12736_v54, %v12763_v58 }
 0xac8   :  { %v7061_v18 = vpack.c.b16 %v7059_v10, %v7059_v10  ;;  %v6828_v35 = vrot.slane %v6796_v22, 7  ;;  %v6854_v52 = vmul.f32 %v12775_v51, %v6822_v11  ;;  %v6866_v3 = vadd.f32 %v12740_v15, %v12767_v37 }
 0xac9   :  { %v6856_v53 = vmul.f32 %v12779_v32, %v6824_v38  ;;  %v6858_v43 = vmul.f32 %v12783_v33, %v6826_v12  ;;  %v6868_v34 = vadd.f32 %v12744_v25, %v6852_v1  ;;  %v6929_v4 = vmax.f32 %v6862_v44, 0.0 }
 0xaca   :  { %7192 = vmatprep.mubr.bf16.mxu1 %v7061_v18  ;;  %v6860_v62 = vmul.f32 %v12786_v14, %v6828_v35  ;;  %v6870_v41 = vadd.f32 %v12789_v40, %v6854_v52  ;;  %v6931_v54 = vmax.f32 %v6864_v61, 0.0  ;;  %v6933_v58 = vmax.f32 %v6866_v3, 0.0 }
 0xacb   :  { %v6872_v28 = vadd.f32 %v12792_v13, %v6856_v53  ;;  %v6874_v51 = vadd.f32 %v12795_v42, %v6858_v43  ;;  %v6935_v39 = vmax.f32 %v6868_v34, 0.0  ;;  %v6945_v15 = vpack.c.bf16 %v6929_v4, %v6929_v4 }
 0xacc   :  { %v6876_v37 = vadd.f32 %v9182_v6, %v6860_v62  ;;  %v6937_v32 = vmax.f32 %v6870_v41, 0.0  ;;  %v6947_v45 = vpack.c.bf16 %v6931_v54, %v6931_v54  ;;  %v6949_v33 = vpack.c.bf16 %v6933_v58, %v6933_v58 }
 0xacd   :  { %v6939_v17 = vmax.f32 %v6872_v28, 0.0  ;;  %v6941_v25 = vmax.f32 %v6874_v51, 0.0  ;;  %v6951_v59 = vpack.c.bf16 %v6935_v39, %v6935_v39  ;;  %v7016_v55 = vunpack.c.l.b16 %v6945_v15 }
 0xace   :  { %v6943_v20 = vmax.f32 %v6876_v37, 0.0  ;;  %v6953_v14 = vpack.c.bf16 %v6937_v32, %v6937_v32  ;;  %v7018_v48 = vunpack.c.l.b16 %v6947_v45  ;;  %v7020_v40 = vunpack.c.l.b16 %v6949_v33 }
 0xacf   :  { %v6955_v9 = vpack.c.bf16 %v6939_v17, %v6939_v17  ;;  %v6957_v21 = vpack.c.bf16 %v6941_v25, %v6941_v25  ;;  %v7022_v5 = vunpack.c.l.b16 %v6951_v59  ;;  %v7032_v13 = vrot.slane %v7016_v55, 7 }
 0xad0   :  { %v7024_v19 = vunpack.c.l.b16 %v6953_v14  ;;  %v7033_v42 = vrot.slane %v7018_v48, 6  ;;  %v7035_v24 = vrot.slane %v7020_v40, 5  ;;  %v6959_v23 = vpack.c.bf16 %v6943_v20, %v6943_v20 }
 0xad1   :  { %v7026_v0 = vunpack.c.l.b16 %v6955_v9  ;;  %v7028_v6 = vunpack.c.l.b16 %v6957_v21  ;;  %v7037_v2 = vrot.slane %v7022_v5, 4 }
 0xad2   :  { %v7034_v8 = vsel %vm1771_vm0, %v7033_v42, %v7032_v13  ;;  %v7039_v16 = vrot.slane %v7024_v19, 3  ;;  %v7030_v60 = vunpack.c.l.b16 %v6959_v23 }
 0xad3   :  { %v7036_v26 = vsel %vm1774_vm1, %v7035_v24, %v7034_v8  ;;  %v7041_v47 = vrot.slane %v7026_v0, 2  ;;  %v7043_v30 = vrot.slane %v7028_v6, 1 }
 0xad4   :  { %v7038_v27 = vsel %vm1777_vm2, %v7037_v2, %v7036_v26 }
 0xad5   :  { %v7040_v7 = vsel %vm1780_vm3, %v7039_v16, %v7038_v27 }
 0xad6   :  { %v7042_v31 = vsel %vm1783_vm4, %v7041_v47, %v7040_v7 }
 0xad7   :  { %v7044_v36 = vsel %vm1786_vm5, %v7043_v30, %v7042_v31 }
 0xad8   :  { %v7045_v57 = vsel %vm1789_vm6, %v7030_v60, %v7044_v36 }
 0xad9   :  { %v7060_v56 = vpack.c.b16 %v7045_v57, %v7045_v57 }
 0xadb   :  { %7193 = vmatmul.mubr.bf16.vlgmr.msra.gmra.mxu1 %v7060_v56 }
 0xb9b   :  { %v7651_v29 = vpop.f32.mrf.mxu1 }
 0xb9d   :  { %v7652_v50 = vpop.f32.mrf.mxu1 }
 0xb9e   :  { %v7653_v1 = vadd.f32 %v7652_v50, %v7651_v29 }
 0xb9f   :  { %v7654_v63 = vpop.f32.mrf.mxu1 }
 0xba0   :  { %v7195_v49 = vadd.f32 %v7653_v1, %v7618_v46 }
 0xba1   :  { %v7655_v22 = vpop.f32.mrf.mxu1 }
 0xba2   :  { %7200 = vst [vmem:[#allocation12] sm:$0xff] %v7195_v49 }
 0xba3   :  { %9900 = shalt.err (!%p9897_p1)
}
 0xba4   :  { %7210 = dma.vmem_to_hbm [thread:$0]  %s7208_s8, 128, %s12848_s7, [#allocation5]  }
 0xba5   :  { %9915 = dma.done.wait [#allocation5], 128  }
 0xba6   :  { %9916 = vsyncadd [#allocation5], 4294967168 }
 0xba7   :  { %7214 = vsyncpa [#allocation4], 1 }
 0xba8   :  { %7215 = vsyncpa [#allocation7], 1 }
 0xba9   :  { %7216 = vsyncpa [#allocation10], 1 }
 0xbaa   :  { %7217 = vsyncpa [#allocation5], 1 }

</bundles_post_ra>
